<compile_context>
chip_gen: v6e
topology: v6e:2x2x1
jax: 0.10.0
libtpu: 0.0.40
codegen_flags: <defaults>
</compile_context>

<pallas_src>
import numpy as np
import jax
import jax.numpy as jnp
from jax.experimental import pallas as pl
from jax.experimental.pallas import tpu as pltpu


# ---------------------------------------------------------------------------
# model constants (mirror CNN_B)
# ---------------------------------------------------------------------------
C1 = 64            # conv1 out channels
C2 = 16            # conv2 out channels
K1, S1, P1 = 3, 3, 4
K2, S2, P2 = 5, 1, 1
POOL1, POOL2 = 4, 2
H1, H2, H3 = 2048, 1024, 256


def cnn_b_shapes(t_samples):
    """Mirrors CNN_B._out_shape bookkeeping."""
    L1 = (t_samples + 2 * P1 - K1) // S1 + 1
    L1p = L1 // POOL1
    L2 = (L1p + 2 * P2 - K2) // S2 + 1
    L2p = L2 // POOL2
    num_out = C2 * L2p
    return L1, L1p, L2, L2p, num_out


def _full_spec(shape):
    """BlockSpec covering the whole array (grid=(1,))."""
    nd = len(shape)
    return pl.BlockSpec(shape, lambda *_: (0,) * nd)


# ---------------------------------------------------------------------------
# fused kernel
# ---------------------------------------------------------------------------
def _cnn_b_kernel(x_ref, xr_ref, w1c_ref, b1c_ref, st_ref, w2c_ref, b2c_ref,
                  mp2_ref, w1a_ref, w1s_ref, b1_ref, w2_ref, b2_ref,
                  w3_ref, b3_ref, w4_ref, b4_ref, o_ref):
    B = x_ref.shape[0]
    n_elem = float(x_ref.shape[0] * x_ref.shape[1])
    c2 = w2c_ref.shape[2]
    l2p = mp2_ref.shape[0] // B

    # ---- global std over all input elements (unbiased, two-pass, clamped) ----
    xv = x_ref[...]                                                   # (B, T)
    mean = jnp.sum(xv, axis=(0, 1), keepdims=True) * (1.0 / n_elem)   # (1, 1)
    diff = xv - mean
    var = jnp.sum(diff * diff, axis=(0, 1), keepdims=True) * (1.0 / (n_elem - 1.0))
    std = jnp.sqrt(jnp.maximum(var, 0.0))                             # (1, 1)

    # ---- conv1 (k=3, s=3, BN folded) + ReLU : 3 VPU broadcast-FMAs ----------
    xr = xr_ref[...]                                                  # (B*L1, 3)
    w1c = w1c_ref[...]                                                # (3, C1)
    h1 = (xr[:, 0:1] * w1c[0:1, :]
          + xr[:, 1:2] * w1c[1:2, :]
          + xr[:, 2:3] * w1c[2:3, :]
          + b1c_ref[...])
    h1 = jnp.maximum(h1, 0.0)                                         # (B*L1, C1)

    # ---- pool1 + conv2 (BN folded) + ReLU -----------------------------------
    # avg-pool(4) and the zero-padded tap shifts are folded into st[t].
    acc2 = None
    for t in range(w2c_ref.shape[0]):
        tap = jnp.dot(st_ref[t], h1, preferred_element_type=jnp.float32)    # (B*L2, C1)
        prt = jnp.dot(tap, w2c_ref[t], preferred_element_type=jnp.float32)  # (B*L2, C2)
        acc2 = prt if acc2 is None else acc2 + prt
    h2 = jnp.maximum(acc2 + b2c_ref[...], 0.0)                        # (B*L2, C2)

    # ---- pool2 (avg 2) + reorder rows to j-major (precomputed matrix) -------
    h2p = jnp.dot(mp2_ref[...], h2, preferred_element_type=jnp.float32)  # (L2p*B, C2)

    # ---- linear1: the torch NCL transpose/flatten is folded into the row
    #      permutation of w1a; the constant "s" block is std * colsum(W1) -----
    z1 = None
    for j in range(l2p):
        lhs = h2p[j * B:(j + 1) * B, :].astype(jnp.bfloat16)          # (B, C2)
        rhs = w1a_ref[j * c2:(j + 1) * c2, :]                         # (C2, H1) bf16
        d = jnp.dot(lhs, rhs, preferred_element_type=jnp.float32)
        z1 = d if z1 is None else z1 + d
    z1 = z1 + b1_ref[...] + std * w1s_ref[...]
    a1 = jnp.maximum(z1, 0.0).astype(jnp.bfloat16)                    # (B, H1)

    # ---- linear2 + relu, linear3 + relu, predict + softplus -----------------
    z2 = jnp.dot(a1, w2_ref[...], preferred_element_type=jnp.float32) + b2_ref[...]
    a2 = jnp.maximum(z2, 0.0).astype(jnp.bfloat16)
    z3 = jnp.dot(a2, w3_ref[...], preferred_element_type=jnp.float32) + b3_ref[...]
    a3 = jnp.maximum(z3, 0.0)
    z4 = jnp.dot(a3, w4_ref[...], preferred_element_type=jnp.float32) + b4_ref[...]
    # numerically stable softplus
    o_ref[...] = jnp.maximum(z4, 0.0) + jnp.log(1.0 + jnp.exp(-jnp.abs(z4)))


# ---------------------------------------------------------------------------
# precomputed structure matrices (pooling / conv2 shifts / row reorder)
# ---------------------------------------------------------------------------
def _build_structure(t_samples, batch):
    L1, L1p, L2, L2p, _ = cnn_b_shapes(t_samples)
    B = batch
    # st[t, b*L2 + l, b*L1 + 4*(l+t-1) + k] = 0.25   -> (conv2 tap shift) o (avg-pool 4)
    st = np.zeros((K2, B * L2, B * L1), np.float32)
    for t in range(K2):
        for b in range(B):
            for l in range(L2):
                j1 = l + t - P2
                if 0 <= j1 < L1p:
                    base = b * L1 + POOL1 * j1
                    st[t, b * L2 + l, base:base + POOL1] = 1.0 / POOL1
    # mp2[j*B + b, b*L2 + 2*j + k] = 0.5             -> avg-pool 2 + j-major row order
    mp2 = np.zeros((L2p * B, B * L2), np.float32)
    for b in range(B):
        for j in range(L2p):
            base = b * L2 + POOL2 * j
            mp2[j * B + b, base:base + POOL2] = 1.0 / POOL2
    return jnp.asarray(st), jnp.asarray(mp2)


# ---------------------------------------------------------------------------
# parameter init (deterministic, synthetic; torch-default distributions)
# ---------------------------------------------------------------------------
def init_params(key, t_samples, batch):
    L1, L1p, L2, L2p, num_out = cnn_b_shapes(t_samples)
    feat_in = num_out * 2
    ks = jax.random.split(key, 12)

    def u(k, shape, fan_in):
        bound = 1.0 / float(fan_in) ** 0.5
        return jax.random.uniform(k, shape, jnp.float32, -bound, bound)

    eps = 1e-5
    s1 = jnp.full((C1,), 1.0 / np.sqrt(1.0 + eps), jnp.float32)   # gamma=1, var=1
    s2 = jnp.full((C2,), 1.0 / np.sqrt(1.0 + eps), jnp.float32)
    sh1 = jnp.zeros((C1,), jnp.float32)                            # beta=0, mean=0
    sh2 = jnp.zeros((C2,), jnp.float32)

    conv1_w = u(ks[0], (K1, C1), K1 * 1)        # torch (64,1,3)  -> (tap, cout)
    conv1_b = u(ks[1], (C1,), K1 * 1)
    conv2_w = u(ks[2], (K2, C1, C2), K2 * C1)   # torch (16,64,5) -> (tap, cin, cout)
    conv2_b = u(ks[3], (C2,), K2 * C1)

    # linear1 in torch layout (out, in); input cols [0:num_out] are the conv
    # features flattened in NCL (channel-major) order, cols [num_out:] see std.
    w1_t = u(ks[4], (H1, feat_in), feat_in)
    b1 = u(ks[5], (1, H1), feat_in)
    w1_in_out = w1_t.T                                             # (feat_in, H1)
    w1_feat = w1_in_out[:num_out]                                  # rows = c*L2p + j
    # permute rows to j-major / channel-minor so the NCL transpose+flatten is free
    w1a = (w1_feat.reshape(C2, L2p, H1).transpose(1, 0, 2)
           .reshape(num_out, H1)).astype(jnp.bfloat16)             # rows = j*C2 + c
    w1s = jnp.sum(w1_in_out[num_out:], axis=0, keepdims=True)      # (1, H1), f32

    st, mp2 = _build_structure(t_samples, batch)

    return {
        # conv weights with inference BatchNorm folded in
        "w1c": conv1_w * s1[None, :],
        "b1c": (conv1_b * s1 + sh1)[None, :],
        "w2c": conv2_w * s2[None, None, :],
        "b2c": (conv2_b * s2 + sh2)[None, :],
        # structure matrices (pool1 folded into conv2 taps, pool2 + reorder)
        "st": st, "mp2": mp2,
        # MLP head (big weights in bf16, biases / tiny weights in f32)
        "w1a": w1a, "w1s": w1s, "b1": b1,
        "w2": u(ks[6], (H1, H2), H1).astype(jnp.bfloat16), "b2": u(ks[7], (1, H2), H1),
        "w3": u(ks[8], (H2, H3), H2).astype(jnp.bfloat16), "b3": u(ks[9], (1, H3), H2),
        "w4": u(ks[10], (H3, 2), H3),                      "b4": u(ks[11], (1, 2), H3),
    }


# ---------------------------------------------------------------------------
# forward pass: one fused pallas_call
# ---------------------------------------------------------------------------
def cnn_b_forward(params, x):
    """x: (B, t_samples) float32 -> (B, 2) float32."""
    B, T = x.shape
    L1, _, _, _, _ = cnn_b_shapes(T)

    # conv1 im2col is a free reshape because stride == kernel (= 3):
    # pad by 4 on each side and view contiguous windows of 3.
    xpad = jnp.pad(x, ((0, 0), (P1, P1)))[:, :K1 * L1]
    xr = xpad.reshape(B * L1, K1)

    in_arrays = (x, xr, params["w1c"], params["b1c"], params["st"],
                 params["w2c"], params["b2c"], params["mp2"],
                 params["w1a"], params["w1s"], params["b1"],
                 params["w2"], params["b2"], params["w3"], params["b3"],
                 params["w4"], params["b4"])

    return pl.pallas_call(
        _cnn_b_kernel,
        out_shape=jax.ShapeDtypeStruct((B, 2), jnp.float32),
        grid=(1,),
        in_specs=[_full_spec(a.shape) for a in in_arrays],
        out_specs=_full_spec((B, 2)),
        compiler_params=pltpu.CompilerParams(
            dimension_semantics=("arbitrary",),
            vmem_limit_bytes=32 * 1024 * 1024),
    )(*in_arrays)


# ---------------------------------------------------------------------------
if __name__ == "__main__":
    t_samples = 256
    batch = 2

    key = jax.random.PRNGKey(0)
    pkey, xkey = jax.random.split(key)

    params = init_params(pkey, t_samples, batch)
    x = jax.random.normal(xkey, (batch, t_samples), dtype=jnp.float32)

    fwd = jax.jit(cnn_b_forward)
    out = jax.block_until_ready(fwd(params, x))

    assert out.shape == (batch, 2), out.shape
    assert out.dtype == jnp.float32
    assert bool(jnp.all(jnp.isfinite(out)))
    assert bool(jnp.all(out >= 0.0))   # softplus output is non-negative
    print("KERNEL_OK")
</pallas_src>

<mosaic_0001>
module attributes {stable_mosaic.version = 11 : i64} {
  func.func @_cnn_b_kernel(%arg0: i32, %arg1: memref<2x256xf32, #tpu.memory_space<vmem>>, %arg2: memref<176x3xf32, #tpu.memory_space<vmem>>, %arg3: memref<3x64xf32, #tpu.memory_space<vmem>>, %arg4: memref<1x64xf32, #tpu.memory_space<vmem>>, %arg5: memref<5x40x176xf32, #tpu.memory_space<vmem>>, %arg6: memref<5x64x16xf32, #tpu.memory_space<vmem>>, %arg7: memref<1x16xf32, #tpu.memory_space<vmem>>, %arg8: memref<20x40xf32, #tpu.memory_space<vmem>>, %arg9: memref<160x2048xbf16, #tpu.memory_space<vmem>>, %arg10: memref<1x2048xf32, #tpu.memory_space<vmem>>, %arg11: memref<1x2048xf32, #tpu.memory_space<vmem>>, %arg12: memref<2048x1024xbf16, #tpu.memory_space<vmem>>, %arg13: memref<1x1024xf32, #tpu.memory_space<vmem>>, %arg14: memref<1024x256xbf16, #tpu.memory_space<vmem>>, %arg15: memref<1x256xf32, #tpu.memory_space<vmem>>, %arg16: memref<256x2xf32, #tpu.memory_space<vmem>>, %arg17: memref<1x2xf32, #tpu.memory_space<vmem>>, %arg18: memref<2x2xf32, #tpu.memory_space<vmem>>) attributes {dimension_semantics = [#tpu.dimension_semantics<arbitrary>], iteration_bounds = array<i64: 1>, scalar_prefetch = 0 : i64, scratch_operands = 0 : i64, tpu.core_type = #tpu.core_type<tc>, window_params = [{pipeline_mode = #tpu.pipeline_mode<synchronous>, transform_indices = @transform_0, window_bounds = array<i64: 2, 256>}, {pipeline_mode = #tpu.pipeline_mode<synchronous>, transform_indices = @transform_1, window_bounds = array<i64: 176, 3>}, {pipeline_mode = #tpu.pipeline_mode<synchronous>, transform_indices = @transform_2, window_bounds = array<i64: 3, 64>}, {pipeline_mode = #tpu.pipeline_mode<synchronous>, transform_indices = @transform_3, window_bounds = array<i64: 1, 64>}, {pipeline_mode = #tpu.pipeline_mode<synchronous>, transform_indices = @transform_4, window_bounds = array<i64: 5, 40, 176>}, {pipeline_mode = #tpu.pipeline_mode<synchronous>, transform_indices = @transform_5, window_bounds = array<i64: 5, 64, 16>}, {pipeline_mode = #tpu.pipeline_mode<synchronous>, transform_indices = @transform_6, window_bounds = array<i64: 1, 16>}, {pipeline_mode = #tpu.pipeline_mode<synchronous>, transform_indices = @transform_7, window_bounds = array<i64: 20, 40>}, {pipeline_mode = #tpu.pipeline_mode<synchronous>, transform_indices = @transform_8, window_bounds = array<i64: 160, 2048>}, {pipeline_mode = #tpu.pipeline_mode<synchronous>, transform_indices = @transform_9, window_bounds = array<i64: 1, 2048>}, {pipeline_mode = #tpu.pipeline_mode<synchronous>, transform_indices = @transform_10, window_bounds = array<i64: 1, 2048>}, {pipeline_mode = #tpu.pipeline_mode<synchronous>, transform_indices = @transform_11, window_bounds = array<i64: 2048, 1024>}, {pipeline_mode = #tpu.pipeline_mode<synchronous>, transform_indices = @transform_12, window_bounds = array<i64: 1, 1024>}, {pipeline_mode = #tpu.pipeline_mode<synchronous>, transform_indices = @transform_13, window_bounds = array<i64: 1024, 256>}, {pipeline_mode = #tpu.pipeline_mode<synchronous>, transform_indices = @transform_14, window_bounds = array<i64: 1, 256>}, {pipeline_mode = #tpu.pipeline_mode<synchronous>, transform_indices = @transform_15, window_bounds = array<i64: 256, 2>}, {pipeline_mode = #tpu.pipeline_mode<synchronous>, transform_indices = @transform_16, window_bounds = array<i64: 1, 2>}, {pipeline_mode = #tpu.pipeline_mode<synchronous>, transform_indices = @transform_17, window_bounds = array<i64: 2, 2>}]} {
    %c0 = arith.constant 0 : index
    %c0_0 = arith.constant 0 : index
    %0 = vector.load %arg1[%c0, %c0_0] : memref<2x256xf32, #tpu.memory_space<vmem>>, vector<2x256xf32>
    %1 = vector.shape_cast %0 : vector<2x256xf32> to vector<1x2x256xf32>
    %cst = arith.constant dense<0.000000e+00> : vector<1xf32>
    %2 = vector.multi_reduction <add>, %1, %cst [1, 2] : vector<1x2x256xf32> to vector<1xf32>
    %3 = vector.shape_cast %2 : vector<1xf32> to vector<1x1x1xf32>
    %4 = vector.extract %3[0, 0, 0] : f32 from vector<1x1x1xf32>
    %5 = vector.broadcast %4 : f32 to vector<1x1xf32>
    %cst_1 = arith.constant 0.001953125 : f32
    %6 = vector.broadcast %cst_1 : f32 to vector<1x1xf32>
    %7 = arith.mulf %5, %6 : vector<1x1xf32>
    %8 = vector.broadcast %7 : vector<1x1xf32> to vector<2x256xf32>
    %9 = arith.subf %0, %8 : vector<2x256xf32>
    %10 = arith.mulf %9, %9 : vector<2x256xf32>
    %11 = vector.shape_cast %10 : vector<2x256xf32> to vector<1x2x256xf32>
    %cst_2 = arith.constant dense<0.000000e+00> : vector<1xf32>
    %12 = vector.multi_reduction <add>, %11, %cst_2 [1, 2] : vector<1x2x256xf32> to vector<1xf32>
    %13 = vector.shape_cast %12 : vector<1xf32> to vector<1x1x1xf32>
    %14 = vector.extract %13[0, 0, 0] : f32 from vector<1x1x1xf32>
    %15 = vector.broadcast %14 : f32 to vector<1x1xf32>
    %cst_3 = arith.constant 0.00195694715 : f32
    %16 = vector.broadcast %cst_3 : f32 to vector<1x1xf32>
    %17 = arith.mulf %15, %16 : vector<1x1xf32>
    %cst_4 = arith.constant 0.000000e+00 : f32
    %18 = vector.broadcast %cst_4 : f32 to vector<1x1xf32>
    %19 = arith.maximumf %17, %18 : vector<1x1xf32>
    %20 = math.sqrt %19 : vector<1x1xf32>
    %c0_5 = arith.constant 0 : index
    %c0_6 = arith.constant 0 : index
    %21 = vector.load %arg2[%c0_5, %c0_6] : memref<176x3xf32, #tpu.memory_space<vmem>>, vector<176x3xf32>
    %c0_7 = arith.constant 0 : index
    %c0_8 = arith.constant 0 : index
    %22 = vector.load %arg3[%c0_7, %c0_8] : memref<3x64xf32, #tpu.memory_space<vmem>>, vector<3x64xf32>
    %23 = vector.extract_strided_slice %21 {offsets = [0, 0], sizes = [176, 1], strides = [1, 1]} : vector<176x3xf32> to vector<176x1xf32>
    %24 = vector.extract_strided_slice %22 {offsets = [0, 0], sizes = [1, 64], strides = [1, 1]} : vector<3x64xf32> to vector<1x64xf32>
    %25 = vector.broadcast %23 : vector<176x1xf32> to vector<176x64xf32>
    %26 = vector.broadcast %24 : vector<1x64xf32> to vector<176x64xf32>
    %27 = arith.mulf %25, %26 : vector<176x64xf32>
    %28 = vector.extract_strided_slice %21 {offsets = [0, 1], sizes = [176, 1], strides = [1, 1]} : vector<176x3xf32> to vector<176x1xf32>
    %29 = vector.extract_strided_slice %22 {offsets = [1, 0], sizes = [1, 64], strides = [1, 1]} : vector<3x64xf32> to vector<1x64xf32>
    %30 = vector.broadcast %28 : vector<176x1xf32> to vector<176x64xf32>
    %31 = vector.broadcast %29 : vector<1x64xf32> to vector<176x64xf32>
    %32 = arith.mulf %30, %31 : vector<176x64xf32>
    %33 = arith.addf %27, %32 : vector<176x64xf32>
    %34 = vector.extract_strided_slice %21 {offsets = [0, 2], sizes = [176, 1], strides = [1, 1]} : vector<176x3xf32> to vector<176x1xf32>
    %35 = vector.extract_strided_slice %22 {offsets = [2, 0], sizes = [1, 64], strides = [1, 1]} : vector<3x64xf32> to vector<1x64xf32>
    %36 = vector.broadcast %34 : vector<176x1xf32> to vector<176x64xf32>
    %37 = vector.broadcast %35 : vector<1x64xf32> to vector<176x64xf32>
    %38 = arith.mulf %36, %37 : vector<176x64xf32>
    %39 = arith.addf %33, %38 : vector<176x64xf32>
    %c0_9 = arith.constant 0 : index
    %c0_10 = arith.constant 0 : index
    %40 = vector.load %arg4[%c0_9, %c0_10] : memref<1x64xf32, #tpu.memory_space<vmem>>, vector<1x64xf32>
    %41 = vector.broadcast %40 : vector<1x64xf32> to vector<176x64xf32>
    %42 = arith.addf %39, %41 : vector<176x64xf32>
    %cst_11 = arith.constant 0.000000e+00 : f32
    %43 = vector.broadcast %cst_11 : f32 to vector<176x64xf32>
    %44 = arith.maximumf %42, %43 : vector<176x64xf32>
    %c0_12 = arith.constant 0 : index
    %c0_13 = arith.constant 0 : index
    %c0_14 = arith.constant 0 : index
    %45 = vector.load %arg5[%c0_12, %c0_13, %c0_14] : memref<5x40x176xf32, #tpu.memory_space<vmem>>, vector<1x40x176xf32>
    %46 = vector.shape_cast %45 : vector<1x40x176xf32> to vector<40x176xf32>
    %cst_15 = arith.constant dense<0.000000e+00> : vector<40x64xf32>
    %47 = tpu.matmul %46, %44, %cst_15 {dimension_numbers = #tpu.dot_dimension_numbers<[1], [0], [0], [1], [0, 0, 1, 1], [], []>} : vector<40x176xf32>, vector<176x64xf32>, vector<40x64xf32> -> vector<40x64xf32>
    %c0_16 = arith.constant 0 : index
    %c0_17 = arith.constant 0 : index
    %c0_18 = arith.constant 0 : index
    %48 = vector.load %arg6[%c0_16, %c0_17, %c0_18] : memref<5x64x16xf32, #tpu.memory_space<vmem>>, vector<1x64x16xf32>
    %49 = vector.shape_cast %48 : vector<1x64x16xf32> to vector<64x16xf32>
    %cst_19 = arith.constant dense<0.000000e+00> : vector<40x16xf32>
    %50 = tpu.matmul %47, %49, %cst_19 {dimension_numbers = #tpu.dot_dimension_numbers<[1], [0], [0], [1], [0, 0, 1, 1], [], []>} : vector<40x64xf32>, vector<64x16xf32>, vector<40x16xf32> -> vector<40x16xf32>
    %c1 = arith.constant 1 : index
    %c0_20 = arith.constant 0 : index
    %c0_21 = arith.constant 0 : index
    %51 = vector.load %arg5[%c1, %c0_20, %c0_21] : memref<5x40x176xf32, #tpu.memory_space<vmem>>, vector<1x40x176xf32>
    %52 = vector.shape_cast %51 : vector<1x40x176xf32> to vector<40x176xf32>
    %cst_22 = arith.constant dense<0.000000e+00> : vector<40x64xf32>
    %53 = tpu.matmul %52, %44, %cst_22 {dimension_numbers = #tpu.dot_dimension_numbers<[1], [0], [0], [1], [0, 0, 1, 1], [], []>} : vector<40x176xf32>, vector<176x64xf32>, vector<40x64xf32> -> vector<40x64xf32>
    %c1_23 = arith.constant 1 : index
    %c0_24 = arith.constant 0 : index
    %c0_25 = arith.constant 0 : index
    %54 = vector.load %arg6[%c1_23, %c0_24, %c0_25] : memref<5x64x16xf32, #tpu.memory_space<vmem>>, vector<1x64x16xf32>
    %55 = vector.shape_cast %54 : vector<1x64x16xf32> to vector<64x16xf32>
    %cst_26 = arith.constant dense<0.000000e+00> : vector<40x16xf32>
    %56 = tpu.matmul %53, %55, %cst_26 {dimension_numbers = #tpu.dot_dimension_numbers<[1], [0], [0], [1], [0, 0, 1, 1], [], []>} : vector<40x64xf32>, vector<64x16xf32>, vector<40x16xf32> -> vector<40x16xf32>
    %57 = arith.addf %50, %56 : vector<40x16xf32>
    %c2 = arith.constant 2 : index
    %c0_27 = arith.constant 0 : index
    %c0_28 = arith.constant 0 : index
    %58 = vector.load %arg5[%c2, %c0_27, %c0_28] : memref<5x40x176xf32, #tpu.memory_space<vmem>>, vector<1x40x176xf32>
    %59 = vector.shape_cast %58 : vector<1x40x176xf32> to vector<40x176xf32>
    %cst_29 = arith.constant dense<0.000000e+00> : vector<40x64xf32>
    %60 = tpu.matmul %59, %44, %cst_29 {dimension_numbers = #tpu.dot_dimension_numbers<[1], [0], [0], [1], [0, 0, 1, 1], [], []>} : vector<40x176xf32>, vector<176x64xf32>, vector<40x64xf32> -> vector<40x64xf32>
    %c2_30 = arith.constant 2 : index
    %c0_31 = arith.constant 0 : index
    %c0_32 = arith.constant 0 : index
    %61 = vector.load %arg6[%c2_30, %c0_31, %c0_32] : memref<5x64x16xf32, #tpu.memory_space<vmem>>, vector<1x64x16xf32>
    %62 = vector.shape_cast %61 : vector<1x64x16xf32> to vector<64x16xf32>
    %cst_33 = arith.constant dense<0.000000e+00> : vector<40x16xf32>
    %63 = tpu.matmul %60, %62, %cst_33 {dimension_numbers = #tpu.dot_dimension_numbers<[1], [0], [0], [1], [0, 0, 1, 1], [], []>} : vector<40x64xf32>, vector<64x16xf32>, vector<40x16xf32> -> vector<40x16xf32>
    %64 = arith.addf %57, %63 : vector<40x16xf32>
    %c3 = arith.constant 3 : index
    %c0_34 = arith.constant 0 : index
    %c0_35 = arith.constant 0 : index
    %65 = vector.load %arg5[%c3, %c0_34, %c0_35] : memref<5x40x176xf32, #tpu.memory_space<vmem>>, vector<1x40x176xf32>
    %66 = vector.shape_cast %65 : vector<1x40x176xf32> to vector<40x176xf32>
    %cst_36 = arith.constant dense<0.000000e+00> : vector<40x64xf32>
    %67 = tpu.matmul %66, %44, %cst_36 {dimension_numbers = #tpu.dot_dimension_numbers<[1], [0], [0], [1], [0, 0, 1, 1], [], []>} : vector<40x176xf32>, vector<176x64xf32>, vector<40x64xf32> -> vector<40x64xf32>
    %c3_37 = arith.constant 3 : index
    %c0_38 = arith.constant 0 : index
    %c0_39 = arith.constant 0 : index
    %68 = vector.load %arg6[%c3_37, %c0_38, %c0_39] : memref<5x64x16xf32, #tpu.memory_space<vmem>>, vector<1x64x16xf32>
    %69 = vector.shape_cast %68 : vector<1x64x16xf32> to vector<64x16xf32>
    %cst_40 = arith.constant dense<0.000000e+00> : vector<40x16xf32>
    %70 = tpu.matmul %67, %69, %cst_40 {dimension_numbers = #tpu.dot_dimension_numbers<[1], [0], [0], [1], [0, 0, 1, 1], [], []>} : vector<40x64xf32>, vector<64x16xf32>, vector<40x16xf32> -> vector<40x16xf32>
    %71 = arith.addf %64, %70 : vector<40x16xf32>
    %c4 = arith.constant 4 : index
    %c0_41 = arith.constant 0 : index
    %c0_42 = arith.constant 0 : index
    %72 = vector.load %arg5[%c4, %c0_41, %c0_42] : memref<5x40x176xf32, #tpu.memory_space<vmem>>, vector<1x40x176xf32>
    %73 = vector.shape_cast %72 : vector<1x40x176xf32> to vector<40x176xf32>
    %cst_43 = arith.constant dense<0.000000e+00> : vector<40x64xf32>
    %74 = tpu.matmul %73, %44, %cst_43 {dimension_numbers = #tpu.dot_dimension_numbers<[1], [0], [0], [1], [0, 0, 1, 1], [], []>} : vector<40x176xf32>, vector<176x64xf32>, vector<40x64xf32> -> vector<40x64xf32>
    %c4_44 = arith.constant 4 : index
    %c0_45 = arith.constant 0 : index
    %c0_46 = arith.constant 0 : index
    %75 = vector.load %arg6[%c4_44, %c0_45, %c0_46] : memref<5x64x16xf32, #tpu.memory_space<vmem>>, vector<1x64x16xf32>
    %76 = vector.shape_cast %75 : vector<1x64x16xf32> to vector<64x16xf32>
    %cst_47 = arith.constant dense<0.000000e+00> : vector<40x16xf32>
    %77 = tpu.matmul %74, %76, %cst_47 {dimension_numbers = #tpu.dot_dimension_numbers<[1], [0], [0], [1], [0, 0, 1, 1], [], []>} : vector<40x64xf32>, vector<64x16xf32>, vector<40x16xf32> -> vector<40x16xf32>
    %78 = arith.addf %71, %77 : vector<40x16xf32>
    %c0_48 = arith.constant 0 : index
    %c0_49 = arith.constant 0 : index
    %79 = vector.load %arg7[%c0_48, %c0_49] : memref<1x16xf32, #tpu.memory_space<vmem>>, vector<1x16xf32>
    %80 = vector.broadcast %79 : vector<1x16xf32> to vector<40x16xf32>
    %81 = arith.addf %78, %80 : vector<40x16xf32>
    %cst_50 = arith.constant 0.000000e+00 : f32
    %82 = vector.broadcast %cst_50 : f32 to vector<40x16xf32>
    %83 = arith.maximumf %81, %82 : vector<40x16xf32>
    %c0_51 = arith.constant 0 : index
    %c0_52 = arith.constant 0 : index
    %84 = vector.load %arg8[%c0_51, %c0_52] : memref<20x40xf32, #tpu.memory_space<vmem>>, vector<20x40xf32>
    %cst_53 = arith.constant dense<0.000000e+00> : vector<20x16xf32>
    %85 = tpu.matmul %84, %83, %cst_53 {dimension_numbers = #tpu.dot_dimension_numbers<[1], [0], [0], [1], [0, 0, 1, 1], [], []>} : vector<20x40xf32>, vector<40x16xf32>, vector<20x16xf32> -> vector<20x16xf32>
    %86 = vector.extract_strided_slice %85 {offsets = [0, 0], sizes = [2, 16], strides = [1, 1]} : vector<20x16xf32> to vector<2x16xf32>
    %87 = arith.truncf %86 : vector<2x16xf32> to vector<2x16xbf16>
    %c0_54 = arith.constant 0 : index
    %c0_55 = arith.constant 0 : index
    %88 = vector.load %arg9[%c0_54, %c0_55] : memref<160x2048xbf16, #tpu.memory_space<vmem>>, vector<16x2048xbf16>
    %cst_56 = arith.constant dense<0.000000e+00> : vector<2x2048xf32>
    %89 = tpu.matmul %87, %88, %cst_56 {dimension_numbers = #tpu.dot_dimension_numbers<[1], [0], [0], [1], [0, 0, 1, 1], [], []>} : vector<2x16xbf16>, vector<16x2048xbf16>, vector<2x2048xf32> -> vector<2x2048xf32>
    %90 = vector.extract_strided_slice %85 {offsets = [2, 0], sizes = [2, 16], strides = [1, 1]} : vector<20x16xf32> to vector<2x16xf32>
    %91 = arith.truncf %90 : vector<2x16xf32> to vector<2x16xbf16>
    %c16 = arith.constant 16 : index
    %c0_57 = arith.constant 0 : index
    %92 = vector.load %arg9[%c16, %c0_57] : memref<160x2048xbf16, #tpu.memory_space<vmem>>, vector<16x2048xbf16>
    %cst_58 = arith.constant dense<0.000000e+00> : vector<2x2048xf32>
    %93 = tpu.matmul %91, %92, %cst_58 {dimension_numbers = #tpu.dot_dimension_numbers<[1], [0], [0], [1], [0, 0, 1, 1], [], []>} : vector<2x16xbf16>, vector<16x2048xbf16>, vector<2x2048xf32> -> vector<2x2048xf32>
    %94 = arith.addf %89, %93 : vector<2x2048xf32>
    %95 = vector.extract_strided_slice %85 {offsets = [4, 0], sizes = [2, 16], strides = [1, 1]} : vector<20x16xf32> to vector<2x16xf32>
    %96 = arith.truncf %95 : vector<2x16xf32> to vector<2x16xbf16>
    %c32 = arith.constant 32 : index
    %c0_59 = arith.constant 0 : index
    %97 = vector.load %arg9[%c32, %c0_59] : memref<160x2048xbf16, #tpu.memory_space<vmem>>, vector<16x2048xbf16>
    %cst_60 = arith.constant dense<0.000000e+00> : vector<2x2048xf32>
    %98 = tpu.matmul %96, %97, %cst_60 {dimension_numbers = #tpu.dot_dimension_numbers<[1], [0], [0], [1], [0, 0, 1, 1], [], []>} : vector<2x16xbf16>, vector<16x2048xbf16>, vector<2x2048xf32> -> vector<2x2048xf32>
    %99 = arith.addf %94, %98 : vector<2x2048xf32>
    %100 = vector.extract_strided_slice %85 {offsets = [6, 0], sizes = [2, 16], strides = [1, 1]} : vector<20x16xf32> to vector<2x16xf32>
    %101 = arith.truncf %100 : vector<2x16xf32> to vector<2x16xbf16>
    %c48 = arith.constant 48 : index
    %c0_61 = arith.constant 0 : index
    %102 = vector.load %arg9[%c48, %c0_61] : memref<160x2048xbf16, #tpu.memory_space<vmem>>, vector<16x2048xbf16>
    %cst_62 = arith.constant dense<0.000000e+00> : vector<2x2048xf32>
    %103 = tpu.matmul %101, %102, %cst_62 {dimension_numbers = #tpu.dot_dimension_numbers<[1], [0], [0], [1], [0, 0, 1, 1], [], []>} : vector<2x16xbf16>, vector<16x2048xbf16>, vector<2x2048xf32> -> vector<2x2048xf32>
    %104 = arith.addf %99, %103 : vector<2x2048xf32>
    %105 = vector.extract_strided_slice %85 {offsets = [8, 0], sizes = [2, 16], strides = [1, 1]} : vector<20x16xf32> to vector<2x16xf32>
    %106 = arith.truncf %105 : vector<2x16xf32> to vector<2x16xbf16>
    %c64 = arith.constant 64 : index
    %c0_63 = arith.constant 0 : index
    %107 = vector.load %arg9[%c64, %c0_63] : memref<160x2048xbf16, #tpu.memory_space<vmem>>, vector<16x2048xbf16>
    %cst_64 = arith.constant dense<0.000000e+00> : vector<2x2048xf32>
    %108 = tpu.matmul %106, %107, %cst_64 {dimension_numbers = #tpu.dot_dimension_numbers<[1], [0], [0], [1], [0, 0, 1, 1], [], []>} : vector<2x16xbf16>, vector<16x2048xbf16>, vector<2x2048xf32> -> vector<2x2048xf32>
    %109 = arith.addf %104, %108 : vector<2x2048xf32>
    %110 = vector.extract_strided_slice %85 {offsets = [10, 0], sizes = [2, 16], strides = [1, 1]} : vector<20x16xf32> to vector<2x16xf32>
    %111 = arith.truncf %110 : vector<2x16xf32> to vector<2x16xbf16>
    %c80 = arith.constant 80 : index
    %c0_65 = arith.constant 0 : index
    %112 = vector.load %arg9[%c80, %c0_65] : memref<160x2048xbf16, #tpu.memory_space<vmem>>, vector<16x2048xbf16>
    %cst_66 = arith.constant dense<0.000000e+00> : vector<2x2048xf32>
    %113 = tpu.matmul %111, %112, %cst_66 {dimension_numbers = #tpu.dot_dimension_numbers<[1], [0], [0], [1], [0, 0, 1, 1], [], []>} : vector<2x16xbf16>, vector<16x2048xbf16>, vector<2x2048xf32> -> vector<2x2048xf32>
    %114 = arith.addf %109, %113 : vector<2x2048xf32>
    %115 = vector.extract_strided_slice %85 {offsets = [12, 0], sizes = [2, 16], strides = [1, 1]} : vector<20x16xf32> to vector<2x16xf32>
    %116 = arith.truncf %115 : vector<2x16xf32> to vector<2x16xbf16>
    %c96 = arith.constant 96 : index
    %c0_67 = arith.constant 0 : index
    %117 = vector.load %arg9[%c96, %c0_67] : memref<160x2048xbf16, #tpu.memory_space<vmem>>, vector<16x2048xbf16>
    %cst_68 = arith.constant dense<0.000000e+00> : vector<2x2048xf32>
    %118 = tpu.matmul %116, %117, %cst_68 {dimension_numbers = #tpu.dot_dimension_numbers<[1], [0], [0], [1], [0, 0, 1, 1], [], []>} : vector<2x16xbf16>, vector<16x2048xbf16>, vector<2x2048xf32> -> vector<2x2048xf32>
    %119 = arith.addf %114, %118 : vector<2x2048xf32>
    %120 = vector.extract_strided_slice %85 {offsets = [14, 0], sizes = [2, 16], strides = [1, 1]} : vector<20x16xf32> to vector<2x16xf32>
    %121 = arith.truncf %120 : vector<2x16xf32> to vector<2x16xbf16>
    %c112 = arith.constant 112 : index
    %c0_69 = arith.constant 0 : index
    %122 = vector.load %arg9[%c112, %c0_69] : memref<160x2048xbf16, #tpu.memory_space<vmem>>, vector<16x2048xbf16>
    %cst_70 = arith.constant dense<0.000000e+00> : vector<2x2048xf32>
    %123 = tpu.matmul %121, %122, %cst_70 {dimension_numbers = #tpu.dot_dimension_numbers<[1], [0], [0], [1], [0, 0, 1, 1], [], []>} : vector<2x16xbf16>, vector<16x2048xbf16>, vector<2x2048xf32> -> vector<2x2048xf32>
    %124 = arith.addf %119, %123 : vector<2x2048xf32>
    %125 = vector.extract_strided_slice %85 {offsets = [16, 0], sizes = [2, 16], strides = [1, 1]} : vector<20x16xf32> to vector<2x16xf32>
    %126 = arith.truncf %125 : vector<2x16xf32> to vector<2x16xbf16>
    %c128 = arith.constant 128 : index
    %c0_71 = arith.constant 0 : index
    %127 = vector.load %arg9[%c128, %c0_71] : memref<160x2048xbf16, #tpu.memory_space<vmem>>, vector<16x2048xbf16>
    %cst_72 = arith.constant dense<0.000000e+00> : vector<2x2048xf32>
    %128 = tpu.matmul %126, %127, %cst_72 {dimension_numbers = #tpu.dot_dimension_numbers<[1], [0], [0], [1], [0, 0, 1, 1], [], []>} : vector<2x16xbf16>, vector<16x2048xbf16>, vector<2x2048xf32> -> vector<2x2048xf32>
    %129 = arith.addf %124, %128 : vector<2x2048xf32>
    %130 = vector.extract_strided_slice %85 {offsets = [18, 0], sizes = [2, 16], strides = [1, 1]} : vector<20x16xf32> to vector<2x16xf32>
    %131 = arith.truncf %130 : vector<2x16xf32> to vector<2x16xbf16>
    %c144 = arith.constant 144 : index
    %c0_73 = arith.constant 0 : index
    %132 = vector.load %arg9[%c144, %c0_73] : memref<160x2048xbf16, #tpu.memory_space<vmem>>, vector<16x2048xbf16>
    %cst_74 = arith.constant dense<0.000000e+00> : vector<2x2048xf32>
    %133 = tpu.matmul %131, %132, %cst_74 {dimension_numbers = #tpu.dot_dimension_numbers<[1], [0], [0], [1], [0, 0, 1, 1], [], []>} : vector<2x16xbf16>, vector<16x2048xbf16>, vector<2x2048xf32> -> vector<2x2048xf32>
    %134 = arith.addf %129, %133 : vector<2x2048xf32>
    %c0_75 = arith.constant 0 : index
    %c0_76 = arith.constant 0 : index
    %135 = vector.load %arg11[%c0_75, %c0_76] : memref<1x2048xf32, #tpu.memory_space<vmem>>, vector<1x2048xf32>
    %136 = vector.broadcast %135 : vector<1x2048xf32> to vector<2x2048xf32>
    %137 = arith.addf %134, %136 : vector<2x2048xf32>
    %c0_77 = arith.constant 0 : index
    %c0_78 = arith.constant 0 : index
    %138 = vector.load %arg10[%c0_77, %c0_78] : memref<1x2048xf32, #tpu.memory_space<vmem>>, vector<1x2048xf32>
    %139 = vector.broadcast %20 : vector<1x1xf32> to vector<1x2048xf32>
    %140 = arith.mulf %139, %138 : vector<1x2048xf32>
    %141 = vector.broadcast %140 : vector<1x2048xf32> to vector<2x2048xf32>
    %142 = arith.addf %137, %141 : vector<2x2048xf32>
    %cst_79 = arith.constant 0.000000e+00 : f32
    %143 = vector.broadcast %cst_79 : f32 to vector<2x2048xf32>
    %144 = arith.maximumf %142, %143 : vector<2x2048xf32>
    %145 = arith.truncf %144 : vector<2x2048xf32> to vector<2x2048xbf16>
    %c0_80 = arith.constant 0 : index
    %c0_81 = arith.constant 0 : index
    %146 = vector.load %arg12[%c0_80, %c0_81] : memref<2048x1024xbf16, #tpu.memory_space<vmem>>, vector<2048x1024xbf16>
    %cst_82 = arith.constant dense<0.000000e+00> : vector<2x1024xf32>
    %147 = tpu.matmul %145, %146, %cst_82 {dimension_numbers = #tpu.dot_dimension_numbers<[1], [0], [0], [1], [0, 0, 1, 1], [], []>} : vector<2x2048xbf16>, vector<2048x1024xbf16>, vector<2x1024xf32> -> vector<2x1024xf32>
    %c0_83 = arith.constant 0 : index
    %c0_84 = arith.constant 0 : index
    %148 = vector.load %arg13[%c0_83, %c0_84] : memref<1x1024xf32, #tpu.memory_space<vmem>>, vector<1x1024xf32>
    %149 = vector.broadcast %148 : vector<1x1024xf32> to vector<2x1024xf32>
    %150 = arith.addf %147, %149 : vector<2x1024xf32>
    %cst_85 = arith.constant 0.000000e+00 : f32
    %151 = vector.broadcast %cst_85 : f32 to vector<2x1024xf32>
    %152 = arith.maximumf %150, %151 : vector<2x1024xf32>
    %153 = arith.truncf %152 : vector<2x1024xf32> to vector<2x1024xbf16>
    %c0_86 = arith.constant 0 : index
    %c0_87 = arith.constant 0 : index
    %154 = vector.load %arg14[%c0_86, %c0_87] : memref<1024x256xbf16, #tpu.memory_space<vmem>>, vector<1024x256xbf16>
    %cst_88 = arith.constant dense<0.000000e+00> : vector<2x256xf32>
    %155 = tpu.matmul %153, %154, %cst_88 {dimension_numbers = #tpu.dot_dimension_numbers<[1], [0], [0], [1], [0, 0, 1, 1], [], []>} : vector<2x1024xbf16>, vector<1024x256xbf16>, vector<2x256xf32> -> vector<2x256xf32>
    %c0_89 = arith.constant 0 : index
    %c0_90 = arith.constant 0 : index
    %156 = vector.load %arg15[%c0_89, %c0_90] : memref<1x256xf32, #tpu.memory_space<vmem>>, vector<1x256xf32>
    %157 = vector.broadcast %156 : vector<1x256xf32> to vector<2x256xf32>
    %158 = arith.addf %155, %157 : vector<2x256xf32>
    %cst_91 = arith.constant 0.000000e+00 : f32
    %159 = vector.broadcast %cst_91 : f32 to vector<2x256xf32>
    %160 = arith.maximumf %158, %159 : vector<2x256xf32>
    %c0_92 = arith.constant 0 : index
    %c0_93 = arith.constant 0 : index
    %161 = vector.load %arg16[%c0_92, %c0_93] : memref<256x2xf32, #tpu.memory_space<vmem>>, vector<256x2xf32>
    %cst_94 = arith.constant dense<0.000000e+00> : vector<2x2xf32>
    %162 = tpu.matmul %160, %161, %cst_94 {dimension_numbers = #tpu.dot_dimension_numbers<[1], [0], [0], [1], [0, 0, 1, 1], [], []>} : vector<2x256xf32>, vector<256x2xf32>, vector<2x2xf32> -> vector<2x2xf32>
    %c0_95 = arith.constant 0 : index
    %c0_96 = arith.constant 0 : index
    %163 = vector.load %arg17[%c0_95, %c0_96] : memref<1x2xf32, #tpu.memory_space<vmem>>, vector<1x2xf32>
    %164 = vector.broadcast %163 : vector<1x2xf32> to vector<2x2xf32>
    %165 = arith.addf %162, %164 : vector<2x2xf32>
    %cst_97 = arith.constant 0.000000e+00 : f32
    %166 = vector.broadcast %cst_97 : f32 to vector<2x2xf32>
    %167 = arith.maximumf %165, %166 : vector<2x2xf32>
    %168 = math.absf %165 : vector<2x2xf32>
    %cst_98 = arith.constant 0.000000e+00 : f32
    %169 = vector.broadcast %cst_98 : f32 to vector<2x2xf32>
    %170 = arith.subf %169, %168 : vector<2x2xf32>
    %171 = math.exp %170 : vector<2x2xf32>
    %cst_99 = arith.constant 1.000000e+00 : f32
    %172 = vector.broadcast %cst_99 : f32 to vector<2x2xf32>
    %173 = arith.addf %172, %171 : vector<2x2xf32>
    %174 = math.log %173 : vector<2x2xf32>
    %175 = arith.addf %167, %174 : vector<2x2xf32>
    %c0_100 = arith.constant 0 : index
    %c0_101 = arith.constant 0 : index
    %176 = vector.load %arg18[%c0_100, %c0_101] : memref<2x2xf32, #tpu.memory_space<vmem>>, vector<2x2xf32>
    tpu.vector_store %arg18[%c0_100, %c0_101], %175 {strides = array<i32>} : memref<2x2xf32, #tpu.memory_space<vmem>>, vector<2x2xf32>,
    return
  }
  func.func @transform_0(%arg0: i32) -> (i32, i32) {
    %c0_i32 = arith.constant 0 : i32
    %c0_i32_0 = arith.constant 0 : i32
    %c0_i32_1 = arith.constant 0 : i32
    return %c0_i32, %c0_i32_0 : i32, i32
  }
  func.func @transform_1(%arg0: i32) -> (i32, i32) {
    %c0_i32 = arith.constant 0 : i32
    %c0_i32_0 = arith.constant 0 : i32
    %c0_i32_1 = arith.constant 0 : i32
    return %c0_i32, %c0_i32_0 : i32, i32
  }
  func.func @transform_2(%arg0: i32) -> (i32, i32) {
    %c0_i32 = arith.constant 0 : i32
    %c0_i32_0 = arith.constant 0 : i32
    %c0_i32_1 = arith.constant 0 : i32
    return %c0_i32, %c0_i32_0 : i32, i32
  }
  func.func @transform_3(%arg0: i32) -> (i32, i32) {
    %c0_i32 = arith.constant 0 : i32
    %c0_i32_0 = arith.constant 0 : i32
    %c0_i32_1 = arith.constant 0 : i32
    return %c0_i32, %c0_i32_0 : i32, i32
  }
  func.func @transform_4(%arg0: i32) -> (i32, i32, i32) {
    %c0_i32 = arith.constant 0 : i32
    %c0_i32_0 = arith.constant 0 : i32
    %c0_i32_1 = arith.constant 0 : i32
    %c0_i32_2 = arith.constant 0 : i32
    return %c0_i32, %c0_i32_0, %c0_i32_1 : i32, i32, i32
  }
  func.func @transform_5(%arg0: i32) -> (i32, i32, i32) {
    %c0_i32 = arith.constant 0 : i32
    %c0_i32_0 = arith.constant 0 : i32
    %c0_i32_1 = arith.constant 0 : i32
    %c0_i32_2 = arith.constant 0 : i32
    return %c0_i32, %c0_i32_0, %c0_i32_1 : i32, i32, i32
  }
  func.func @transform_6(%arg0: i32) -> (i32, i32) {
    %c0_i32 = arith.constant 0 : i32
    %c0_i32_0 = arith.constant 0 : i32
    %c0_i32_1 = arith.constant 0 : i32
    return %c0_i32, %c0_i32_0 : i32, i32
  }
  func.func @transform_7(%arg0: i32) -> (i32, i32) {
    %c0_i32 = arith.constant 0 : i32
    %c0_i32_0 = arith.constant 0 : i32
    %c0_i32_1 = arith.constant 0 : i32
    return %c0_i32, %c0_i32_0 : i32, i32
  }
  func.func @transform_8(%arg0: i32) -> (i32, i32) {
    %c0_i32 = arith.constant 0 : i32
    %c0_i32_0 = arith.constant 0 : i32
    %c0_i32_1 = arith.constant 0 : i32
    return %c0_i32, %c0_i32_0 : i32, i32
  }
  func.func @transform_9(%arg0: i32) -> (i32, i32) {
    %c0_i32 = arith.constant 0 : i32
    %c0_i32_0 = arith.constant 0 : i32
    %c0_i32_1 = arith.constant 0 : i32
    return %c0_i32, %c0_i32_0 : i32, i32
  }
  func.func @transform_10(%arg0: i32) -> (i32, i32) {
    %c0_i32 = arith.constant 0 : i32
    %c0_i32_0 = arith.constant 0 : i32
    %c0_i32_1 = arith.constant 0 : i32
    return %c0_i32, %c0_i32_0 : i32, i32
  }
  func.func @transform_11(%arg0: i32) -> (i32, i32) {
    %c0_i32 = arith.constant 0 : i32
    %c0_i32_0 = arith.constant 0 : i32
    %c0_i32_1 = arith.constant 0 : i32
    return %c0_i32, %c0_i32_0 : i32, i32
  }
  func.func @transform_12(%arg0: i32) -> (i32, i32) {
    %c0_i32 = arith.constant 0 : i32
    %c0_i32_0 = arith.constant 0 : i32
    %c0_i32_1 = arith.constant 0 : i32
    return %c0_i32, %c0_i32_0 : i32, i32
  }
  func.func @transform_13(%arg0: i32) -> (i32, i32) {
    %c0_i32 = arith.constant 0 : i32
    %c0_i32_0 = arith.constant 0 : i32
    %c0_i32_1 = arith.constant 0 : i32
    return %c0_i32, %c0_i32_0 : i32, i32
  }
  func.func @transform_14(%arg0: i32) -> (i32, i32) {
    %c0_i32 = arith.constant 0 : i32
    %c0_i32_0 = arith.constant 0 : i32
    %c0_i32_1 = arith.constant 0 : i32
    return %c0_i32, %c0_i32_0 : i32, i32
  }
  func.func @transform_15(%arg0: i32) -> (i32, i32) {
    %c0_i32 = arith.constant 0 : i32
    %c0_i32_0 = arith.constant 0 : i32
    %c0_i32_1 = arith.constant 0 : i32
    return %c0_i32, %c0_i32_0 : i32, i32
  }
  func.func @transform_16(%arg0: i32) -> (i32, i32) {
    %c0_i32 = arith.constant 0 : i32
    %c0_i32_0 = arith.constant 0 : i32
    %c0_i32_1 = arith.constant 0 : i32
    return %c0_i32, %c0_i32_0 : i32, i32
  }
  func.func @transform_17(%arg0: i32) -> (i32, i32) {
    %c0_i32 = arith.constant 0 : i32
    %c0_i32_0 = arith.constant 0 : i32
    %c0_i32_1 = arith.constant 0 : i32
    return %c0_i32, %c0_i32_0 : i32, i32
  }
}

</mosaic_0001>

<bundles_post_ra>
// kernel: cnn_b_forward.1
= control target key start
LH: loop header
LB: loop body
LE: loop exit
PB: predicated region body
PF: predicated region fallthrough
CT: control target
= control target key end

     0   :  { %s19852_s0 = inlined_call_operand.hbm [shape: f32[2,256], index: 0, kind: input, shape index: {}]   ;;  %s19853_s1 = inlined_call_operand.vmem [shape: f32[176,3], index: 1, kind: input, shape index: {}]   ;;  %s19854_s2 = inlined_call_operand.hbm [shape: f32[3,64], index: 2, kind: input, shape index: {}]   ;;  %s19855_s3 = inlined_call_operand.hbm [shape: f32[1,64], index: 3, kind: input, shape index: {}]   ;;  %s19856_s4 = inlined_call_operand.hbm [shape: f32[5,40,176], index: 4, kind: input, shape index: {}]   ;;  %s19857_s5 = inlined_call_operand.vmem [shape: f32[5,64,16], index: 5, kind: input, shape index: {}]   ;;  %s19858_s6 = inlined_call_operand.hbm [shape: f32[1,16], index: 6, kind: input, shape index: {}]   ;;  %s19859_s7 = inlined_call_operand.hbm [shape: f32[20,40], index: 7, kind: input, shape index: {}]   ;;  %s19860_s8 = inlined_call_operand.hbm [shape: bf16[160,2048], index: 8, kind: input, shape index: {}]   ;;  %s19861_s9 = inlined_call_operand.hbm [shape: f32[1,2048], index: 9, kind: input, shape index: {}]   ;;  %s19862_s10 = inlined_call_operand.hbm [shape: f32[1,2048], index: 10, kind: input, shape index: {}]   ;;  %s19863_s11 = inlined_call_operand.hbm [shape: bf16[2048,1024], index: 11, kind: input, shape index: {}]   ;;  %s19864_s12 = inlined_call_operand.hbm [shape: f32[1,1024], index: 12, kind: input, shape index: {}]   ;;  %s19865_s13 = inlined_call_operand.hbm [shape: bf16[1024,256], index: 13, kind: input, shape index: {}]   ;;  %s19866_s14 = inlined_call_operand.hbm [shape: f32[1,256], index: 14, kind: input, shape index: {}]   ;;  %s19867_s15 = inlined_call_operand.vmem [shape: f32[256,2], index: 15, kind: input, shape index: {}]   ;;  %s19868_s16 = inlined_call_operand.hbm [shape: f32[1,2], index: 16, kind: input, shape index: {}]   ;;  %s19869_s17 = inlined_call_operand.hbm [shape: f32[2,2], index: 17, kind: output, shape index: {}]  }
   0x1   :  { %19871 = sst [smem:[#allocation35_spill]] %s19852_s0 }
   0x2   :  { %19872 = sst [smem:[#allocation36_spill]] %s19853_s1 }
   0x3   :  { %22 = vsyncpa [#allocation3], 0 }
   0x4   :  { %23 = vsyncpa [#allocation6], 0 }
   0x5   :  { %24 = vsyncpa [#allocation9], 0 }
   0x6   :  { %25 = vsyncpa [#allocation12], 0 }
   0x7   :  { %26 = vsyncpa [#allocation15], 0 }
   0x8   :  { %27 = vsyncpa [#allocation18], 0 }
   0x9   :  { %28 = vsyncpa [#allocation21], 0 }
   0xa   :  { %29 = vsyncpa [#allocation24], 0 }
   0xb   :  { %30 = vsyncpa [#allocation4], 0  ;;  %s17656_s24 = smov [#allocation5]   ;;  %s17657_s26 = smov [#allocation8]  }
   0xc   :  { %s49_s25 = sshll.u32 %s17656_s24, 4  ;;  %s68_s27 = sshll.u32 %s17657_s26, 4  ;;  %s50_s25 = int_to_ptr.vmem [resolvable:$true] %s49_s25  ;;  %s69_s27 = int_to_ptr.vmem [resolvable:$true] %s68_s27 }
   0xd   :  { %s17346_s28 = scalar_lea.vmem %s50_s25, 64  ;;  %p17351_p1 = scmp.lt.s32.totalorder %s50_s25, %s50_s25 }
   0xe   :  { %p17347_p0 = scmp.ne.s32.totalorder %s50_s25, %s17346_s28  ;;  %p17352_p2 = scmp.lt.s32.totalorder %s17346_s28, %s17346_s28 }
  0x10   :  { %p17353_p3 = por %p17352_p2, %p17351_p1 }
  0x12   :  { %p17354_p4 = pnand %p17353_p3, %p17347_p0 }
  0x14   :  { %17357 = shalt.err (!%p17354_p4)
}
  0x15   :  { %52 = dma.hbm_to_vmem [thread:$0]  %s19854_s2, 64, %s50_s25, [#allocation6]  }
  0x16   :  { %s17366_s30 = scalar_lea.vmem %s69_s27, 6400  ;;  %p17371_p6 = scmp.lt.s32.totalorder %s69_s27, %s69_s27 }
  0x17   :  { %p17367_p5 = scmp.ne.s32.totalorder %s69_s27, %s17366_s30  ;;  %p17372_p7 = scmp.lt.s32.totalorder %s17366_s30, %s17366_s30 }
  0x19   :  { %p17373_p8 = por %p17372_p7, %p17371_p6 }
  0x1b   :  { %p17374_p9 = pnand %p17373_p8, %p17367_p5 }
  0x1d   :  { %17377 = shalt.err (!%p17374_p9)
}
  0x1e   :  { %s17658_s18 = smov 256   ;;  %s17659_s19 = smov 16  }
  0x1f   :  { %74 = dma.hbm_to_vmem [thread:$0]  %s19856_s4, 6400, %s69_s27, [#allocation9], %s17658_s18, %s17658_s18, %s17659_s19  }
  0x20   :  { %s17660_s21 = smov [#allocation11]  }
  0x21   :  { %s92_s22 = sshll.u32 %s17660_s21, 4  ;;  %s93_s22 = int_to_ptr.vmem [resolvable:$true] %s92_s22 }
  0x22   :  { %s17386_s23 = scalar_lea.vmem %s93_s22, 384  ;;  %p17391_p11 = scmp.lt.s32.totalorder %s93_s22, %s93_s22 }
  0x23   :  { %p17387_p10 = scmp.ne.s32.totalorder %s93_s22, %s17386_s23  ;;  %p17392_p12 = scmp.lt.s32.totalorder %s17386_s23, %s17386_s23 }
  0x25   :  { %p17393_p13 = por %p17392_p12, %p17391_p11 }
  0x27   :  { %p17394_p0 = pnand %p17393_p13, %p17387_p10 }
  0x29   :  { %17397 = shalt.err (!%p17394_p0)
}
  0x2a   :  { %s17661_s2 = smov 128   ;;  %s17662_s24 = smov 8  }
  0x2b   :  { %98 = dma.hbm_to_vmem [thread:$0]  %s19859_s7, 384, %s93_s22, [#allocation12], %s17661_s2, %s17661_s2, %s17662_s24  }
  0x2c   :  { %s17663_s4 = smov [#allocation14]   ;;  %s17664_s28 = smov [#allocation17]  }
  0x2d   :  { %s117_s27 = sshll.u32 %s17663_s4, 4  ;;  %s136_s29 = sshll.u32 %s17664_s28, 4  ;;  %s118_s27 = int_to_ptr.vmem [resolvable:$true] %s117_s27  ;;  %s137_s29 = int_to_ptr.vmem [resolvable:$true] %s136_s29 }
  0x2e   :  { %s17406_s0 = scalar_lea.vmem %s118_s27, 256  ;;  %p17411_p2 = scmp.lt.s32.totalorder %s118_s27, %s118_s27 }
  0x2f   :  { %p17407_p1 = scmp.ne.s32.totalorder %s118_s27, %s17406_s0  ;;  %p17412_p3 = scmp.lt.s32.totalorder %s17406_s0, %s17406_s0 }
  0x31   :  { %p17413_p4 = por %p17412_p3, %p17411_p2 }
  0x33   :  { %p17414_p5 = pnand %p17413_p4, %p17407_p1 }
  0x35   :  { %17417 = shalt.err (!%p17414_p5)
}
  0x36   :  { %120 = dma.hbm_to_vmem [thread:$0]  %s19861_s9, 256, %s118_s27, [#allocation15]  }
  0x37   :  { %s17426_s19 = scalar_lea.vmem %s137_s29, 131072  ;;  %p17431_p7 = scmp.lt.s32.totalorder %s137_s29, %s137_s29 }
  0x38   :  { %p17427_p6 = scmp.ne.s32.totalorder %s137_s29, %s17426_s19  ;;  %p17432_p8 = scmp.lt.s32.totalorder %s17426_s19, %s17426_s19 }
  0x3a   :  { %p17433_p9 = por %p17432_p8, %p17431_p7 }
  0x3c   :  { %p17434_p10 = pnand %p17433_p9, %p17427_p6 }
  0x3e   :  { %17437 = shalt.err (!%p17434_p10)
}
  0x3f   :  { %s17665_s7 = smov 512   ;;  %s17666_s1 = smov 32  }
  0x40   :  { %142 = dma.hbm_to_vmem [thread:$0]  %s19863_s11, 131072, %s137_s29, [#allocation18], %s17665_s7, %s17665_s7, %s17666_s1  }
  0x41   :  { %s17667_s22 = smov [#allocation20]   ;;  %s17668_s25 = smov [#allocation2]  }
  0x42   :  { %s158_s23 = sshll.u32 %s17667_s22, 4  ;;  %s37_s26 = sshll.u32 %s17668_s25, 4  ;;  %s159_s23 = int_to_ptr.vmem [resolvable:$true] %s158_s23  ;;  %s38_s26 = int_to_ptr.vmem [resolvable:$true] %s37_s26 }
  0x43   :  { %s17446_s9 = scalar_lea.vmem %s159_s23, 16384  ;;  %p17451_p12 = scmp.lt.s32.totalorder %s159_s23, %s159_s23 }
  0x44   :  { %p17447_p11 = scmp.ne.s32.totalorder %s159_s23, %s17446_s9  ;;  %p17452_p13 = scmp.lt.s32.totalorder %s17446_s9, %s17446_s9 }
  0x46   :  { %p17453_p0 = por %p17452_p13, %p17451_p12 }
  0x48   :  { %p17454_p1 = pnand %p17453_p0, %p17447_p11 }
  0x4a   :  { %17457 = shalt.err (!%p17454_p1)
}
  0x4b   :  { %164 = dma.hbm_to_vmem [thread:$0]  %s19865_s13, 16384, %s159_s23, [#allocation21], %s17661_s2, %s17661_s2, %s17662_s24  }
  0x4c   :  { %s17466_s11 = scalar_lea.vmem %s38_s26, 64  ;;  %p17471_p3 = scmp.lt.s32.totalorder %s38_s26, %s38_s26 }
  0x4d   :  { %p17467_p2 = scmp.ne.s32.totalorder %s38_s26, %s17466_s11  ;;  %p17472_p4 = scmp.lt.s32.totalorder %s17466_s11, %s17466_s11 }
  0x4f   :  { %p17473_p5 = por %p17472_p4, %p17471_p3 }
  0x51   :  { %p17474_p6 = pnand %p17473_p5, %p17467_p2 }
  0x53   :  { %17477 = shalt.err (!%p17474_p6)
}
  0x54   :  { %s19873_s0 = sld [smem:[#allocation35_spill]]  ;;  %s17669_s30 = smov [#allocation7]  }
  0x55   :  { %s59_s18 = sshll.u32 %s17669_s30, 4  ;;  %s17670_s19 = smov [#allocation10]   ;;  %s60_s18 = int_to_ptr.vmem [resolvable:$true] %s59_s18 }
  0x56   :  { %s83_s7 = sshll.u32 %s17670_s19, 4  ;;  %s17486_s1 = scalar_lea.vmem %s60_s18, 16  ;;  %s84_s7 = int_to_ptr.vmem [resolvable:$true] %s83_s7 }
  0x57   :  { %p17487_p7 = scmp.ne.s32.totalorder %s60_s18, %s17486_s1  ;;  %s17490_s13 = scalar_lea.vmem %s60_s18, 32 }
  0x58   :  { %p17491_p8 = scmp.lt.s32.totalorder %s60_s18, %s60_s18  ;;  %p17492_p9 = scmp.lt.s32.totalorder %s17490_s13, %s17486_s1 }
  0x5a   :  { %40 = dma.hbm_to_vmem [thread:$0]  %s19873_s0, 64, %s38_s26, [#allocation3]  }
  0x5b   :  { %p17493_p10 = por %p17492_p9, %p17491_p8 }
  0x5d   :  { %p17494_p11 = pnand %p17493_p10, %p17487_p7 }
  0x5f   :  { %17497 = shalt.err (!%p17494_p11)
}
  0x60   :  { %62 = dma.hbm_to_vmem [thread:$0]  %s19855_s3, 16, %s60_s18, [#allocation6]  }
  0x61   :  { %s17506_s20 = scalar_lea.vmem %s84_s7, 16  ;;  %s17510_s21 = scalar_lea.vmem %s84_s7, 32 }
  0x62   :  { %p17507_p12 = scmp.ne.s32.totalorder %s84_s7, %s17506_s20  ;;  %p17511_p13 = scmp.lt.s32.totalorder %s84_s7, %s84_s7 }
  0x63   :  { %p17512_p0 = scmp.lt.s32.totalorder %s17510_s21, %s17506_s20 }
  0x65   :  { %p17513_p1 = por %p17512_p0, %p17511_p13 }
  0x67   :  { %p17514_p2 = pnand %p17513_p1, %p17507_p12 }
  0x69   :  { %17517 = shalt.err (!%p17514_p2)
}
  0x6a   :  { %86 = dma.hbm_to_vmem [thread:$0]  %s19858_s6, 16, %s84_s7, [#allocation9]  }
  0x6b   :  { %s17671_s25 = smov [#allocation13]  }
  0x6c   :  { %s104_s26 = sshll.u32 %s17671_s25, 4  ;;  %s105_s26 = int_to_ptr.vmem [resolvable:$true] %s104_s26 }
  0x6d   :  { %s17526_s9 = scalar_lea.vmem %s105_s26, 20480  ;;  %p17531_p4 = scmp.lt.s32.totalorder %s105_s26, %s105_s26 }
  0x6e   :  { %p17527_p3 = scmp.ne.s32.totalorder %s105_s26, %s17526_s9  ;;  %p17532_p5 = scmp.lt.s32.totalorder %s17526_s9, %s17526_s9 }
  0x70   :  { %p17533_p6 = por %p17532_p5, %p17531_p4 }
  0x72   :  { %p17534_p7 = pnand %p17533_p6, %p17527_p3 }
  0x74   :  { %17537 = shalt.err (!%p17534_p7)
}
  0x75   :  { %s17672_s3 = smov 1024   ;;  %s17673_s4 = smov 64  }
  0x76   :  { %110 = dma.hbm_to_vmem [thread:$0]  %s19860_s8, 20480, %s105_s26, [#allocation12], %s17672_s3, %s17672_s3, %s17673_s4  }
  0x77   :  { %s17674_s28 = smov [#allocation16]   ;;  %s17675_s0 = smov [#allocation19]  }
  0x78   :  { %s127_s29 = sshll.u32 %s17674_s28, 4  ;;  %s149_s6 = sshll.u32 %s17675_s0, 4  ;;  %s128_s29 = int_to_ptr.vmem [resolvable:$true] %s127_s29  ;;  %s150_s6 = int_to_ptr.vmem [resolvable:$true] %s149_s6 }
  0x79   :  { %s17546_s30 = scalar_lea.vmem %s128_s29, 256  ;;  %p17551_p9 = scmp.lt.s32.totalorder %s128_s29, %s128_s29 }
  0x7a   :  { %p17547_p8 = scmp.ne.s32.totalorder %s128_s29, %s17546_s30  ;;  %p17552_p10 = scmp.lt.s32.totalorder %s17546_s30, %s17546_s30 }
  0x7c   :  { %p17553_p11 = por %p17552_p10, %p17551_p9 }
  0x7e   :  { %p17554_p12 = pnand %p17553_p11, %p17547_p8 }
  0x80   :  { %17557 = shalt.err (!%p17554_p12)
}
  0x81   :  { %130 = dma.hbm_to_vmem [thread:$0]  %s19862_s10, 256, %s128_s29, [#allocation15]  }
  0x82   :  { %s17566_s7 = scalar_lea.vmem %s150_s6, 128  ;;  %p17571_p0 = scmp.lt.s32.totalorder %s150_s6, %s150_s6 }
  0x83   :  { %p17567_p13 = scmp.ne.s32.totalorder %s150_s6, %s17566_s7  ;;  %p17572_p1 = scmp.lt.s32.totalorder %s17566_s7, %s17566_s7 }
  0x85   :  { %p17573_p2 = por %p17572_p1, %p17571_p0 }
  0x87   :  { %p17574_p3 = pnand %p17573_p2, %p17567_p13 }
  0x89   :  { %17577 = shalt.err (!%p17574_p3)
}
  0x8a   :  { %152 = dma.hbm_to_vmem [thread:$0]  %s19864_s12, 128, %s150_s6, [#allocation18]  }
  0x8b   :  { %s17676_s13 = smov [#allocation22]   ;;  %s17677_s24 = smov [#allocation23]  }
  0x8c   :  { %s171_s2 = sshll.u32 %s17676_s13, 4  ;;  %s183_s20 = sshll.u32 %s17677_s24, 4  ;;  %s172_s2 = int_to_ptr.vmem [resolvable:$true] %s171_s2  ;;  %s184_s20 = int_to_ptr.vmem [resolvable:$true] %s183_s20 }
  0x8d   :  { %s17586_s21 = scalar_lea.vmem %s172_s2, 32  ;;  %p17591_p5 = scmp.lt.s32.totalorder %s172_s2, %s172_s2 }
  0x8e   :  { %p17587_p4 = scmp.ne.s32.totalorder %s172_s2, %s17586_s21  ;;  %p17592_p6 = scmp.lt.s32.totalorder %s17586_s21, %s17586_s21 }
  0x90   :  { %p17593_p7 = por %p17592_p6, %p17591_p5 }
  0x92   :  { %p17594_p8 = pnand %p17593_p7, %p17587_p4 }
  0x94   :  { %17597 = shalt.err (!%p17594_p8)
}
  0x95   :  { %174 = dma.hbm_to_vmem [thread:$0]  %s19866_s14, 32, %s172_s2, [#allocation21]  }
  0x96   :  { %s17606_s23 = scalar_lea.vmem %s184_s20, 16  ;;  %s17610_s12 = scalar_lea.vmem %s184_s20, 32 }
  0x97   :  { %p17607_p9 = scmp.ne.s32.totalorder %s184_s20, %s17606_s23  ;;  %p17611_p10 = scmp.lt.s32.totalorder %s184_s20, %s184_s20 }
  0x98   :  { %p17612_p11 = scmp.lt.s32.totalorder %s17610_s12, %s17606_s23 }
  0x9a   :  { %p17613_p12 = por %p17612_p11, %p17611_p10 }
  0x9c   :  { %p17614_p13 = pnand %p17613_p12, %p17607_p9 }
  0x9e   :  { %17617 = shalt.err (!%p17614_p13)
}
  0x9f   :  { %186 = dma.hbm_to_vmem [thread:$0]  %s19868_s16, 16, %s184_s20, [#allocation24]  }
  0xa0   :  { %17638 = dma.done.wait [#allocation3], 64  }
  0xa1   :  { %17639 = vsyncadd [#allocation3], 4294967232 }
  0xa2   :  { %17640 = dma.done.wait [#allocation6], 80  }
  0xa3   :  { %17641 = vsyncadd [#allocation6], 4294967216 }
  0xa4   :  { %17642 = dma.done.wait [#allocation9], 6416  }
  0xa5   :  { %17643 = vsyncadd [#allocation9], 4294960880 }
  0xa6   :  { %17644 = dma.done.wait [#allocation12], 20864  }
  0xa7   :  { %17645 = vsyncadd [#allocation12], 4294946432 }
  0xa8   :  { %17646 = dma.done.wait [#allocation15], 512  }
  0xa9   :  { %17647 = vsyncadd [#allocation15], 4294966784 }
  0xaa   :  { %17648 = dma.done.wait [#allocation18], 131200  }
  0xab   :  { %17649 = vsyncadd [#allocation18], 4294836096 }
  0xac   :  { %17650 = dma.done.wait [#allocation21], 16416  }
  0xad   :  { %17651 = vsyncadd [#allocation21], 4294950880 }
  0xae   :  { %17652 = dma.done.wait [#allocation24], 16  }
  0xaf   :  { %17653 = vsyncadd [#allocation24], 4294967280  ;;  %v17678_v0 = vmov 0   ;;  %s19874_s9 = sld [smem:[#allocation36_spill]]  ;;  %v17679_v3 = vmov 1   ;;  %v17680_v5 = vmov 2   ;;  %v235_v24 = vlaneseq }
  0xb0   :  { %17094 = vset.pattern.permute.xlu1 %v17678_v0  ;;  %17092 = vset.pattern.permute.xlu0 %v17678_v0  ;;  %v17681_v8 = vmov 0.0   ;;  %v314_v28 = vld [vmem:[#allocation5] sm:$0x7]  ;;  %v17977_v44 = vld [vmem:[#allocation7] ss:$0 sm:$0xff]  ;;  %vm784_vm0 = vcmask 392192  }
  0xb1   :  { %800 = vmatprep.subr.mxu0 %v17681_v8  ;;  %924 = vmatprep.subr.mxu1 %v17681_v8  ;;  %v17949_v26 = vshrl.u32 %v235_v24, 7  ;;  %vm17682_vm1 = vmmov 0   ;;  %vm1023_vm2 = vcmask 523264   ;;  %vm1959_vm3 = vcmask 326656  }
  0xb2   :  { %vm242_vm4 = vcmask 1041408   ;;  %vm2164_vm5 = vcmask 130048   ;;  %vm15273_vm8 = vcmask 9216  }
  0xb3   :  { %v17953_v27 = vsub.s32 0, %v17949_v26  ;;  %v17956_v31 = vsub.s32 1, %v17949_v26  ;;  %v17963_v33 = vsub.s32 2, %v17949_v26 }
  0xb5   :  { %v307_v1 = vld [vmem:[%s19874_s9 + $0x78] sm:$0xff]  ;;  %v306_v2 = vld [vmem:[%s19874_s9 + $0x70] sm:$0xff]  ;;  %v305_v4 = vld [vmem:[%s19874_s9 + $0x68] sm:$0xff]  ;;  %v17960_v32 = vrot.slane %v314_v28, %v17953_v27  ;;  %v17966_v34 = vrot.slane %v314_v28, %v17956_v31  ;;  %v17973_v39 = vrot.slane %v314_v28, %v17963_v33 }
  0xb6   :  { %392 = vperm.xlu0 %17092, %v307_v1   ;;  %387 = vperm.xlu1 %17094, %v306_v2   ;;  %v304_v6 = vld [vmem:[%s19874_s9 + $0x60] sm:$0xff]  ;;  %v299_v9 = vld [vmem:[%s19874_s9 + $0x38] sm:$0xff]  ;;  %v17864_v12 = vld [vmem:[%s19874_s9 + $0x10] sm:$0xff] }
  0xb7   :  { %v300_v7 = vld [vmem:[%s19874_s9 + $0x40] sm:$0xff]  ;;  %v17854_v10 = vld [vmem:[%s19874_s9 + $0x18] sm:$0xff]  ;;  %v302_v15 = vld [vmem:[%s19874_s9 + $0x50] sm:$0xff] }
  0xb8   :  { %v303_v11 = vld [vmem:[%s19874_s9 + $0x58] sm:$0xff]  ;;  %v17870_v13 = vld [vmem:[%s19874_s9 + $0xa0] sm:$0xff]  ;;  %v301_v16 = vld [vmem:[%s19874_s9 + $0x48] sm:$0xff] }
  0xb9   :  { %v17876_v14 = vld [vmem:[%s19874_s9 + $0x98] sm:$0xff]  ;;  %v298_v17 = vld [vmem:[%s19874_s9 + $0x30] sm:$0xff]  ;;  %v297_v18 = vld [vmem:[%s19874_s9 + $0x28] sm:$0xff] }
  0xba   :  { %17093 = vset.pattern.permute.xlu0 %v17679_v3  ;;  %17095 = vset.pattern.permute.xlu1 %v17679_v3  ;;  %v296_v19 = vld [vmem:[%s19874_s9 + $0x20] sm:$0xff]  ;;  %v17922_v21 = vld [vmem:[%s19874_s9 + $0xa8] sm:$0xff] }
  0xbb   :  { %512 = vperm.xlu0 %17093, %v307_v1   ;;  %508 = vperm.xlu1 %17095, %v306_v2   ;;  %v17916_v20 = vld [vmem:[%s19874_s9] sm:$0xff]  ;;  %v17929_v22 = vld [vmem:[%s19874_s9 + $0x88] sm:$0xff] }
  0xbc   :  { %v17936_v23 = vld [vmem:[%s19874_s9 + $0x80] sm:$0xff]  ;;  %v293_v25 = vld [vmem:[%s19874_s9 + $0x8] sm:$0xff] }
  0xbf   :  { %17097 = vset.pattern.permute.xlu0 %v17678_v0  ;;  %17096 = vset.pattern.permute.xlu1 %v17680_v5 }
  0xc0   :  { %648 = vperm.xlu1 %17096, %v307_v1   ;;  %382 = vperm.xlu0 %17097, %v305_v4  }
  0xc4   :  { %17098 = vset.pattern.permute.xlu1 %v17679_v3  ;;  %377 = vperm.xlu0 %17097, %v304_v6  }
  0xc5   :  { %504 = vperm.xlu1 %17098, %v305_v4  }
  0xc8   :  { %357 = vperm.xlu0 %17097, %v300_v7  }
  0xc9   :  { %17099 = vset.pattern.permute.xlu1 %v17680_v5 }
  0xca   :  { %644 = vperm.xlu1 %17099, %v306_v2  }
  0xcc   :  { %352 = vperm.xlu0 %17097, %v299_v9  }
  0xce   :  { %17100 = vset.pattern.permute.xlu1 %v17679_v3 }
  0xcf   :  { %500 = vperm.xlu1 %17100, %v304_v6  }
  0xd0   :  { %332 = vperm.xlu0 %17097, %v17854_v10  }
  0xd3   :  { %17101 = vset.pattern.permute.xlu1 %v17678_v0 }
  0xd4   :  { %372 = vperm.xlu1 %17101, %v303_v11   ;;  %327 = vperm.xlu0 %17097, %v17864_v12  }
  0xd8   :  { %17102 = vset.pattern.permute.xlu1 %v17679_v3  ;;  %417 = vperm.xlu0 %17097, %v17870_v13  }
  0xd9   :  { %496 = vperm.xlu1 %17102, %v303_v11  }
  0xdc   :  { %412 = vperm.xlu0 %17097, %v17876_v14  }
  0xdd   :  { %17103 = vset.pattern.permute.xlu1 %v17678_v0 }
  0xde   :  { %367 = vperm.xlu1 %17103, %v302_v15  }
  0xe0   :  { %17127 = vset.pattern.permute.xlu0 %v17680_v5 }
  0xe1   :  { %640 = vperm.xlu0 %17127, %v305_v4  }
  0xe2   :  { %17104 = vset.pattern.permute.xlu1 %v17680_v5 }
  0xe3   :  { %632 = vperm.xlu1 %17104, %v303_v11  }
  0xe5   :  { %636 = vperm.xlu0 %17127, %v304_v6   ;;  %v310_v6 = vld [vmem:[%s19874_s9 + $0x90] sm:$0xff] }
  0xe7   :  { %17105 = vset.pattern.permute.xlu1 %v17678_v0 }
  0xe8   :  { %362 = vperm.xlu1 %17105, %v301_v16  }
  0xe9   :  { %620 = vperm.xlu0 %17127, %v300_v7  }
  0xec   :  { %17106 = vset.pattern.permute.xlu1 %v17680_v5 }
  0xed   :  { %628 = vperm.xlu1 %17106, %v302_v15   ;;  %616 = vperm.xlu0 %17127, %v299_v9  }
  0xf1   :  { %17107 = vset.pattern.permute.xlu1 %v17679_v3  ;;  %600 = vperm.xlu0 %17127, %v17854_v10  }
  0xf2   :  { %484 = vperm.xlu1 %17107, %v300_v7  }
  0xf5   :  { %596 = vperm.xlu0 %17127, %v17864_v12  }
  0xf6   :  { %17108 = vset.pattern.permute.xlu1 %v17680_v5 }
  0xf7   :  { %624 = vperm.xlu1 %17108, %v301_v16  }
  0xf9   :  { %668 = vperm.xlu0 %17127, %v17870_v13  }
  0xfb   :  { %17109 = vset.pattern.permute.xlu1 %v17679_v3 }
  0xfc   :  { %480 = vperm.xlu1 %17109, %v299_v9  }
  0xfd   :  { %664 = vperm.xlu0 %17127, %v17876_v14  }
 0x100   :  { %17110 = vset.pattern.permute.xlu1 %v17678_v0 }
 0x101   :  { %347 = vperm.xlu1 %17110, %v298_v17   ;;  %17131 = vset.pattern.permute.xlu0 %v17679_v3 }
 0x102   :  { %492 = vperm.xlu0 %17131, %v302_v15  }
 0x105   :  { %17111 = vset.pattern.permute.xlu1 %v17679_v3 }
 0x106   :  { %476 = vperm.xlu1 %17111, %v298_v17   ;;  %488 = vperm.xlu0 %17131, %v301_v16  }
 0x10a   :  { %17112 = vset.pattern.permute.xlu1 %v17678_v0  ;;  %472 = vperm.xlu0 %17131, %v297_v18  }
 0x10b   :  { %342 = vperm.xlu1 %17112, %v297_v18  }
 0x10e   :  { %468 = vperm.xlu0 %17131, %v296_v19  }
 0x10f   :  { %17113 = vset.pattern.permute.xlu1 %v17680_v5 }
 0x110   :  { %612 = vperm.xlu1 %17113, %v298_v17  }
 0x112   :  { %452 = vperm.xlu0 %17131, %v17916_v20  }
 0x114   :  { %17114 = vset.pattern.permute.xlu1 %v17678_v0 }
 0x115   :  { %337 = vperm.xlu1 %17114, %v296_v19  }
 0x116   :  { %536 = vperm.xlu0 %17131, %v17922_v21  }
 0x119   :  { %17115 = vset.pattern.permute.xlu1 %v17680_v5 }
 0x11a   :  { %608 = vperm.xlu1 %17115, %v297_v18   ;;  %520 = vperm.xlu0 %17131, %v17929_v22  }
 0x11e   :  { %17116 = vset.pattern.permute.xlu1 %v17679_v3  ;;  %516 = vperm.xlu0 %17131, %v17936_v23  }
 0x11f   :  { %464 = vperm.xlu1 %17116, %v17854_v10  }
 0x122   :  { %17136 = vset.pattern.permute.xlu0 %v17680_v5 }
 0x123   :  { %17117 = vset.pattern.permute.xlu1 %v17680_v5  ;;  %652 = vperm.xlu0 %17136, %v17936_v23  }
 0x124   :  { %604 = vperm.xlu1 %17117, %v296_v19  }
 0x128   :  { %17118 = vset.pattern.permute.xlu1 %v17679_v3 }
 0x129   :  { %460 = vperm.xlu1 %17118, %v17864_v12  }
 0x12d   :  { %17119 = vset.pattern.permute.xlu1 %v17678_v0 }
 0x12e   :  { %322 = vperm.xlu1 %17119, %v293_v25  }
 0x131   :  { %v388_v29 = vpop.permute.xlu1 %387  ;;  %v393_v30 = vpop.permute.xlu0 %392 }
 0x132   :  { %17120 = vset.pattern.permute.xlu1 %v17679_v3  ;;  %v444_v35 = vmul.f32 %v17960_v32, %v393_v30  ;;  %v443_v52 = vmul.f32 %v17960_v32, %v388_v29 }
 0x133   :  { %456 = vperm.xlu1 %17120, %v293_v25  }
 0x136   :  { %v509_v36 = vpop.permute.xlu1 %508  ;;  %v513_v37 = vpop.permute.xlu0 %512 }
 0x137   :  { %17121 = vset.pattern.permute.xlu1 %v17678_v0  ;;  %v558_v38 = vmul.f32 %v17966_v34, %v513_v37  ;;  %v557_v49 = vmul.f32 %v17966_v34, %v509_v36 }
 0x138   :  { %317 = vperm.xlu1 %17121, %v17916_v20  }
 0x139   :  { %v580_v40 = vadd.f32 %v558_v38, %v444_v35  ;;  %v579_v54 = vadd.f32 %v557_v49, %v443_v52 }
 0x13b   :  { %v649_v41 = vpop.permute.xlu1 %648  ;;  %v383_v42 = vpop.permute.xlu0 %382 }
 0x13c   :  { %v694_v43 = vmul.f32 %v17973_v39, %v649_v41  ;;  %17122 = vset.pattern.permute.xlu1 %v17680_v5  ;;  %v442_v7 = vmul.f32 %v17960_v32, %v383_v42 }
 0x13d   :  { %592 = vperm.xlu1 %17122, %v293_v25  }
 0x13e   :  { %v716_v45 = vadd.f32 %v694_v43, %v580_v40 }
 0x13f   :  { %v378_v46 = vpop.permute.xlu0 %377 }
 0x140   :  { %v745_v47 = vadd.f32 %v17977_v44, %v716_v45  ;;  %v505_v48 = vpop.permute.xlu1 %504 }
 0x141   :  { %17123 = vset.pattern.permute.xlu1 %v17678_v0  ;;  %v556_v9 = vmul.f32 %v17966_v34, %v505_v48 }
 0x142   :  { %v17982_v50 = vmax.f32 %v745_v47, 0.0  ;;  %422 = vperm.xlu1 %17123, %v17922_v21  }
 0x143   :  { %v17985_v51 = vpop.permute.xlu0 %357 }
 0x144   :  { %801 = vmatpush1.msra.mxu0 %v17982_v50  ;;  %925 = vmatpush1.msra.mxu1 %v17982_v50 }
 0x145   :  { %v645_v53 = vpop.permute.xlu1 %644  ;;  %802 = vmatprep.subr.mxu0 %v17681_v8  ;;  %926 = vmatprep.subr.mxu1 %v17681_v8 }
 0x146   :  { %v693_v55 = vmul.f32 %v17973_v39, %v645_v53  ;;  %17124 = vset.pattern.permute.xlu1 %v17680_v5 }
 0x147   :  { %588 = vperm.xlu1 %17124, %v17916_v20   ;;  %v17995_v56 = vpop.permute.xlu0 %352 }
 0x148   :  { %v715_v57 = vadd.f32 %v693_v55, %v579_v54  ;;  %v775_v55 = vld [vmem:[#allocation8 + $0x8] sm:$0xff] }
 0x149   :  { %15298 = vmatprep.mubr.msk.f32.mxu0 %vm784_vm0, %v775_v55 }
 0x14a   :  { %v744_v58 = vadd.f32 %v17977_v44, %v715_v57  ;;  %v501_v59 = vpop.permute.xlu1 %500  ;;  %v900_v57 = vld [vmem:[#allocation8 + $0x58] sm:$0xff] }
 0x14b   :  { %17125 = vset.pattern.permute.xlu1 %v17679_v3  ;;  %v17999_v60 = vpop.permute.xlu0 %332  ;;  %v555_v15 = vmul.f32 %v17966_v34, %v501_v59  ;;  %15303 = vmatprep.mubr.msk.f32.mxu1 %vm784_vm0, %v900_v57 }
 0x14c   :  { %v18001_v61 = vmax.f32 %v744_v58, 0.0  ;;  %532 = vperm.xlu1 %17125, %v17870_v13   ;;  %v578_v13 = vadd.f32 %v556_v9, %v442_v7 }
 0x14e   :  { %803 = vmatpush1.msra.mxu0 %v18001_v61  ;;  %927 = vmatpush1.msra.mxu1 %v18001_v61 }
 0x14f   :  { %v373_v62 = vpop.permute.xlu1 %372  ;;  %v18006_v63 = vpop.permute.xlu0 %327  ;;  %804 = vmatprep.subr.mxu0 %v17681_v8  ;;  %928 = vmatprep.subr.mxu1 %v17681_v8 }
 0x150   :  { %17126 = vset.pattern.permute.xlu1 %v17680_v5  ;;  %v440_v17 = vmul.f32 %v17960_v32, %v373_v62 }
 0x151   :  { %672 = vperm.xlu1 %17126, %v17922_v21  }
 0x153   :  { %v18012_v1 = vpop.permute.xlu0 %417 }
 0x154   :  { %v497_v2 = vpop.permute.xlu1 %496 }
 0x155   :  { %17128 = vset.pattern.permute.xlu1 %v17679_v3  ;;  %v554_v11 = vmul.f32 %v17966_v34, %v497_v2 }
 0x156   :  { %528 = vperm.xlu1 %17128, %v17876_v14   ;;  %v441_v14 = vmul.f32 %v17960_v32, %v378_v46 }
 0x157   :  { %v18016_v4 = vpop.permute.xlu0 %412  ;;  %v576_v21 = vadd.f32 %v554_v11, %v440_v17 }
 0x158   :  { %v577_v25 = vadd.f32 %v555_v15, %v441_v14 }
 0x159   :  { %v18023_v10 = vpop.permute.xlu1 %367 }
 0x15a   :  { %17129 = vset.pattern.permute.xlu1 %v17678_v0  ;;  %v439_v62 = vmul.f32 %v17960_v32, %v18023_v10 }
 0x15b   :  { %407 = vperm.xlu1 %17129, %v310_v6  }
 0x15c   :  { %v641_v12 = vpop.permute.xlu0 %640 }
 0x15d   :  { %v692_v16 = vmul.f32 %v17973_v39, %v641_v12 }
 0x15e   :  { %v633_v18 = vpop.permute.xlu1 %632 }
 0x15f   :  { %v714_v19 = vadd.f32 %v692_v16, %v578_v13  ;;  %v690_v20 = vmul.f32 %v17973_v39, %v633_v18  ;;  %17130 = vset.pattern.permute.xlu1 %v17679_v3 }
 0x160   :  { %v637_v24 = vpop.permute.xlu0 %636  ;;  %524 = vperm.xlu1 %17130, %v310_v6  }
 0x161   :  { %v743_v28 = vadd.f32 %v17977_v44, %v714_v19  ;;  %v691_v29 = vmul.f32 %v17973_v39, %v637_v24  ;;  %v712_v30 = vadd.f32 %v690_v20, %v576_v21 }
 0x163   :  { %v18035_v35 = vmax.f32 %v743_v28, 0.0  ;;  %v713_v36 = vadd.f32 %v691_v29, %v577_v25  ;;  %v363_v37 = vpop.permute.xlu1 %362  ;;  %v741_v3 = vadd.f32 %v17977_v44, %v712_v30 }
 0x164   :  { %17132 = vset.pattern.permute.xlu1 %v17678_v0  ;;  %v621_v38 = vpop.permute.xlu0 %620  ;;  %v438_v12 = vmul.f32 %v17960_v32, %v363_v37 }
 0x165   :  { %v742_v40 = vadd.f32 %v17977_v44, %v713_v36  ;;  %805 = vmatpush1.msra.mxu0 %v18035_v35  ;;  %929 = vmatpush1.msra.mxu1 %v18035_v35  ;;  %v18049_v45 = vmax.f32 %v741_v3, 0.0  ;;  %v687_v7 = vmul.f32 %v17973_v39, %v621_v38 }
 0x166   :  { %402 = vperm.xlu1 %17132, %v17929_v22   ;;  %806 = vmatprep.subr.mxu0 %v17681_v8 }
 0x167   :  { %v18044_v41 = vmax.f32 %v742_v40, 0.0  ;;  %930 = vmatprep.subr.mxu1 %v17681_v8 }
 0x168   :  { %v629_v42 = vpop.permute.xlu1 %628  ;;  %v617_v43 = vpop.permute.xlu0 %616 }
 0x169   :  { %807 = vmatpush1.msra.mxu0 %v18044_v41  ;;  %931 = vmatpush1.msra.mxu1 %v18044_v41  ;;  %v689_v9 = vmul.f32 %v17973_v39, %v629_v42  ;;  %v686_v15 = vmul.f32 %v17973_v39, %v617_v43 }
 0x16a   :  { %17133 = vset.pattern.permute.xlu1 %v17680_v5  ;;  %808 = vmatprep.subr.mxu0 %v17681_v8 }
 0x16b   :  { %932 = vmatprep.subr.mxu1 %v17681_v8  ;;  %660 = vperm.xlu1 %17133, %v310_v6  }
 0x16c   :  { %809 = vmatpush1.msra.mxu0 %v18049_v45  ;;  %933 = vmatpush1.msra.mxu1 %v18049_v45  ;;  %v18056_v46 = vpop.permute.xlu0 %600 }
 0x16d   :  { %v485_v47 = vpop.permute.xlu1 %484  ;;  %810 = vmatprep.subr.mxu0 %v17681_v8  ;;  %934 = vmatprep.subr.mxu1 %v17681_v8 }
 0x16e   :  { %v551_v58 = vmul.f32 %v17966_v34, %v485_v47 }
 0x16f   :  { %17134 = vset.pattern.permute.xlu1 %v17678_v0 }
 0x170   :  { %397 = vperm.xlu1 %17134, %v17936_v23   ;;  %v18062_v48 = vpop.permute.xlu0 %596  ;;  %v437_v23 = vmul.f32 %v17960_v32, %v17985_v51 }
 0x172   :  { %v625_v49 = vpop.permute.xlu1 %624  ;;  %v573_v11 = vadd.f32 %v551_v58, %v437_v23 }
 0x173   :  { %v688_v18 = vmul.f32 %v17973_v39, %v625_v49 }
 0x174   :  { %17135 = vset.pattern.permute.xlu1 %v17680_v5  ;;  %v18065_v52 = vpop.permute.xlu0 %668  ;;  %v709_v17 = vadd.f32 %v687_v7, %v573_v11 }
 0x175   :  { %656 = vperm.xlu1 %17135, %v17929_v22   ;;  %v436_v22 = vmul.f32 %v17960_v32, %v17995_v56 }
 0x176   :  { %v738_v29 = vadd.f32 %v17977_v44, %v709_v17 }
 0x177   :  { %v481_v53 = vpop.permute.xlu1 %480 }
 0x178   :  { %v18068_v54 = vpop.permute.xlu0 %664  ;;  %v550_v2 = vmul.f32 %v17966_v34, %v481_v53  ;;  %v18101_v42 = vmax.f32 %v738_v29, 0.0 }
 0x17a   :  { %v572_v56 = vadd.f32 %v550_v2, %v436_v22 }
 0x17c   :  { %v348_v5 = vpop.permute.xlu1 %347  ;;  %v708_v21 = vadd.f32 %v686_v15, %v572_v56 }
 0x17d   :  { %v493_v59 = vpop.permute.xlu0 %492  ;;  %v435_v38 = vmul.f32 %v17960_v32, %v348_v5 }
 0x17e   :  { %v553_v6 = vmul.f32 %v17966_v34, %v493_v59  ;;  %v737_v37 = vadd.f32 %v17977_v44, %v708_v21 }
 0x180   :  { %v575_v51 = vadd.f32 %v553_v6, %v439_v62  ;;  %v18108_v49 = vmax.f32 %v737_v37, 0.0 }
 0x181   :  { %v477_v13 = vpop.permute.xlu1 %476  ;;  %v489_v14 = vpop.permute.xlu0 %488 }
 0x182   :  { %v711_v16 = vadd.f32 %v689_v9, %v575_v51  ;;  %v552_v10 = vmul.f32 %v17966_v34, %v489_v14  ;;  %v549_v30 = vmul.f32 %v17966_v34, %v477_v13  ;;  %v432_v51 = vmul.f32 %v17960_v32, %v17999_v60 }
 0x183   :  { %v682_v13 = vmul.f32 %v17973_v39, %v18056_v46 }
 0x184   :  { %v740_v19 = vadd.f32 %v17977_v44, %v711_v16  ;;  %v574_v20 = vadd.f32 %v552_v10, %v438_v12  ;;  %v571_v43 = vadd.f32 %v549_v30, %v435_v38 }
 0x185   :  { %v473_v55 = vpop.permute.xlu0 %472 }
 0x186   :  { %v18088_v24 = vmax.f32 %v740_v19, 0.0  ;;  %v710_v25 = vadd.f32 %v688_v18, %v574_v20  ;;  %v343_v28 = vpop.permute.xlu1 %342  ;;  %v548_v5 = vmul.f32 %v17966_v34, %v473_v55 }
 0x187   :  { %v434_v58 = vmul.f32 %v17960_v32, %v343_v28  ;;  %v681_v28 = vmul.f32 %v17973_v39, %v18062_v48 }
 0x188   :  { %v739_v36 = vadd.f32 %v17977_v44, %v710_v25  ;;  %811 = vmatpush1.msra.mxu0 %v18088_v24  ;;  %935 = vmatpush1.msra.mxu1 %v18088_v24  ;;  %v431_v25 = vmul.f32 %v17960_v32, %v18006_v63 }
 0x189   :  { %812 = vmatprep.subr.mxu0 %v17681_v8  ;;  %936 = vmatprep.subr.mxu1 %v17681_v8  ;;  %v570_v62 = vadd.f32 %v548_v5, %v434_v58  ;;  %v469_v7 = vpop.permute.xlu0 %468 }
 0x18a   :  { %v18099_v40 = vmax.f32 %v739_v36, 0.0  ;;  %v547_v15 = vmul.f32 %v17966_v34, %v469_v7 }
 0x18b   :  { %v613_v3 = vpop.permute.xlu1 %612 }
 0x18c   :  { %v685_v47 = vmul.f32 %v17973_v39, %v613_v3  ;;  %813 = vmatpush1.msra.mxu0 %v18099_v40  ;;  %937 = vmatpush1.msra.mxu1 %v18099_v40 }
 0x18d   :  { %814 = vmatprep.subr.mxu0 %v17681_v8  ;;  %938 = vmatprep.subr.mxu1 %v17681_v8 }
 0x18e   :  { %v707_v53 = vadd.f32 %v685_v47, %v571_v43  ;;  %815 = vmatpush1.msra.mxu0 %v18101_v42  ;;  %939 = vmatpush1.msra.mxu1 %v18101_v42 }
 0x18f   :  { %816 = vmatprep.subr.mxu0 %v17681_v8  ;;  %940 = vmatprep.subr.mxu1 %v17681_v8 }
 0x190   :  { %v736_v57 = vadd.f32 %v17977_v44, %v707_v53  ;;  %v338_v23 = vpop.permute.xlu1 %337  ;;  %817 = vmatpush1.msra.mxu0 %v18108_v49  ;;  %941 = vmatpush1.msra.mxu1 %v18108_v49 }
 0x191   :  { %818 = vmatprep.subr.mxu0 %v17681_v8  ;;  %942 = vmatprep.subr.mxu1 %v17681_v8  ;;  %v433_v14 = vmul.f32 %v17960_v32, %v338_v23 }
 0x192   :  { %v18121_v59 = vmax.f32 %v736_v57, 0.0 }
 0x193   :  { %v569_v60 = vadd.f32 %v547_v15, %v433_v14 }
 0x194   :  { %819 = vmatpush1.msra.mxu0 %v18121_v59  ;;  %943 = vmatpush1.msra.mxu1 %v18121_v59 }
 0x195   :  { %v609_v22 = vpop.permute.xlu1 %608  ;;  %820 = vmatprep.subr.mxu0 %v17681_v8  ;;  %944 = vmatprep.subr.mxu1 %v17681_v8 }
 0x196   :  { %v684_v2 = vmul.f32 %v17973_v39, %v609_v22  ;;  %v453_v22 = vpop.permute.xlu0 %452 }
 0x198   :  { %v706_v6 = vadd.f32 %v684_v2, %v570_v62 }
 0x19a   :  { %v735_v9 = vadd.f32 %v17977_v44, %v706_v6  ;;  %v465_v11 = vpop.permute.xlu1 %464  ;;  %v543_v6 = vmul.f32 %v17966_v34, %v453_v22  ;;  %v537_v14 = vpop.permute.xlu0 %536 }
 0x19b   :  { %v546_v12 = vmul.f32 %v17966_v34, %v465_v11 }
 0x19c   :  { %v18136_v56 = vmax.f32 %v735_v9, 0.0 }
 0x19d   :  { %v568_v16 = vadd.f32 %v546_v12, %v432_v51 }
 0x19e   :  { %821 = vmatpush1.msra.mxu0 %v18136_v56  ;;  %945 = vmatpush1.msra.mxu1 %v18136_v56 }
 0x19f   :  { %v605_v10 = vpop.permute.xlu1 %604  ;;  %822 = vmatprep.subr.mxu0 %v17681_v8  ;;  %946 = vmatprep.subr.mxu1 %v17681_v8  ;;  %v704_v17 = vadd.f32 %v682_v13, %v568_v16 }
 0x1a0   :  { %v683_v46 = vmul.f32 %v17973_v39, %v605_v10  ;;  %v449_v10 = vmul.f32 %v17960_v32, %v18012_v1 }
 0x1a1   :  { %v733_v19 = vadd.f32 %v17977_v44, %v704_v17  ;;  %v564_v17 = vmul.f32 %v17966_v34, %v537_v14 }
 0x1a2   :  { %v705_v18 = vadd.f32 %v683_v46, %v569_v60 }
 0x1a3   :  { %v18152_v37 = vmax.f32 %v733_v19, 0.0  ;;  %v699_v19 = vmul.f32 %v17973_v39, %v18065_v52 }
 0x1a4   :  { %v734_v20 = vadd.f32 %v17977_v44, %v705_v18  ;;  %v461_v21 = vpop.permute.xlu1 %460 }
 0x1a5   :  { %v545_v29 = vmul.f32 %v17966_v34, %v461_v21 }
 0x1a6   :  { %v18150_v30 = vmax.f32 %v734_v20, 0.0 }
 0x1a7   :  { %v567_v36 = vadd.f32 %v545_v29, %v431_v25 }
 0x1a8   :  { %823 = vmatpush1.msra.mxu0 %v18150_v30  ;;  %947 = vmatpush1.msra.mxu1 %v18150_v30 }
 0x1a9   :  { %v703_v38 = vadd.f32 %v681_v28, %v567_v36  ;;  %824 = vmatprep.subr.mxu0 %v17681_v8  ;;  %948 = vmatprep.subr.mxu1 %v17681_v8  ;;  %v323_v63 = vpop.permute.xlu1 %322 }
 0x1aa   :  { %825 = vmatpush1.msra.mxu0 %v18152_v37  ;;  %949 = vmatpush1.msra.mxu1 %v18152_v37  ;;  %v430_v55 = vmul.f32 %v17960_v32, %v323_v63  ;;  %v448_v63 = vmul.f32 %v17960_v32, %v18016_v4 }
 0x1ab   :  { %v732_v48 = vadd.f32 %v17977_v44, %v703_v38  ;;  %826 = vmatprep.subr.mxu0 %v17681_v8  ;;  %950 = vmatprep.subr.mxu1 %v17681_v8 }
 0x1ad   :  { %v18163_v3 = vmax.f32 %v732_v48, 0.0 }
 0x1ae   :  { %v457_v43 = vpop.permute.xlu1 %456 }
 0x1af   :  { %827 = vmatpush1.msra.mxu0 %v18163_v3  ;;  %951 = vmatpush1.msra.mxu1 %v18163_v3  ;;  %v544_v53 = vmul.f32 %v17966_v34, %v457_v43 }
 0x1b0   :  { %828 = vmatprep.subr.mxu0 %v17681_v8  ;;  %952 = vmatprep.subr.mxu1 %v17681_v8 }
 0x1b1   :  { %v566_v23 = vadd.f32 %v544_v53, %v430_v55 }
 0x1b3   :  { %v318_v47 = vpop.permute.xlu1 %317 }
 0x1b4   :  { %v429_v7 = vmul.f32 %v17960_v32, %v318_v47  ;;  %v698_v47 = vmul.f32 %v17973_v39, %v18068_v54 }
 0x1b6   :  { %v565_v51 = vadd.f32 %v543_v6, %v429_v7 }
 0x1b8   :  { %v593_v57 = vpop.permute.xlu1 %592 }
 0x1b9   :  { %v680_v58 = vmul.f32 %v17973_v39, %v593_v57 }
 0x1bb   :  { %v702_v5 = vadd.f32 %v680_v58, %v566_v23 }
 0x1bd   :  { %v731_v62 = vadd.f32 %v17977_v44, %v702_v5  ;;  %v423_v2 = vpop.permute.xlu1 %422  ;;  %v521_v5 = vpop.permute.xlu0 %520 }
 0x1be   :  { %v450_v46 = vmul.f32 %v17960_v32, %v423_v2 }
 0x1bf   :  { %v18175_v9 = vmax.f32 %v731_v62, 0.0 }
 0x1c0   :  { %v586_v1 = vadd.f32 %v564_v17, %v450_v46 }
 0x1c1   :  { %829 = vmatpush1.msra.mxu0 %v18175_v9  ;;  %953 = vmatpush1.msra.mxu1 %v18175_v9  ;;  %v517_v6 = vpop.permute.xlu0 %516 }
 0x1c2   :  { %v589_v11 = vpop.permute.xlu1 %588  ;;  %830 = vmatprep.subr.mxu0 %v17681_v8  ;;  %954 = vmatprep.subr.mxu1 %v17681_v8 }
 0x1c3   :  { %v679_v12 = vmul.f32 %v17973_v39, %v589_v11 }
 0x1c5   :  { %v701_v13 = vadd.f32 %v679_v12, %v565_v51 }
 0x1c7   :  { %v730_v15 = vadd.f32 %v17977_v44, %v701_v13  ;;  %v533_v16 = vpop.permute.xlu1 %532  ;;  %v653_v13 = vpop.permute.xlu0 %652 }
 0x1c8   :  { %v563_v60 = vmul.f32 %v17966_v34, %v533_v16  ;;  %v559_v16 = vmul.f32 %v17966_v34, %v517_v6  ;;  %v695_v46 = vmul.f32 %v17973_v39, %v653_v13  ;;  %v781_v6 = vld [vmem:[#allocation8 + $0x38] sm:$0xff] }
 0x1c9   :  { %v18188_v18 = vmax.f32 %v730_v15, 0.0  ;;  %v908_v13 = vld [vmem:[#allocation8 + $0x98] sm:$0xff] }
 0x1ca   :  { %v585_v20 = vadd.f32 %v563_v60, %v449_v10 }
 0x1cb   :  { %831 = vmatpush1.msra.mxu0 %v18188_v18  ;;  %955 = vmatpush1.msra.mxu1 %v18188_v18 }
 0x1cc   :  { %v721_v21 = vadd.f32 %v699_v19, %v585_v20  ;;  %v673_v25 = vpop.permute.xlu1 %672  ;;  %852 = vmatprep.subr.mxu0 %v17681_v8  ;;  %976 = vmatprep.subr.mxu1 %v17681_v8  ;;  %v560_v20 = vmul.f32 %v17966_v34, %v521_v5  ;;  %v896_v5 = vld [vmem:[%s19857_s5 + $0x30] sm:$0xff] }
 0x1cd   :  { %v700_v28 = vmul.f32 %v17973_v39, %v673_v25 }
 0x1ce   :  { %v750_v36 = vadd.f32 %v17977_v44, %v721_v21 }
 0x1cf   :  { %v722_v29 = vadd.f32 %v700_v28, %v586_v1 }
 0x1d0   :  { %v18206_v55 = vmax.f32 %v750_v36, 0.0 }
 0x1d1   :  { %v751_v38 = vadd.f32 %v17977_v44, %v722_v29  ;;  %v529_v52 = vpop.permute.xlu1 %528 }
 0x1d2   :  { %v562_v48 = vmul.f32 %v17966_v34, %v529_v52  ;;  %v774_v52 = vld [vmem:[#allocation8] sm:$0xff] }
 0x1d3   :  { %v18202_v43 = vmax.f32 %v751_v38, 0.0 }
 0x1d4   :  { %v584_v53 = vadd.f32 %v562_v48, %v448_v63  ;;  %v899_v63 = vld [vmem:[#allocation8 + $0x50] sm:$0xff]  ;;  %v777_v48 = vld [vmem:[#allocation8 + $0x18] sm:$0xff] }
 0x1d5   :  { %853 = vmatpush2.msra.mxu0 %v18202_v43  ;;  %977 = vmatpush2.msra.mxu1 %v18202_v43 }
 0x1d6   :  { %v720_v57 = vadd.f32 %v698_v47, %v584_v53  ;;  %854 = vmatprep.subr.mxu0 %v17681_v8  ;;  %978 = vmatprep.subr.mxu1 %v17681_v8  ;;  %v408_v4 = vpop.permute.xlu1 %407  ;;  %v897_v47 = vld [vmem:[%s19857_s5 + $0x38] sm:$0xff]  ;;  %v901_v53 = vld [vmem:[#allocation8 + $0x60] sm:$0xff] }
 0x1d7   :  { %855 = vmatpush2.msra.mxu0 %v18206_v55  ;;  %979 = vmatpush2.msra.mxu1 %v18206_v55  ;;  %v447_v2 = vmul.f32 %v17960_v32, %v408_v4  ;;  %v904_v4 = vld [vmem:[#allocation8 + $0x78] sm:$0xff] }
 0x1d8   :  { %v749_v23 = vadd.f32 %v17977_v44, %v720_v57  ;;  %856 = vmatprep.subr.mxu0 %v17681_v8  ;;  %980 = vmatprep.subr.mxu1 %v17681_v8  ;;  %v776_v57 = vld [vmem:[#allocation8 + $0x10] sm:$0xff] }
 0x1da   :  { %v18217_v54 = vmax.f32 %v749_v23, 0.0  ;;  %v779_v23 = vld [vmem:[#allocation8 + $0x28] sm:$0xff] }
 0x1db   :  { %v525_v58 = vpop.permute.xlu1 %524 }
 0x1dc   :  { %857 = vmatpush2.msra.mxu0 %v18217_v54  ;;  %981 = vmatpush2.msra.mxu1 %v18217_v54  ;;  %v561_v62 = vmul.f32 %v17966_v34, %v525_v58  ;;  %v15314_v58 = vld [vmem:[%s19857_s5 + $0x70] sm:$0xff] }
 0x1dd   :  { %858 = vmatprep.subr.mxu0 %v17681_v8  ;;  %982 = vmatprep.subr.mxu1 %v17681_v8 }
 0x1de   :  { %v583_v11 = vadd.f32 %v561_v62, %v447_v2  ;;  %v778_v62 = vld [vmem:[#allocation8 + $0x20] sm:$0xff]  ;;  %v906_v2 = vld [vmem:[#allocation8 + $0x88] sm:$0xff] }
 0x1e1   :  { %v403_v22 = vpop.permute.xlu1 %402 }
 0x1e2   :  { %v446_v60 = vmul.f32 %v17960_v32, %v403_v22  ;;  %v903_v22 = vld [vmem:[#allocation8 + $0x70] sm:$0xff] }
 0x1e4   :  { %v582_v25 = vadd.f32 %v560_v20, %v446_v60  ;;  %v782_v60 = vld [vmem:[#allocation8 + $0x40] sm:$0xff] }
 0x1e5   :  { %v15310_v20 = vld [vmem:[%s19857_s5 + $0x50] sm:$0xff] }
 0x1e6   :  { %v661_v7 = vpop.permute.xlu1 %660 }
 0x1e7   :  { %v697_v51 = vmul.f32 %v17973_v39, %v661_v7  ;;  %v15313_v7 = vld [vmem:[%s19857_s5 + $0x68] sm:$0xff] }
 0x1e9   :  { %v719_v12 = vadd.f32 %v697_v51, %v583_v11  ;;  %v895_v11 = vld [vmem:[%s19857_s5 + $0x28] sm:$0xff] }
 0x1ea   :  { %v905_v51 = vld [vmem:[#allocation8 + $0x80] sm:$0xff] }
 0x1eb   :  { %v748_v14 = vadd.f32 %v17977_v44, %v719_v12  ;;  %v398_v15 = vpop.permute.xlu1 %397  ;;  %v780_v12 = vld [vmem:[#allocation8 + $0x30] sm:$0xff] }
 0x1ec   :  { %v445_v10 = vmul.f32 %v17960_v32, %v398_v15  ;;  %v15312_v15 = vld [vmem:[%s19857_s5 + $0x60] sm:$0xff] }
 0x1ed   :  { %v18230_v17 = vmax.f32 %v748_v14, 0.0  ;;  %v783_v14 = vld [vmem:[#allocation8 + $0x48] sm:$0xff] }
 0x1ee   :  { %v581_v19 = vadd.f32 %v559_v16, %v445_v10  ;;  %v894_v16 = vld [vmem:[%s19857_s5 + $0x20] sm:$0xff] }
 0x1ef   :  { %859 = vmatpush2.msra.mxu0 %v18230_v17  ;;  %983 = vmatpush2.msra.mxu1 %v18230_v17  ;;  %v907_v10 = vld [vmem:[#allocation8 + $0x90] sm:$0xff] }
 0x1f0   :  { %v657_v21 = vpop.permute.xlu1 %656  ;;  %860 = vmatprep.subr.mxu0 %v17681_v8  ;;  %984 = vmatprep.subr.mxu1 %v17681_v8  ;;  %v717_v1 = vadd.f32 %v695_v46, %v581_v19  ;;  %v15311_v46 = vld [vmem:[%s19857_s5 + $0x58] sm:$0xff] }
 0x1f1   :  { %v696_v32 = vmul.f32 %v17973_v39, %v657_v21  ;;  %v902_v39 = vld [vmem:[#allocation8 + $0x68] sm:$0xff] }
 0x1f2   :  { %v746_v29 = vadd.f32 %v17977_v44, %v717_v1  ;;  %v893_v19 = vld [vmem:[%s19857_s5 + $0x18] sm:$0xff]  ;;  %v892_v21 = vld [vmem:[%s19857_s5 + $0x10] sm:$0xff]  ;;  %v891_v1 = vld [vmem:[%s19857_s5 + $0x8] sm:$0xff] }
 0x1f3   :  { %v718_v28 = vadd.f32 %v696_v32, %v582_v25  ;;  %v15309_v25 = vld [vmem:[%s19857_s5 + $0x48] sm:$0xff]  ;;  %v15308_v32 = vld [vmem:[%s19857_s5 + $0x40] sm:$0xff] }
 0x1f4   :  { %v18243_v34 = vmax.f32 %v746_v29, 0.0 }
 0x1f5   :  { %v747_v36 = vadd.f32 %v17977_v44, %v718_v28  ;;  %v15315_v44 = vld [vmem:[%s19857_s5 + $0x78] sm:$0xff]  ;;  %v890_v28 = vld [vmem:[%s19857_s5] sm:$0xff] }
 0x1f7   :  { %v18241_v38 = vmax.f32 %v747_v36, 0.0 }
 0x1f9   :  { %861 = vmatpush2.msra.mxu0 %v18241_v38  ;;  %985 = vmatpush2.msra.mxu1 %v18241_v38 }
 0x1fa   :  { %862 = vmatprep.subr.mxu0 %v17681_v8  ;;  %986 = vmatprep.subr.mxu1 %v17681_v8 }
 0x1fb   :  { %863 = vmatpush2.msra.mxu0 %v18243_v34  ;;  %987 = vmatpush2.msra.mxu1 %v18243_v34 }
 0x1fc   :  { %865 = vmatmul.mubr.f32.vlgmr.msra.gmra.mxu0 %v774_v52  ;;  %989 = vmatmul.mubr.f32.vlgmr.msra.gmra.mxu1 %v899_v63 }
 0x1fd   :  { %15304 = vmatprep.mubr.msk.f32.mxu1 %vm784_vm0, %v902_v39  ;;  %15299 = vmatprep.mubr.msk.f32.mxu0 %vm784_vm0, %v777_v48 }
 0x1fe   :  { %16885 = vmatprep.subr.mxu0 %v17681_v8  ;;  %16916 = vmatprep.subr.mxu1 %v17681_v8 }
 0x1ff   :  { %16886 = vmatpush3.msra.mxu0 %v15315_v44  ;;  %16917 = vmatpush3.msra.mxu1 %v897_v47 }
 0x200   :  { %994 = vmatmul.mubr.f32.gmra.mxu1 %v901_v53  ;;  %870 = vmatmul.mubr.f32.gmra.mxu0 %v776_v57 }
 0x201   :  { %15305 = vmatprep.mubr.msk.f32.mxu1 %vm784_vm0, %v904_v4  ;;  %15300 = vmatprep.mubr.msk.f32.mxu0 %vm784_vm0, %v779_v23 }
 0x202   :  { %16887 = vmatprep.subr.mxu0 %v17681_v8  ;;  %16918 = vmatprep.subr.mxu1 %v17681_v8 }
 0x203   :  { %16888 = vmatpush3.msra.mxu0 %v15314_v58  ;;  %16919 = vmatpush3.msra.mxu1 %v896_v5 }
 0x204   :  { %999 = vmatmul.mubr.f32.gmra.mxu1 %v903_v22  ;;  %875 = vmatmul.mubr.f32.gmra.mxu0 %v778_v62 }
 0x205   :  { %15306 = vmatprep.mubr.msk.f32.mxu1 %vm784_vm0, %v906_v2  ;;  %15301 = vmatprep.mubr.msk.f32.mxu0 %vm784_vm0, %v781_v6 }
 0x206   :  { %16889 = vmatprep.subr.mxu0 %v17681_v8  ;;  %16920 = vmatprep.subr.mxu1 %v17681_v8 }
 0x207   :  { %16890 = vmatpush3.msra.mxu0 %v15313_v7  ;;  %16921 = vmatpush3.msra.mxu1 %v895_v11  ;;  %v1236_v7 = vld [vmem:[#allocation8 + $0xa8] sm:$0xff] }
 0x208   :  { %1004 = vmatmul.mubr.f32.gmra.mxu1 %v905_v51  ;;  %880 = vmatmul.mubr.f32.gmra.mxu0 %v780_v12  ;;  %v1235_v12 = vld [vmem:[#allocation8 + $0xa0] sm:$0xff] }
 0x209   :  { %15307 = vmatprep.mubr.msk.f32.mxu1 %vm784_vm0, %v908_v13  ;;  %15302 = vmatprep.mubr.msk.f32.mxu0 %vm784_vm0, %v783_v14  ;;  %v1238_v13 = vld [vmem:[#allocation8 + $0xb8] sm:$0xff]  ;;  %v1237_v14 = vld [vmem:[#allocation8 + $0xb0] sm:$0xff] }
 0x20a   :  { %16891 = vmatprep.subr.mxu0 %v17681_v8  ;;  %16922 = vmatprep.subr.mxu1 %v17681_v8 }
 0x20b   :  { %16892 = vmatpush3.msra.mxu0 %v15312_v15  ;;  %16923 = vmatpush3.msra.mxu1 %v894_v16  ;;  %v1240_v15 = vld [vmem:[#allocation8 + $0xc8] sm:$0xff]  ;;  %v1239_v16 = vld [vmem:[#allocation8 + $0xc0] sm:$0xff] }
 0x20c   :  { %1009 = vmatmul.mubr.f32.gmra.mxu1 %v907_v10  ;;  %885 = vmatmul.mubr.f32.gmra.mxu0 %v782_v60  ;;  %v1242_v10 = vld [vmem:[#allocation8 + $0xd8] sm:$0xff]  ;;  %v1241_v60 = vld [vmem:[#allocation8 + $0xd0] sm:$0xff] }
 0x20d   :  { %16893 = vmatprep.subr.mxu0 %v17681_v8  ;;  %16924 = vmatprep.subr.mxu1 %v17681_v8 }
 0x20e   :  { %16894 = vmatpush3.msra.mxu0 %v15311_v46  ;;  %16925 = vmatpush3.msra.mxu1 %v893_v19  ;;  %v1244_v46 = vld [vmem:[#allocation8 + $0xe8] sm:$0xff]  ;;  %v1243_v19 = vld [vmem:[#allocation8 + $0xe0] sm:$0xff] }
 0x20f   :  { %16895 = vmatprep.subr.mxu0 %v17681_v8  ;;  %16926 = vmatprep.subr.mxu1 %v17681_v8 }
 0x210   :  { %16896 = vmatpush3.msra.mxu0 %v15310_v20  ;;  %16927 = vmatpush3.msra.mxu1 %v892_v21  ;;  %v15338_v20 = vld [vmem:[%s19857_s5 + $0xb8] sm:$0xff]  ;;  %v15337_v21 = vld [vmem:[%s19857_s5 + $0xb0] sm:$0xff] }
 0x211   :  { %16897 = vmatprep.subr.mxu0 %v17681_v8  ;;  %16928 = vmatprep.subr.mxu1 %v17681_v8 }
 0x212   :  { %16898 = vmatpush3.msra.mxu0 %v15309_v25  ;;  %16929 = vmatpush3.msra.mxu1 %v891_v1  ;;  %v15336_v25 = vld [vmem:[%s19857_s5 + $0xa8] sm:$0xff]  ;;  %v15335_v1 = vld [vmem:[%s19857_s5 + $0xa0] sm:$0xff] }
 0x213   :  { %16899 = vmatprep.subr.mxu0 %v17681_v8  ;;  %16930 = vmatprep.subr.mxu1 %v17681_v8 }
 0x214   :  { %16900 = vmatpush3.msra.mxu0 %v15308_v32  ;;  %16901 = vmatprep.mubr.msk.f32.mxu0 %vm17682_vm1, %v17681_v8  ;;  %v15334_v32 = vld [vmem:[%s19857_s5 + $0x98] sm:$0xff] }
 0x215   :  { %1260 = vmatprep.subr.mxu0 %v17681_v8  ;;  %16931 = vmatpush3.msra.mxu1 %v890_v28  ;;  %v15333_v28 = vld [vmem:[%s19857_s5 + $0x90] sm:$0xff] }
 0x216   :  { %16932 = vmatprep.mubr.msk.f32.mxu1 %vm17682_vm1, %v17681_v8  ;;  %16947 = vmatprep.subr.mxu1 %v17681_v8 }
 0x2bc   :  { %v866_v29 = vpop.f32.mrf.mxu0  ;;  %v990_v36 = vpop.f32.mrf.mxu1 }
 0x2bd   :  { %16902 = vmatmul.mubr.msk.f32.vlgmr.msra.gmra.mxu0 %vm1023_vm2, %v990_v36  ;;  %16933 = vmatmul.mubr.msk.f32.vlgmr.msra.gmra.mxu1 %vm1023_vm2, %v866_v29  ;;  %v15332_v29 = vld [vmem:[%s19857_s5 + $0x88] sm:$0xff]  ;;  %v15331_v36 = vld [vmem:[%s19857_s5 + $0x80] sm:$0xff] }
 0x2be   :  { %1261 = vmatpush1.msra.mxu0 %v17982_v50  ;;  %v992_v52 = vpop.f32.mrf.mxu1  ;;  %v868_v63 = vpop.f32.mrf.mxu0  ;;  %16904 = vmatprep.mubr.msk.f32.mxu0 %vm17682_vm1, %v17681_v8 }
 0x2bf   :  { %1262 = vmatprep.subr.mxu0 %v17681_v8  ;;  %16935 = vmatprep.mubr.msk.f32.mxu1 %vm17682_vm1, %v17681_v8 }
 0x2c0   :  { %1263 = vmatpush1.msra.mxu0 %v18001_v61  ;;  %v995_v39 = vpop.f32.mrf.mxu1  ;;  %v871_v48 = vpop.f32.mrf.mxu0  ;;  %16948 = vmatpush3.msra.mxu1 %v15338_v20 }
 0x2c1   :  { %1264 = vmatprep.subr.mxu0 %v17681_v8  ;;  %16905 = vmatmul.mubr.msk.f32.gmra.mxu0 %vm1023_vm2, %v995_v39 }
 0x2c2   :  { %1265 = vmatpush1.msra.mxu0 %v18035_v35  ;;  %v997_v44 = vpop.f32.mrf.mxu1  ;;  %16936 = vmatmul.mubr.msk.f32.gmra.mxu1 %vm1023_vm2, %v871_v48  ;;  %v873_v47 = vpop.f32.mrf.mxu0 }
 0x2c3   :  { %1266 = vmatprep.subr.mxu0 %v17681_v8  ;;  %16907 = vmatprep.mubr.msk.f32.mxu0 %vm17682_vm1, %v17681_v8 }
 0x2c4   :  { %1267 = vmatpush1.msra.mxu0 %v18044_v41  ;;  %v1000_v53 = vpop.f32.mrf.mxu1  ;;  %v876_v57 = vpop.f32.mrf.mxu0  ;;  %16938 = vmatprep.mubr.msk.f32.mxu1 %vm17682_vm1, %v17681_v8 }
 0x2c5   :  { %1268 = vmatprep.subr.mxu0 %v17681_v8  ;;  %16908 = vmatmul.mubr.msk.f32.gmra.mxu0 %vm1023_vm2, %v1000_v53 }
 0x2c6   :  { %1269 = vmatpush1.msra.mxu0 %v18049_v45  ;;  %v1002_v4 = vpop.f32.mrf.mxu1  ;;  %16939 = vmatmul.mubr.msk.f32.gmra.mxu1 %vm1023_vm2, %v876_v57  ;;  %v878_v23 = vpop.f32.mrf.mxu0 }
 0x2c7   :  { %1270 = vmatprep.subr.mxu0 %v17681_v8  ;;  %16910 = vmatprep.mubr.msk.f32.mxu0 %vm17682_vm1, %v17681_v8 }
 0x2c8   :  { %1271 = vmatpush1.msra.mxu0 %v18088_v24  ;;  %v1005_v58 = vpop.f32.mrf.mxu1  ;;  %v881_v5 = vpop.f32.mrf.mxu0  ;;  %16941 = vmatprep.mubr.msk.f32.mxu1 %vm17682_vm1, %v17681_v8 }
 0x2c9   :  { %1272 = vmatprep.subr.mxu0 %v17681_v8  ;;  %16911 = vmatmul.mubr.msk.f32.gmra.mxu0 %vm1023_vm2, %v1005_v58 }
 0x2ca   :  { %1273 = vmatpush1.msra.mxu0 %v18099_v40  ;;  %v1007_v22 = vpop.f32.mrf.mxu1  ;;  %16942 = vmatmul.mubr.msk.f32.gmra.mxu1 %vm1023_vm2, %v881_v5  ;;  %v883_v62 = vpop.f32.mrf.mxu0 }
 0x2cb   :  { %1274 = vmatprep.subr.mxu0 %v17681_v8  ;;  %16913 = vmatprep.mubr.msk.f32.mxu0 %vm17682_vm1, %v17681_v8 }
 0x2cc   :  { %1275 = vmatpush1.msra.mxu0 %v18101_v42  ;;  %v1010_v2 = vpop.f32.mrf.mxu1  ;;  %v886_v6 = vpop.f32.mrf.mxu0  ;;  %16944 = vmatprep.mubr.msk.f32.mxu1 %vm17682_vm1, %v17681_v8 }
 0x2cd   :  { %1276 = vmatprep.subr.mxu0 %v17681_v8  ;;  %16914 = vmatmul.mubr.msk.f32.gmra.mxu0 %vm1023_vm2, %v1010_v2 }
 0x2ce   :  { %1277 = vmatpush1.msra.mxu0 %v18108_v49  ;;  %v1012_v11 = vpop.f32.mrf.mxu1  ;;  %16945 = vmatmul.mubr.msk.f32.gmra.mxu1 %vm1023_vm2, %v886_v6  ;;  %v888_v51 = vpop.f32.mrf.mxu0 }
 0x2cf   :  { %1278 = vmatprep.subr.mxu0 %v17681_v8  ;;  %15326 = vmatprep.mubr.msk.f32.mxu0 %vm784_vm0, %v1236_v7 }
 0x2d0   :  { %1279 = vmatpush1.msra.mxu0 %v18121_v59  ;;  %16963 = vmatprep.mubr.msk.f32.mxu1 %vm17682_vm1, %v17681_v8 }
 0x2d1   :  { %1280 = vmatprep.subr.mxu0 %v17681_v8  ;;  %16949 = vmatprep.subr.mxu1 %v17681_v8 }
 0x2d2   :  { %1281 = vmatpush1.msra.mxu0 %v18136_v56  ;;  %16950 = vmatpush3.msra.mxu1 %v15337_v21 }
 0x2d3   :  { %1282 = vmatprep.subr.mxu0 %v17681_v8  ;;  %16951 = vmatprep.subr.mxu1 %v17681_v8 }
 0x2d4   :  { %1283 = vmatpush1.msra.mxu0 %v18150_v30  ;;  %16952 = vmatpush3.msra.mxu1 %v15336_v25 }
 0x2d5   :  { %1284 = vmatprep.subr.mxu0 %v17681_v8  ;;  %16953 = vmatprep.subr.mxu1 %v17681_v8 }
 0x2d6   :  { %1285 = vmatpush1.msra.mxu0 %v18152_v37  ;;  %16954 = vmatpush3.msra.mxu1 %v15335_v1 }
 0x2d7   :  { %1286 = vmatprep.subr.mxu0 %v17681_v8  ;;  %16955 = vmatprep.subr.mxu1 %v17681_v8 }
 0x2d8   :  { %1287 = vmatpush1.msra.mxu0 %v18163_v3  ;;  %16956 = vmatpush3.msra.mxu1 %v15334_v32 }
 0x2d9   :  { %1288 = vmatprep.subr.mxu0 %v17681_v8  ;;  %16957 = vmatprep.subr.mxu1 %v17681_v8 }
 0x2da   :  { %1289 = vmatpush1.msra.mxu0 %v18175_v9  ;;  %16958 = vmatpush3.msra.mxu1 %v15333_v28  ;;  %v1471_v28 = vld [vmem:[#allocation8 + $0xf8] sm:$0xff] }
 0x2db   :  { %1290 = vmatprep.subr.mxu0 %v17681_v8  ;;  %16959 = vmatprep.subr.mxu1 %v17681_v8 }
 0x2dc   :  { %1291 = vmatpush1.msra.mxu0 %v18188_v18  ;;  %16960 = vmatpush3.msra.mxu1 %v15332_v29 }
 0x2dd   :  { %1312 = vmatprep.subr.mxu0 %v17681_v8  ;;  %16961 = vmatprep.subr.mxu1 %v17681_v8 }
 0x2de   :  { %1313 = vmatpush2.msra.mxu0 %v18202_v43  ;;  %16962 = vmatpush3.msra.mxu1 %v15331_v36 }
 0x2df   :  { %1314 = vmatprep.subr.mxu0 %v17681_v8  ;;  %1495 = vmatprep.subr.mxu1 %v17681_v8 }
 0x2e0   :  { %1315 = vmatpush2.msra.mxu0 %v18206_v55 }
 0x2e1   :  { %1316 = vmatprep.subr.mxu0 %v17681_v8 }
 0x2e2   :  { %1317 = vmatpush2.msra.mxu0 %v18217_v54 }
 0x2e3   :  { %1318 = vmatprep.subr.mxu0 %v17681_v8 }
 0x2e4   :  { %1319 = vmatpush2.msra.mxu0 %v18230_v17 }
 0x2e5   :  { %1320 = vmatprep.subr.mxu0 %v17681_v8 }
 0x2e6   :  { %1321 = vmatpush2.msra.mxu0 %v18241_v38 }
 0x2e7   :  { %1322 = vmatprep.subr.mxu0 %v17681_v8 }
 0x2e8   :  { %1323 = vmatpush2.msra.mxu0 %v18243_v34 }
 0x2e9   :  { %1325 = vmatmul.mubr.f32.vlgmr.msra.gmra.mxu0 %v1235_v12  ;;  %16978 = vmatprep.subr.mxu0 %v17681_v8 }
 0x2ea   :  { %15327 = vmatprep.mubr.msk.f32.mxu0 %vm784_vm0, %v1238_v13 }
 0x2ed   :  { %1330 = vmatmul.mubr.f32.gmra.mxu0 %v1237_v14 }
 0x2ee   :  { %15328 = vmatprep.mubr.msk.f32.mxu0 %vm784_vm0, %v1240_v15 }
 0x2f1   :  { %1335 = vmatmul.mubr.f32.gmra.mxu0 %v1239_v16 }
 0x2f2   :  { %15329 = vmatprep.mubr.msk.f32.mxu0 %vm784_vm0, %v1242_v10 }
 0x2f5   :  { %1340 = vmatmul.mubr.f32.gmra.mxu0 %v1241_v60 }
 0x2f6   :  { %15330 = vmatprep.mubr.msk.f32.mxu0 %vm784_vm0, %v1244_v46 }
 0x2f9   :  { %1345 = vmatmul.mubr.f32.gmra.mxu0 %v1243_v19 }
 0x2fa   :  { %16994 = vmatprep.mubr.msk.f32.mxu0 %vm17682_vm1, %v17681_v8 }
 0x37d   :  { %v1105_v52 = vpop.f32.mrf.mxu0  ;;  %v1210_v63 = vpop.f32.mrf.mxu1 }
 0x37e   :  { %v18440_v39 = vadd.f32 %v1210_v63, %v1105_v52  ;;  %v1470_v52 = vld [vmem:[#allocation8 + $0xf0] sm:$0xff]  ;;  %v1473_v63 = vld [vmem:[#allocation8 + $0x108] sm:$0xff] }
 0x37f   :  { %v16903_v48 = vpop.f32.mrf.mxu0  ;;  %v16934_v44 = vpop.f32.mrf.mxu1 }
 0x380   :  { %v1472_v48 = vld [vmem:[#allocation8 + $0x100] sm:$0xff]  ;;  %v1475_v44 = vld [vmem:[#allocation8 + $0x118] sm:$0xff] }
 0x381   :  { %v1110_v47 = vpop.f32.mrf.mxu0 }
 0x382   :  { %v1215_v53 = vpop.f32.mrf.mxu1 }
 0x383   :  { %v16906_v57 = vpop.f32.mrf.mxu0  ;;  %v18442_v4 = vadd.f32 %v1215_v53, %v1110_v47  ;;  %v1474_v47 = vld [vmem:[#allocation8 + $0x110] sm:$0xff]  ;;  %v1477_v53 = vld [vmem:[#allocation8 + $0x128] sm:$0xff] }
 0x384   :  { %v16937_v23 = vpop.f32.mrf.mxu1  ;;  %v1476_v57 = vld [vmem:[#allocation8 + $0x120] sm:$0xff] }
 0x385   :  { %v1115_v58 = vpop.f32.mrf.mxu0  ;;  %v1479_v23 = vld [vmem:[#allocation8 + $0x138] sm:$0xff] }
 0x386   :  { %v1220_v5 = vpop.f32.mrf.mxu1 }
 0x387   :  { %v16909_v22 = vpop.f32.mrf.mxu0  ;;  %v18444_v62 = vadd.f32 %v1220_v5, %v1115_v58  ;;  %v1478_v58 = vld [vmem:[#allocation8 + $0x130] sm:$0xff] }
 0x388   :  { %v16940_v2 = vpop.f32.mrf.mxu1  ;;  %v15356_v5 = vld [vmem:[%s19857_s5 + $0xf8] sm:$0xff]  ;;  %v15355_v22 = vld [vmem:[%s19857_s5 + $0xf0] sm:$0xff] }
 0x389   :  { %v1120_v6 = vpop.f32.mrf.mxu0  ;;  %16979 = vmatpush3.msra.mxu0 %v15356_v5  ;;  %v15354_v2 = vld [vmem:[%s19857_s5 + $0xe8] sm:$0xff] }
 0x38a   :  { %v1225_v7 = vpop.f32.mrf.mxu1  ;;  %16980 = vmatprep.subr.mxu0 %v17681_v8 }
 0x38b   :  { %v16912_v11 = vpop.f32.mrf.mxu0  ;;  %v18446_v51 = vadd.f32 %v1225_v7, %v1120_v6  ;;  %16981 = vmatpush3.msra.mxu0 %v15355_v22  ;;  %v15353_v6 = vld [vmem:[%s19857_s5 + $0xe0] sm:$0xff]  ;;  %v15352_v7 = vld [vmem:[%s19857_s5 + $0xd8] sm:$0xff] }
 0x38c   :  { %v16943_v12 = vpop.f32.mrf.mxu1  ;;  %16982 = vmatprep.subr.mxu0 %v17681_v8  ;;  %v15351_v11 = vld [vmem:[%s19857_s5 + $0xd0] sm:$0xff] }
 0x38d   :  { %v1125_v13 = vpop.f32.mrf.mxu0  ;;  %16983 = vmatpush3.msra.mxu0 %v15354_v2  ;;  %v15350_v12 = vld [vmem:[%s19857_s5 + $0xc8] sm:$0xff] }
 0x38e   :  { %v1230_v14 = vpop.f32.mrf.mxu1  ;;  %16984 = vmatprep.subr.mxu0 %v17681_v8 }
 0x38f   :  { %v16915_v15 = vpop.f32.mrf.mxu0  ;;  %v18448_v16 = vadd.f32 %v1230_v14, %v1125_v13  ;;  %16985 = vmatpush3.msra.mxu0 %v15353_v6  ;;  %v15349_v13 = vld [vmem:[%s19857_s5 + $0xc0] sm:$0xff] }
 0x390   :  { %v16946_v10 = vpop.f32.mrf.mxu1  ;;  %16986 = vmatprep.subr.mxu0 %v17681_v8 }
 0x391   :  { %16987 = vmatpush3.msra.mxu0 %v15352_v7 }
 0x392   :  { %16988 = vmatprep.subr.mxu0 %v17681_v8 }
 0x393   :  { %16989 = vmatpush3.msra.mxu0 %v15351_v11 }
 0x394   :  { %16990 = vmatprep.subr.mxu0 %v17681_v8 }
 0x395   :  { %16991 = vmatpush3.msra.mxu0 %v15350_v12 }
 0x396   :  { %16992 = vmatprep.subr.mxu0 %v17681_v8 }
 0x397   :  { %16993 = vmatpush3.msra.mxu0 %v15349_v13 }
 0x398   :  { %1730 = vmatprep.subr.mxu0 %v17681_v8 }
 0x3a9   :  { %v1326_v60 = vpop.f32.mrf.mxu0 }
 0x3aa   :  { %16964 = vmatmul.mubr.msk.f32.vlgmr.msra.gmra.mxu1 %vm1023_vm2, %v1326_v60 }
 0x3ab   :  { %1496 = vmatpush1.msra.mxu1 %v17982_v50  ;;  %v1328_v46 = vpop.f32.mrf.mxu0  ;;  %16966 = vmatprep.mubr.msk.f32.mxu1 %vm17682_vm1, %v17681_v8 }
 0x3ac   :  { %1497 = vmatprep.subr.mxu1 %v17681_v8 }
 0x3ad   :  { %1498 = vmatpush1.msra.mxu1 %v18001_v61  ;;  %v1331_v19 = vpop.f32.mrf.mxu0 }
 0x3ae   :  { %1499 = vmatprep.subr.mxu1 %v17681_v8  ;;  %16967 = vmatmul.mubr.msk.f32.gmra.mxu1 %vm1023_vm2, %v1331_v19 }
 0x3af   :  { %1500 = vmatpush1.msra.mxu1 %v18035_v35  ;;  %v1333_v20 = vpop.f32.mrf.mxu0  ;;  %16969 = vmatprep.mubr.msk.f32.mxu1 %vm17682_vm1, %v17681_v8 }
 0x3b0   :  { %1501 = vmatprep.subr.mxu1 %v17681_v8 }
 0x3b1   :  { %1502 = vmatpush1.msra.mxu1 %v18044_v41  ;;  %v1336_v21 = vpop.f32.mrf.mxu0 }
 0x3b2   :  { %1503 = vmatprep.subr.mxu1 %v17681_v8  ;;  %16970 = vmatmul.mubr.msk.f32.gmra.mxu1 %vm1023_vm2, %v1336_v21 }
 0x3b3   :  { %1504 = vmatpush1.msra.mxu1 %v18049_v45  ;;  %v1338_v25 = vpop.f32.mrf.mxu0  ;;  %16972 = vmatprep.mubr.msk.f32.mxu1 %vm17682_vm1, %v17681_v8 }
 0x3b4   :  { %1505 = vmatprep.subr.mxu1 %v17681_v8 }
 0x3b5   :  { %1506 = vmatpush1.msra.mxu1 %v18088_v24  ;;  %v1341_v1 = vpop.f32.mrf.mxu0 }
 0x3b6   :  { %1507 = vmatprep.subr.mxu1 %v17681_v8  ;;  %16973 = vmatmul.mubr.msk.f32.gmra.mxu1 %vm1023_vm2, %v1341_v1 }
 0x3b7   :  { %1508 = vmatpush1.msra.mxu1 %v18099_v40  ;;  %v1343_v32 = vpop.f32.mrf.mxu0  ;;  %16975 = vmatprep.mubr.msk.f32.mxu1 %vm17682_vm1, %v17681_v8 }
 0x3b8   :  { %1509 = vmatprep.subr.mxu1 %v17681_v8 }
 0x3b9   :  { %1510 = vmatpush1.msra.mxu1 %v18101_v42  ;;  %v1346_v29 = vpop.f32.mrf.mxu0 }
 0x3ba   :  { %1511 = vmatprep.subr.mxu1 %v17681_v8  ;;  %16976 = vmatmul.mubr.msk.f32.gmra.mxu1 %vm1023_vm2, %v1346_v29 }
 0x3bb   :  { %1512 = vmatpush1.msra.mxu1 %v18108_v49  ;;  %v1348_v36 = vpop.f32.mrf.mxu0  ;;  %15344 = vmatprep.mubr.msk.f32.mxu1 %vm784_vm0, %v1471_v28 }
 0x3bc   :  { %1513 = vmatprep.subr.mxu1 %v17681_v8 }
 0x3bd   :  { %1514 = vmatpush1.msra.mxu1 %v18121_v59 }
 0x3be   :  { %1515 = vmatprep.subr.mxu1 %v17681_v8 }
 0x3bf   :  { %1516 = vmatpush1.msra.mxu1 %v18136_v56 }
 0x3c0   :  { %1517 = vmatprep.subr.mxu1 %v17681_v8 }
 0x3c1   :  { %1518 = vmatpush1.msra.mxu1 %v18150_v30 }
 0x3c2   :  { %1519 = vmatprep.subr.mxu1 %v17681_v8 }
 0x3c3   :  { %1520 = vmatpush1.msra.mxu1 %v18152_v37 }
 0x3c4   :  { %1521 = vmatprep.subr.mxu1 %v17681_v8 }
 0x3c5   :  { %1522 = vmatpush1.msra.mxu1 %v18163_v3 }
 0x3c6   :  { %1523 = vmatprep.subr.mxu1 %v17681_v8 }
 0x3c7   :  { %1524 = vmatpush1.msra.mxu1 %v18175_v9 }
 0x3c8   :  { %1525 = vmatprep.subr.mxu1 %v17681_v8 }
 0x3c9   :  { %1526 = vmatpush1.msra.mxu1 %v18188_v18 }
 0x3ca   :  { %1547 = vmatprep.subr.mxu1 %v17681_v8 }
 0x3cb   :  { %1548 = vmatpush2.msra.mxu1 %v18202_v43 }
 0x3cc   :  { %1549 = vmatprep.subr.mxu1 %v17681_v8 }
 0x3cd   :  { %1550 = vmatpush2.msra.mxu1 %v18206_v55 }
 0x3ce   :  { %1551 = vmatprep.subr.mxu1 %v17681_v8 }
 0x3cf   :  { %1552 = vmatpush2.msra.mxu1 %v18217_v54 }
 0x3d0   :  { %1553 = vmatprep.subr.mxu1 %v17681_v8 }
 0x3d1   :  { %1554 = vmatpush2.msra.mxu1 %v18230_v17 }
 0x3d2   :  { %1555 = vmatprep.subr.mxu1 %v17681_v8 }
 0x3d3   :  { %1556 = vmatpush2.msra.mxu1 %v18241_v38 }
 0x3d4   :  { %1557 = vmatprep.subr.mxu1 %v17681_v8 }
 0x3d5   :  { %1558 = vmatpush2.msra.mxu1 %v18243_v34 }
 0x3d6   :  { %1560 = vmatmul.mubr.f32.vlgmr.msra.gmra.mxu1 %v1470_v52  ;;  %17009 = vmatprep.subr.mxu1 %v17681_v8 }
 0x3d7   :  { %15345 = vmatprep.mubr.msk.f32.mxu1 %vm784_vm0, %v1473_v63  ;;  %v15367_v63 = vld [vmem:[%s19857_s5 + $0x100] sm:$0xff] }
 0x3da   :  { %1565 = vmatmul.mubr.f32.gmra.mxu1 %v1472_v48 }
 0x3db   :  { %15346 = vmatprep.mubr.msk.f32.mxu1 %vm784_vm0, %v1475_v44 }
 0x3de   :  { %1570 = vmatmul.mubr.f32.gmra.mxu1 %v1474_v47 }
 0x3df   :  { %15347 = vmatprep.mubr.msk.f32.mxu1 %vm784_vm0, %v1477_v53 }
 0x3e2   :  { %1575 = vmatmul.mubr.f32.gmra.mxu1 %v1476_v57 }
 0x3e3   :  { %15348 = vmatprep.mubr.msk.f32.mxu1 %vm784_vm0, %v1479_v23 }
 0x3e6   :  { %1580 = vmatmul.mubr.f32.gmra.mxu1 %v1478_v58 }
 0x3e7   :  { %17025 = vmatprep.mubr.msk.f32.mxu1 %vm17682_vm1, %v17681_v8 }
 0x46a   :  { %v1440_v14 = vpop.f32.mrf.mxu1 }
 0x46b   :  { %v18547_v15 = vadd.f32 %v1440_v14, %v18440_v39 }
 0x46c   :  { %v16965_v10 = vpop.f32.mrf.mxu1 }
 0x46e   :  { %v1445_v60 = vpop.f32.mrf.mxu1 }
 0x46f   :  { %v18550_v46 = vadd.f32 %v1445_v60, %v18442_v4 }
 0x470   :  { %v16968_v19 = vpop.f32.mrf.mxu1 }
 0x472   :  { %v1450_v20 = vpop.f32.mrf.mxu1 }
 0x473   :  { %v18553_v21 = vadd.f32 %v1450_v20, %v18444_v62 }
 0x474   :  { %v16971_v25 = vpop.f32.mrf.mxu1 }
 0x476   :  { %v1455_v1 = vpop.f32.mrf.mxu1 }
 0x477   :  { %v18556_v32 = vadd.f32 %v1455_v1, %v18446_v51 }
 0x478   :  { %v16974_v28 = vpop.f32.mrf.mxu1 }
 0x47a   :  { %v1460_v29 = vpop.f32.mrf.mxu1 }
 0x47b   :  { %v18559_v39 = vadd.f32 %v1460_v29, %v18448_v16 }
 0x47c   :  { %v16977_v36 = vpop.f32.mrf.mxu1 }
 0x496   :  { %v1561_v52 = vpop.f32.mrf.mxu1 }
 0x497   :  { %16995 = vmatmul.mubr.msk.f32.vlgmr.msra.gmra.mxu0 %vm1023_vm2, %v1561_v52 }
 0x498   :  { %1731 = vmatpush1.msra.mxu0 %v17982_v50  ;;  %v1563_v4 = vpop.f32.mrf.mxu1  ;;  %16997 = vmatprep.mubr.msk.f32.mxu0 %vm17682_vm1, %v17681_v8 }
 0x499   :  { %1732 = vmatprep.subr.mxu0 %v17681_v8 }
 0x49a   :  { %1733 = vmatpush1.msra.mxu0 %v18001_v61  ;;  %v1566_v62 = vpop.f32.mrf.mxu1 }
 0x49b   :  { %1734 = vmatprep.subr.mxu0 %v17681_v8  ;;  %16998 = vmatmul.mubr.msk.f32.gmra.mxu0 %vm1023_vm2, %v1566_v62 }
 0x49c   :  { %1735 = vmatpush1.msra.mxu0 %v18035_v35  ;;  %v1568_v51 = vpop.f32.mrf.mxu1  ;;  %17000 = vmatprep.mubr.msk.f32.mxu0 %vm17682_vm1, %v17681_v8 }
 0x49d   :  { %1736 = vmatprep.subr.mxu0 %v17681_v8 }
 0x49e   :  { %1737 = vmatpush1.msra.mxu0 %v18044_v41  ;;  %v1571_v50 = vpop.f32.mrf.mxu1 }
 0x49f   :  { %1738 = vmatprep.subr.mxu0 %v17681_v8  ;;  %17001 = vmatmul.mubr.msk.f32.gmra.mxu0 %vm1023_vm2, %v1571_v50 }
 0x4a0   :  { %1739 = vmatpush1.msra.mxu0 %v18049_v45  ;;  %v1573_v61 = vpop.f32.mrf.mxu1  ;;  %17003 = vmatprep.mubr.msk.f32.mxu0 %vm17682_vm1, %v17681_v8  ;;  %v1706_v45 = vld [vmem:[#allocation8 + $0x148] sm:$0xff] }
 0x4a1   :  { %1740 = vmatprep.subr.mxu0 %v17681_v8 }
 0x4a2   :  { %1741 = vmatpush1.msra.mxu0 %v18088_v24  ;;  %v1576_v35 = vpop.f32.mrf.mxu1 }
 0x4a3   :  { %1742 = vmatprep.subr.mxu0 %v17681_v8  ;;  %17004 = vmatmul.mubr.msk.f32.gmra.mxu0 %vm1023_vm2, %v1576_v35 }
 0x4a4   :  { %1743 = vmatpush1.msra.mxu0 %v18099_v40  ;;  %v1578_v41 = vpop.f32.mrf.mxu1  ;;  %17006 = vmatprep.mubr.msk.f32.mxu0 %vm17682_vm1, %v17681_v8  ;;  %v1705_v40 = vld [vmem:[#allocation8 + $0x140] sm:$0xff] }
 0x4a5   :  { %1744 = vmatprep.subr.mxu0 %v17681_v8  ;;  %v15380_v41 = vld [vmem:[#allocation10] ss:$0 sm:$0xff] }
 0x4a6   :  { %1745 = vmatpush1.msra.mxu0 %v18101_v42  ;;  %v1581_v16 = vpop.f32.mrf.mxu1  ;;  %v1708_v42 = vld [vmem:[#allocation8 + $0x158] sm:$0xff] }
 0x4a7   :  { %1746 = vmatprep.subr.mxu0 %v17681_v8  ;;  %17007 = vmatmul.mubr.msk.f32.gmra.mxu0 %vm1023_vm2, %v1581_v16 }
 0x4a8   :  { %1747 = vmatpush1.msra.mxu0 %v18108_v49  ;;  %v1583_v24 = vpop.f32.mrf.mxu1  ;;  %15362 = vmatprep.mubr.msk.f32.mxu0 %vm784_vm0, %v1706_v45  ;;  %v1707_v49 = vld [vmem:[#allocation8 + $0x150] sm:$0xff] }
 0x4a9   :  { %1748 = vmatprep.subr.mxu0 %v17681_v8 }
 0x4aa   :  { %1749 = vmatpush1.msra.mxu0 %v18121_v59  ;;  %v1710_v59 = vld [vmem:[#allocation8 + $0x168] sm:$0xff] }
 0x4ab   :  { %1750 = vmatprep.subr.mxu0 %v17681_v8 }
 0x4ac   :  { %1751 = vmatpush1.msra.mxu0 %v18136_v56  ;;  %v1709_v56 = vld [vmem:[#allocation8 + $0x160] sm:$0xff] }
 0x4ad   :  { %1752 = vmatprep.subr.mxu0 %v17681_v8 }
 0x4ae   :  { %1753 = vmatpush1.msra.mxu0 %v18150_v30  ;;  %v1712_v30 = vld [vmem:[#allocation8 + $0x178] sm:$0xff] }
 0x4af   :  { %1754 = vmatprep.subr.mxu0 %v17681_v8 }
 0x4b0   :  { %1755 = vmatpush1.msra.mxu0 %v18152_v37  ;;  %v1711_v37 = vld [vmem:[#allocation8 + $0x170] sm:$0xff] }
 0x4b1   :  { %1756 = vmatprep.subr.mxu0 %v17681_v8 }
 0x4b2   :  { %1757 = vmatpush1.msra.mxu0 %v18163_v3  ;;  %v1714_v3 = vld [vmem:[#allocation8 + $0x188] sm:$0xff] }
 0x4b3   :  { %1758 = vmatprep.subr.mxu0 %v17681_v8 }
 0x4b4   :  { %1759 = vmatpush1.msra.mxu0 %v18175_v9  ;;  %v1713_v9 = vld [vmem:[#allocation8 + $0x180] sm:$0xff] }
 0x4b5   :  { %1760 = vmatprep.subr.mxu0 %v17681_v8 }
 0x4b6   :  { %1761 = vmatpush1.msra.mxu0 %v18188_v18  ;;  %v15374_v18 = vld [vmem:[%s19857_s5 + $0x138] sm:$0xff] }
 0x4b7   :  { %1782 = vmatprep.subr.mxu0 %v17681_v8  ;;  %17010 = vmatpush3.msra.mxu1 %v15374_v18 }
 0x4b8   :  { %1783 = vmatpush2.msra.mxu0 %v18202_v43  ;;  %v15373_v43 = vld [vmem:[%s19857_s5 + $0x130] sm:$0xff]  ;;  %17011 = vmatprep.subr.mxu1 %v17681_v8 }
 0x4b9   :  { %1784 = vmatprep.subr.mxu0 %v17681_v8  ;;  %17012 = vmatpush3.msra.mxu1 %v15373_v43  ;;  %v1956_v43 = vld [vmem:[#allocation11] sm:$0xff] }
 0x4ba   :  { %1785 = vmatpush2.msra.mxu0 %v18206_v55  ;;  %v15372_v55 = vld [vmem:[%s19857_s5 + $0x128] sm:$0xff]  ;;  %17013 = vmatprep.subr.mxu1 %v17681_v8 }
 0x4bb   :  { %1786 = vmatprep.subr.mxu0 %v17681_v8  ;;  %17014 = vmatpush3.msra.mxu1 %v15372_v55  ;;  %v1957_v55 = vld [vmem:[#allocation11 + $0x8] sm:$0xff] }
 0x4bc   :  { %1787 = vmatpush2.msra.mxu0 %v18217_v54  ;;  %v15371_v54 = vld [vmem:[%s19857_s5 + $0x120] sm:$0xff]  ;;  %17015 = vmatprep.subr.mxu1 %v17681_v8 }
 0x4bd   :  { %1788 = vmatprep.subr.mxu0 %v17681_v8  ;;  %17016 = vmatpush3.msra.mxu1 %v15371_v54  ;;  %v1958_v54 = vld [vmem:[#allocation11 + $0x10] sm:$0xf] }
 0x4be   :  { %1789 = vmatpush2.msra.mxu0 %v18230_v17  ;;  %v15370_v17 = vld [vmem:[%s19857_s5 + $0x118] sm:$0xff]  ;;  %17017 = vmatprep.subr.mxu1 %v17681_v8 }
 0x4bf   :  { %1790 = vmatprep.subr.mxu0 %v17681_v8  ;;  %17018 = vmatpush3.msra.mxu1 %v15370_v17  ;;  %v2066_v17 = vld [vmem:[#allocation13 + $0x80] sm:$0xff] }
 0x4c0   :  { %1791 = vmatpush2.msra.mxu0 %v18241_v38  ;;  %v15369_v38 = vld [vmem:[%s19857_s5 + $0x110] sm:$0xff]  ;;  %17019 = vmatprep.subr.mxu1 %v17681_v8 }
 0x4c1   :  { %1792 = vmatprep.subr.mxu0 %v17681_v8  ;;  %17020 = vmatpush3.msra.mxu1 %v15369_v38  ;;  %v2074_v38 = vld [vmem:[#allocation13 + $0xc0] sm:$0xff] }
 0x4c2   :  { %1793 = vmatpush2.msra.mxu0 %v18243_v34  ;;  %v15368_v34 = vld [vmem:[%s19857_s5 + $0x108] sm:$0xff]  ;;  %17021 = vmatprep.subr.mxu1 %v17681_v8 }
 0x4c3   :  { %1795 = vmatmul.mubr.f32.vlgmr.msra.gmra.mxu0 %v1705_v40  ;;  %17022 = vmatpush3.msra.mxu1 %v15368_v34  ;;  %v15385_v34 = vcombine.high %v2066_v17, %v2074_v38 }
 0x4c4   :  { %15363 = vmatprep.mubr.msk.f32.mxu0 %vm784_vm0, %v1708_v42  ;;  %17023 = vmatprep.subr.mxu1 %v17681_v8 }
 0x4c5   :  { %17024 = vmatpush3.msra.mxu1 %v15367_v63  ;;  %v2070_v63 = vld [vmem:[#allocation13 + $0xa0] sm:$0xff] }
 0x4c6   :  { %17040 = vmatprep.subr.mxu1 %v17681_v8 }
 0x4c7   :  { %1800 = vmatmul.mubr.f32.gmra.mxu0 %v1707_v49 }
 0x4c8   :  { %15364 = vmatprep.mubr.msk.f32.mxu0 %vm784_vm0, %v1710_v59 }
 0x4cb   :  { %1805 = vmatmul.mubr.f32.gmra.mxu0 %v1709_v56 }
 0x4cc   :  { %15365 = vmatprep.mubr.msk.f32.mxu0 %vm784_vm0, %v1712_v30 }
 0x4cf   :  { %1810 = vmatmul.mubr.f32.gmra.mxu0 %v1711_v37 }
 0x4d0   :  { %15366 = vmatprep.mubr.msk.f32.mxu0 %vm784_vm0, %v1714_v3 }
 0x4d3   :  { %1815 = vmatmul.mubr.f32.gmra.mxu0 %v1713_v9 }
 0x4d4   :  { %2364 = vmatprep.mubr.bf16.mxu0 %v17678_v0 }
 0x557   :  { %v1675_v48 = vpop.f32.mrf.mxu0 }
 0x558   :  { %v1699_v44 = vadd.f32 %v1675_v48, %v18547_v15  ;;  %v2078_v48 = vld [vmem:[#allocation13 + $0xe0] sm:$0xff] }
 0x559   :  { %v16996_v47 = vpop.f32.mrf.mxu0 }
 0x55a   :  { %v15392_v47 = vcombine.low %v2070_v63, %v2078_v48 }
 0x55b   :  { %v1680_v53 = vpop.f32.mrf.mxu0 }
 0x55c   :  { %v1700_v57 = vadd.f32 %v1680_v53, %v18550_v46  ;;  %v15393_v53 = vcombine.high %v2070_v63, %v2078_v48  ;;  %v2051_v63 = vld [vmem:[#allocation13 + $0x8] sm:$0xff] }
 0x55d   :  { %v16999_v23 = vpop.f32.mrf.mxu0  ;;  %v2059_v48 = vld [vmem:[#allocation13 + $0x48] sm:$0xff] }
 0x55e   :  { %2346 = vmatprep.subr.bf16.mxu0 %v15393_v53  ;;  %v2075_v23 = vld [vmem:[#allocation13 + $0xc8] sm:$0xff] }
 0x55f   :  { %v1685_v58 = vpop.f32.mrf.mxu0  ;;  %2347 = vmatpush1.bf16.msra.mxu0 %v15392_v47  ;;  %v2915_v47 = vld [vmem:[#allocation13 + $0x140] sm:$0xff] }
 0x560   :  { %v1701_v5 = vadd.f32 %v1685_v58, %v18553_v21  ;;  %v2072_v58 = vld [vmem:[#allocation13 + $0xb0] sm:$0xff] }
 0x561   :  { %v17002_v22 = vpop.f32.mrf.mxu0 }
 0x562   :  { %v2080_v22 = vld [vmem:[#allocation13 + $0xf0] sm:$0xff] }
 0x563   :  { %v1690_v2 = vpop.f32.mrf.mxu0 }
 0x564   :  { %v1702_v6 = vadd.f32 %v1690_v2, %v18556_v32  ;;  %v15396_v2 = vcombine.low %v2072_v58, %v2080_v22 }
 0x565   :  { %v17005_v7 = vpop.f32.mrf.mxu0 }
 0x566   :  { %v17683_v7 = vmov 1983009808  }
 0x567   :  { %v1695_v11 = vpop.f32.mrf.mxu0 }
 0x568   :  { %v1703_v12 = vadd.f32 %v1695_v11, %v18559_v39  ;;  %v233_v11 = vunpack.c.l.s4 %v17683_v7 }
 0x569   :  { %v17008_v13 = vpop.f32.mrf.mxu0 }
 0x583   :  { %v1796_v14 = vpop.f32.mrf.mxu0 }
 0x584   :  { %17026 = vmatmul.mubr.msk.f32.vlgmr.msra.gmra.mxu1 %vm1023_vm2, %v1796_v14  ;;  %v18687_v14 = vld [vmem:[#allocation2] sm:$0xf] }
 0x585   :  { %v1798_v15 = vpop.f32.mrf.mxu0  ;;  %17028 = vmatprep.mubr.msk.f32.mxu1 %vm17682_vm1, %v17681_v8 }
 0x587   :  { %v1801_v10 = vpop.f32.mrf.mxu0 }
 0x588   :  { %17029 = vmatmul.mubr.msk.f32.gmra.mxu1 %vm1023_vm2, %v1801_v10 }
 0x589   :  { %v1803_v60 = vpop.f32.mrf.mxu0  ;;  %17031 = vmatprep.mubr.msk.f32.mxu1 %vm17682_vm1, %v17681_v8 }
 0x58b   :  { %v1806_v46 = vpop.f32.mrf.mxu0 }
 0x58c   :  { %17032 = vmatmul.mubr.msk.f32.gmra.mxu1 %vm1023_vm2, %v1806_v46 }
 0x58d   :  { %v1808_v19 = vpop.f32.mrf.mxu0  ;;  %17034 = vmatprep.mubr.msk.f32.mxu1 %vm17682_vm1, %v17681_v8 }
 0x58f   :  { %v1811_v20 = vpop.f32.mrf.mxu0 }
 0x590   :  { %17035 = vmatmul.mubr.msk.f32.gmra.mxu1 %vm1023_vm2, %v1811_v20 }
 0x591   :  { %v1813_v21 = vpop.f32.mrf.mxu0  ;;  %17037 = vmatprep.mubr.msk.f32.mxu1 %vm17682_vm1, %v17681_v8 }
 0x592   :  { %v2068_v21 = vld [vmem:[#allocation13 + $0x90] sm:$0xff] }
 0x593   :  { %v1816_v25 = vpop.f32.mrf.mxu0 }
 0x594   :  { %17038 = vmatmul.mubr.msk.f32.gmra.mxu1 %vm1023_vm2, %v1816_v25 }
 0x595   :  { %v1818_v1 = vpop.f32.mrf.mxu0  ;;  %17050 = vmatprep.mubr.msk.f32.mxu1 %vm17682_vm1, %v17681_v8 }
 0x596   :  { %v2076_v1 = vld [vmem:[#allocation13 + $0xd0] sm:$0xff] }
 0x644   :  { %v1910_v32 = vpop.f32.mrf.mxu1 }
 0x645   :  { %v1934_v42 = vadd.f32 %v1910_v32, %v1699_v44  ;;  %v15384_v44 = vcombine.low %v2066_v17, %v2074_v38  ;;  %v2050_v32 = vld [vmem:[#allocation13] sm:$0xff] }
 0x646   :  { %v17027_v28 = vpop.f32.mrf.mxu1 }
 0x647   :  { %v1946_v37 = vadd.f32 %v15380_v41, %v1934_v42  ;;  %v2058_v28 = vld [vmem:[#allocation13 + $0x40] sm:$0xff]  ;;  %v2079_v42 = vld [vmem:[#allocation13 + $0xe8] sm:$0xff] }
 0x648   :  { %v1915_v29 = vpop.f32.mrf.mxu1 }
 0x649   :  { %v1935_v16 = vadd.f32 %v1915_v29, %v1700_v57  ;;  %v1951_v18 = vmax.f32 %v1946_v37, 0.0  ;;  %v2067_v57 = vld [vmem:[#allocation13 + $0x88] sm:$0xff] }
 0x64a   :  { %v17030_v39 = vpop.f32.mrf.mxu1 }
 0x64b   :  { %v1947_v56 = vadd.f32 %v15380_v41, %v1935_v16 }
 0x64c   :  { %v1920_v36 = vpop.f32.mrf.mxu1 }
 0x64d   :  { %v1936_v61 = vadd.f32 %v1920_v36, %v1701_v5  ;;  %v1952_v9 = vmax.f32 %v1947_v56, 0.0  ;;  %v15387_v5 = vcombine.high %v2067_v57, %v2075_v23  ;;  %v15389_v36 = vcombine.high %v2068_v21, %v2076_v1 }
 0x64e   :  { %v17033_v52 = vpop.f32.mrf.mxu1 }
 0x64f   :  { %v1948_v49 = vadd.f32 %v15380_v41, %v1936_v61  ;;  %v15409_v52 = vcombine.high %v2050_v32, %v2058_v28  ;;  %v2052_v61 = vld [vmem:[#allocation13 + $0x10] sm:$0xff] }
 0x650   :  { %v1925_v4 = vpop.f32.mrf.mxu1 }
 0x651   :  { %v1937_v51 = vadd.f32 %v1925_v4, %v1702_v6  ;;  %v1953_v3 = vmax.f32 %v1948_v49, 0.0  ;;  %v15397_v6 = vcombine.high %v2072_v58, %v2080_v22  ;;  %v2054_v49 = vld [vmem:[#allocation13 + $0x20] sm:$0xff]  ;;  %v2909_v22 = vld [vmem:[#allocation13 + $0x110] sm:$0xff] }
 0x652   :  { %v17036_v62 = vpop.f32.mrf.mxu1 }
 0x653   :  { %v1949_v24 = vadd.f32 %v15380_v41, %v1937_v51  ;;  %2428 = vmatprep.subr.bf16.mxu0 %v15397_v6  ;;  %v2069_v51 = vld [vmem:[#allocation13 + $0x98] sm:$0xff]  ;;  %v15410_v6 = vcombine.low %v2051_v63, %v2059_v48 }
 0x654   :  { %v1930_v50 = vpop.f32.mrf.mxu1 }
 0x655   :  { %v1938_v35 = vadd.f32 %v1930_v50, %v1703_v12  ;;  %v1954_v30 = vmax.f32 %v1949_v24, 0.0  ;;  %v234_v12 = vunpack.c.0.s8 %v233_v11  ;;  %v2077_v50 = vld [vmem:[#allocation13 + $0xd8] sm:$0xff] }
 0x656   :  { %v17039_v45 = vpop.f32.mrf.mxu1  ;;  %v15391_v16 = vcombine.high %v2069_v51, %v2077_v50  ;;  %v15390_v56 = vcombine.low %v2069_v51, %v2077_v50  ;;  %v2057_v50 = vld [vmem:[#allocation13 + $0x38] sm:$0xff] }
 0x657   :  { %v1950_v40 = vadd.f32 %v15380_v41, %v1938_v35  ;;  %v18685_v13 = vsub.s32 %v234_v12, %v17949_v26  ;;  %v2060_v35 = vld [vmem:[#allocation13 + $0x50] sm:$0xff]  ;;  %v15388_v41 = vcombine.low %v2068_v21, %v2076_v1  ;;  %v15408_v45 = vcombine.low %v2050_v32, %v2058_v28  ;;  %v2911_v21 = vld [vmem:[#allocation13 + $0x120] sm:$0xff] }
 0x658   :  { %v15413_v24 = vcombine.high %v2052_v61, %v2060_v35  ;;  %v2919_v1 = vld [vmem:[#allocation13 + $0x160] sm:$0xff] }
 0x659   :  { %v1955_v59 = vmax.f32 %v1950_v40, 0.0  ;;  %v238_v15 = vrot.slane %v18687_v14, %v18685_v13  ;;  %v2071_v40 = vld [vmem:[#allocation13 + $0xa8] sm:$0xff] }
 0x65a   :  { %v15395_v37 = vcombine.high %v2071_v40, %v2079_v42 }
 0x65b   :  { %17041 = vmatpush3.msra.mxu1 %v1955_v59  ;;  %v239_v10 = vcombine.high %v238_v15, %v238_v15  ;;  %v243_v60 = vsel %vm242_vm4, %v238_v15, 0.0  ;;  %v2062_v59 = vld [vmem:[#allocation13 + $0x60] sm:$0xff] }
 0x65c   :  { %17042 = vmatprep.subr.mxu1 %v17681_v8  ;;  %v15416_v17 = vcombine.low %v2054_v49, %v2062_v59 }
 0x65d   :  { %17043 = vmatpush3.msra.mxu1 %v1954_v30  ;;  %v244_v46 = vsel %vm242_vm4, %v239_v10, 0.0  ;;  %v15412_v30 = vcombine.low %v2052_v61, %v2060_v35  ;;  %v2065_v61 = vld [vmem:[#allocation13 + $0x78] sm:$0xff]  ;;  %v2913_v35 = vld [vmem:[#allocation13 + $0x130] sm:$0xff] }
 0x65e   :  { %17044 = vmatprep.subr.mxu1 %v17681_v8  ;;  %v245_v19 = vadd.f32 %v244_v46, %v243_v60 }
 0x65f   :  { %17045 = vmatpush3.msra.mxu1 %v1953_v3  ;;  %v15417_v3 = vcombine.high %v2054_v49, %v2062_v59  ;;  %v2908_v49 = vld [vmem:[#allocation13 + $0x108] sm:$0xff] }
 0x660   :  { %17046 = vmatprep.subr.mxu1 %v17681_v8  ;;  %246 = vadd.xlane.f32.xlu1 %v245_v19  ;;  %v2055_v19 = vld [vmem:[#allocation13 + $0x28] sm:$0xff] }
 0x661   :  { %17047 = vmatpush3.msra.mxu1 %v1952_v9  ;;  %v2073_v9 = vld [vmem:[#allocation13 + $0xb8] sm:$0xff]  ;;  %v2916_v59 = vld [vmem:[#allocation13 + $0x148] sm:$0xff] }
 0x662   :  { %17048 = vmatprep.subr.mxu1 %v17681_v8 }
 0x663   :  { %17049 = vmatpush3.msra.mxu1 %v1951_v18  ;;  %v2081_v18 = vld [vmem:[#allocation13 + $0xf8] sm:$0xff] }
 0x664   :  { %17051 = vmatmul.mubr.msk.f32.vlgmr.msra.gmra.mxu1 %vm1959_vm3, %v1956_v43  ;;  %2182 = vmatprep.subr.bf16.mxu1 %v15385_v34  ;;  %v2056_v43 = vld [vmem:[#allocation13 + $0x30] sm:$0xff]  ;;  %v15399_v38 = vcombine.high %v2073_v9, %v2081_v18  ;;  %v15398_v53 = vcombine.low %v2073_v9, %v2081_v18  ;;  %v15435_v18 = vcombine.high %v2908_v49, %v2916_v59 }
 0x665   :  { %17053 = vmatprep.mubr.msk.f32.mxu1 %vm17682_vm1, %v17681_v8  ;;  %2183 = vmatpush1.bf16.msra.mxu1 %v15384_v44  ;;  %v2907_v44 = vld [vmem:[#allocation13 + $0x100] sm:$0xff] }
 0x666   :  { %2223 = vmatprep.subr.bf16.mxu1 %v15387_v5  ;;  %v15433_v58 = vcombine.high %v2907_v44, %v2915_v47  ;;  %v2061_v5 = vld [vmem:[#allocation13 + $0x58] sm:$0xff]  ;;  %v15432_v7 = vcombine.low %v2907_v44, %v2915_v47  ;;  %v2912_v47 = vld [vmem:[#allocation13 + $0x128] sm:$0xff] }
 0x668   :  { %17054 = vmatmul.mubr.msk.f32.gmra.mxu1 %vm1959_vm3, %v1957_v55  ;;  %v2064_v55 = vld [vmem:[#allocation13 + $0x70] sm:$0xff] }
 0x669   :  { %17056 = vmatprep.mubr.msk.f32.mxu1 %vm17682_vm1, %v17681_v8  ;;  %v15386_v8 = vcombine.low %v2067_v57, %v2075_v23  ;;  %v15421_v34 = vcombine.high %v2056_v43, %v2064_v55  ;;  %v15420_v57 = vcombine.low %v2056_v43, %v2064_v55  ;;  %v15411_v23 = vcombine.high %v2051_v63, %v2059_v48  ;;  %v2910_v55 = vld [vmem:[#allocation13 + $0x118] sm:$0xff] }
 0x66c   :  { %17057 = vmatmul.mubr.msk.f32.gmra.mxu1 %vm1959_vm3, %v1958_v54  ;;  %v15394_v54 = vcombine.low %v2071_v40, %v2079_v42 }
 0x66d   :  { %2200 = vmatprep.mubr.bf16.mxu1 %v17678_v0 }
 0x6e9   :  { %v247_v11 = vpop.xlane.xlu1 %246 }
 0x6ea   :  { %v248_v12 = vrot.slane %v247_v11, 4 }
 0x6ec   :  { %v249_v60 = vadd.f32 %v248_v12, %v247_v11  ;;  %v3365_v11 = vld [vmem:[#allocation13 + $0x1f0] sm:$0xff] }
 0x6ee   :  { %v250_v46 = vrot.slane %v249_v60, 2 }
 0x6f0   :  { %v251_v32 = vadd.f32 %v250_v46, %v249_v60  ;;  %v3352_v46 = vld [vmem:[#allocation13 + $0x188] sm:$0xff] }
 0x724   :  { %v2035_v20 = vpop.f32.mrf.mxu1 }
 0x725   :  { %v18693_v25 = vpack.c.bf16 %v2035_v20, %v2035_v20  ;;  %v2063_v20 = vld [vmem:[#allocation13 + $0x68] sm:$0xff] }
 0x726   :  { %v17052_v29 = vpop.f32.mrf.mxu1 }
 0x727   :  { %v18696_v39 = vrot.slane %v18693_v25, 1 }
 0x728   :  { %v18698_v4 = vpop.f32.mrf.mxu1 }
 0x729   :  { %15400 = vmatmul.mubr.msk.bf16.vlgmr.msra.gmra.mxu1 %vm2164_vm5, %v18696_v39  ;;  %15404 = vmatmul.mubr.msk.bf16.vlgmr.msra.gmra.mxu0 %vm2164_vm5, %v18696_v39 }
 0x72a   :  { %2224 = vmatpush1.bf16.msra.mxu1 %v15386_v8  ;;  %2429 = vmatpush1.bf16.msra.mxu0 %v15396_v2  ;;  %v17055_v62 = vpop.f32.mrf.mxu1  ;;  %v2053_v8 = vld [vmem:[#allocation13 + $0x18] sm:$0xff]  ;;  %v2917_v2 = vld [vmem:[#allocation13 + $0x150] sm:$0xff] }
 0x72b   :  { %2241 = vmatprep.mubr.bf16.mxu1 %v17678_v0  ;;  %2446 = vmatprep.mubr.bf16.mxu0 %v17678_v0  ;;  %v15415_v15 = vcombine.high %v2053_v8, %v2061_v5  ;;  %v15437_v10 = vcombine.high %v2909_v22, %v2917_v2  ;;  %v15414_v28 = vcombine.low %v2053_v8, %v2061_v5  ;;  %v18766_v5 = vrot.slane %v18693_v25, 3 }
 0x72c   :  { %2264 = vmatprep.subr.bf16.mxu1 %v15389_v36  ;;  %2593 = vmatprep.subr.bf16.mxu0 %v15409_v52  ;;  %v15436_v29 = vcombine.low %v2909_v22, %v2917_v2  ;;  %v252_v36 = vrot.slane %v251_v32, 1  ;;  %v15419_v52 = vcombine.high %v2055_v19, %v2063_v20  ;;  %v15441_v62 = vcombine.high %v2911_v21, %v2919_v1  ;;  %v18751_v42 = vpop.f32.mrf.mxu1 }
 0x72e   :  { %v253_v51 = vadd.f32 %v252_v36, %v251_v32  ;;  %v3354_v36 = vld [vmem:[#allocation13 + $0x198] sm:$0xff] }
 0x730   :  { %17059 = vpush %v253_v51  ;;  %v3806_v51 = vld [vmem:[#allocation13 + $0x250] sm:$0xff] }
 0x731   :  { %15401 = vmatmul.mubr.msk.bf16.vlgmr.msra.gmra.mxu1 %vm2164_vm5, %v18696_v39  ;;  %15406 = vmatmul.mubr.msk.bf16.vlgmr.msra.gmra.mxu0 %vm2164_vm5, %v18696_v39 }
 0x732   :  { %2265 = vmatpush1.bf16.msra.mxu1 %v15388_v41  ;;  %2594 = vmatpush1.bf16.msra.mxu0 %v15408_v45  ;;  %v2921_v41 = vld [vmem:[#allocation13 + $0x170] sm:$0xff]  ;;  %v15418_v45 = vcombine.low %v2055_v19, %v2063_v20  ;;  %v3360_v19 = vld [vmem:[#allocation13 + $0x1c8] sm:$0xff]  ;;  %v3796_v20 = vld [vmem:[#allocation13 + $0x200] sm:$0xff] }
 0x733   :  { %2282 = vmatprep.mubr.bf16.mxu1 %v17678_v0  ;;  %2611 = vmatprep.mubr.bf16.mxu0 %v17678_v0  ;;  %v15445_v40 = vcombine.high %v2913_v35, %v2921_v41  ;;  %v15444_v9 = vcombine.low %v2913_v35, %v2921_v41 }
 0x734   :  { %2305 = vmatprep.subr.bf16.mxu1 %v15391_v16  ;;  %2675 = vmatprep.subr.bf16.mxu0 %v15413_v24  ;;  %v15440_v16 = vcombine.low %v2911_v21, %v2919_v1  ;;  %v15423_v24 = vcombine.high %v2057_v50, %v2065_v61  ;;  %v3804_v21 = vld [vmem:[#allocation13 + $0x240] sm:$0xff] }
 0x735   :  { %v15480_v35 = vcombine.low %v3796_v20, %v3804_v21 }
 0x739   :  { %15402 = vmatmul.mubr.msk.bf16.vlgmr.msra.gmra.mxu1 %vm2164_vm5, %v18696_v39  ;;  %15424 = vmatmul.mubr.msk.bf16.vlgmr.msra.gmra.mxu0 %vm2164_vm5, %v18693_v25 }
 0x73a   :  { %2306 = vmatpush1.bf16.msra.mxu1 %v15390_v56  ;;  %2676 = vmatpush1.bf16.msra.mxu0 %v15412_v30  ;;  %v3351_v56 = vld [vmem:[#allocation13 + $0x180] sm:$0xff] }
 0x73b   :  { %2323 = vmatprep.mubr.bf16.mxu1 %v17678_v0  ;;  %2693 = vmatprep.mubr.bf16.mxu0 %v17678_v0  ;;  %v3359_v30 = vld [vmem:[#allocation13 + $0x1c0] sm:$0xff] }
 0x73c   :  { %2387 = vmatprep.subr.bf16.mxu1 %v15395_v37  ;;  %2757 = vmatprep.subr.bf16.mxu0 %v15417_v3  ;;  %v17058_v37 = vpop.f32.mrf.mxu1  ;;  %v15422_v3 = vcombine.low %v2057_v50, %v2065_v61  ;;  %v15457_v43 = vcombine.high %v3351_v56, %v3359_v30  ;;  %v15456_v63 = vcombine.low %v3351_v56, %v3359_v30  ;;  %v3800_v56 = vld [vmem:[#allocation13 + $0x220] sm:$0xff] }
 0x73d   :  { %v15458_v61 = vcombine.low %v3352_v46, %v3360_v19 }
 0x741   :  { %15403 = vmatmul.mubr.msk.bf16.vlgmr.msra.gmra.mxu1 %vm2164_vm5, %v18696_v39  ;;  %15426 = vmatmul.mubr.msk.bf16.vlgmr.msra.gmra.mxu0 %vm2164_vm5, %v18693_v25 }
 0x742   :  { %2388 = vmatpush1.bf16.msra.mxu1 %v15394_v54  ;;  %2758 = vmatpush1.bf16.msra.mxu0 %v15416_v17  ;;  %v2918_v54 = vld [vmem:[#allocation13 + $0x158] sm:$0xff]  ;;  %v3353_v17 = vld [vmem:[#allocation13 + $0x190] sm:$0xff] }
 0x743   :  { %2405 = vmatprep.mubr.bf16.mxu1 %v17678_v0  ;;  %2775 = vmatprep.mubr.bf16.mxu0 %v17678_v0  ;;  %v15439_v48 = vcombine.high %v2910_v55, %v2918_v54 }
 0x744   :  { %2469 = vmatprep.subr.bf16.mxu1 %v15399_v38  ;;  %2839 = vmatprep.subr.bf16.mxu0 %v15421_v34  ;;  %v3361_v38 = vld [vmem:[#allocation13 + $0x1d0] sm:$0xff]  ;;  %v15434_v34 = vcombine.low %v2908_v49, %v2916_v59  ;;  %v3356_v49 = vld [vmem:[#allocation13 + $0x1a8] sm:$0xff]  ;;  %v18795_v59 = vpack.c.bf16 %v18698_v4, %v18698_v4 }
 0x745   :  { %v15461_v44 = vcombine.high %v3353_v17, %v3361_v38  ;;  %v15460_v8 = vcombine.low %v3353_v17, %v3361_v38  ;;  %v3366_v17 = vld [vmem:[#allocation13 + $0x1f8] sm:$0xff]  ;;  %v3802_v38 = vld [vmem:[#allocation13 + $0x230] sm:$0xff] }
 0x749   :  { %15405 = vmatmul.mubr.msk.bf16.vlgmr.msra.gmra.mxu1 %vm2164_vm5, %v18696_v39  ;;  %15428 = vmatmul.mubr.msk.bf16.vlgmr.msra.gmra.mxu0 %vm2164_vm5, %v18693_v25 }
 0x74a   :  { %2470 = vmatpush1.bf16.msra.mxu1 %v15398_v53  ;;  %2840 = vmatpush1.bf16.msra.mxu0 %v15420_v57  ;;  %v2920_v53 = vld [vmem:[#allocation13 + $0x168] sm:$0xff]  ;;  %v3355_v57 = vld [vmem:[#allocation13 + $0x1a0] sm:$0xff] }
 0x74b   :  { %2487 = vmatprep.mubr.bf16.mxu1 %v17678_v0  ;;  %2857 = vmatprep.mubr.bf16.mxu0 %v17678_v0  ;;  %v15443_v22 = vcombine.high %v2912_v47, %v2920_v53  ;;  %v15442_v12 = vcombine.low %v2912_v47, %v2920_v53  ;;  %v3797_v53 = vld [vmem:[#allocation13 + $0x208] sm:$0xff] }
 0x74c   :  { %2634 = vmatprep.subr.bf16.mxu1 %v15411_v23  ;;  %3021 = vmatprep.subr.bf16.mxu0 %v15433_v58  ;;  %v3363_v23 = vld [vmem:[#allocation13 + $0x1e0] sm:$0xff]  ;;  %v15438_v58 = vcombine.low %v2910_v55, %v2918_v54 }
 0x74d   :  { %v15465_v2 = vcombine.high %v3355_v57, %v3363_v23 }
 0x751   :  { %15407 = vmatmul.mubr.msk.bf16.vlgmr.msra.gmra.mxu1 %vm2164_vm5, %v18696_v39  ;;  %15430 = vmatmul.mubr.msk.bf16.vlgmr.msra.gmra.mxu0 %vm2164_vm5, %v18693_v25  ;;  %v18737_v39 = vrot.slane %v18693_v25, 2 }
 0x752   :  { %2635 = vmatpush1.bf16.msra.mxu1 %v15410_v6  ;;  %3022 = vmatpush1.bf16.msra.mxu0 %v15432_v7  ;;  %v2914_v6 = vld [vmem:[#allocation13 + $0x138] sm:$0xff] }
 0x753   :  { %2652 = vmatprep.mubr.bf16.mxu1 %v17678_v0  ;;  %3039 = vmatprep.mubr.bf16.mxu0 %v17678_v0  ;;  %v2922_v7 = vld [vmem:[#allocation13 + $0x178] sm:$0xff] }
 0x754   :  { %2716 = vmatprep.subr.bf16.mxu1 %v15415_v15  ;;  %3103 = vmatprep.subr.bf16.mxu0 %v15437_v10  ;;  %v15464_v15 = vcombine.low %v3355_v57, %v3363_v23  ;;  %v15447_v10 = vcombine.high %v2914_v6, %v2922_v7  ;;  %v15446_v1 = vcombine.low %v2914_v6, %v2922_v7  ;;  %v3805_v57 = vld [vmem:[#allocation13 + $0x248] sm:$0xff]  ;;  %v4239_v23 = vld [vmem:[#allocation13 + $0x280] sm:$0xff]  ;;  %v3799_v7 = vld [vmem:[#allocation13 + $0x218] sm:$0xff] }
 0x759   :  { %15425 = vmatmul.mubr.msk.bf16.vlgmr.msra.gmra.mxu1 %vm2164_vm5, %v18693_v25  ;;  %15448 = vmatmul.mubr.msk.bf16.vlgmr.msra.gmra.mxu0 %vm2164_vm5, %v18737_v39 }
 0x75a   :  { %2717 = vmatpush1.bf16.msra.mxu1 %v15414_v28  ;;  %3104 = vmatpush1.bf16.msra.mxu0 %v15436_v29  ;;  %v15459_v28 = vcombine.high %v3352_v46, %v3360_v19  ;;  %v15481_v29 = vcombine.high %v3796_v20, %v3804_v21  ;;  %v3801_v19 = vld [vmem:[#allocation13 + $0x228] sm:$0xff]  ;;  %v18825_v20 = vrot.slane %v18795_v59, 1 }
 0x75b   :  { %2734 = vmatprep.mubr.bf16.mxu1 %v17678_v0  ;;  %3121 = vmatprep.mubr.bf16.mxu0 %v17678_v0  ;;  %v3809_v21 = vld [vmem:[#allocation13 + $0x268] sm:$0xff] }
 0x75c   :  { %2798 = vmatprep.subr.bf16.mxu1 %v15419_v52  ;;  %3185 = vmatprep.subr.bf16.mxu0 %v15441_v62  ;;  %v3362_v52 = vld [vmem:[#allocation13 + $0x1d8] sm:$0xff]  ;;  %v3798_v62 = vld [vmem:[#allocation13 + $0x210] sm:$0xff] }
 0x75d   :  { %v15462_v37 = vcombine.low %v3354_v36, %v3362_v52 }
 0x761   :  { %15427 = vmatmul.mubr.msk.bf16.vlgmr.msra.gmra.mxu1 %vm2164_vm5, %v18693_v25  ;;  %15450 = vmatmul.mubr.msk.bf16.vlgmr.msra.gmra.mxu0 %vm2164_vm5, %v18737_v39  ;;  %s17060_s5 = spop %17059 }
 0x762   :  { %2799 = vmatpush1.bf16.msra.mxu1 %v15418_v45  ;;  %3186 = vmatpush1.bf16.msra.mxu0 %v15440_v16  ;;  %v255_v50 = vstv %s17060_s5  ;;  %v15463_v45 = vcombine.high %v3354_v36, %v3362_v52  ;;  %v15485_v16 = vcombine.high %v3798_v62, %v3806_v51  ;;  %v3803_v52 = vld [vmem:[#allocation13 + $0x238] sm:$0xff] }
 0x763   :  { %2816 = vmatprep.mubr.bf16.mxu1 %v17678_v0  ;;  %3203 = vmatprep.mubr.bf16.mxu0 %v17678_v0  ;;  %v256_v41 = vmul.f32 0.001953125, %v255_v50  ;;  %v4253_v50 = vld [vmem:[#allocation13 + $0x2f0] sm:$0xff] }
 0x764   :  { %2880 = vmatprep.subr.bf16.mxu1 %v15423_v24  ;;  %3267 = vmatprep.subr.bf16.mxu0 %v15445_v40 }
 0x765   :  { %v257_v24 = vsub.f32 %v18687_v14, %v256_v41  ;;  %v3364_v14 = vld [vmem:[#allocation13 + $0x1e8] sm:$0xff] }
 0x767   :  { %v258_v40 = vmul.f32 %v257_v24, %v257_v24  ;;  %v4248_v24 = vld [vmem:[#allocation13 + $0x2c8] sm:$0xff] }
 0x769   :  { %15429 = vmatmul.mubr.msk.bf16.vlgmr.msra.gmra.mxu1 %vm2164_vm5, %v18693_v25  ;;  %15452 = vmatmul.mubr.msk.bf16.vlgmr.msra.gmra.mxu0 %vm2164_vm5, %v18737_v39  ;;  %v266_v30 = vrot.slane %v258_v40, %v18685_v13  ;;  %v3358_v13 = vld [vmem:[#allocation13 + $0x1b8] sm:$0xff]  ;;  %v4684_v40 = vld [vmem:[#allocation13 + $0x300] sm:$0xff] }
 0x76a   :  { %2881 = vmatpush1.bf16.msra.mxu1 %v15422_v3  ;;  %3268 = vmatpush1.bf16.msra.mxu0 %v15444_v9  ;;  %v15484_v3 = vcombine.low %v3798_v62, %v3806_v51  ;;  %v3811_v62 = vld [vmem:[#allocation13 + $0x278] sm:$0xff]  ;;  %v4245_v51 = vld [vmem:[#allocation13 + $0x2b0] sm:$0xff] }
 0x76b   :  { %2898 = vmatprep.mubr.bf16.mxu1 %v17678_v0  ;;  %3285 = vmatprep.mubr.bf16.mxu0 %v17678_v0  ;;  %v267_v9 = vcombine.high %v266_v30, %v266_v30  ;;  %v270_v55 = vsel %vm242_vm4, %v266_v30, 0.0  ;;  %v15495_v41 = vcombine.high %v3803_v52, %v3811_v62 }
 0x76c   :  { %3062 = vmatprep.subr.bf16.mxu1 %v15435_v18  ;;  %3465 = vmatprep.subr.bf16.mxu0 %v15457_v43  ;;  %v15467_v18 = vcombine.high %v3356_v49, %v3364_v14 }
 0x76d   :  { %v271_v4 = vsel %vm242_vm4, %v267_v9, 0.0  ;;  %v4686_v9 = vld [vmem:[#allocation13 + $0x310] sm:$0xff] }
 0x76e   :  { %v272_v54 = vadd.f32 %v271_v4, %v270_v55 }
 0x770   :  { %273 = vadd.xlane.f32.xlu0 %v272_v54 }
 0x771   :  { %15431 = vmatmul.mubr.msk.bf16.vlgmr.msra.gmra.mxu1 %vm2164_vm5, %v18693_v25  ;;  %15454 = vmatmul.mubr.msk.bf16.vlgmr.msra.gmra.mxu0 %vm2164_vm5, %v18737_v39  ;;  %v3357_v25 = vld [vmem:[#allocation13 + $0x1b0] sm:$0xff] }
 0x772   :  { %3063 = vmatpush1.bf16.msra.mxu1 %v15434_v34  ;;  %3466 = vmatpush1.bf16.msra.mxu0 %v15456_v63  ;;  %v15469_v60 = vcombine.high %v3357_v25, %v3365_v11  ;;  %v15468_v32 = vcombine.low %v3357_v25, %v3365_v11  ;;  %v3810_v34 = vld [vmem:[#allocation13 + $0x270] sm:$0xff]  ;;  %v15466_v63 = vcombine.low %v3356_v49, %v3364_v14  ;;  %v3807_v25 = vld [vmem:[#allocation13 + $0x258] sm:$0xff]  ;;  %v4692_v49 = vld [vmem:[#allocation13 + $0x340] sm:$0xff] }
 0x773   :  { %3080 = vmatprep.mubr.bf16.mxu1 %v17678_v0  ;;  %3483 = vmatprep.mubr.bf16.mxu0 %v17678_v0  ;;  %v15493_v47 = vcombine.high %v3802_v38, %v3810_v34  ;;  %v4241_v11 = vld [vmem:[#allocation13 + $0x290] sm:$0xff]  ;;  %v15494_v14 = vcombine.low %v3803_v52, %v3811_v62  ;;  %v15529_v30 = vcombine.high %v4684_v40, %v4692_v49  ;;  %v4695_v52 = vld [vmem:[#allocation13 + $0x358] sm:$0xff] }
 0x774   :  { %3144 = vmatprep.subr.bf16.mxu1 %v15439_v48  ;;  %3547 = vmatprep.subr.bf16.mxu0 %v15461_v44  ;;  %v15471_v44 = vcombine.high %v3358_v13, %v3366_v17  ;;  %v15528_v55 = vcombine.low %v4684_v40, %v4692_v49  ;;  %v5130_v62 = vld [vmem:[#allocation13 + $0x390] sm:$0xff] }
 0x779   :  { %15449 = vmatmul.mubr.msk.bf16.vlgmr.msra.gmra.mxu1 %vm2164_vm5, %v18737_v39  ;;  %15472 = vmatmul.mubr.msk.bf16.vlgmr.msra.gmra.mxu0 %vm2164_vm5, %v18766_v5 }
 0x77a   :  { %3145 = vmatpush1.bf16.msra.mxu1 %v15438_v58  ;;  %3548 = vmatpush1.bf16.msra.mxu0 %v15460_v8  ;;  %v4247_v58 = vld [vmem:[#allocation13 + $0x2c0] sm:$0xff]  ;;  %v15470_v8 = vcombine.low %v3358_v13, %v3366_v17  ;;  %v4244_v13 = vld [vmem:[#allocation13 + $0x2a8] sm:$0xff] }
 0x77b   :  { %3162 = vmatprep.mubr.bf16.mxu1 %v17678_v0  ;;  %3565 = vmatprep.mubr.bf16.mxu0 %v17678_v0  ;;  %v15505_v6 = vcombine.high %v4239_v23, %v4247_v58  ;;  %v4252_v17 = vld [vmem:[#allocation13 + $0x2e8] sm:$0xff] }
 0x77c   :  { %3226 = vmatprep.subr.bf16.mxu1 %v15443_v22  ;;  %3629 = vmatprep.subr.bf16.mxu0 %v15465_v2  ;;  %v15492_v22 = vcombine.low %v3802_v38, %v3810_v34  ;;  %v15483_v2 = vcombine.high %v3797_v53, %v3805_v57  ;;  %v4688_v38 = vld [vmem:[#allocation13 + $0x320] sm:$0xff] }
 0x77d   :  { %v4696_v34 = vld [vmem:[#allocation13 + $0x360] sm:$0xff] }
 0x781   :  { %15451 = vmatmul.mubr.msk.bf16.vlgmr.msra.gmra.mxu1 %vm2164_vm5, %v18737_v39  ;;  %15474 = vmatmul.mubr.msk.bf16.vlgmr.msra.gmra.mxu0 %vm2164_vm5, %v18766_v5 }
 0x782   :  { %3227 = vmatpush1.bf16.msra.mxu1 %v15442_v12  ;;  %3630 = vmatpush1.bf16.msra.mxu0 %v15464_v15  ;;  %v4249_v12 = vld [vmem:[#allocation13 + $0x2d0] sm:$0xff]  ;;  %v15482_v15 = vcombine.low %v3797_v53, %v3805_v57  ;;  %v15537_v53 = vcombine.high %v4688_v38, %v4696_v34  ;;  %v4246_v57 = vld [vmem:[#allocation13 + $0x2b8] sm:$0xff] }
 0x783   :  { %3244 = vmatprep.mubr.bf16.mxu1 %v17678_v0  ;;  %3647 = vmatprep.mubr.bf16.mxu0 %v17678_v0  ;;  %v15509_v46 = vcombine.high %v4241_v11, %v4249_v12 }
 0x784   :  { %3308 = vmatprep.subr.bf16.mxu1 %v15447_v10  ;;  %3711 = vmatprep.subr.bf16.mxu0 %v15469_v60  ;;  %v15504_v10 = vcombine.low %v4239_v23, %v4247_v58  ;;  %v15487_v60 = vcombine.high %v3799_v7, %v3807_v25  ;;  %v4254_v23 = vld [vmem:[#allocation13 + $0x2f8] sm:$0xff]  ;;  %v4690_v58 = vld [vmem:[#allocation13 + $0x330] sm:$0xff] }
 0x789   :  { %15453 = vmatmul.mubr.msk.bf16.vlgmr.msra.gmra.mxu1 %vm2164_vm5, %v18737_v39  ;;  %15476 = vmatmul.mubr.msk.bf16.vlgmr.msra.gmra.mxu0 %vm2164_vm5, %v18766_v5 }
 0x78a   :  { %3309 = vmatpush1.bf16.msra.mxu1 %v15446_v1  ;;  %3712 = vmatpush1.bf16.msra.mxu0 %v15468_v32  ;;  %v4243_v1 = vld [vmem:[#allocation13 + $0x2a0] sm:$0xff] }
 0x78b   :  { %3326 = vmatprep.mubr.bf16.mxu1 %v17678_v0  ;;  %3729 = vmatprep.mubr.bf16.mxu0 %v17678_v0  ;;  %v4251_v32 = vld [vmem:[#allocation13 + $0x2e0] sm:$0xff] }
 0x78c   :  { %3506 = vmatprep.subr.bf16.mxu1 %v15459_v28  ;;  %3909 = vmatprep.subr.bf16.mxu0 %v15481_v29  ;;  %v15486_v28 = vcombine.low %v3799_v7, %v3807_v25  ;;  %v15491_v29 = vcombine.high %v3801_v19, %v3809_v21  ;;  %v15513_v36 = vcombine.high %v4243_v1, %v4251_v32  ;;  %v4685_v25 = vld [vmem:[#allocation13 + $0x308] sm:$0xff] }
 0x791   :  { %15455 = vmatmul.mubr.msk.bf16.vlgmr.msra.gmra.mxu1 %vm2164_vm5, %v18737_v39  ;;  %15478 = vmatmul.mubr.msk.bf16.vlgmr.msra.gmra.mxu0 %vm2164_vm5, %v18766_v5  ;;  %v3808_v39 = vld [vmem:[#allocation13 + $0x260] sm:$0xff] }
 0x792   :  { %3507 = vmatpush1.bf16.msra.mxu1 %v15458_v61  ;;  %3910 = vmatpush1.bf16.msra.mxu0 %v15480_v35  ;;  %v15489_v43 = vcombine.high %v3800_v56, %v3808_v39  ;;  %v15488_v48 = vcombine.low %v3800_v56, %v3808_v39  ;;  %v15490_v61 = vcombine.low %v3801_v19, %v3809_v21 }
 0x793   :  { %3524 = vmatprep.mubr.bf16.mxu1 %v17678_v0  ;;  %3927 = vmatprep.mubr.bf16.mxu0 %v17678_v0  ;;  %v15512_v35 = vcombine.low %v4243_v1, %v4251_v32  ;;  %v15516_v56 = vcombine.low %v4245_v51, %v4253_v50 }
 0x794   :  { %3588 = vmatprep.subr.bf16.mxu1 %v15463_v45  ;;  %3991 = vmatprep.subr.bf16.mxu0 %v15485_v16  ;;  %v15517_v45 = vcombine.high %v4245_v51, %v4253_v50  ;;  %v4240_v16 = vld [vmem:[#allocation13 + $0x288] sm:$0xff]  ;;  %v5138_v51 = vld [vmem:[#allocation13 + $0x3d0] sm:$0xff] }
 0x795   :  { %v15507_v39 = vcombine.high %v4240_v16, %v4248_v24 }
 0x799   :  { %15473 = vmatmul.mubr.msk.bf16.vlgmr.msra.gmra.mxu1 %vm2164_vm5, %v18766_v5  ;;  %15496 = vmatmul.mubr.msk.bf16.vlgmr.msra.gmra.mxu0 %vm2164_vm5, %v18795_v59 }
 0x79a   :  { %3589 = vmatpush1.bf16.msra.mxu1 %v15462_v37  ;;  %3992 = vmatpush1.bf16.msra.mxu0 %v15484_v3  ;;  %v4242_v37 = vld [vmem:[#allocation13 + $0x298] sm:$0xff] }
 0x79b   :  { %3606 = vmatprep.mubr.bf16.mxu1 %v17678_v0  ;;  %4009 = vmatprep.mubr.bf16.mxu0 %v17678_v0  ;;  %v4250_v3 = vld [vmem:[#allocation13 + $0x2d8] sm:$0xff] }
 0x79c   :  { %3670 = vmatprep.subr.bf16.mxu1 %v15467_v18  ;;  %4073 = vmatprep.subr.bf16.mxu0 %v15489_v43  ;;  %v4694_v18 = vld [vmem:[#allocation13 + $0x350] sm:$0xff]  ;;  %v15506_v43 = vcombine.low %v4240_v16, %v4248_v24  ;;  %v15511_v4 = vcombine.high %v4242_v37, %v4250_v3  ;;  %v15557_v16 = vcombine.high %v5130_v62, %v5138_v51 }
 0x79d   :  { %v15533_v54 = vcombine.high %v4686_v9, %v4694_v18 }
 0x7a1   :  { %15475 = vmatmul.mubr.msk.bf16.vlgmr.msra.gmra.mxu1 %vm2164_vm5, %v18766_v5  ;;  %15498 = vmatmul.mubr.msk.bf16.vlgmr.msra.gmra.mxu0 %vm2164_vm5, %v18795_v59 }
 0x7a2   :  { %3671 = vmatpush1.bf16.msra.mxu1 %v15466_v63  ;;  %4074 = vmatpush1.bf16.msra.mxu0 %v15488_v48  ;;  %v15510_v63 = vcombine.low %v4242_v37, %v4250_v3  ;;  %v15532_v48 = vcombine.low %v4686_v9, %v4694_v18  ;;  %v4697_v37 = vld [vmem:[#allocation13 + $0x368] sm:$0xff]  ;;  %v5140_v3 = vld [vmem:[#allocation13 + $0x3e0] sm:$0xff]  ;;  %v15556_v18 = vcombine.low %v5130_v62, %v5138_v51 }
 0x7a3   :  { %3688 = vmatprep.mubr.bf16.mxu1 %v17678_v0  ;;  %4091 = vmatprep.mubr.bf16.mxu0 %v17678_v0 }
 0x7a4   :  { %3752 = vmatprep.subr.bf16.mxu1 %v15471_v44  ;;  %4155 = vmatprep.subr.bf16.mxu0 %v15493_v47  ;;  %v18852_v44 = vrot.slane %v18795_v59, 2  ;;  %v15515_v47 = vcombine.high %v4244_v13, %v4252_v17 }
 0x7a9   :  { %15477 = vmatmul.mubr.msk.bf16.vlgmr.msra.gmra.mxu1 %vm2164_vm5, %v18766_v5  ;;  %15500 = vmatmul.mubr.msk.bf16.vlgmr.msra.gmra.mxu0 %vm2164_vm5, %v18795_v59 }
 0x7aa   :  { %3753 = vmatpush1.bf16.msra.mxu1 %v15470_v8  ;;  %4156 = vmatpush1.bf16.msra.mxu0 %v15492_v22  ;;  %v4698_v8 = vld [vmem:[#allocation13 + $0x370] sm:$0xff]  ;;  %v15514_v22 = vcombine.low %v4244_v13, %v4252_v17 }
 0x7ab   :  { %3770 = vmatprep.mubr.bf16.mxu1 %v17678_v0  ;;  %4173 = vmatprep.mubr.bf16.mxu0 %v17678_v0  ;;  %v15541_v7 = vcombine.high %v4690_v58, %v4698_v8 }
 0x7ac   :  { %3950 = vmatprep.subr.bf16.mxu1 %v15483_v2  ;;  %4354 = vmatprep.subr.bf16.mxu0 %v15505_v6  ;;  %v15536_v2 = vcombine.low %v4688_v38, %v4696_v34  ;;  %v15519_v6 = vcombine.high %v4246_v57, %v4254_v23 }
 0x7b1   :  { %15479 = vmatmul.mubr.msk.bf16.vlgmr.msra.gmra.mxu1 %vm2164_vm5, %v18766_v5  ;;  %15502 = vmatmul.mubr.msk.bf16.vlgmr.msra.gmra.mxu0 %vm2164_vm5, %v18795_v59  ;;  %v15508_v5 = vcombine.low %v4241_v11, %v4249_v12  ;;  %v4693_v11 = vld [vmem:[#allocation13 + $0x348] sm:$0xff]  ;;  %v5128_v12 = vld [vmem:[#allocation13 + $0x380] sm:$0xff] }
 0x7b2   :  { %3951 = vmatpush1.bf16.msra.mxu1 %v15482_v15  ;;  %4355 = vmatpush1.bf16.msra.mxu0 %v15504_v10  ;;  %v5136_v15 = vld [vmem:[#allocation13 + $0x3c0] sm:$0xff]  ;;  %v15518_v10 = vcombine.low %v4246_v57, %v4254_v23  ;;  %v15530_v50 = vcombine.low %v4685_v25, %v4693_v11  ;;  %v4699_v23 = vld [vmem:[#allocation13 + $0x378] sm:$0xff] }
 0x7b3   :  { %3968 = vmatprep.mubr.bf16.mxu1 %v17678_v0  ;;  %4372 = vmatprep.mubr.bf16.mxu0 %v17678_v0  ;;  %v15553_v19 = vcombine.high %v5128_v12, %v5136_v15 }
 0x7b4   :  { %4032 = vmatprep.subr.bf16.mxu1 %v15487_v60  ;;  %4436 = vmatprep.subr.bf16.mxu0 %v15509_v46  ;;  %v15540_v60 = vcombine.low %v4690_v58, %v4698_v8  ;;  %v15531_v46 = vcombine.high %v4685_v25, %v4693_v11  ;;  %v5134_v58 = vld [vmem:[#allocation13 + $0x3b0] sm:$0xff] }
 0x7b5   :  { %v5142_v8 = vld [vmem:[#allocation13 + $0x3f0] sm:$0xff] }
 0x7b6   :  { %v15565_v11 = vcombine.high %v5134_v58, %v5142_v8  ;;  %v15564_v51 = vcombine.low %v5134_v58, %v5142_v8 }
 0x7b9   :  { %15497 = vmatmul.mubr.msk.bf16.vlgmr.msra.gmra.mxu1 %vm2164_vm5, %v18795_v59  ;;  %15520 = vmatmul.mubr.msk.bf16.vlgmr.msra.gmra.mxu0 %vm2164_vm5, %v18825_v20 }
 0x7ba   :  { %4033 = vmatpush1.bf16.msra.mxu1 %v15486_v28  ;;  %4437 = vmatpush1.bf16.msra.mxu0 %v15508_v5  ;;  %v4687_v5 = vld [vmem:[#allocation13 + $0x318] sm:$0xff] }
 0x7bb   :  { %4050 = vmatprep.mubr.bf16.mxu1 %v17678_v0  ;;  %4454 = vmatprep.mubr.bf16.mxu0 %v17678_v0  ;;  %v15534_v9 = vcombine.low %v4687_v5, %v4695_v52 }
 0x7bc   :  { %4114 = vmatprep.subr.bf16.mxu1 %v15491_v29  ;;  %4518 = vmatprep.subr.bf16.mxu0 %v15513_v36 }
 0x7c1   :  { %15499 = vmatmul.mubr.msk.bf16.vlgmr.msra.gmra.mxu1 %vm2164_vm5, %v18795_v59  ;;  %15522 = vmatmul.mubr.msk.bf16.vlgmr.msra.gmra.mxu0 %vm2164_vm5, %v18825_v20 }
 0x7c2   :  { %4115 = vmatpush1.bf16.msra.mxu1 %v15490_v61  ;;  %4519 = vmatpush1.bf16.msra.mxu0 %v15512_v35  ;;  %v15552_v61 = vcombine.low %v5128_v12, %v5136_v15 }
 0x7c3   :  { %4132 = vmatprep.mubr.bf16.mxu1 %v17678_v0  ;;  %4536 = vmatprep.mubr.bf16.mxu0 %v17678_v0 }
 0x7c4   :  { %4196 = vmatprep.subr.bf16.mxu1 %v15495_v41  ;;  %4600 = vmatprep.subr.bf16.mxu0 %v15517_v45  ;;  %v15535_v45 = vcombine.high %v4687_v5, %v4695_v52  ;;  %v5581_v52 = vld [vmem:[#allocation13 + $0x440] sm:$0xff] }
 0x7c9   :  { %15501 = vmatmul.mubr.msk.bf16.vlgmr.msra.gmra.mxu1 %vm2164_vm5, %v18795_v59  ;;  %15524 = vmatmul.mubr.msk.bf16.vlgmr.msra.gmra.mxu0 %vm2164_vm5, %v18825_v20 }
 0x7ca   :  { %4197 = vmatpush1.bf16.msra.mxu1 %v15494_v14  ;;  %4601 = vmatpush1.bf16.msra.mxu0 %v15516_v56  ;;  %v4689_v56 = vld [vmem:[#allocation13 + $0x328] sm:$0xff] }
 0x7cb   :  { %4214 = vmatprep.mubr.bf16.mxu1 %v17678_v0  ;;  %4618 = vmatprep.mubr.bf16.mxu0 %v17678_v0 }
 0x7cc   :  { %4395 = vmatprep.subr.bf16.mxu1 %v15507_v39  ;;  %4798 = vmatprep.subr.bf16.mxu0 %v15529_v30 }
 0x7d1   :  { %15503 = vmatmul.mubr.msk.bf16.vlgmr.msra.gmra.mxu1 %vm2164_vm5, %v18795_v59  ;;  %15526 = vmatmul.mubr.msk.bf16.vlgmr.msra.gmra.mxu0 %vm2164_vm5, %v18825_v20 }
 0x7d2   :  { %4396 = vmatpush1.bf16.msra.mxu1 %v15506_v43  ;;  %4799 = vmatpush1.bf16.msra.mxu0 %v15528_v55 }
 0x7d3   :  { %4413 = vmatprep.mubr.bf16.mxu1 %v17678_v0  ;;  %4816 = vmatprep.mubr.bf16.mxu0 %v17678_v0 }
 0x7d4   :  { %4477 = vmatprep.subr.bf16.mxu1 %v15511_v4  ;;  %4880 = vmatprep.subr.bf16.mxu0 %v15533_v54  ;;  %v18891_v4 = vrot.slane %v18795_v59, 3  ;;  %v15539_v54 = vcombine.high %v4689_v56, %v4697_v37 }
 0x7d9   :  { %15521 = vmatmul.mubr.msk.bf16.vlgmr.msra.gmra.mxu1 %vm2164_vm5, %v18825_v20  ;;  %15544 = vmatmul.mubr.msk.bf16.vlgmr.msra.gmra.mxu0 %vm2164_vm5, %v18852_v44 }
 0x7da   :  { %4478 = vmatpush1.bf16.msra.mxu1 %v15510_v63  ;;  %4881 = vmatpush1.bf16.msra.mxu0 %v15532_v48 }
 0x7db   :  { %4495 = vmatprep.mubr.bf16.mxu1 %v17678_v0  ;;  %4898 = vmatprep.mubr.bf16.mxu0 %v17678_v0 }
 0x7dc   :  { %4559 = vmatprep.subr.bf16.mxu1 %v15515_v47  ;;  %4962 = vmatprep.subr.bf16.mxu0 %v15537_v53  ;;  %v4691_v47 = vld [vmem:[#allocation13 + $0x338] sm:$0xff] }
 0x7dd   :  { %v15543_v25 = vcombine.high %v4691_v47, %v4699_v23  ;;  %v15542_v62 = vcombine.low %v4691_v47, %v4699_v23 }
 0x7e1   :  { %15523 = vmatmul.mubr.msk.bf16.vlgmr.msra.gmra.mxu1 %vm2164_vm5, %v18825_v20  ;;  %15546 = vmatmul.mubr.msk.bf16.vlgmr.msra.gmra.mxu0 %vm2164_vm5, %v18852_v44 }
 0x7e2   :  { %4560 = vmatpush1.bf16.msra.mxu1 %v15514_v22  ;;  %4963 = vmatpush1.bf16.msra.mxu0 %v15536_v2  ;;  %v15538_v22 = vcombine.low %v4689_v56, %v4697_v37 }
 0x7e3   :  { %4577 = vmatprep.mubr.bf16.mxu1 %v17678_v0  ;;  %4980 = vmatprep.mubr.bf16.mxu0 %v17678_v0 }
 0x7e4   :  { %4641 = vmatprep.subr.bf16.mxu1 %v15519_v6  ;;  %5044 = vmatprep.subr.bf16.mxu0 %v15541_v7 }
 0x7e9   :  { %v2202_v21 = vpop.f32.mrf.mxu1  ;;  %v18866_v1 = vpop.f32.mrf.mxu0  ;;  %15525 = vmatmul.mubr.msk.bf16.vlgmr.msra.gmra.mxu1 %vm2164_vm5, %v18825_v20  ;;  %15548 = vmatmul.mubr.msk.bf16.vlgmr.msra.gmra.mxu0 %vm2164_vm5, %v18852_v44 }
 0x7ea   :  { %4642 = vmatpush1.bf16.msra.mxu1 %v15518_v10  ;;  %5045 = vmatpush1.bf16.msra.mxu0 %v15540_v60 }
 0x7eb   :  { %v2204_v32 = vpop.f32.mrf.mxu1  ;;  %v18872_v28 = vpop.f32.mrf.mxu0  ;;  %4659 = vmatprep.mubr.bf16.mxu1 %v17678_v0  ;;  %5062 = vmatprep.mubr.bf16.mxu0 %v17678_v0 }
 0x7ec   :  { %4839 = vmatprep.subr.bf16.mxu1 %v15531_v46  ;;  %5242 = vmatprep.subr.bf16.mxu0 %v15553_v19 }
 0x7ed   :  { %v2206_v29 = vpop.f32.mrf.mxu1  ;;  %v2370_v36 = vpop.f32.mrf.mxu0 }
 0x7ee   :  { %v5137_v29 = vld [vmem:[#allocation13 + $0x3c8] sm:$0xff]  ;;  %v5573_v36 = vld [vmem:[#allocation13 + $0x400] sm:$0xff] }
 0x7ef   :  { %v2207_v35 = vpop.f32.mrf.mxu1  ;;  %v2371_v41 = vpop.f32.mrf.mxu0 }
 0x7f0   :  { %v15577_v41 = vcombine.high %v5573_v36, %v5581_v52 }
 0x7f1   :  { %v18876_v24 = vpop.f32.mrf.mxu1  ;;  %v18878_v40 = vpop.f32.mrf.mxu0  ;;  %15527 = vmatmul.mubr.msk.bf16.vlgmr.msra.gmra.mxu1 %vm2164_vm5, %v18825_v20  ;;  %15550 = vmatmul.mubr.msk.bf16.vlgmr.msra.gmra.mxu0 %vm2164_vm5, %v18852_v44  ;;  %v5132_v20 = vld [vmem:[#allocation13 + $0x3a0] sm:$0xff] }
 0x7f2   :  { %4840 = vmatpush1.bf16.msra.mxu1 %v15530_v50  ;;  %5243 = vmatpush1.bf16.msra.mxu0 %v15552_v61  ;;  %v15561_v13 = vcombine.high %v5132_v20, %v5140_v3  ;;  %v15560_v2 = vcombine.low %v5132_v20, %v5140_v3  ;;  %v5131_v20 = vld [vmem:[#allocation13 + $0x398] sm:$0xff] }
 0x7f3   :  { %v18884_v49 = vpop.f32.mrf.mxu1  ;;  %v18886_v14 = vpop.f32.mrf.mxu0  ;;  %4857 = vmatprep.mubr.bf16.mxu1 %v17678_v0  ;;  %5260 = vmatprep.mubr.bf16.mxu0 %v17678_v0 }
 0x7f4   :  { %4921 = vmatprep.subr.bf16.mxu1 %v15535_v45  ;;  %5324 = vmatprep.subr.bf16.mxu0 %v15557_v16 }
 0x7f5   :  { %v2247_v39 = vpop.f32.mrf.mxu1  ;;  %v2452_v30 = vpop.f32.mrf.mxu0 }
 0x7f7   :  { %v2248_v43 = vpop.f32.mrf.mxu1  ;;  %v2453_v55 = vpop.f32.mrf.mxu0 }
 0x7f8   :  { %v5583_v43 = vld [vmem:[#allocation13 + $0x450] sm:$0xff] }
 0x7f9   :  { %v2284_v17 = vpop.f32.mrf.mxu1  ;;  %v2613_v38 = vpop.f32.mrf.mxu0  ;;  %15545 = vmatmul.mubr.msk.bf16.vlgmr.msra.gmra.mxu1 %vm2164_vm5, %v18852_v44  ;;  %15568 = vmatmul.mubr.msk.bf16.vlgmr.msra.gmra.mxu0 %vm2164_vm5, %v18891_v4 }
 0x7fa   :  { %v18897_v34 = vadd.f32 %v2613_v38, %v2202_v21  ;;  %4922 = vmatpush1.bf16.msra.mxu1 %v15534_v9  ;;  %5325 = vmatpush1.bf16.msra.mxu0 %v15556_v18  ;;  %v5129_v21 = vld [vmem:[#allocation13 + $0x388] sm:$0xff]  ;;  %v5139_v18 = vld [vmem:[#allocation13 + $0x3d8] sm:$0xff] }
 0x7fb   :  { %v2286_v63 = vpop.f32.mrf.mxu1  ;;  %v2615_v48 = vpop.f32.mrf.mxu0  ;;  %4939 = vmatprep.mubr.bf16.mxu1 %v17678_v0  ;;  %5342 = vmatprep.mubr.bf16.mxu0 %v17678_v0  ;;  %v15555_v35 = vcombine.high %v5129_v21, %v5137_v29  ;;  %v15554_v55 = vcombine.low %v5129_v21, %v5137_v29  ;;  %v15559_v38 = vcombine.high %v5131_v20, %v5139_v18 }
 0x7fc   :  { %v18901_v59 = vadd.f32 %v2615_v48, %v2204_v32  ;;  %5003 = vmatprep.subr.bf16.mxu1 %v15539_v54  ;;  %5406 = vmatprep.subr.bf16.mxu0 %v15561_v13  ;;  %v15576_v54 = vcombine.low %v5573_v36, %v5581_v52 }
 0x7fd   :  { %v2288_v53 = vpop.f32.mrf.mxu1  ;;  %v2617_v57 = vpop.f32.mrf.mxu0 }
 0x7ff   :  { %v2289_v6 = vpop.f32.mrf.mxu1  ;;  %v2618_v7 = vpop.f32.mrf.mxu0 }
 0x800   :  { %v15558_v6 = vcombine.low %v5131_v20, %v5139_v18 }
 0x801   :  { %v18903_v12 = vpop.f32.mrf.mxu1  ;;  %v2695_v15 = vpop.f32.mrf.mxu0  ;;  %15547 = vmatmul.mubr.msk.bf16.vlgmr.msra.gmra.mxu1 %vm2164_vm5, %v18852_v44  ;;  %15570 = vmatmul.mubr.msk.bf16.vlgmr.msra.gmra.mxu0 %vm2164_vm5, %v18891_v4 }
 0x802   :  { %v18909_v10 = vadd.f32 %v2695_v15, %v2284_v17  ;;  %5004 = vmatpush1.bf16.msra.mxu1 %v15538_v22  ;;  %5407 = vmatpush1.bf16.msra.mxu0 %v15560_v2  ;;  %v5141_v22 = vld [vmem:[#allocation13 + $0x3e8] sm:$0xff]  ;;  %v5585_v2 = vld [vmem:[#allocation13 + $0x460] sm:$0xff] }
 0x803   :  { %v18911_v60 = vpop.f32.mrf.mxu1  ;;  %v2697_v46 = vpop.f32.mrf.mxu0  ;;  %5021 = vmatprep.mubr.bf16.mxu1 %v17678_v0  ;;  %5424 = vmatprep.mubr.bf16.mxu0 %v17678_v0 }
 0x804   :  { %v18915_v19 = vadd.f32 %v2697_v46, %v2286_v63  ;;  %5085 = vmatprep.subr.bf16.mxu1 %v15543_v25  ;;  %5488 = vmatprep.subr.bf16.mxu0 %v15565_v11  ;;  %v18951_v25 = vpack.c.bf16 %v18751_v42, %v18751_v42 }
 0x805   :  { %v2329_v32 = vpop.f32.mrf.mxu1  ;;  %v2699_v5 = vpop.f32.mrf.mxu0 }
 0x807   :  { %v2330_v50 = vpop.f32.mrf.mxu1  ;;  %v2700_v61 = vpop.f32.mrf.mxu0 }
 0x808   :  { %v5143_v50 = vld [vmem:[#allocation13 + $0x3f8] sm:$0xff]  ;;  %v5579_v61 = vld [vmem:[#allocation13 + $0x430] sm:$0xff] }
 0x809   :  { %v18917_v45 = vpop.f32.mrf.mxu1  ;;  %v2777_v16 = vpop.f32.mrf.mxu0  ;;  %15549 = vmatmul.mubr.msk.bf16.vlgmr.msra.gmra.mxu1 %vm2164_vm5, %v18852_v44  ;;  %15572 = vmatmul.mubr.msk.bf16.vlgmr.msra.gmra.mxu0 %vm2164_vm5, %v18891_v4 }
 0x80a   :  { %v18924_v56 = vadd.f32 %v2777_v16, %v18866_v1  ;;  %5086 = vmatpush1.bf16.msra.mxu1 %v15542_v62  ;;  %5489 = vmatpush1.bf16.msra.mxu0 %v15564_v51  ;;  %v5575_v1 = vld [vmem:[#allocation13 + $0x410] sm:$0xff] }
 0x80b   :  { %v18926_v39 = vpop.f32.mrf.mxu1  ;;  %v2779_v30 = vpop.f32.mrf.mxu0  ;;  %5103 = vmatprep.mubr.bf16.mxu1 %v17678_v0  ;;  %5506 = vmatprep.mubr.bf16.mxu0 %v17678_v0  ;;  %v15581_v63 = vcombine.high %v5575_v1, %v5583_v43  ;;  %v15580_v7 = vcombine.low %v5575_v1, %v5583_v43 }
 0x80c   :  { %v18931_v37 = vadd.f32 %v2779_v30, %v18872_v28  ;;  %5283 = vmatprep.subr.bf16.mxu1 %v15555_v35  ;;  %5686 = vmatprep.subr.bf16.mxu0 %v15577_v41  ;;  %v5587_v35 = vld [vmem:[#allocation13 + $0x470] sm:$0xff] }
 0x80d   :  { %v2411_v3 = vpop.f32.mrf.mxu1  ;;  %v2781_v9 = vpop.f32.mrf.mxu0 }
 0x80e   :  { %v15589_v9 = vcombine.high %v5579_v61, %v5587_v35 }
 0x80f   :  { %v2412_v13 = vpop.f32.mrf.mxu1  ;;  %v2782_v17 = vpop.f32.mrf.mxu0 }
 0x811   :  { %v18933_v48 = vpop.f32.mrf.mxu1  ;;  %v2859_v47 = vpop.f32.mrf.mxu0  ;;  %15551 = vmatmul.mubr.msk.bf16.vlgmr.msra.gmra.mxu1 %vm2164_vm5, %v18852_v44  ;;  %15574 = vmatmul.mubr.msk.bf16.vlgmr.msra.gmra.mxu0 %vm2164_vm5, %v18891_v4  ;;  %v5133_v44 = vld [vmem:[#allocation13 + $0x3a8] sm:$0xff] }
 0x812   :  { %v18940_v28 = vadd.f32 %v2859_v47, %v18878_v40  ;;  %5284 = vmatpush1.bf16.msra.mxu1 %v15554_v55  ;;  %5687 = vmatpush1.bf16.msra.mxu0 %v15576_v54  ;;  %v5577_v40 = vld [vmem:[#allocation13 + $0x420] sm:$0xff]  ;;  %v15563_v46 = vcombine.high %v5133_v44, %v5141_v22  ;;  %v15562_v41 = vcombine.low %v5133_v44, %v5141_v22 }
 0x813   :  { %v18942_v53 = vpop.f32.mrf.mxu1  ;;  %v2861_v57 = vpop.f32.mrf.mxu0  ;;  %5301 = vmatprep.mubr.bf16.mxu1 %v17678_v0  ;;  %5704 = vmatprep.mubr.bf16.mxu0 %v17678_v0  ;;  %v15585_v21 = vcombine.high %v5577_v40, %v5585_v2  ;;  %v15584_v16 = vcombine.low %v5577_v40, %v5585_v2  ;;  %v6024_v47 = vld [vmem:[#allocation13 + $0x4c0] sm:$0xff]  ;;  %v15588_v44 = vcombine.low %v5579_v61, %v5587_v35 }
 0x814   :  { %v18947_v23 = vadd.f32 %v2861_v57, %v18886_v14  ;;  %5365 = vmatprep.subr.bf16.mxu1 %v15559_v38  ;;  %5768 = vmatprep.subr.bf16.mxu0 %v15581_v63  ;;  %v5582_v38 = vld [vmem:[#allocation13 + $0x448] sm:$0xff]  ;;  %v6016_v63 = vld [vmem:[#allocation13 + $0x480] sm:$0xff] }
 0x815   :  { %v2493_v58 = vpop.f32.mrf.mxu1  ;;  %v2863_v8 = vpop.f32.mrf.mxu0  ;;  %v15600_v35 = vcombine.low %v6016_v63, %v6024_v47 }
 0x816   :  { %v274_v58 = vpop.xlane.xlu0 %273 }
 0x817   :  { %v2494_v11 = vpop.f32.mrf.mxu1  ;;  %v2864_v15 = vpop.f32.mrf.mxu0  ;;  %v275_v40 = vrot.slane %v274_v58, 4 }
 0x819   :  { %v2654_v14 = vpop.f32.mrf.mxu1  ;;  %v3041_v32 = vpop.f32.mrf.mxu0  ;;  %15569 = vmatmul.mubr.msk.bf16.vlgmr.msra.gmra.mxu1 %vm2164_vm5, %v18891_v4  ;;  %15592 = vmatmul.mubr.msk.bf16.vlgmr.msra.gmra.mxu0 %vm2164_vm5, %v18951_v25 }
 0x81a   :  { %v18958_v5 = vadd.f32 %v2654_v14, %v18876_v24  ;;  %v18961_v29 = vadd.f32 %v3041_v32, %v18897_v34  ;;  %5366 = vmatpush1.bf16.msra.mxu1 %v15558_v6  ;;  %5769 = vmatpush1.bf16.msra.mxu0 %v15580_v7  ;;  %v5135_v24 = vld [vmem:[#allocation13 + $0x3b8] sm:$0xff] }
 0x81b   :  { %v2656_v42 = vpop.f32.mrf.mxu1  ;;  %v3043_v36 = vpop.f32.mrf.mxu0  ;;  %5383 = vmatprep.mubr.bf16.mxu1 %v17678_v0  ;;  %5786 = vmatprep.mubr.bf16.mxu0 %v17678_v0  ;;  %v15567_v3 = vcombine.high %v5135_v24, %v5143_v50  ;;  %v15566_v57 = vcombine.low %v5135_v24, %v5143_v50  ;;  %v5584_v24 = vld [vmem:[#allocation13 + $0x458] sm:$0xff] }
 0x81c   :  { %v18966_v52 = vadd.f32 %v2656_v42, %v18884_v49  ;;  %v18969_v62 = vadd.f32 %v3043_v36, %v18901_v59  ;;  %5447 = vmatprep.subr.bf16.mxu1 %v15563_v46  ;;  %5850 = vmatprep.subr.bf16.mxu0 %v15585_v21 }
 0x81d   :  { %v2658_v51 = vpop.f32.mrf.mxu1  ;;  %v3045_v34 = vpop.f32.mrf.mxu0 }
 0x81e   :  { %v6018_v51 = vld [vmem:[#allocation13 + $0x490] sm:$0xff] }
 0x81f   :  { %v2659_v30 = vpop.f32.mrf.mxu1  ;;  %v3046_v20 = vpop.f32.mrf.mxu0  ;;  %v6026_v34 = vld [vmem:[#allocation13 + $0x4d0] sm:$0xff] }
 0x821   :  { %v2736_v18 = vpop.f32.mrf.mxu1  ;;  %v3123_v49 = vpop.f32.mrf.mxu0  ;;  %15571 = vmatmul.mubr.msk.bf16.vlgmr.msra.gmra.mxu1 %vm2164_vm5, %v18891_v4  ;;  %15594 = vmatmul.mubr.msk.bf16.vlgmr.msra.gmra.mxu0 %vm2164_vm5, %v18951_v25 }
 0x822   :  { %v18976_v59 = vadd.f32 %v2736_v18, %v18903_v12  ;;  %v18979_v1 = vadd.f32 %v3123_v49, %v18909_v10  ;;  %5448 = vmatpush1.bf16.msra.mxu1 %v15562_v41  ;;  %5851 = vmatpush1.bf16.msra.mxu0 %v15584_v16  ;;  %v5574_v12 = vld [vmem:[#allocation13 + $0x408] sm:$0xff] }
 0x823   :  { %v2738_v43 = vpop.f32.mrf.mxu1  ;;  %v3125_v55 = vpop.f32.mrf.mxu0  ;;  %5465 = vmatprep.mubr.bf16.mxu1 %v17678_v0  ;;  %5868 = vmatprep.mubr.bf16.mxu0 %v17678_v0  ;;  %v15579_v2 = vcombine.high %v5574_v12, %v5582_v38  ;;  %v15578_v61 = vcombine.low %v5574_v12, %v5582_v38  ;;  %v6020_v38 = vld [vmem:[#allocation13 + $0x4a0] sm:$0xff] }
 0x824   :  { %v18984_v54 = vadd.f32 %v2738_v43, %v18911_v60  ;;  %v18987_v13 = vadd.f32 %v3125_v55, %v18915_v19  ;;  %5529 = vmatprep.subr.bf16.mxu1 %v15567_v3  ;;  %5932 = vmatprep.subr.bf16.mxu0 %v15589_v9  ;;  %v15601_v60 = vcombine.high %v6016_v63, %v6024_v47  ;;  %v6028_v63 = vld [vmem:[#allocation13 + $0x4e0] sm:$0xff] }
 0x825   :  { %v2740_v17 = vpop.f32.mrf.mxu1  ;;  %v3127_v10 = vpop.f32.mrf.mxu0  ;;  %v276_v19 = vadd.f32 %v275_v40, %v274_v58 }
 0x826   :  { %v5586_v10 = vld [vmem:[#allocation13 + $0x468] sm:$0xff] }
 0x827   :  { %v2741_v8 = vpop.f32.mrf.mxu1  ;;  %v3128_v22 = vpop.f32.mrf.mxu0  ;;  %v277_v14 = vrot.slane %v276_v19, 2 }
 0x828   :  { %v19026_v8 = vrot.slane %v18951_v25, 1  ;;  %v15609_v22 = vcombine.high %v6020_v38, %v6028_v63 }
 0x829   :  { %v2818_v6 = vpop.f32.mrf.mxu1  ;;  %v3205_v7 = vpop.f32.mrf.mxu0  ;;  %15573 = vmatmul.mubr.msk.bf16.vlgmr.msra.gmra.mxu1 %vm2164_vm5, %v18891_v4  ;;  %15596 = vmatmul.mubr.msk.bf16.vlgmr.msra.gmra.mxu0 %vm2164_vm5, %v18951_v25  ;;  %v278_v50 = vadd.f32 %v277_v14, %v276_v19  ;;  %v5588_v14 = vld [vmem:[#allocation13 + $0x478] sm:$0xff] }
 0x82a   :  { %v18994_v11 = vadd.f32 %v2818_v6, %v18917_v45  ;;  %v18997_v15 = vadd.f32 %v3205_v7, %v18924_v56  ;;  %5530 = vmatpush1.bf16.msra.mxu1 %v15566_v57  ;;  %5933 = vmatpush1.bf16.msra.mxu0 %v15588_v44  ;;  %v5576_v45 = vld [vmem:[#allocation13 + $0x418] sm:$0xff]  ;;  %v15604_v57 = vcombine.low %v6018_v51, %v6026_v34 }
 0x82b   :  { %v2820_v46 = vpop.f32.mrf.mxu1  ;;  %v3207_v21 = vpop.f32.mrf.mxu0  ;;  %5547 = vmatprep.mubr.bf16.mxu1 %v17678_v0  ;;  %5950 = vmatprep.mubr.bf16.mxu0 %v17678_v0  ;;  %v279_v30 = vrot.slane %v278_v50, 1  ;;  %v15583_v20 = vcombine.high %v5576_v45, %v5584_v24  ;;  %v15582_v47 = vcombine.low %v5576_v45, %v5584_v24  ;;  %v6022_v45 = vld [vmem:[#allocation13 + $0x4b0] sm:$0xff]  ;;  %v15608_v24 = vcombine.low %v6020_v38, %v6028_v63 }
 0x82c   :  { %v19002_v32 = vadd.f32 %v2820_v46, %v18926_v39  ;;  %v19005_v42 = vadd.f32 %v3207_v21, %v18931_v37  ;;  %5727 = vmatprep.subr.bf16.mxu1 %v15579_v2  ;;  %6131 = vmatprep.subr.bf16.mxu0 %v15601_v60  ;;  %v15605_v39 = vcombine.high %v6018_v51, %v6026_v34 }
 0x82d   :  { %v2822_v56 = vpop.f32.mrf.mxu1  ;;  %v3209_v36 = vpop.f32.mrf.mxu0  ;;  %v280_v37 = vadd.f32 %v279_v30, %v278_v50 }
 0x82e   :  { %v6030_v56 = vld [vmem:[#allocation13 + $0x4f0] sm:$0xff] }
 0x82f   :  { %v2823_v41 = vpop.f32.mrf.mxu1  ;;  %v3210_v16 = vpop.f32.mrf.mxu0  ;;  %17061 = vpush %v280_v37  ;;  %v6751_v37 = vld [vmem:[#allocation17 + $0x1c0] sm:$0xff] }
 0x831   :  { %v2900_v3 = vpop.f32.mrf.mxu1  ;;  %v3287_v9 = vpop.f32.mrf.mxu0  ;;  %15575 = vmatmul.mubr.msk.bf16.vlgmr.msra.gmra.mxu1 %vm2164_vm5, %v18891_v4  ;;  %15598 = vmatmul.mubr.msk.bf16.vlgmr.msra.gmra.mxu0 %vm2164_vm5, %v18951_v25 }
 0x832   :  { %v19012_v18 = vadd.f32 %v2900_v3, %v18933_v48  ;;  %v19015_v49 = vadd.f32 %v3287_v9, %v18940_v28  ;;  %5728 = vmatpush1.bf16.msra.mxu1 %v15578_v61  ;;  %6132 = vmatpush1.bf16.msra.mxu0 %v15600_v35  ;;  %v5578_v48 = vld [vmem:[#allocation13 + $0x428] sm:$0xff]  ;;  %v15613_v61 = vcombine.high %v6022_v45, %v6030_v56 }
 0x833   :  { %v2902_v43 = vpop.f32.mrf.mxu1  ;;  %v3289_v55 = vpop.f32.mrf.mxu0  ;;  %5745 = vmatprep.mubr.bf16.mxu1 %v17678_v0  ;;  %6149 = vmatprep.mubr.bf16.mxu0 %v17678_v0  ;;  %v15586_v36 = vcombine.low %v5578_v48, %v5586_v10  ;;  %v6025_v9 = vld [vmem:[#allocation13 + $0x4c8] sm:$0xff] }
 0x834   :  { %v19020_v4 = vadd.f32 %v2902_v43, %v18942_v53  ;;  %v19023_v12 = vadd.f32 %v3289_v55, %v18947_v23  ;;  %5809 = vmatprep.subr.bf16.mxu1 %v15583_v20  ;;  %6213 = vmatprep.subr.bf16.mxu0 %v15605_v39  ;;  %v15587_v53 = vcombine.high %v5578_v48, %v5586_v10  ;;  %v6755_v43 = vld [vmem:[#allocation17 + $0x1e0] sm:$0xff] }
 0x835   :  { %v2904_v28 = vpop.f32.mrf.mxu1  ;;  %v3291_v17 = vpop.f32.mrf.mxu0  ;;  %v15612_v48 = vcombine.low %v6022_v45, %v6030_v56  ;;  %v15681_v38 = vcombine.high %v6751_v37, %v6755_v43 }
 0x837   :  { %v2905_v44 = vpop.f32.mrf.mxu1  ;;  %v3292_v58 = vpop.f32.mrf.mxu0 }
 0x839   :  { %v3082_v40 = vpop.f32.mrf.mxu1  ;;  %v3485_v23 = vpop.f32.mrf.mxu0  ;;  %15593 = vmatmul.mubr.msk.bf16.vlgmr.msra.gmra.mxu1 %vm2164_vm5, %v18951_v25  ;;  %15616 = vmatmul.mubr.msk.bf16.vlgmr.msra.gmra.mxu0 %vm2164_vm5, %v19026_v8 }
 0x83a   :  { %v19033_v2 = vadd.f32 %v3082_v40, %v18958_v5  ;;  %v19036_v60 = vadd.f32 %v3485_v23, %v18961_v29  ;;  %5810 = vmatpush1.bf16.msra.mxu1 %v15582_v47  ;;  %6214 = vmatpush1.bf16.msra.mxu0 %v15604_v57  ;;  %v5580_v5 = vld [vmem:[#allocation13 + $0x438] sm:$0xff]  ;;  %v6743_v23 = vld [vmem:[#allocation17 + $0x180] sm:$0xff] }
 0x83b   :  { %v3084_v6 = vpop.f32.mrf.mxu1  ;;  %v3487_v7 = vpop.f32.mrf.mxu0  ;;  %5827 = vmatprep.mubr.bf16.mxu1 %v17678_v0  ;;  %6231 = vmatprep.mubr.bf16.mxu0 %v17678_v0  ;;  %v15591_v50 = vcombine.high %v5580_v5, %v5588_v14  ;;  %v15590_v55 = vcombine.low %v5580_v5, %v5588_v14  ;;  %v15680_v14 = vcombine.low %v6751_v37, %v6755_v43 }
 0x83c   :  { %v19041_v19 = vadd.f32 %v3084_v6, %v18966_v52  ;;  %v19044_v46 = vadd.f32 %v3487_v7, %v18969_v62  ;;  %5891 = vmatprep.subr.bf16.mxu1 %v15587_v53  ;;  %6295 = vmatprep.subr.bf16.mxu0 %v15609_v22  ;;  %v6027_v22 = vld [vmem:[#allocation13 + $0x4d8] sm:$0xff]  ;;  %v6747_v6 = vld [vmem:[#allocation17 + $0x1a0] sm:$0xff] }
 0x83d   :  { %v3086_v21 = vpop.f32.mrf.mxu1  ;;  %v3489_v29 = vpop.f32.mrf.mxu0  ;;  %v15673_v45 = vcombine.high %v6743_v23, %v6747_v6 }
 0x83f   :  { %v3087_v51 = vpop.f32.mrf.mxu1  ;;  %v3490_v34 = vpop.f32.mrf.mxu0 }
 0x841   :  { %v3164_v35 = vpop.f32.mrf.mxu1  ;;  %v3567_v52 = vpop.f32.mrf.mxu0  ;;  %15595 = vmatmul.mubr.msk.bf16.vlgmr.msra.gmra.mxu1 %vm2164_vm5, %v18951_v25  ;;  %15618 = vmatmul.mubr.msk.bf16.vlgmr.msra.gmra.mxu0 %vm2164_vm5, %v19026_v8 }
 0x842   :  { %v19051_v62 = vadd.f32 %v3164_v35, %v18976_v59  ;;  %v19054_v41 = vadd.f32 %v3567_v52, %v18979_v1  ;;  %5892 = vmatpush1.bf16.msra.mxu1 %v15586_v36  ;;  %6296 = vmatpush1.bf16.msra.mxu0 %v15608_v24  ;;  %v6017_v59 = vld [vmem:[#allocation13 + $0x488] sm:$0xff]  ;;  %v6739_v36 = vld [vmem:[#allocation17 + $0x160] sm:$0xff] }
 0x843   :  { %v3166_v16 = vpop.f32.mrf.mxu1  ;;  %v3569_v30 = vpop.f32.mrf.mxu0  ;;  %5909 = vmatprep.mubr.bf16.mxu1 %v17678_v0  ;;  %6313 = vmatprep.mubr.bf16.mxu0 %v17678_v0  ;;  %v15603_v10 = vcombine.high %v6017_v59, %v6025_v9  ;;  %v15602_v7 = vcombine.low %v6017_v59, %v6025_v9  ;;  %v6021_v52 = vld [vmem:[#allocation13 + $0x4a8] sm:$0xff]  ;;  %v6727_v59 = vld [vmem:[#allocation17 + $0x100] sm:$0xff] }
 0x844   :  { %v19059_v20 = vadd.f32 %v3166_v16, %v18984_v54  ;;  %v19062_v39 = vadd.f32 %v3569_v30, %v18987_v13  ;;  %5973 = vmatprep.subr.bf16.mxu1 %v15591_v50  ;;  %6377 = vmatprep.subr.bf16.mxu0 %v15613_v61  ;;  %v15672_v61 = vcombine.low %v6743_v23, %v6747_v6  ;;  %v6711_v23 = vld [vmem:[#allocation17 + $0x80] sm:$0xff] }
 0x845   :  { %v3168_v3 = vpop.f32.mrf.mxu1  ;;  %v3571_v1 = vpop.f32.mrf.mxu0  ;;  %v6715_v6 = vld [vmem:[#allocation17 + $0xa0] sm:$0xff] }
 0x846   :  { %v6731_v3 = vld [vmem:[#allocation17 + $0x120] sm:$0xff] }
 0x847   :  { %v3169_v28 = vpop.f32.mrf.mxu1  ;;  %v3572_v17 = vpop.f32.mrf.mxu0 }
 0x848   :  { %v6723_v17 = vld [vmem:[#allocation17 + $0xe0] sm:$0xff] }
 0x849   :  { %v3246_v63 = vpop.f32.mrf.mxu1  ;;  %v3649_v54 = vpop.f32.mrf.mxu0  ;;  %15597 = vmatmul.mubr.msk.bf16.vlgmr.msra.gmra.mxu1 %vm2164_vm5, %v18951_v25  ;;  %15620 = vmatmul.mubr.msk.bf16.vlgmr.msra.gmra.mxu0 %vm2164_vm5, %v19026_v8 }
 0x84a   :  { %v19069_v13 = vadd.f32 %v3246_v63, %v18994_v11  ;;  %v19072_v47 = vadd.f32 %v3649_v54, %v18997_v15  ;;  %5974 = vmatpush1.bf16.msra.mxu1 %v15590_v55  ;;  %6378 = vmatpush1.bf16.msra.mxu0 %v15612_v48  ;;  %v6019_v11 = vld [vmem:[#allocation13 + $0x498] sm:$0xff] }
 0x84b   :  { %v3248_v57 = vpop.f32.mrf.mxu1  ;;  %v3651_v44 = vpop.f32.mrf.mxu0  ;;  %5991 = vmatprep.mubr.bf16.mxu1 %v17678_v0  ;;  %6395 = vmatprep.mubr.bf16.mxu0 %v17678_v0  ;;  %v15607_v29 = vcombine.high %v6019_v11, %v6027_v22  ;;  %v15606_v1 = vcombine.low %v6019_v11, %v6027_v22  ;;  %v6023_v22 = vld [vmem:[#allocation13 + $0x4b8] sm:$0xff] }
 0x84c   :  { %v19077_v58 = vadd.f32 %v3248_v57, %v19002_v32  ;;  %v19080_v53 = vadd.f32 %v3651_v44, %v19005_v42  ;;  %6172 = vmatprep.subr.bf16.mxu1 %v15603_v10  ;;  %12881 = vmatprep.subr.bf16.mxu0 %v15681_v38  ;;  %v6735_v42 = vld [vmem:[#allocation17 + $0x140] sm:$0xff]  ;;  %v15656_v57 = vcombine.low %v6727_v59, %v6731_v3 }
 0x84d   :  { %v3250_v15 = vpop.f32.mrf.mxu1  ;;  %v3653_v40 = vpop.f32.mrf.mxu0  ;;  %v15665_v16 = vcombine.high %v6735_v42, %v6739_v36  ;;  %v15664_v55 = vcombine.low %v6735_v42, %v6739_v36 }
 0x84f   :  { %v3251_v5 = vpop.f32.mrf.mxu1  ;;  %v3654_v21 = vpop.f32.mrf.mxu0 }
 0x851   :  { %v3328_v56 = vpop.f32.mrf.mxu1  ;;  %v3731_v32 = vpop.f32.mrf.mxu0  ;;  %15599 = vmatmul.mubr.msk.bf16.vlgmr.msra.gmra.mxu1 %vm2164_vm5, %v18951_v25  ;;  %15622 = vmatmul.mubr.msk.bf16.vlgmr.msra.gmra.mxu0 %vm2164_vm5, %v19026_v8 }
 0x852   :  { %v19087_v24 = vadd.f32 %v3328_v56, %v19012_v18  ;;  %v19090_v51 = vadd.f32 %v3731_v32, %v19015_v49  ;;  %6173 = vmatpush1.bf16.msra.mxu1 %v15602_v7  ;;  %6190 = vmatprep.mubr.bf16.mxu1 %v17678_v0  ;;  %v6029_v18 = vld [vmem:[#allocation13 + $0x4e8] sm:$0xff]  ;;  %v6707_v32 = vld [vmem:[#allocation17 + $0x60] sm:$0xff] }
 0x853   :  { %v3330_v34 = vpop.f32.mrf.mxu1  ;;  %v3733_v50 = vpop.f32.mrf.mxu0  ;;  %6254 = vmatprep.subr.bf16.mxu1 %v15607_v29  ;;  %12882 = vmatpush1.bf16.msra.mxu0 %v15680_v14  ;;  %v15611_v43 = vcombine.high %v6021_v52, %v6029_v18  ;;  %v15610_v7 = vcombine.low %v6021_v52, %v6029_v18 }
 0x854   :  { %v19094_v25 = vadd.f32 %v3330_v34, %v19020_v4  ;;  %v19097_v35 = vadd.f32 %v3733_v50, %v19023_v12  ;;  %12883 = vmatprep.subr.bf16.mxu0 %v15673_v45  ;;  %v15657_v4 = vcombine.high %v6727_v59, %v6731_v3  ;;  %v6719_v12 = vld [vmem:[#allocation17 + $0xc0] sm:$0xff] }
 0x855   :  { %v3332_v49 = vpop.f32.mrf.mxu1  ;;  %v3735_v30 = vpop.f32.mrf.mxu0  ;;  %v15649_v15 = vcombine.high %v6719_v12, %v6723_v17  ;;  %v15648_v14 = vcombine.low %v6719_v12, %v6723_v17  ;;  %v6695_v59 = vld [vmem:[#allocation17] sm:$0xff] }
 0x856   :  { %v6883_v49 = vld [vmem:[#allocation17 + $0x5e0] sm:$0xff] }
 0x857   :  { %v3333_v9 = vpop.f32.mrf.mxu1  ;;  %v3736_v37 = vpop.f32.mrf.mxu0  ;;  %12884 = vmatpush1.bf16.msra.mxu0 %v15672_v61  ;;  %v15640_v61 = vcombine.low %v6711_v23, %v6715_v6  ;;  %v6699_v3 = vld [vmem:[#allocation17 + $0x20] sm:$0xff] }
 0x858   :  { %12885 = vmatprep.subr.bf16.mxu0 %v15665_v16  ;;  %v6879_v16 = vld [vmem:[#allocation17 + $0x5c0] sm:$0xff] }
 0x859   :  { %v3526_v48 = vpop.f32.mrf.mxu1  ;;  %v3929_v28 = vpop.f32.mrf.mxu0  ;;  %15617 = vmatmul.mubr.msk.bf16.vlgmr.msra.gmra.mxu1 %vm2164_vm5, %v19026_v8 }
 0x85a   :  { %v19102_v10 = vadd.f32 %v3526_v48, %v19033_v2  ;;  %v19105_v38 = vadd.f32 %v3929_v28, %v19036_v60  ;;  %6255 = vmatpush1.bf16.msra.mxu1 %v15606_v1  ;;  %6272 = vmatprep.mubr.bf16.mxu1 %v17678_v0  ;;  %v6031_v2 = vld [vmem:[#allocation13 + $0x4f8] sm:$0xff]  ;;  %v6819_v28 = vld [vmem:[#allocation17 + $0x3e0] sm:$0xff] }
 0x85b   :  { %v3528_v63 = vpop.f32.mrf.mxu1  ;;  %v3931_v54 = vpop.f32.mrf.mxu0  ;;  %6336 = vmatprep.subr.bf16.mxu1 %v15611_v43  ;;  %12886 = vmatpush1.bf16.msra.mxu0 %v15664_v55  ;;  %v15615_v29 = vcombine.high %v6023_v22, %v6031_v2  ;;  %v15614_v1 = vcombine.low %v6023_v22, %v6031_v2  ;;  %v15809_v55 = vcombine.high %v6879_v16, %v6883_v49 }
 0x85c   :  { %v19109_v44 = vadd.f32 %v3528_v63, %v19041_v19  ;;  %v19112_v11 = vadd.f32 %v3931_v54, %v19044_v46  ;;  %12887 = vmatprep.subr.bf16.mxu0 %v15657_v4  ;;  %v15641_v19 = vcombine.high %v6711_v23, %v6715_v6  ;;  %v6703_v46 = vld [vmem:[#allocation17 + $0x40] sm:$0xff] }
 0x85d   :  { %v3530_v60 = vpop.f32.mrf.mxu1  ;;  %v3933_v40 = vpop.f32.mrf.mxu0  ;;  %v15632_v43 = vcombine.low %v6703_v46, %v6707_v32  ;;  %v6807_v23 = vld [vmem:[#allocation17 + $0x380] sm:$0xff] }
 0x85e   :  { %v6875_v60 = vld [vmem:[#allocation17 + $0x5a0] sm:$0xff] }
 0x85f   :  { %v3531_v5 = vpop.f32.mrf.mxu1  ;;  %v3934_v21 = vpop.f32.mrf.mxu0  ;;  %12888 = vmatpush1.bf16.msra.mxu0 %v15656_v57  ;;  %v15624_v57 = vcombine.low %v6695_v59, %v6699_v3  ;;  %v6811_v6 = vld [vmem:[#allocation17 + $0x3a0] sm:$0xff] }
 0x860   :  { %12889 = vmatprep.subr.bf16.mxu0 %v15649_v15  ;;  %v6871_v15 = vld [vmem:[#allocation17 + $0x580] sm:$0xff]  ;;  %s17062_s7 = spop %17061 }
 0x861   :  { %v3608_v45 = vpop.f32.mrf.mxu1  ;;  %v4011_v56 = vpop.f32.mrf.mxu0  ;;  %15619 = vmatmul.mubr.msk.bf16.vlgmr.msra.gmra.mxu1 %vm2164_vm5, %v19026_v8 }
 0x862   :  { %v19117_v42 = vadd.f32 %v3608_v45, %v19051_v62  ;;  %v19120_v36 = vadd.f32 %v4011_v56, %v19054_v41  ;;  %6337 = vmatpush1.bf16.msra.mxu1 %v15610_v7  ;;  %6354 = vmatprep.mubr.bf16.mxu1 %v17678_v0  ;;  %v15633_v62 = vcombine.high %v6703_v46, %v6707_v32  ;;  %v6799_v56 = vld [vmem:[#allocation17 + $0x340] sm:$0xff] }
 0x863   :  { %v3610_v34 = vpop.f32.mrf.mxu1  ;;  %v4013_v50 = vpop.f32.mrf.mxu0  ;;  %6418 = vmatprep.subr.bf16.mxu1 %v15615_v29  ;;  %12890 = vmatpush1.bf16.msra.mxu0 %v15648_v14  ;;  %v15801_v29 = vcombine.high %v6871_v15, %v6875_v60  ;;  %v6863_v14 = vld [vmem:[#allocation17 + $0x540] sm:$0xff] }
 0x864   :  { %v19124_v52 = vadd.f32 %v3610_v34, %v19059_v20  ;;  %v19127_v18 = vadd.f32 %v4013_v50, %v19062_v39  ;;  %12891 = vmatprep.subr.bf16.mxu0 %v15641_v19  ;;  %v15625_v20 = vcombine.high %v6695_v59, %v6699_v3  ;;  %v6815_v39 = vld [vmem:[#allocation17 + $0x3c0] sm:$0xff]  ;;  %v15800_v50 = vcombine.low %v6871_v15, %v6875_v60 }
 0x865   :  { %v3612_v41 = vpop.f32.mrf.mxu1  ;;  %v4015_v30 = vpop.f32.mrf.mxu0  ;;  %v15744_v21 = vcombine.low %v6815_v39, %v6819_v28  ;;  %v6867_v19 = vld [vmem:[#allocation17 + $0x560] sm:$0xff] }
 0x866   :  { %v6803_v46 = vld [vmem:[#allocation17 + $0x360] sm:$0xff] }
 0x867   :  { %v3613_v9 = vpop.f32.mrf.mxu1  ;;  %v4016_v37 = vpop.f32.mrf.mxu0  ;;  %12892 = vmatpush1.bf16.msra.mxu0 %v15640_v61  ;;  %v6855_v30 = vld [vmem:[#allocation17 + $0x500] sm:$0xff] }
 0x868   :  { %12893 = vmatprep.subr.bf16.mxu0 %v15633_v62  ;;  %v6859_v59 = vld [vmem:[#allocation17 + $0x520] sm:$0xff]  ;;  %v15792_v37 = vcombine.low %v6863_v14, %v6867_v19 }
 0x869   :  { %v3690_v4 = vpop.f32.mrf.mxu1  ;;  %v4093_v48 = vpop.f32.mrf.mxu0  ;;  %15621 = vmatmul.mubr.msk.bf16.vlgmr.msra.gmra.mxu1 %vm2164_vm5, %v19026_v8  ;;  %v6795_v9 = vld [vmem:[#allocation17 + $0x320] sm:$0xff]  ;;  %v15784_v15 = vcombine.low %v6855_v30, %v6859_v59 }
 0x86a   :  { %v19132_v12 = vadd.f32 %v3690_v4, %v19069_v13  ;;  %v19135_v17 = vadd.f32 %v4093_v48, %v19072_v47  ;;  %6419 = vmatpush1.bf16.msra.mxu1 %v15614_v1  ;;  %6436 = vmatprep.mubr.bf16.mxu1 %v17678_v0  ;;  %v15745_v13 = vcombine.high %v6815_v39, %v6819_v28  ;;  %v6791_v1 = vld [vmem:[#allocation17 + $0x300] sm:$0xff] }
 0x86b   :  { %v3692_v63 = vpop.f32.mrf.mxu1  ;;  %v4095_v54 = vpop.f32.mrf.mxu0  ;;  %12894 = vmatpush1.bf16.msra.mxu0 %v15632_v43  ;;  %12922 = vmatprep.subr.bf16.mxu1 %v15809_v55  ;;  %v15808_v0 = vcombine.low %v6879_v16, %v6883_v49  ;;  %v15736_v16 = vcombine.low %v6807_v23, %v6811_v6  ;;  %v15793_v49 = vcombine.high %v6863_v14, %v6867_v19  ;;  %v6851_v48 = vld [vmem:[#allocation17 + $0x4e0] sm:$0xff] }
 0x86c   :  { %v19139_v22 = vadd.f32 %v3692_v63, %v19077_v58  ;;  %v19142_v2 = vadd.f32 %v4095_v54, %v19080_v53  ;;  %12895 = vmatprep.subr.bf16.mxu0 %v15625_v20  ;;  %v15737_v58 = vcombine.high %v6807_v23, %v6811_v6  ;;  %v15728_v20 = vcombine.low %v6799_v56, %v6803_v46  ;;  %v6783_v63 = vld [vmem:[#allocation17 + $0x2c0] sm:$0xff] }
 0x86d   :  { %v3694_v47 = vpop.f32.mrf.mxu1  ;;  %v4097_v40 = vpop.f32.mrf.mxu0  ;;  %v15721_v4 = vcombine.high %v6791_v1, %v6795_v9  ;;  %v6787_v54 = vld [vmem:[#allocation17 + $0x2e0] sm:$0xff] }
 0x86e   :  { %v15720_v40 = vcombine.low %v6791_v1, %v6795_v9  ;;  %v19176_v9 = vld [vmem:[#allocation17 + $0x9c0] sm:$0xff] }
 0x86f   :  { %v3695_v7 = vpop.f32.mrf.mxu1  ;;  %v4098_v5 = vpop.f32.mrf.mxu0  ;;  %12896 = vmatpush1.bf16.msra.mxu0 %v15624_v57 }
 0x870   :  { %12897 = vmatprep.subr.bf16.mxu0 %v15745_v13  ;;  %v6839_v7 = vld [vmem:[#allocation17 + $0x480] sm:$0xff] }
 0x871   :  { %v3772_v53 = vpop.f32.mrf.mxu1  ;;  %v4175_v45 = vpop.f32.mrf.mxu0  ;;  %15623 = vmatmul.mubr.msk.bf16.vlgmr.msra.gmra.mxu1 %vm2164_vm5, %v19026_v8  ;;  %v6843_v5 = vld [vmem:[#allocation17 + $0x4a0] sm:$0xff] }
 0x872   :  { %v19147_v32 = vadd.f32 %v3772_v53, %v19087_v24  ;;  %v19150_v34 = vadd.f32 %v4175_v45, %v19090_v51  ;;  %12923 = vmatpush1.bf16.msra.mxu1 %v15808_v0  ;;  %v15729_v24 = vcombine.high %v6799_v56, %v6803_v46  ;;  %v15712_v45 = vcombine.low %v6783_v63, %v6787_v54  ;;  %v6835_v46 = vld [vmem:[#allocation17 + $0x460] sm:$0xff] }
 0x873   :  { %v3774_v61 = vpop.f32.mrf.mxu1  ;;  %v4177_v62 = vpop.f32.mrf.mxu0  ;;  %12898 = vmatpush2.bf16.msra.mxu0 %v15744_v21  ;;  %12924 = vmatprep.subr.bf16.mxu1 %v15801_v29  ;;  %v6775_v29 = vld [vmem:[#allocation17 + $0x280] sm:$0xff] }
 0x874   :  { %v19153_v41 = vadd.f32 %v3774_v61, %v19094_v25  ;;  %v19156_v8 = vadd.f32 %v4177_v62, %v19097_v35  ;;  %12899 = vmatprep.subr.bf16.mxu0 %v15737_v58  ;;  %v15785_v25 = vcombine.high %v6855_v30, %v6859_v59  ;;  %v6847_v35 = vld [vmem:[#allocation17 + $0x4c0] sm:$0xff]  ;;  %v15768_v30 = vcombine.low %v6839_v7, %v6843_v5 }
 0x875   :  { %v3776_v51 = vpop.f32.mrf.mxu1  ;;  %v4179_v3 = vpop.f32.mrf.mxu0  ;;  %v15777_v23 = vcombine.high %v6847_v35, %v6851_v48  ;;  %v6779_v58 = vld [vmem:[#allocation17 + $0x2a0] sm:$0xff]  ;;  %v15776_v14 = vcombine.low %v6847_v35, %v6851_v48 }
 0x876   :  { %12925 = vmatpush1.bf16.msra.mxu1 %v15800_v50  ;;  %v15705_v56 = vcombine.high %v6775_v29, %v6779_v58  ;;  %v6767_v62 = vld [vmem:[#allocation17 + $0x240] sm:$0xff]  ;;  %v15704_v3 = vcombine.low %v6775_v29, %v6779_v58 }
 0x877   :  { %v3777_v43 = vpop.f32.mrf.mxu1  ;;  %v4180_v55 = vpop.f32.mrf.mxu0  ;;  %12900 = vmatpush2.bf16.msra.mxu0 %v15736_v16  ;;  %12926 = vmatprep.subr.bf16.mxu1 %v15793_v49  ;;  %v6771_v16 = vld [vmem:[#allocation17 + $0x260] sm:$0xff] }
 0x878   :  { %12901 = vmatprep.subr.bf16.mxu0 %v15729_v24  ;;  %v6827_v55 = vld [vmem:[#allocation17 + $0x420] sm:$0xff] }
 0x879   :  { %v3970_v39 = vpop.f32.mrf.mxu1  ;;  %v4374_v28 = vpop.f32.mrf.mxu0  ;;  %v6759_v35 = vld [vmem:[#allocation17 + $0x200] sm:$0xff] }
 0x87a   :  { %v19159_v57 = vadd.f32 %v3970_v39, %v19102_v10  ;;  %v19162_v13 = vadd.f32 %v4374_v28, %v19105_v38  ;;  %12927 = vmatpush1.bf16.msra.mxu1 %v15792_v37  ;;  %v15713_v10 = vcombine.high %v6783_v63, %v6787_v54  ;;  %v6763_v48 = vld [vmem:[#allocation17 + $0x220] sm:$0xff] }
 0x87b   :  { %v3972_v60 = vpop.f32.mrf.mxu1  ;;  %v4376_v47 = vpop.f32.mrf.mxu0  ;;  %12902 = vmatpush2.bf16.msra.mxu0 %v15728_v20  ;;  %12928 = vmatprep.subr.bf16.mxu1 %v15785_v25  ;;  %v19184_v20 = vld [vmem:[#allocation17 + $0x9e0] sm:$0xff]  ;;  %v15688_v29 = vcombine.low %v6759_v35, %v6763_v48 }
 0x87c   :  { %v19165_v6 = vadd.f32 %v3972_v60, %v19109_v44  ;;  %v19168_v0 = vadd.f32 %v4376_v47, %v19112_v11  ;;  %12903 = vmatprep.subr.bf16.mxu0 %v15721_v4  ;;  %v15769_v44 = vcombine.high %v6839_v7, %v6843_v5  ;;  %v6831_v11 = vld [vmem:[#allocation17 + $0x440] sm:$0xff]  ;;  %v15936_v39 = vcombine.low %v19176_v9, %v19184_v20 }
 0x87d   :  { %v3974_v38 = vpop.f32.mrf.mxu1  ;;  %v4378_v21 = vpop.f32.mrf.mxu0  ;;  %v15761_v1 = vcombine.high %v6831_v11, %v6835_v46  ;;  %v15760_v28 = vcombine.low %v6831_v11, %v6835_v46  ;;  %v6943_v60 = vld [vmem:[#allocation17 + $0x7c0] sm:$0xff] }
 0x87e   :  { %12929 = vmatpush1.bf16.msra.mxu1 %v15784_v15  ;;  %v15689_v15 = vcombine.high %v6759_v35, %v6763_v48  ;;  %v6947_v47 = vld [vmem:[#allocation17 + $0x7e0] sm:$0xff] }
 0x87f   :  { %v3975_v19 = vpop.f32.mrf.mxu1  ;;  %v4379_v53 = vpop.f32.mrf.mxu0  ;;  %12904 = vmatpush2.bf16.msra.mxu0 %v15720_v40  ;;  %12930 = vmatprep.subr.bf16.mxu1 %v15777_v23  ;;  %v15873_v58 = vcombine.high %v6943_v60, %v6947_v47 }
 0x880   :  { %12905 = vmatprep.subr.bf16.mxu0 %v15713_v10  ;;  %v6939_v53 = vld [vmem:[#allocation17 + $0x7a0] sm:$0xff] }
 0x881   :  { %v4052_v50 = vpop.f32.mrf.mxu1  ;;  %v4456_v61 = vpop.f32.mrf.mxu0 }
 0x882   :  { %v19171_v49 = vadd.f32 %v4052_v50, %v19117_v42  ;;  %v19174_v24 = vadd.f32 %v4456_v61, %v19120_v36  ;;  %12931 = vmatpush1.bf16.msra.mxu1 %v15776_v14  ;;  %v15697_v42 = vcombine.high %v6767_v62, %v6771_v16  ;;  %v6823_v36 = vld [vmem:[#allocation17 + $0x400] sm:$0xff] }
 0x883   :  { %v4054_v59 = vpop.f32.mrf.mxu1  ;;  %v4458_v51 = vpop.f32.mrf.mxu0  ;;  %12906 = vmatpush2.bf16.msra.mxu0 %v15712_v45  ;;  %12932 = vmatprep.subr.bf16.mxu1 %v15769_v44  ;;  %v15753_v54 = vcombine.high %v6823_v36, %v6827_v55  ;;  %v15752_v5 = vcombine.low %v6823_v36, %v6827_v55  ;;  %v6931_v61 = vld [vmem:[#allocation17 + $0x760] sm:$0xff] }
 0x884   :  { %v19179_v37 = vadd.f32 %v4054_v59, %v19124_v52  ;;  %v19182_v43 = vadd.f32 %v4458_v51, %v19127_v18  ;;  %12907 = vmatprep.subr.bf16.mxu0 %v15705_v56  ;;  %v15696_v18 = vcombine.low %v6767_v62, %v6771_v16  ;;  %v15872_v56 = vcombine.low %v6943_v60, %v6947_v47  ;;  %v6919_v55 = vld [vmem:[#allocation17 + $0x700] sm:$0xff] }
 0x885   :  { %v4056_v25 = vpop.f32.mrf.mxu1  ;;  %v4460_v4 = vpop.f32.mrf.mxu0 }
 0x886   :  { %12933 = vmatpush1.bf16.msra.mxu1 %v15768_v30  ;;  %v6923_v25 = vld [vmem:[#allocation17 + $0x720] sm:$0xff] }
 0x887   :  { %v4057_v52 = vpop.f32.mrf.mxu1  ;;  %v4461_v63 = vpop.f32.mrf.mxu0  ;;  %12908 = vmatpush2.bf16.msra.mxu0 %v15704_v3  ;;  %12934 = vmatprep.subr.bf16.mxu1 %v15761_v1 }
 0x888   :  { %12909 = vmatprep.subr.bf16.mxu0 %v15697_v42  ;;  %v6911_v52 = vld [vmem:[#allocation17 + $0x6c0] sm:$0xff] }
 0x889   :  { %v4134_v40 = vpop.f32.mrf.mxu1  ;;  %v4538_v23 = vpop.f32.mrf.mxu0  ;;  %v6915_v63 = vld [vmem:[#allocation17 + $0x6e0] sm:$0xff] }
 0x88a   :  { %v19189_v10 = vadd.f32 %v4134_v40, %v19132_v12  ;;  %v19192_v7 = vadd.f32 %v4538_v23, %v19135_v17  ;;  %12935 = vmatpush1.bf16.msra.mxu1 %v15760_v28  ;;  %v15937_v12 = vcombine.high %v19176_v9, %v19184_v20  ;;  %v6935_v17 = vld [vmem:[#allocation17 + $0x780] sm:$0xff]  ;;  %v15849_v28 = vcombine.high %v6919_v55, %v6923_v25 }
 0x88b   :  { %v4136_v38 = vpop.f32.mrf.mxu1  ;;  %v4540_v21 = vpop.f32.mrf.mxu0  ;;  %12910 = vmatpush2.bf16.msra.mxu0 %v15696_v18  ;;  %12936 = vmatprep.subr.bf16.mxu1 %v15753_v54  ;;  %v15865_v50 = vcombine.high %v6935_v17, %v6939_v53  ;;  %v15864_v59 = vcombine.low %v6935_v17, %v6939_v53  ;;  %v15841_v40 = vcombine.high %v6911_v52, %v6915_v63  ;;  %v6895_v53 = vld [vmem:[#allocation17 + $0x640] sm:$0xff] }
 0x88c   :  { %v19195_v14 = vadd.f32 %v4136_v38, %v19139_v22  ;;  %v19198_v19 = vadd.f32 %v4540_v21, %v19142_v2  ;;  %12911 = vmatprep.subr.bf16.mxu0 %v15689_v15  ;;  %v6927_v22 = vld [vmem:[#allocation17 + $0x740] sm:$0xff]  ;;  %v15848_v15 = vcombine.low %v6919_v55, %v6923_v25 }
 0x88d   :  { %v4138_v45 = vpop.f32.mrf.mxu1  ;;  %v4542_v44 = vpop.f32.mrf.mxu0  ;;  %v15857_v1 = vcombine.high %v6927_v22, %v6931_v61  ;;  %v15856_v35 = vcombine.low %v6927_v22, %v6931_v61  ;;  %v6903_v38 = vld [vmem:[#allocation17 + $0x680] sm:$0xff] }
 0x88e   :  { %12937 = vmatpush1.bf16.msra.mxu1 %v15752_v5  ;;  %v6907_v21 = vld [vmem:[#allocation17 + $0x6a0] sm:$0xff] }
 0x88f   :  { %v4139_v11 = vpop.f32.mrf.mxu1  ;;  %v4543_v46 = vpop.f32.mrf.mxu0  ;;  %12912 = vmatpush2.bf16.msra.mxu0 %v15688_v29  ;;  %12938 = vmatprep.subr.bf16.mxu1 %v15873_v58  ;;  %v15840_v58 = vcombine.low %v6911_v52, %v6915_v63  ;;  %v15833_v17 = vcombine.high %v6903_v38, %v6907_v21  ;;  %v6899_v45 = vld [vmem:[#allocation17 + $0x660] sm:$0xff] }
 0x890   :  { %12963 = vmatprep.subr.bf16.mxu0 %v15937_v12  ;;  %v15832_v11 = vcombine.low %v6903_v38, %v6907_v21  ;;  %v15825_v22 = vcombine.high %v6895_v53, %v6899_v45  ;;  %v6987_v9 = vld [vmem:[#allocation17 + $0x920] sm:$0xff] }
 0x891   :  { %v4216_v2 = vpop.f32.mrf.mxu1  ;;  %v4620_v62 = vpop.f32.mrf.mxu0 }
 0x892   :  { %v19203_v16 = vadd.f32 %v4216_v2, %v19147_v32  ;;  %v19206_v30 = vadd.f32 %v4620_v62, %v19150_v34  ;;  %12939 = vmatpush2.bf16.msra.mxu1 %v15872_v56  ;;  %v6887_v62 = vld [vmem:[#allocation17 + $0x600] sm:$0xff] }
 0x893   :  { %v4218_v51 = vpop.f32.mrf.mxu1  ;;  %v4622_v3 = vpop.f32.mrf.mxu0  ;;  %12940 = vmatprep.subr.bf16.mxu1 %v15865_v50 }
 0x894   :  { %v19209_v42 = vadd.f32 %v4218_v51, %v19153_v41  ;;  %v19212_v36 = vadd.f32 %v4622_v3, %v19156_v8  ;;  %v19236_v51 = vld [vmem:[#allocation17 + $0xdc0] sm:$0xff] }
 0x895   :  { %v4220_v4 = vpop.f32.mrf.mxu1  ;;  %v4624_v32 = vpop.f32.mrf.mxu0 }
 0x896   :  { %12941 = vmatpush2.bf16.msra.mxu1 %v15864_v59  ;;  %v6891_v59 = vld [vmem:[#allocation17 + $0x620] sm:$0xff] }
 0x897   :  { %v4221_v34 = vpop.f32.mrf.mxu1  ;;  %v4625_v48 = vpop.f32.mrf.mxu0  ;;  %12942 = vmatprep.subr.bf16.mxu1 %v15857_v1  ;;  %v19238_v1 = vld [vmem:[#allocation17 + $0xde0] sm:$0xff] }
 0x898   :  { %v16064_v55 = vcombine.low %v19236_v51, %v19238_v1  ;;  %v15816_v48 = vcombine.low %v6887_v62, %v6891_v59  ;;  %v16065_v63 = vcombine.high %v19236_v51, %v19238_v1  ;;  %v7115_v51 = vld [vmem:[#allocation17 + $0xd20] sm:$0xff] }
 0x899   :  { %v4415_v18 = vpop.f32.mrf.mxu1  ;;  %v4818_v54 = vpop.f32.mrf.mxu0 }
 0x89a   :  { %v19215_v41 = vadd.f32 %v4415_v18, %v19159_v57  ;;  %v19218_v8 = vadd.f32 %v4818_v54, %v19162_v13  ;;  %12943 = vmatpush2.bf16.msra.mxu1 %v15856_v35 }
 0x89b   :  { %v4417_v60 = vpop.f32.mrf.mxu1  ;;  %v4820_v47 = vpop.f32.mrf.mxu0  ;;  %12944 = vmatprep.subr.bf16.mxu1 %v15849_v28 }
 0x89c   :  { %v19221_v23 = vadd.f32 %v4417_v60, %v19165_v6  ;;  %v19224_v5 = vadd.f32 %v4820_v47, %v19168_v0 }
 0x89d   :  { %v4419_v29 = vpop.f32.mrf.mxu1  ;;  %v4822_v57 = vpop.f32.mrf.mxu0 }
 0x89e   :  { %12945 = vmatpush2.bf16.msra.mxu1 %v15848_v15 }
 0x89f   :  { %v4420_v13 = vpop.f32.mrf.mxu1  ;;  %v4823_v12 = vpop.f32.mrf.mxu0  ;;  %12946 = vmatprep.subr.bf16.mxu1 %v15841_v40 }
 0x8a1   :  { %v4497_v44 = vpop.f32.mrf.mxu1  ;;  %v4900_v56 = vpop.f32.mrf.mxu0 }
 0x8a2   :  { %v19227_v6 = vadd.f32 %v4497_v44, %v19171_v49  ;;  %v19230_v0 = vadd.f32 %v4900_v56, %v19174_v24  ;;  %12947 = vmatpush2.bf16.msra.mxu1 %v15840_v58  ;;  %v15824_v24 = vcombine.low %v6895_v53, %v6899_v45 }
 0x8a3   :  { %v4499_v46 = vpop.f32.mrf.mxu1  ;;  %v4902_v50 = vpop.f32.mrf.mxu0  ;;  %12948 = vmatprep.subr.bf16.mxu1 %v15833_v17 }
 0x8a4   :  { %v4675_v61 = vadd.f32 %v4499_v46, %v19179_v37  ;;  %v19234_v2 = vadd.f32 %v4902_v50, %v19182_v43  ;;  %v15817_v37 = vcombine.high %v6887_v62, %v6891_v59 }
 0x8a5   :  { %v4501_v49 = vpop.f32.mrf.mxu1  ;;  %v4904_v3 = vpop.f32.mrf.mxu0 }
 0x8a6   :  { %12949 = vmatpush2.bf16.msra.mxu1 %v15832_v11 }
 0x8a7   :  { %v4502_v25 = vpop.f32.mrf.mxu1  ;;  %v4905_v4 = vpop.f32.mrf.mxu0  ;;  %12950 = vmatprep.subr.bf16.mxu1 %v15825_v22 }
 0x8a9   :  { %v4579_v32 = vpop.f32.mrf.mxu1  ;;  %v4982_v43 = vpop.f32.mrf.mxu0 }
 0x8aa   :  { %v4678_v35 = vadd.f32 %v4579_v32, %v19189_v10  ;;  %v5120_v34 = vadd.f32 %v4982_v43, %v19192_v7  ;;  %12951 = vmatpush2.bf16.msra.mxu1 %v15824_v24 }
 0x8ab   :  { %v4581_v28 = vpop.f32.mrf.mxu1  ;;  %v4984_v52 = vpop.f32.mrf.mxu0  ;;  %12952 = vmatprep.subr.bf16.mxu1 %v15817_v37 }
 0x8ac   :  { %v4679_v18 = vadd.f32 %v4581_v28, %v19195_v14  ;;  %v19248_v54 = vadd.f32 %v4984_v52, %v19198_v19 }
 0x8ad   :  { %v4583_v15 = vpop.f32.mrf.mxu1  ;;  %v4986_v60 = vpop.f32.mrf.mxu0 }
 0x8ae   :  { %12953 = vmatpush2.bf16.msra.mxu1 %v15816_v48 }
 0x8af   :  { %v4584_v47 = vpop.f32.mrf.mxu1  ;;  %v4987_v10 = vpop.f32.mrf.mxu0  ;;  %13004 = vmatprep.subr.bf16.mxu1 %v16065_v63 }
 0x8b1   :  { %v4661_v7 = vpop.f32.mrf.mxu1  ;;  %v5064_v40 = vpop.f32.mrf.mxu0 }
 0x8b2   :  { %v4682_v38 = vadd.f32 %v4661_v7, %v19203_v16  ;;  %v5124_v21 = vadd.f32 %v5064_v40, %v19206_v30 }
 0x8b3   :  { %v4663_v29 = vpop.f32.mrf.mxu1  ;;  %v5066_v57 = vpop.f32.mrf.mxu0 }
 0x8b4   :  { %v4683_v58 = vadd.f32 %v4663_v29, %v19209_v42  ;;  %v5125_v14 = vadd.f32 %v5066_v57, %v19212_v36 }
 0x8b5   :  { %v4665_v19 = vpop.f32.mrf.mxu1  ;;  %v5068_v13 = vpop.f32.mrf.mxu0 }
 0x8b7   :  { %v4666_v12 = vpop.f32.mrf.mxu1  ;;  %v5069_v17 = vpop.f32.mrf.mxu0 }
 0x8b9   :  { %v4859_v53 = vpop.f32.mrf.mxu1  ;;  %v19254_v45 = vpop.f32.mrf.mxu0 }
 0x8ba   :  { %v19257_v44 = vadd.f32 %v4859_v53, %v19215_v41 }
 0x8bb   :  { %v4861_v56 = vpop.f32.mrf.mxu1  ;;  %v19259_v16 = vpop.f32.mrf.mxu0 }
 0x8bc   :  { %v19262_v30 = vadd.f32 %v4861_v56, %v19221_v23 }
 0x8bd   :  { %v4863_v11 = vpop.f32.mrf.mxu1  ;;  %v5266_v42 = vpop.f32.mrf.mxu0 }
 0x8bf   :  { %v4864_v46 = vpop.f32.mrf.mxu1  ;;  %v5267_v36 = vpop.f32.mrf.mxu0 }
 0x8c1   :  { %v4941_v50 = vpop.f32.mrf.mxu1  ;;  %v5344_v22 = vpop.f32.mrf.mxu0 }
 0x8c2   :  { %v5118_v62 = vadd.f32 %v4941_v50, %v19227_v6  ;;  %v5560_v59 = vadd.f32 %v5344_v22, %v19230_v0 }
 0x8c3   :  { %v4943_v49 = vpop.f32.mrf.mxu1  ;;  %v19266_v3 = vpop.f32.mrf.mxu0 }
 0x8c4   :  { %v19268_v41 = vadd.f32 %v4943_v49, %v4675_v61  ;;  %v282_v61 = vstv %s17062_s7 }
 0x8c5   :  { %v4945_v24 = vpop.f32.mrf.mxu1  ;;  %v5348_v25 = vpop.f32.mrf.mxu0  ;;  %v283_v12 = vmul.f32 0.0019569471, %v282_v61 }
 0x8c7   :  { %v4946_v4 = vpop.f32.mrf.mxu1  ;;  %v5349_v23 = vpop.f32.mrf.mxu0 }
 0x8c9   :  { %v5023_v37 = vpop.f32.mrf.mxu1  ;;  %v5426_v32 = vpop.f32.mrf.mxu0 }
 0x8ca   :  { %v5122_v43 = vadd.f32 %v5023_v37, %v4678_v35  ;;  %v5564_v48 = vadd.f32 %v5426_v32, %v5120_v34 }
 0x8cb   :  { %v5025_v28 = vpop.f32.mrf.mxu1  ;;  %v5428_v52 = vpop.f32.mrf.mxu0 }
 0x8cc   :  { %v5123_v63 = vadd.f32 %v5025_v28, %v4679_v18  ;;  %v284_v18 = vmax.f32 %v283_v12, 0.0 }
 0x8cd   :  { %v5027_v15 = vpop.f32.mrf.mxu1  ;;  %v5430_v6 = vpop.f32.mrf.mxu0 }
 0x8ce   :  { %17329 = vrsqrt.f32 %v284_v18  ;;  %vm287_vm6 = vcmp.eq.f32.partialorder %v284_v18, inf  ;;  %vm289_vm7 = vcmp.eq.f32.partialorder %v284_v18, 0.0 }
 0x8cf   :  { %v5028_v0 = vpop.f32.mrf.mxu1  ;;  %v5431_v60 = vpop.f32.mrf.mxu0 }
 0x8d0   :  { %v5565_v0 = vadd.f32 %v5428_v52, %v19248_v54 }
 0x8d1   :  { %v5105_v47 = vpop.f32.mrf.mxu1  ;;  %v5508_v10 = vpop.f32.mrf.mxu0 }
 0x8d2   :  { %v5126_v7 = vadd.f32 %v5105_v47, %v4682_v38  ;;  %v5568_v40 = vadd.f32 %v5508_v10, %v5124_v21 }
 0x8d3   :  { %v5107_v29 = vpop.f32.mrf.mxu1  ;;  %v5510_v57 = vpop.f32.mrf.mxu0 }
 0x8d4   :  { %v5127_v19 = vadd.f32 %v5107_v29, %v4683_v58  ;;  %v5569_v13 = vadd.f32 %v5510_v57, %v5125_v14 }
 0x8d5   :  { %v5109_v35 = vpop.f32.mrf.mxu1  ;;  %v5512_v34 = vpop.f32.mrf.mxu0 }
 0x8d6   :  { %v290_v35 = vand.u32 2147483648, %v284_v18 }
 0x8d7   :  { %v5110_v17 = vpop.f32.mrf.mxu1  ;;  %v5513_v53 = vpop.f32.mrf.mxu0 }
 0x8d9   :  { %v19270_v56 = vpop.f32.mrf.mxu1  ;;  %v5706_v11 = vpop.f32.mrf.mxu0 }
 0x8db   :  { %v19272_v42 = vpop.f32.mrf.mxu1  ;;  %v5708_v46 = vpop.f32.mrf.mxu0 }
 0x8dc   :  { %v17330_v28 = vpop.eup %17329 }
 0x8dd   :  { %v5307_v36 = vpop.f32.mrf.mxu1  ;;  %v5710_v38 = vpop.f32.mrf.mxu0  ;;  %v286_v10 = vmul.f32 %v17330_v28, %v284_v18 }
 0x8df   :  { %v5308_v21 = vpop.f32.mrf.mxu1  ;;  %v5711_v50 = vpop.f32.mrf.mxu0  ;;  %v288_v53 = vsel %vm287_vm6, %v284_v18, %v286_v10  ;;  %v5556_v18 = vadd.f32 %v19254_v45, %v19218_v8 }
 0x8e0   :  { %v19295_v36 = vsel %vm289_vm7, %v290_v35, %v288_v53  ;;  %v19326_v53 = vsub.s32 5, %v17949_v26 }
 0x8e1   :  { %v5385_v22 = vpop.f32.mrf.mxu1  ;;  %v5788_v58 = vpop.f32.mrf.mxu0  ;;  %v6000_v28 = vadd.f32 %v5706_v11, %v5556_v18 }
 0x8e2   :  { %v19274_v14 = vadd.f32 %v5385_v22, %v5118_v62  ;;  %v19276_v49 = vadd.f32 %v5788_v58, %v5560_v59 }
 0x8e3   :  { %v19278_v24 = vpop.f32.mrf.mxu1  ;;  %v19280_v25 = vpop.f32.mrf.mxu0 }
 0x8e5   :  { %v5389_v4 = vpop.f32.mrf.mxu1  ;;  %v5792_v23 = vpop.f32.mrf.mxu0 }
 0x8e6   :  { %v19301_v23 = vld [vmem:[#allocation16] sm:$0xff] }
 0x8e7   :  { %v5390_v37 = vpop.f32.mrf.mxu1  ;;  %v5793_v32 = vpop.f32.mrf.mxu0  ;;  %v6472_v45 = vrot.slane %v19301_v23, %v17956_v31 }
 0x8e8   :  { %v5557_v32 = vadd.f32 %v19259_v16, %v19224_v5 }
 0x8e9   :  { %v5467_v15 = vpop.f32.mrf.mxu1  ;;  %v5870_v6 = vpop.f32.mrf.mxu0 }
 0x8ea   :  { %v19283_v60 = vadd.f32 %v5467_v15, %v5122_v43  ;;  %v19285_v47 = vadd.f32 %v5870_v6, %v5564_v48  ;;  %v6001_v6 = vadd.f32 %v5708_v46, %v5557_v32  ;;  %v19323_v46 = vsub.s32 4, %v17949_v26 }
 0x8eb   :  { %v5469_v62 = vpop.f32.mrf.mxu1  ;;  %v5872_v59 = vpop.f32.mrf.mxu0 }
 0x8ec   :  { %v19287_v61 = vadd.f32 %v5469_v62, %v5123_v63  ;;  %v19289_v29 = vadd.f32 %v5872_v59, %v5565_v0  ;;  %v6561_v63 = vld [vmem:[#allocation14] sm:$0xff] }
 0x8ed   :  { %v5471_v57 = vpop.f32.mrf.mxu1  ;;  %v5874_v12 = vpop.f32.mrf.mxu0 }
 0x8ef   :  { %v5472_v34 = vpop.f32.mrf.mxu1  ;;  %v5875_v17 = vpop.f32.mrf.mxu0 }
 0x8f1   :  { %v5549_v54 = vpop.f32.mrf.mxu1  ;;  %v5952_v43 = vpop.f32.mrf.mxu0 }
 0x8f2   :  { %v19291_v52 = vadd.f32 %v5549_v54, %v5126_v7  ;;  %v19293_v48 = vadd.f32 %v5952_v43, %v5568_v40  ;;  %v19306_v7 = vmul.f32 %v6561_v63, %v19295_v36  ;;  %v5561_v54 = vadd.f32 %v19266_v3, %v19234_v2  ;;  %v7003_v2 = vld [vmem:[#allocation17 + $0x9a0] sm:$0xff] }
 0x8f3   :  { %v5551_v38 = vpop.f32.mrf.mxu1  ;;  %v5954_v21 = vpop.f32.mrf.mxu0  ;;  %v6484_v63 = vrot.slane %v19301_v23, %v19323_v46 }
 0x8f4   :  { %v19297_v50 = vadd.f32 %v5551_v38, %v5127_v19  ;;  %v19299_v22 = vadd.f32 %v5954_v21, %v5569_v13  ;;  %v6468_v19 = vrot.slane %v19301_v23, %v17953_v27  ;;  %v6570_v8 = vrot.slane %v19306_v7, %v17953_v27 }
 0x8f5   :  { %v5553_v58 = vpop.f32.mrf.mxu1  ;;  %v5956_v4 = vpop.f32.mrf.mxu0  ;;  %v6574_v16 = vrot.slane %v19306_v7, %v17956_v31  ;;  %v6005_v18 = vadd.f32 %v19280_v25, %v5561_v54 }
 0x8f6   :  { %v6488_v4 = vrot.slane %v19301_v23, %v19326_v53 }
 0x8f7   :  { %v5554_v40 = vpop.f32.mrf.mxu1  ;;  %v5957_v37 = vpop.f32.mrf.mxu0 }
 0x8f9   :  { %v19312_v13 = vpop.f32.mrf.mxu1  ;;  %v6151_v15 = vpop.f32.mrf.mxu0 }
 0x8fa   :  { %v6445_v0 = vadd.f32 %v6151_v15, %v6000_v28  ;;  %v6999_v28 = vld [vmem:[#allocation17 + $0x980] sm:$0xff]  ;;  %v6562_v15 = vld [vmem:[#allocation14 + $0x8] sm:$0xff] }
 0x8fb   :  { %v19318_v62 = vpop.f32.mrf.mxu1  ;;  %v6153_v59 = vpop.f32.mrf.mxu0 }
 0x8fc   :  { %v6545_v10 = vadd.f32 %v6468_v19, %v6445_v0  ;;  %v6446_v5 = vadd.f32 %v6153_v59, %v6001_v6 }
 0x8fd   :  { %v5751_v11 = vpop.f32.mrf.mxu1  ;;  %v6155_v57 = vpop.f32.mrf.mxu0 }
 0x8fe   :  { %v6647_v12 = vadd.f32 %v6570_v8, %v6545_v10  ;;  %v6546_v35 = vadd.f32 %v6472_v45, %v6446_v5  ;;  %v6586_v8 = vrot.slane %v19306_v7, %v19323_v46  ;;  %v19347_v10 = vld [vmem:[#allocation16 + $0x8] sm:$0xff]  ;;  %v6590_v11 = vrot.slane %v19306_v7, %v19326_v53  ;;  %v6991_v57 = vld [vmem:[#allocation17 + $0x940] sm:$0xff] }
 0x8ff   :  { %v5752_v34 = vpop.f32.mrf.mxu1  ;;  %v6156_v17 = vpop.f32.mrf.mxu0 }
 0x900   :  { %v6648_v43 = vadd.f32 %v6574_v16, %v6546_v35  ;;  %v6663_v38 = vmax.f32 %v6647_v12, 0.0  ;;  %v6995_v12 = vld [vmem:[#allocation17 + $0x960] sm:$0xff]  ;;  %v19355_v35 = vmul.f32 %v6562_v15, %v19295_v36 }
 0x901   :  { %v5829_v21 = vpop.f32.mrf.mxu1  ;;  %v6233_v58 = vpop.f32.mrf.mxu0 }
 0x902   :  { %v6664_v40 = vmax.f32 %v6648_v43, 0.0  ;;  %v19336_v37 = vadd.f32 %v5829_v21, %v19274_v14  ;;  %v6449_v32 = vadd.f32 %v6233_v58, %v19276_v49  ;;  %v19345_v25 = vpack.c.bf16 %v6663_v38, %v6663_v38 }
 0x903   :  { %v19339_v3 = vpop.f32.mrf.mxu1  ;;  %v6235_v19 = vpop.f32.mrf.mxu0  ;;  %v15929_v49 = vcombine.high %v6999_v28, %v7003_v2  ;;  %v6500_v43 = vrot.slane %v19347_v10, %v17953_v27  ;;  %v15921_v58 = vcombine.high %v6991_v57, %v6995_v12  ;;  %v6602_v20 = vrot.slane %v19355_v35, %v17953_v27 }
 0x904   :  { %v19341_v6 = vpack.c.bf16 %v6664_v40, %v6664_v40  ;;  %v6549_v0 = vadd.f32 %v6484_v63, %v6449_v32  ;;  %v6450_v45 = vadd.f32 %v6235_v19, %v6005_v18  ;;  %v15928_v63 = vcombine.low %v6999_v28, %v7003_v2  ;;  %v6983_v32 = vld [vmem:[#allocation17 + $0x900] sm:$0xff] }
 0x905   :  { %v5833_v59 = vpop.f32.mrf.mxu1  ;;  %v6237_v14 = vpop.f32.mrf.mxu0  ;;  %v6504_v40 = vrot.slane %v19347_v10, %v17956_v31  ;;  %v15920_v2 = vcombine.low %v6991_v57, %v6995_v12  ;;  %v6610_v1 = vrot.slane %v19355_v35, %v17963_v33 }
 0x906   :  { %v19349_v5 = vadd.f32 %v6586_v8, %v6549_v0  ;;  %v6550_v16 = vadd.f32 %v6488_v4, %v6450_v45  ;;  %12913 = vmatprep.mubr.bf16.mxu0 %v19341_v6  ;;  %v15913_v45 = vcombine.high %v6983_v32, %v6987_v9 }
 0x907   :  { %v5834_v34 = vpop.f32.mrf.mxu1  ;;  %v6238_v17 = vpop.f32.mrf.mxu0  ;;  %12914 = vmatmul.mubr.bf16.vlgmr.msra.gmra.mxu0 %v19345_v25 }
 0x908   :  { %v6652_v54 = vadd.f32 %v6590_v11, %v6550_v16  ;;  %12964 = vmatpush1.bf16.msra.mxu0 %v15936_v39  ;;  %v6975_v16 = vld [vmem:[#allocation17 + $0x8c0] sm:$0xff]  ;;  %v15912_v34 = vcombine.low %v6983_v32, %v6987_v9 }
 0x909   :  { %v5911_v38 = vpop.f32.mrf.mxu1  ;;  %v6315_v21 = vpop.f32.mrf.mxu0  ;;  %12965 = vmatprep.subr.bf16.mxu0 %v15929_v49  ;;  %v6606_v49 = vrot.slane %v19355_v35, %v17956_v31  ;;  %v6979_v11 = vld [vmem:[#allocation17 + $0x8e0] sm:$0xff] }
 0x90a   :  { %v6668_v4 = vmax.f32 %v6652_v54, 0.0  ;;  %v19364_v36 = vadd.f32 %v5911_v38, %v19283_v60  ;;  %v6453_v18 = vadd.f32 %v6315_v21, %v19285_v47  ;;  %v6520_v21 = vrot.slane %v19347_v10, %v19326_v53 }
 0x90b   :  { %v5913_v39 = vpop.f32.mrf.mxu1  ;;  %v6317_v28 = vpop.f32.mrf.mxu0 }
 0x90c   :  { %v19371_v19 = vpack.c.bf16 %v6668_v4, %v6668_v4  ;;  %v6553_v15 = vadd.f32 %v6500_v43, %v6453_v18  ;;  %v19374_v0 = vadd.f32 %v5913_v39, %v19287_v61  ;;  %v6454_v60 = vadd.f32 %v6317_v28, %v19289_v29  ;;  %12966 = vmatpush1.bf16.msra.mxu0 %v15928_v63  ;;  %v6971_v4 = vld [vmem:[#allocation17 + $0x8a0] sm:$0xff] }
 0x90d   :  { %v5915_v47 = vpop.f32.mrf.mxu1  ;;  %v6319_v8 = vpop.f32.mrf.mxu0  ;;  %12967 = vmatprep.subr.bf16.mxu0 %v15921_v58  ;;  %v6516_v29 = vrot.slane %v19347_v10, %v19323_v46  ;;  %v15905_v43 = vcombine.high %v6975_v16, %v6979_v11  ;;  %v6967_v58 = vld [vmem:[#allocation17 + $0x880] sm:$0xff]  ;;  %v6618_v18 = vrot.slane %v19355_v35, %v19323_v46 }
 0x90e   :  { %v19377_v59 = vadd.f32 %v6602_v20, %v6553_v15  ;;  %v6554_v14 = vadd.f32 %v6504_v40, %v6454_v60  ;;  %12995 = vmatprep.mubr.bf16.mxu0 %v19371_v19  ;;  %v5558_v15 = vadd.f32 %v19270_v56, %v19257_v44  ;;  %v6622_v8 = vrot.slane %v19355_v35, %v19326_v53 }
 0x90f   :  { %v5916_v57 = vpop.f32.mrf.mxu1  ;;  %v6320_v61 = vpop.f32.mrf.mxu0  ;;  %v6476_v56 = vrot.slane %v19301_v23, %v17963_v33 }
 0x910   :  { %v19382_v12 = vadd.f32 %v6606_v49, %v6554_v14  ;;  %12968 = vmatpush1.bf16.msra.mxu0 %v15920_v2  ;;  %v15897_v2 = vcombine.high %v6967_v58, %v6971_v4  ;;  %v6002_v57 = vadd.f32 %v19312_v13, %v5558_v15  ;;  %v6578_v13 = vrot.slane %v19306_v7, %v17963_v33 }
 0x911   :  { %v5993_v17 = vpop.f32.mrf.mxu1  ;;  %v6397_v54 = vpop.f32.mrf.mxu0  ;;  %12969 = vmatprep.subr.bf16.mxu0 %v15913_v45  ;;  %v6959_v45 = vld [vmem:[#allocation17 + $0x840] sm:$0xff] }
 0x912   :  { %v19387_v63 = vadd.f32 %v5993_v17, %v19291_v52  ;;  %v6457_v38 = vadd.f32 %v6397_v54, %v19293_v48  ;;  %v15904_v52 = vcombine.low %v6975_v16, %v6979_v11  ;;  %v19405_v16 = vsub.s32 3, %v17949_v26 }
 0x913   :  { %v5995_v40 = vpop.f32.mrf.mxu1  ;;  %v6399_v20 = vpop.f32.mrf.mxu0  ;;  %v5559_v11 = vadd.f32 %v19272_v42, %v19262_v30 }
 0x914   :  { %v6557_v32 = vadd.f32 %v6516_v29, %v6457_v38  ;;  %v19395_v9 = vadd.f32 %v5995_v40, %v19297_v50  ;;  %v6458_v39 = vadd.f32 %v6399_v20, %v19299_v22  ;;  %12970 = vmatpush1.bf16.msra.mxu0 %v15912_v34  ;;  %v6963_v50 = vld [vmem:[#allocation17 + $0x860] sm:$0xff]  ;;  %v15896_v22 = vcombine.low %v6967_v58, %v6971_v4 }
 0x915   :  { %v5997_v28 = vpop.f32.mrf.mxu1  ;;  %v6401_v48 = vpop.f32.mrf.mxu0  ;;  %12971 = vmatprep.subr.bf16.mxu0 %v15905_v43  ;;  %v15889_v29 = vcombine.high %v6959_v45, %v6963_v50  ;;  %v6003_v34 = vadd.f32 %v19318_v62, %v5559_v11  ;;  %v6480_v54 = vrot.slane %v19301_v23, %v19405_v16  ;;  %v6951_v43 = vld [vmem:[#allocation17 + $0x800] sm:$0xff]  ;;  %v15888_v58 = vcombine.low %v6959_v45, %v6963_v50 }
 0x916   :  { %v19400_v60 = vadd.f32 %v6618_v18, %v6557_v32  ;;  %v6558_v47 = vadd.f32 %v6520_v21, %v6458_v39  ;;  %v6955_v38 = vld [vmem:[#allocation17 + $0x820] sm:$0xff]  ;;  %v6582_v62 = vrot.slane %v19306_v7, %v19405_v16  ;;  %v19422_v32 = vsub.s32 6, %v17949_v26 }
 0x917   :  { %v5998_v14 = vpop.f32.mrf.mxu1  ;;  %v6402_v49 = vpop.f32.mrf.mxu0  ;;  %v15881_v18 = vcombine.high %v6951_v43, %v6955_v38  ;;  %v7071_v39 = vld [vmem:[#allocation17 + $0xbc0] sm:$0xff]  ;;  %v19425_v48 = vsub.s32 7, %v17949_v26 }
 0x918   :  { %v19410_v44 = vadd.f32 %v6622_v8, %v6558_v47  ;;  %12972 = vmatpush1.bf16.msra.mxu0 %v15904_v52  ;;  %v7075_v52 = vld [vmem:[#allocation17 + $0xbe0] sm:$0xff]  ;;  %v6492_v47 = vrot.slane %v19301_v23, %v19422_v32  ;;  %v15880_v8 = vcombine.low %v6951_v43, %v6955_v38 }
 0x919   :  { %v6192_v61 = vpop.f32.mrf.mxu1  ;;  %12973 = vmatprep.subr.bf16.mxu0 %v15897_v2  ;;  %v5563_v2 = vadd.f32 %v19278_v24, %v19268_v41  ;;  %v16001_v14 = vcombine.high %v7071_v39, %v7075_v52  ;;  %v7063_v49 = vld [vmem:[#allocation17 + $0xb80] sm:$0xff]  ;;  %v16000_v43 = vcombine.low %v7071_v39, %v7075_v52  ;;  %v6508_v39 = vrot.slane %v19347_v10, %v17963_v33 }
 0x91a   :  { %v6447_v17 = vadd.f32 %v6192_v61, %v6002_v57  ;;  %v6496_v57 = vrot.slane %v19301_v23, %v19425_v48  ;;  %v7067_v41 = vld [vmem:[#allocation17 + $0xba0] sm:$0xff]  ;;  %v6594_v61 = vrot.slane %v19306_v7, %v19422_v32 }
 0x91b   :  { %v6194_v30 = vpop.f32.mrf.mxu1  ;;  %v7127_v24 = vld [vmem:[#allocation17 + $0xd80] sm:$0xff] }
 0x91c   :  { %v6547_v42 = vadd.f32 %v6476_v56, %v6447_v17  ;;  %v6448_v21 = vadd.f32 %v6194_v30, %v6003_v34  ;;  %12974 = vmatpush1.bf16.msra.mxu0 %v15896_v22  ;;  %v6007_v22 = vadd.f32 %v19339_v3, %v5563_v2  ;;  %v7131_v56 = vld [vmem:[#allocation17 + $0xda0] sm:$0xff] }
 0x91d   :  { %v6196_v4 = vpop.f32.mrf.mxu1  ;;  %12975 = vmatprep.subr.bf16.mxu0 %v15889_v29  ;;  %v16057_v30 = vcombine.high %v7127_v24, %v7131_v56  ;;  %v7055_v23 = vld [vmem:[#allocation17 + $0xb40] sm:$0xff]  ;;  %v16056_v52 = vcombine.low %v7127_v24, %v7131_v56 }
 0x91e   :  { %v6649_v40 = vadd.f32 %v6578_v13, %v6547_v42  ;;  %v6548_v20 = vadd.f32 %v6480_v54, %v6448_v21  ;;  %v6598_v21 = vrot.slane %v19306_v7, %v19425_v48  ;;  %v7119_v4 = vld [vmem:[#allocation17 + $0xd40] sm:$0xff] }
 0x91f   :  { %v6197_v28 = vpop.f32.mrf.mxu1  ;;  %v7039_v56 = vld [vmem:[#allocation17 + $0xac0] sm:$0xff] }
 0x920   :  { %v6650_v15 = vadd.f32 %v6582_v62, %v6548_v20  ;;  %12976 = vmatpush1.bf16.msra.mxu0 %v15888_v58  ;;  %v6665_v45 = vmax.f32 %v6649_v40, 0.0  ;;  %v7059_v58 = vld [vmem:[#allocation17 + $0xb60] sm:$0xff]  ;;  %v15992_v20 = vcombine.low %v7063_v49, %v7067_v41 }
 0x921   :  { %v6274_v50 = vpop.f32.mrf.mxu1  ;;  %12977 = vmatprep.subr.bf16.mxu0 %v15881_v18  ;;  %v7123_v18 = vld [vmem:[#allocation17 + $0xd60] sm:$0xff]  ;;  %v15985_v28 = vcombine.high %v7055_v23, %v7059_v58 }
 0x922   :  { %v6666_v11 = vmax.f32 %v6650_v15, 0.0  ;;  %v6451_v26 = vadd.f32 %v6274_v50, %v19336_v37  ;;  %v19439_v3 = vpack.c.bf16 %v6665_v45, %v6665_v45  ;;  %v15993_v37 = vcombine.high %v7063_v49, %v7067_v41  ;;  %v7047_v15 = vld [vmem:[#allocation17 + $0xb00] sm:$0xff] }
 0x923   :  { %v6276_v29 = vpop.f32.mrf.mxu1  ;;  %v16049_v2 = vcombine.high %v7119_v4, %v7123_v18  ;;  %v6512_v45 = vrot.slane %v19347_v10, %v19405_v16  ;;  %v7051_v50 = vld [vmem:[#allocation17 + $0xb20] sm:$0xff]  ;;  %v15984_v49 = vcombine.low %v7055_v23, %v7059_v58  ;;  %v6524_v23 = vrot.slane %v19347_v10, %v19422_v32 }
 0x924   :  { %v19437_v34 = vpack.c.bf16 %v6666_v11, %v6666_v11  ;;  %v6551_v17 = vadd.f32 %v6492_v47, %v6451_v26  ;;  %v6452_v54 = vadd.f32 %v6276_v29, %v6007_v22  ;;  %12978 = vmatpush1.bf16.msra.mxu0 %v15880_v8  ;;  %v16048_v22 = vcombine.low %v7119_v4, %v7123_v18  ;;  %v7031_v18 = vld [vmem:[#allocation17 + $0xa80] sm:$0xff] }
 0x925   :  { %v6278_v38 = vpop.f32.mrf.mxu1  ;;  %12979 = vmatprep.subr.bf16.mxu0 %v16001_v14  ;;  %v7111_v14 = vld [vmem:[#allocation17 + $0xd00] sm:$0xff]  ;;  %v15977_v41 = vcombine.high %v7047_v15, %v7051_v50 }
 0x926   :  { %v19441_v42 = vadd.f32 %v6594_v61, %v6551_v17  ;;  %v6552_v13 = vadd.f32 %v6496_v57, %v6452_v54  ;;  %12954 = vmatprep.mubr.bf16.mxu1 %v19437_v34  ;;  %v16041_v24 = vcombine.high %v7111_v14, %v7115_v51  ;;  %v6614_v17 = vrot.slane %v19355_v35, %v19405_v16  ;;  %v7043_v54 = vld [vmem:[#allocation17 + $0xae0] sm:$0xff] }
 0x927   :  { %v6279_v40 = vpop.f32.mrf.mxu1  ;;  %12955 = vmatmul.mubr.bf16.vlgmr.msra.gmra.mxu1 %v19439_v3  ;;  %v7107_v38 = vld [vmem:[#allocation17 + $0xce0] sm:$0xff]  ;;  %v15969_v58 = vcombine.high %v7039_v56, %v7043_v54 }
 0x928   :  { %v6654_v62 = vadd.f32 %v6598_v21, %v6552_v13  ;;  %12980 = vmatpush2.bf16.msra.mxu0 %v16000_v43  ;;  %13005 = vmatpush1.bf16.msra.mxu1 %v16064_v55  ;;  %v7103_v43 = vld [vmem:[#allocation17 + $0xcc0] sm:$0xff]  ;;  %v16040_v13 = vcombine.low %v7111_v14, %v7115_v51 }
 0x929   :  { %v6356_v7 = vpop.f32.mrf.mxu1  ;;  %12981 = vmatprep.subr.bf16.mxu0 %v15993_v37  ;;  %13006 = vmatprep.subr.bf16.mxu1 %v16057_v30  ;;  %v15976_v37 = vcombine.low %v7047_v15, %v7051_v50  ;;  %v16033_v4 = vcombine.high %v7103_v43, %v7107_v38 }
 0x92a   :  { %v6670_v47 = vmax.f32 %v6654_v62, 0.0  ;;  %v6455_v8 = vadd.f32 %v6356_v7, %v19364_v36  ;;  %v7035_v62 = vld [vmem:[#allocation17 + $0xaa0] sm:$0xff]  ;;  %v6626_v7 = vrot.slane %v19355_v35, %v19422_v32 }
 0x92b   :  { %v6358_v55 = vpop.f32.mrf.mxu1 }
 0x92c   :  { %v19457_v11 = vpack.c.bf16 %v6670_v47, %v6670_v47  ;;  %v6555_v26 = vadd.f32 %v6508_v39, %v6455_v8  ;;  %v6456_v57 = vadd.f32 %v6358_v55, %v19374_v0  ;;  %12982 = vmatpush2.bf16.msra.mxu0 %v15992_v20  ;;  %13007 = vmatpush1.bf16.msra.mxu1 %v16056_v52  ;;  %v7095_v39 = vld [vmem:[#allocation17 + $0xc80] sm:$0xff] }
 0x92d   :  { %v6360_v36 = vpop.f32.mrf.mxu1  ;;  %12983 = vmatprep.subr.bf16.mxu0 %v15985_v28  ;;  %13008 = vmatprep.subr.bf16.mxu1 %v16049_v2  ;;  %v6528_v20 = vrot.slane %v19347_v10, %v19425_v48  ;;  %v7099_v52 = vld [vmem:[#allocation17 + $0xca0] sm:$0xff]  ;;  %v15968_v2 = vcombine.low %v7039_v56, %v7043_v54  ;;  %v16032_v8 = vcombine.low %v7103_v43, %v7107_v38 }
 0x92e   :  { %v19460_v61 = vadd.f32 %v6610_v1, %v6555_v26  ;;  %v6556_v29 = vadd.f32 %v6512_v45, %v6456_v57  ;;  %13036 = vmatprep.mubr.bf16.mxu1 %v19457_v11  ;;  %v16025_v50 = vcombine.high %v7095_v39, %v7099_v52  ;;  %v7023_v10 = vld [vmem:[#allocation17 + $0xa40] sm:$0xff]  ;;  %v6630_v1 = vrot.slane %v19355_v35, %v19425_v48 }
 0x92f   :  { %v6361_v0 = vpop.f32.mrf.mxu1  ;;  %v7027_v55 = vld [vmem:[#allocation17 + $0xa60] sm:$0xff]  ;;  %v15960_v57 = vcombine.low %v7031_v18, %v7035_v62  ;;  %v16024_v36 = vcombine.low %v7095_v39, %v7099_v52  ;;  %v6672_v52 = vmax.f32 %v19382_v12, 0.0 }
 0x930   :  { %v19465_v30 = vadd.f32 %v6614_v17, %v6556_v29  ;;  %12984 = vmatpush2.bf16.msra.mxu0 %v15984_v49  ;;  %13009 = vmatpush1.bf16.msra.mxu1 %v16048_v22  ;;  %v7087_v49 = vld [vmem:[#allocation17 + $0xc40] sm:$0xff]  ;;  %v15952_v35 = vcombine.low %v7023_v10, %v7027_v55 }
 0x931   :  { %v6438_v21 = vpop.f32.mrf.mxu1  ;;  %12985 = vmatprep.subr.bf16.mxu0 %v15977_v41  ;;  %13010 = vmatprep.subr.bf16.mxu1 %v16041_v24  ;;  %v7091_v22 = vld [vmem:[#allocation17 + $0xc60] sm:$0xff]  ;;  %v15953_v41 = vcombine.high %v7023_v10, %v7027_v55 }
 0x932   :  { %v6459_v40 = vadd.f32 %v6438_v21, %v19387_v63  ;;  %v15961_v63 = vcombine.high %v7031_v18, %v7035_v62  ;;  %v16017_v24 = vcombine.high %v7087_v49, %v7091_v22  ;;  %v7015_v56 = vld [vmem:[#allocation17 + $0xa00] sm:$0xff]  ;;  %v16016_v43 = vcombine.low %v7087_v49, %v7091_v22 }
 0x933   :  { %v6440_v28 = vpop.f32.mrf.mxu1  ;;  %v7019_v29 = vld [vmem:[#allocation17 + $0xa20] sm:$0xff]  ;;  %v6667_v18 = vmax.f32 %v19349_v5, 0.0 }
 0x934   :  { %v6559_v15 = vadd.f32 %v6524_v23, %v6459_v40  ;;  %v6460_v47 = vadd.f32 %v6440_v28, %v19395_v9  ;;  %12986 = vmatpush2.bf16.msra.mxu0 %v15976_v37  ;;  %13011 = vmatpush1.bf16.msra.mxu1 %v16040_v13  ;;  %v7079_v17 = vld [vmem:[#allocation17 + $0xc00] sm:$0xff]  ;;  %v15945_v38 = vcombine.high %v7015_v56, %v7019_v29 }
 0x935   :  { %v6442_v45 = vpop.f32.mrf.mxu1  ;;  %12987 = vmatprep.subr.bf16.mxu0 %v15969_v58  ;;  %13012 = vmatprep.subr.bf16.mxu1 %v16033_v4  ;;  %v7083_v54 = vld [vmem:[#allocation17 + $0xc20] sm:$0xff]  ;;  %v15944_v58 = vcombine.low %v7015_v56, %v7019_v29 }
 0x936   :  { %v19475_v14 = vadd.f32 %v6626_v7, %v6559_v15  ;;  %v6560_v51 = vadd.f32 %v6528_v20, %v6460_v47  ;;  %v16009_v0 = vcombine.high %v7079_v17, %v7083_v54  ;;  %v7199_v37 = vld [vmem:[#allocation17 + $0xfc0] sm:$0xff]  ;;  %v16008_v4 = vcombine.low %v7079_v17, %v7083_v54 }
 0x937   :  { %v6443_v26 = vpop.f32.mrf.mxu1  ;;  %v7203_v23 = vld [vmem:[#allocation17 + $0xfe0] sm:$0xff]  ;;  %v19483_v47 = vpack.c.bf16 %v6667_v18, %v6667_v18 }
 0x938   :  { %v19479_v9 = vadd.f32 %v6630_v1, %v6560_v51  ;;  %12988 = vmatpush2.bf16.msra.mxu0 %v15968_v2  ;;  %13013 = vmatpush1.bf16.msra.mxu1 %v16032_v8  ;;  %v7263_v13 = vld [vmem:[#allocation17 + $0x11c0] sm:$0xff]  ;;  %v16129_v40 = vcombine.high %v7199_v37, %v7203_v23  ;;  %v16128_v2 = vcombine.low %v7199_v37, %v7203_v23 }
 0x939   :  { %12989 = vmatprep.subr.bf16.mxu0 %v15961_v63  ;;  %13014 = vmatprep.subr.bf16.mxu1 %v16025_v50  ;;  %v7267_v21 = vld [vmem:[#allocation17 + $0x11e0] sm:$0xff]  ;;  %v19485_v51 = vpack.c.bf16 %v6672_v52, %v6672_v52 }
 0x93a   :  { %v16193_v20 = vcombine.high %v7263_v13, %v7267_v21  ;;  %v7191_v62 = vld [vmem:[#allocation17 + $0xf80] sm:$0xff]  ;;  %v16192_v15 = vcombine.low %v7263_v13, %v7267_v21 }
 0x93b   :  { %v7195_v39 = vld [vmem:[#allocation17 + $0xfa0] sm:$0xff] }
 0x93c   :  { %12990 = vmatpush2.bf16.msra.mxu0 %v15960_v57  ;;  %13015 = vmatpush1.bf16.msra.mxu1 %v16024_v36  ;;  %v7255_v7 = vld [vmem:[#allocation17 + $0x1180] sm:$0xff]  ;;  %v16121_v8 = vcombine.high %v7191_v62, %v7195_v39  ;;  %v16120_v12 = vcombine.low %v7191_v62, %v7195_v39 }
 0x93d   :  { %12991 = vmatprep.subr.bf16.mxu0 %v15953_v41  ;;  %13016 = vmatprep.subr.bf16.mxu1 %v16017_v24  ;;  %v7259_v28 = vld [vmem:[#allocation17 + $0x11a0] sm:$0xff] }
 0x93e   :  { %v7183_v5 = vld [vmem:[#allocation17 + $0xf40] sm:$0xff]  ;;  %v16185_v45 = vcombine.high %v7255_v7, %v7259_v28  ;;  %v16184_v1 = vcombine.low %v7255_v7, %v7259_v28 }
 0x93f   :  { %v7187_v63 = vld [vmem:[#allocation17 + $0xf60] sm:$0xff] }
 0x940   :  { %12992 = vmatpush2.bf16.msra.mxu0 %v15952_v35  ;;  %13017 = vmatpush1.bf16.msra.mxu1 %v16016_v43  ;;  %v7247_v50 = vld [vmem:[#allocation17 + $0x1140] sm:$0xff]  ;;  %v16113_v55 = vcombine.high %v7183_v5, %v7187_v63  ;;  %v16112_v41 = vcombine.low %v7183_v5, %v7187_v63 }
 0x941   :  { %12993 = vmatprep.subr.bf16.mxu0 %v15945_v38  ;;  %13018 = vmatprep.subr.bf16.mxu1 %v16009_v0  ;;  %v7251_v10 = vld [vmem:[#allocation17 + $0x1160] sm:$0xff] }
 0x942   :  { %v16177_v49 = vcombine.high %v7247_v50, %v7251_v10  ;;  %v7175_v22 = vld [vmem:[#allocation17 + $0xf00] sm:$0xff]  ;;  %v16176_v24 = vcombine.low %v7247_v50, %v7251_v10 }
 0x943   :  { %v7179_v26 = vld [vmem:[#allocation17 + $0xf20] sm:$0xff] }
 0x944   :  { %12994 = vmatpush2.bf16.msra.mxu0 %v15944_v58  ;;  %13019 = vmatpush1.bf16.msra.mxu1 %v16008_v4  ;;  %v7239_v57 = vld [vmem:[#allocation17 + $0x1100] sm:$0xff]  ;;  %v16105_v56 = vcombine.high %v7175_v22, %v7179_v26  ;;  %v16104_v38 = vcombine.low %v7175_v22, %v7179_v26 }
 0x945   :  { %13020 = vmatprep.subr.bf16.mxu1 %v16129_v40  ;;  %13045 = vmatprep.subr.bf16.mxu0 %v16193_v20  ;;  %v7243_v36 = vld [vmem:[#allocation17 + $0x1120] sm:$0xff] }
 0x946   :  { %v16169_v29 = vcombine.high %v7239_v57, %v7243_v36  ;;  %v7167_v17 = vld [vmem:[#allocation17 + $0xec0] sm:$0xff]  ;;  %v16168_v0 = vcombine.low %v7239_v57, %v7243_v36 }
 0x947   :  { %12996 = vmatmul.mubr.bf16.vlgmr.msra.gmra.mxu0 %v19483_v47  ;;  %v7171_v54 = vld [vmem:[#allocation17 + $0xee0] sm:$0xff] }
 0x948   :  { %13021 = vmatpush2.bf16.msra.mxu1 %v16128_v2  ;;  %13046 = vmatpush1.bf16.msra.mxu0 %v16192_v15  ;;  %v7231_v35 = vld [vmem:[#allocation17 + $0x10c0] sm:$0xff]  ;;  %v16097_v37 = vcombine.high %v7167_v17, %v7171_v54  ;;  %v16096_v18 = vcombine.low %v7167_v17, %v7171_v54 }
 0x949   :  { %13077 = vmatprep.mubr.bf16.mxu0 %v19485_v51  ;;  %13022 = vmatprep.subr.bf16.mxu1 %v16121_v8  ;;  %v7235_v43 = vld [vmem:[#allocation17 + $0x10e0] sm:$0xff] }
 0x94a   :  { %13047 = vmatprep.subr.bf16.mxu0 %v16185_v45  ;;  %v16161_v23 = vcombine.high %v7231_v35, %v7235_v43  ;;  %v7159_v13 = vld [vmem:[#allocation17 + $0xe80] sm:$0xff]  ;;  %v16160_v40 = vcombine.low %v7231_v35, %v7235_v43  ;;  %v6674_v43 = vmax.f32 %v19465_v30, 0.0 }
 0x94b   :  { %v7163_v21 = vld [vmem:[#allocation17 + $0xea0] sm:$0xff] }
 0x94c   :  { %13023 = vmatpush2.bf16.msra.mxu1 %v16120_v12  ;;  %13048 = vmatpush1.bf16.msra.mxu0 %v16184_v1  ;;  %v7223_v58 = vld [vmem:[#allocation17 + $0x1080] sm:$0xff]  ;;  %v16089_v20 = vcombine.high %v7159_v13, %v7163_v21  ;;  %v16088_v2 = vcombine.low %v7159_v13, %v7163_v21 }
 0x94d   :  { %13024 = vmatprep.subr.bf16.mxu1 %v16113_v55  ;;  %13049 = vmatprep.subr.bf16.mxu0 %v16177_v49  ;;  %v7227_v4 = vld [vmem:[#allocation17 + $0x10a0] sm:$0xff] }
 0x94e   :  { %v16153_v62 = vcombine.high %v7223_v58, %v7227_v4  ;;  %v7151_v39 = vld [vmem:[#allocation17 + $0xe40] sm:$0xff]  ;;  %v16152_v15 = vcombine.low %v7223_v58, %v7227_v4 }
 0x94f   :  { %v7155_v52 = vld [vmem:[#allocation17 + $0xe60] sm:$0xff] }
 0x950   :  { %13025 = vmatpush2.bf16.msra.mxu1 %v16112_v41  ;;  %13050 = vmatpush1.bf16.msra.mxu0 %v16176_v24  ;;  %v7215_v7 = vld [vmem:[#allocation17 + $0x1040] sm:$0xff]  ;;  %v16081_v8 = vcombine.high %v7151_v39, %v7155_v52  ;;  %v16080_v12 = vcombine.low %v7151_v39, %v7155_v52 }
 0x951   :  { %13026 = vmatprep.subr.bf16.mxu1 %v16105_v56  ;;  %13051 = vmatprep.subr.bf16.mxu0 %v16169_v29  ;;  %v7219_v28 = vld [vmem:[#allocation17 + $0x1060] sm:$0xff]  ;;  %v6669_v56 = vmax.f32 %v19441_v42, 0.0 }
 0x952   :  { %v16145_v5 = vcombine.high %v7215_v7, %v7219_v28  ;;  %v7143_v45 = vld [vmem:[#allocation17 + $0xe00] sm:$0xff]  ;;  %v16144_v1 = vcombine.low %v7215_v7, %v7219_v28 }
 0x953   :  { %v7147_v63 = vld [vmem:[#allocation17 + $0xe20] sm:$0xff]  ;;  %v19491_v13 = vpack.c.bf16 %v6669_v56, %v6669_v56 }
 0x954   :  { %13027 = vmatpush2.bf16.msra.mxu1 %v16104_v38  ;;  %13052 = vmatpush1.bf16.msra.mxu0 %v16168_v0  ;;  %v7207_v50 = vld [vmem:[#allocation17 + $0x1000] sm:$0xff]  ;;  %v16073_v55 = vcombine.high %v7143_v45, %v7147_v63  ;;  %v16072_v41 = vcombine.low %v7143_v45, %v7147_v63 }
 0x955   :  { %13028 = vmatprep.subr.bf16.mxu1 %v16097_v37  ;;  %13053 = vmatprep.subr.bf16.mxu0 %v16161_v23  ;;  %v7211_v10 = vld [vmem:[#allocation17 + $0x1020] sm:$0xff] }
 0x956   :  { %v16137_v49 = vcombine.high %v7207_v50, %v7211_v10  ;;  %v7327_v22 = vld [vmem:[#allocation17 + $0x13c0] sm:$0xff]  ;;  %v16136_v24 = vcombine.low %v7207_v50, %v7211_v10 }
 0x957   :  { %v7331_v26 = vld [vmem:[#allocation17 + $0x13e0] sm:$0xff] }
 0x958   :  { %13029 = vmatpush2.bf16.msra.mxu1 %v16096_v18  ;;  %13054 = vmatpush1.bf16.msra.mxu0 %v16160_v40  ;;  %v7391_v57 = vld [vmem:[#allocation17 + $0x15c0] sm:$0xff]  ;;  %v16257_v29 = vcombine.high %v7327_v22, %v7331_v26  ;;  %v16256_v37 = vcombine.low %v7327_v22, %v7331_v26 }
 0x959   :  { %13030 = vmatprep.subr.bf16.mxu1 %v16089_v20  ;;  %13055 = vmatprep.subr.bf16.mxu0 %v16153_v62  ;;  %v7395_v36 = vld [vmem:[#allocation17 + $0x15e0] sm:$0xff]  ;;  %v19493_v20 = vpack.c.bf16 %v6674_v43, %v6674_v43 }
 0x95a   :  { %v16321_v17 = vcombine.high %v7391_v57, %v7395_v36  ;;  %v7319_v54 = vld [vmem:[#allocation17 + $0x1380] sm:$0xff]  ;;  %v16320_v23 = vcombine.low %v7391_v57, %v7395_v36 }
 0x95b   :  { %v7323_v35 = vld [vmem:[#allocation17 + $0x13a0] sm:$0xff] }
 0x95c   :  { %13031 = vmatpush2.bf16.msra.mxu1 %v16088_v2  ;;  %13056 = vmatpush1.bf16.msra.mxu0 %v16152_v15  ;;  %v7383_v38 = vld [vmem:[#allocation17 + $0x1580] sm:$0xff]  ;;  %v16249_v21 = vcombine.high %v7319_v54, %v7323_v35  ;;  %v16248_v30 = vcombine.low %v7319_v54, %v7323_v35 }
 0x95d   :  { %13032 = vmatprep.subr.bf16.mxu1 %v16081_v8  ;;  %13057 = vmatprep.subr.bf16.mxu0 %v16145_v5  ;;  %v7387_v0 = vld [vmem:[#allocation17 + $0x15a0] sm:$0xff] }
 0x95e   :  { %v7311_v42 = vld [vmem:[#allocation17 + $0x1340] sm:$0xff]  ;;  %v16313_v58 = vcombine.high %v7383_v38, %v7387_v0  ;;  %v16312_v62 = vcombine.low %v7383_v38, %v7387_v0 }
 0x95f   :  { %v7315_v4 = vld [vmem:[#allocation17 + $0x1360] sm:$0xff] }
 0x960   :  { %13033 = vmatpush2.bf16.msra.mxu1 %v16080_v12  ;;  %13058 = vmatpush1.bf16.msra.mxu0 %v16144_v1  ;;  %v7375_v18 = vld [vmem:[#allocation17 + $0x1540] sm:$0xff]  ;;  %v16241_v39 = vcombine.high %v7311_v42, %v7315_v4  ;;  %v16240_v8 = vcombine.low %v7311_v42, %v7315_v4 }
 0x961   :  { %13034 = vmatprep.subr.bf16.mxu1 %v16073_v55  ;;  %13059 = vmatprep.subr.bf16.mxu0 %v16137_v49  ;;  %v7379_v40 = vld [vmem:[#allocation17 + $0x1560] sm:$0xff] }
 0x962   :  { %v16305_v52 = vcombine.high %v7375_v18, %v7379_v40  ;;  %v7303_v7 = vld [vmem:[#allocation17 + $0x1300] sm:$0xff]  ;;  %v16304_v5 = vcombine.low %v7375_v18, %v7379_v40 }
 0x963   :  { %v7307_v28 = vld [vmem:[#allocation17 + $0x1320] sm:$0xff] }
 0x964   :  { %13035 = vmatpush2.bf16.msra.mxu1 %v16072_v41  ;;  %13060 = vmatpush1.bf16.msra.mxu0 %v16136_v24  ;;  %v7367_v2 = vld [vmem:[#allocation17 + $0x1500] sm:$0xff]  ;;  %v16233_v45 = vcombine.high %v7303_v7, %v7307_v28  ;;  %v16232_v55 = vcombine.low %v7303_v7, %v7307_v28 }
 0x965   :  { %13061 = vmatprep.subr.bf16.mxu0 %v16257_v29  ;;  %13086 = vmatprep.subr.bf16.mxu1 %v16321_v17  ;;  %v7371_v15 = vld [vmem:[#allocation17 + $0x1520] sm:$0xff] }
 0x966   :  { %v16297_v63 = vcombine.high %v7367_v2, %v7371_v15  ;;  %v7295_v50 = vld [vmem:[#allocation17 + $0x12c0] sm:$0xff]  ;;  %v16296_v49 = vcombine.low %v7367_v2, %v7371_v15 }
 0x967   :  { %13037 = vmatmul.mubr.bf16.vlgmr.msra.gmra.mxu1 %v19491_v13  ;;  %v7299_v10 = vld [vmem:[#allocation17 + $0x12e0] sm:$0xff] }
 0x968   :  { %13062 = vmatpush2.bf16.msra.mxu0 %v16256_v37  ;;  %13087 = vmatpush1.bf16.msra.mxu1 %v16320_v23  ;;  %v7359_v12 = vld [vmem:[#allocation17 + $0x14c0] sm:$0xff]  ;;  %v16225_v22 = vcombine.high %v7295_v50, %v7299_v10  ;;  %v16224_v56 = vcombine.low %v7295_v50, %v7299_v10 }
 0x969   :  { %13118 = vmatprep.mubr.bf16.mxu1 %v19493_v20  ;;  %13063 = vmatprep.subr.bf16.mxu0 %v16249_v21  ;;  %v7363_v1 = vld [vmem:[#allocation17 + $0x14e0] sm:$0xff] }
 0x96a   :  { %13088 = vmatprep.subr.bf16.mxu1 %v16313_v58  ;;  %v16289_v26 = vcombine.high %v7359_v12, %v7363_v1  ;;  %v7287_v57 = vld [vmem:[#allocation17 + $0x1280] sm:$0xff]  ;;  %v16288_v29 = vcombine.low %v7359_v12, %v7363_v1  ;;  %v6676_v1 = vmax.f32 %v19410_v44, 0.0 }
 0x96b   :  { %v7291_v36 = vld [vmem:[#allocation17 + $0x12a0] sm:$0xff] }
 0x96c   :  { %13064 = vmatpush2.bf16.msra.mxu0 %v16248_v30  ;;  %13089 = vmatpush1.bf16.msra.mxu1 %v16312_v62  ;;  %v7351_v41 = vld [vmem:[#allocation17 + $0x1480] sm:$0xff]  ;;  %v16217_v17 = vcombine.high %v7287_v57, %v7291_v36  ;;  %v16216_v37 = vcombine.low %v7287_v57, %v7291_v36 }
 0x96d   :  { %13065 = vmatprep.subr.bf16.mxu0 %v16241_v39  ;;  %13090 = vmatprep.subr.bf16.mxu1 %v16305_v52  ;;  %v7355_v24 = vld [vmem:[#allocation17 + $0x14a0] sm:$0xff] }
 0x96e   :  { %v16281_v54 = vcombine.high %v7351_v41, %v7355_v24  ;;  %v7279_v35 = vld [vmem:[#allocation17 + $0x1240] sm:$0xff]  ;;  %v16280_v23 = vcombine.low %v7351_v41, %v7355_v24 }
 0x96f   :  { %v7283_v43 = vld [vmem:[#allocation17 + $0x1260] sm:$0xff] }
 0x970   :  { %13066 = vmatpush2.bf16.msra.mxu0 %v16240_v8  ;;  %13091 = vmatpush1.bf16.msra.mxu1 %v16304_v5  ;;  %v7343_v38 = vld [vmem:[#allocation17 + $0x1440] sm:$0xff]  ;;  %v16209_v21 = vcombine.high %v7279_v35, %v7283_v43  ;;  %v16208_v30 = vcombine.low %v7279_v35, %v7283_v43 }
 0x971   :  { %13067 = vmatprep.subr.bf16.mxu0 %v16233_v45  ;;  %13092 = vmatprep.subr.bf16.mxu1 %v16297_v63  ;;  %v7347_v0 = vld [vmem:[#allocation17 + $0x1460] sm:$0xff]  ;;  %v6671_v45 = vmax.f32 %v19377_v59, 0.0 }
 0x972   :  { %v16273_v42 = vcombine.high %v7343_v38, %v7347_v0  ;;  %v7271_v58 = vld [vmem:[#allocation17 + $0x1200] sm:$0xff]  ;;  %v16272_v62 = vcombine.low %v7343_v38, %v7347_v0 }
 0x973   :  { %v7275_v4 = vld [vmem:[#allocation17 + $0x1220] sm:$0xff]  ;;  %v19499_v57 = vpack.c.bf16 %v6671_v45, %v6671_v45 }
 0x974   :  { %13068 = vmatpush2.bf16.msra.mxu0 %v16232_v55  ;;  %13093 = vmatpush1.bf16.msra.mxu1 %v16296_v49  ;;  %v7335_v18 = vld [vmem:[#allocation17 + $0x1400] sm:$0xff]  ;;  %v16201_v39 = vcombine.high %v7271_v58, %v7275_v4  ;;  %v16200_v8 = vcombine.low %v7271_v58, %v7275_v4 }
 0x975   :  { %13069 = vmatprep.subr.bf16.mxu0 %v16225_v22  ;;  %13094 = vmatprep.subr.bf16.mxu1 %v16289_v26  ;;  %v7339_v40 = vld [vmem:[#allocation17 + $0x1420] sm:$0xff] }
 0x976   :  { %v16265_v52 = vcombine.high %v7335_v18, %v7339_v40  ;;  %v7455_v7 = vld [vmem:[#allocation17 + $0x17c0] sm:$0xff]  ;;  %v16264_v5 = vcombine.low %v7335_v18, %v7339_v40 }
 0x977   :  { %v7459_v28 = vld [vmem:[#allocation17 + $0x17e0] sm:$0xff] }
 0x978   :  { %13070 = vmatpush2.bf16.msra.mxu0 %v16224_v56  ;;  %13095 = vmatpush1.bf16.msra.mxu1 %v16288_v29  ;;  %v7519_v2 = vld [vmem:[#allocation17 + $0x19c0] sm:$0xff]  ;;  %v16385_v63 = vcombine.high %v7455_v7, %v7459_v28  ;;  %v16384_v22 = vcombine.low %v7455_v7, %v7459_v28 }
 0x979   :  { %13071 = vmatprep.subr.bf16.mxu0 %v16217_v17  ;;  %13096 = vmatprep.subr.bf16.mxu1 %v16281_v54  ;;  %v7523_v15 = vld [vmem:[#allocation17 + $0x19e0] sm:$0xff]  ;;  %v19501_v17 = vpack.c.bf16 %v6676_v1, %v6676_v1 }
 0x97a   :  { %v16449_v50 = vcombine.high %v7519_v2, %v7523_v15  ;;  %v7447_v10 = vld [vmem:[#allocation17 + $0x1780] sm:$0xff]  ;;  %v16448_v26 = vcombine.low %v7519_v2, %v7523_v15 }
 0x97b   :  { %v7451_v12 = vld [vmem:[#allocation17 + $0x17a0] sm:$0xff] }
 0x97c   :  { %13072 = vmatpush2.bf16.msra.mxu0 %v16216_v37  ;;  %13097 = vmatpush1.bf16.msra.mxu1 %v16280_v23  ;;  %v7511_v55 = vld [vmem:[#allocation17 + $0x1980] sm:$0xff]  ;;  %v16377_v36 = vcombine.high %v7447_v10, %v7451_v12  ;;  %v16376_v44 = vcombine.low %v7447_v10, %v7451_v12 }
 0x97d   :  { %13073 = vmatprep.subr.bf16.mxu0 %v16209_v21  ;;  %13098 = vmatprep.subr.bf16.mxu1 %v16273_v42  ;;  %v7515_v49 = vld [vmem:[#allocation17 + $0x19a0] sm:$0xff] }
 0x97e   :  { %v7439_v59 = vld [vmem:[#allocation17 + $0x1740] sm:$0xff]  ;;  %v16441_v41 = vcombine.high %v7511_v55, %v7515_v49  ;;  %v16440_v54 = vcombine.low %v7511_v55, %v7515_v49 }
 0x97f   :  { %v7443_v24 = vld [vmem:[#allocation17 + $0x1760] sm:$0xff] }
 0x980   :  { %13074 = vmatpush2.bf16.msra.mxu0 %v16208_v30  ;;  %13099 = vmatpush1.bf16.msra.mxu1 %v16272_v62  ;;  %v7503_v56 = vld [vmem:[#allocation17 + $0x1940] sm:$0xff]  ;;  %v16369_v35 = vcombine.high %v7439_v59, %v7443_v24  ;;  %v16368_v21 = vcombine.low %v7439_v59, %v7443_v24 }
 0x981   :  { %13075 = vmatprep.subr.bf16.mxu0 %v16201_v39  ;;  %13100 = vmatprep.subr.bf16.mxu1 %v16265_v52  ;;  %v7507_v29 = vld [vmem:[#allocation17 + $0x1960] sm:$0xff] }
 0x982   :  { %v16433_v43 = vcombine.high %v7503_v56, %v7507_v29  ;;  %v7431_v38 = vld [vmem:[#allocation17 + $0x1700] sm:$0xff]  ;;  %v16432_v42 = vcombine.low %v7503_v56, %v7507_v29 }
 0x983   :  { %v7435_v0 = vld [vmem:[#allocation17 + $0x1720] sm:$0xff] }
 0x984   :  { %13076 = vmatpush2.bf16.msra.mxu0 %v16200_v8  ;;  %13101 = vmatpush1.bf16.msra.mxu1 %v16264_v5  ;;  %v7495_v37 = vld [vmem:[#allocation17 + $0x1900] sm:$0xff]  ;;  %v16361_v58 = vcombine.high %v7431_v38, %v7435_v0  ;;  %v16360_v39 = vcombine.low %v7431_v38, %v7435_v0 }
 0x985   :  { %13102 = vmatprep.subr.bf16.mxu1 %v16385_v63  ;;  %13127 = vmatprep.subr.bf16.mxu0 %v16449_v50  ;;  %v7499_v23 = vld [vmem:[#allocation17 + $0x1920] sm:$0xff] }
 0x986   :  { %v16425_v4 = vcombine.high %v7495_v37, %v7499_v23  ;;  %v7423_v18 = vld [vmem:[#allocation17 + $0x16c0] sm:$0xff]  ;;  %v16424_v52 = vcombine.low %v7495_v37, %v7499_v23 }
 0x987   :  { %13078 = vmatmul.mubr.bf16.vlgmr.msra.gmra.mxu0 %v19499_v57  ;;  %v7427_v40 = vld [vmem:[#allocation17 + $0x16e0] sm:$0xff] }
 0x988   :  { %13103 = vmatpush2.bf16.msra.mxu1 %v16384_v22  ;;  %13128 = vmatpush1.bf16.msra.mxu0 %v16448_v26  ;;  %v7487_v30 = vld [vmem:[#allocation17 + $0x18c0] sm:$0xff]  ;;  %v16353_v7 = vcombine.high %v7423_v18, %v7427_v40  ;;  %v16352_v45 = vcombine.low %v7423_v18, %v7427_v40 }
 0x989   :  { %13159 = vmatprep.mubr.bf16.mxu0 %v19501_v17  ;;  %13104 = vmatprep.subr.bf16.mxu1 %v16377_v36  ;;  %v7491_v62 = vld [vmem:[#allocation17 + $0x18e0] sm:$0xff] }
 0x98a   :  { %13129 = vmatprep.subr.bf16.mxu0 %v16441_v41  ;;  %v16417_v28 = vcombine.high %v7487_v30, %v7491_v62  ;;  %v7415_v2 = vld [vmem:[#allocation17 + $0x1680] sm:$0xff]  ;;  %v16416_v63 = vcombine.low %v7487_v30, %v7491_v62  ;;  %v6678_v62 = vmax.f32 %v19479_v9, 0.0 }
 0x98b   :  { %v7419_v15 = vld [vmem:[#allocation17 + $0x16a0] sm:$0xff] }
 0x98c   :  { %13105 = vmatpush2.bf16.msra.mxu1 %v16376_v44  ;;  %13130 = vmatpush1.bf16.msra.mxu0 %v16440_v54  ;;  %v7479_v8 = vld [vmem:[#allocation17 + $0x1880] sm:$0xff]  ;;  %v16345_v50 = vcombine.high %v7415_v2, %v7419_v15  ;;  %v16344_v22 = vcombine.low %v7415_v2, %v7419_v15 }
 0x98d   :  { %13106 = vmatprep.subr.bf16.mxu1 %v16369_v35  ;;  %13131 = vmatprep.subr.bf16.mxu0 %v16433_v43  ;;  %v7483_v5 = vld [vmem:[#allocation17 + $0x18a0] sm:$0xff] }
 0x98e   :  { %v16409_v10 = vcombine.high %v7479_v8, %v7483_v5  ;;  %v7407_v12 = vld [vmem:[#allocation17 + $0x1640] sm:$0xff]  ;;  %v16408_v26 = vcombine.low %v7479_v8, %v7483_v5 }
 0x98f   :  { %v7411_v1 = vld [vmem:[#allocation17 + $0x1660] sm:$0xff] }
 0x990   :  { %13107 = vmatpush2.bf16.msra.mxu1 %v16368_v21  ;;  %13132 = vmatpush1.bf16.msra.mxu0 %v16432_v42  ;;  %v7471_v55 = vld [vmem:[#allocation17 + $0x1840] sm:$0xff]  ;;  %v16337_v36 = vcombine.high %v7407_v12, %v7411_v1  ;;  %v16336_v44 = vcombine.low %v7407_v12, %v7411_v1 }
 0x991   :  { %13108 = vmatprep.subr.bf16.mxu1 %v16361_v58  ;;  %13133 = vmatprep.subr.bf16.mxu0 %v16425_v4  ;;  %v7475_v49 = vld [vmem:[#allocation17 + $0x1860] sm:$0xff]  ;;  %v6673_v58 = vmax.f32 %v19460_v61, 0.0 }
 0x992   :  { %v16401_v59 = vcombine.high %v7471_v55, %v7475_v49  ;;  %v7399_v41 = vld [vmem:[#allocation17 + $0x1600] sm:$0xff]  ;;  %v16400_v54 = vcombine.low %v7471_v55, %v7475_v49 }
 0x993   :  { %v7403_v24 = vld [vmem:[#allocation17 + $0x1620] sm:$0xff]  ;;  %v19507_v2 = vpack.c.bf16 %v6673_v58, %v6673_v58 }
 0x994   :  { %13109 = vmatpush2.bf16.msra.mxu1 %v16360_v39  ;;  %13134 = vmatpush1.bf16.msra.mxu0 %v16424_v52  ;;  %v7463_v56 = vld [vmem:[#allocation17 + $0x1800] sm:$0xff]  ;;  %v16329_v35 = vcombine.high %v7399_v41, %v7403_v24  ;;  %v16328_v21 = vcombine.low %v7399_v41, %v7403_v24 }
 0x995   :  { %13110 = vmatprep.subr.bf16.mxu1 %v16353_v7  ;;  %13135 = vmatprep.subr.bf16.mxu0 %v16417_v28  ;;  %v7467_v29 = vld [vmem:[#allocation17 + $0x1820] sm:$0xff] }
 0x996   :  { %v16393_v43 = vcombine.high %v7463_v56, %v7467_v29  ;;  %v7583_v38 = vld [vmem:[#allocation17 + $0x1bc0] sm:$0xff]  ;;  %v16392_v42 = vcombine.low %v7463_v56, %v7467_v29 }
 0x997   :  { %v7587_v0 = vld [vmem:[#allocation17 + $0x1be0] sm:$0xff] }
 0x998   :  { %13111 = vmatpush2.bf16.msra.mxu1 %v16352_v45  ;;  %13136 = vmatpush1.bf16.msra.mxu0 %v16416_v63  ;;  %v7647_v37 = vld [vmem:[#allocation17 + $0x1dc0] sm:$0xff]  ;;  %v16513_v4 = vcombine.high %v7583_v38, %v7587_v0  ;;  %v16512_v7 = vcombine.low %v7583_v38, %v7587_v0 }
 0x999   :  { %13112 = vmatprep.subr.bf16.mxu1 %v16345_v50  ;;  %13137 = vmatprep.subr.bf16.mxu0 %v16409_v10  ;;  %v7651_v23 = vld [vmem:[#allocation17 + $0x1de0] sm:$0xff]  ;;  %v19509_v50 = vpack.c.bf16 %v6678_v62, %v6678_v62 }
 0x99a   :  { %v16577_v18 = vcombine.high %v7647_v37, %v7651_v23  ;;  %v7575_v40 = vld [vmem:[#allocation17 + $0x1b80] sm:$0xff]  ;;  %v16576_v28 = vcombine.low %v7647_v37, %v7651_v23 }
 0x99b   :  { %v7579_v30 = vld [vmem:[#allocation17 + $0x1ba0] sm:$0xff] }
 0x99c   :  { %13113 = vmatpush2.bf16.msra.mxu1 %v16344_v22  ;;  %13138 = vmatpush1.bf16.msra.mxu0 %v16408_v26  ;;  %v7639_v39 = vld [vmem:[#allocation17 + $0x1d80] sm:$0xff]  ;;  %v16505_v15 = vcombine.high %v7575_v40, %v7579_v30  ;;  %v16504_v9 = vcombine.low %v7575_v40, %v7579_v30 }
 0x99d   :  { %13114 = vmatprep.subr.bf16.mxu1 %v16337_v36  ;;  %13139 = vmatprep.subr.bf16.mxu0 %v16401_v59  ;;  %v7643_v52 = vld [vmem:[#allocation17 + $0x1da0] sm:$0xff] }
 0x99e   :  { %v7567_v61 = vld [vmem:[#allocation17 + $0x1b40] sm:$0xff]  ;;  %v16569_v8 = vcombine.high %v7639_v39, %v7643_v52  ;;  %v16568_v10 = vcombine.low %v7639_v39, %v7643_v52 }
 0x99f   :  { %v7571_v5 = vld [vmem:[#allocation17 + $0x1b60] sm:$0xff] }
 0x9a0   :  { %13115 = vmatpush2.bf16.msra.mxu1 %v16336_v44  ;;  %13140 = vmatpush1.bf16.msra.mxu0 %v16400_v54  ;;  %v7631_v45 = vld [vmem:[#allocation17 + $0x1d40] sm:$0xff]  ;;  %v16497_v12 = vcombine.high %v7567_v61, %v7571_v5  ;;  %v16496_v36 = vcombine.low %v7567_v61, %v7571_v5 }
 0x9a1   :  { %13116 = vmatprep.subr.bf16.mxu1 %v16329_v35  ;;  %13141 = vmatprep.subr.bf16.mxu0 %v16393_v43  ;;  %v7635_v63 = vld [vmem:[#allocation17 + $0x1d60] sm:$0xff] }
 0x9a2   :  { %v16561_v1 = vcombine.high %v7631_v45, %v7635_v63  ;;  %v7559_v55 = vld [vmem:[#allocation17 + $0x1b00] sm:$0xff]  ;;  %v16560_v59 = vcombine.low %v7631_v45, %v7635_v63 }
 0x9a3   :  { %v7563_v49 = vld [vmem:[#allocation17 + $0x1b20] sm:$0xff] }
 0x9a4   :  { %13117 = vmatpush2.bf16.msra.mxu1 %v16328_v21  ;;  %13142 = vmatpush1.bf16.msra.mxu0 %v16392_v42  ;;  %v7623_v22 = vld [vmem:[#allocation17 + $0x1d00] sm:$0xff]  ;;  %v16489_v41 = vcombine.high %v7559_v55, %v7563_v49  ;;  %v16488_v35 = vcombine.low %v7559_v55, %v7563_v49 }
 0x9a5   :  { %13143 = vmatprep.subr.bf16.mxu0 %v16513_v4  ;;  %13168 = vmatprep.subr.bf16.mxu1 %v16577_v18  ;;  %v7627_v26 = vld [vmem:[#allocation17 + $0x1d20] sm:$0xff] }
 0x9a6   :  { %v16553_v24 = vcombine.high %v7623_v22, %v7627_v26  ;;  %v7551_v56 = vld [vmem:[#allocation17 + $0x1ac0] sm:$0xff]  ;;  %v16552_v43 = vcombine.low %v7623_v22, %v7627_v26  ;;  %v6752_v22 = vld [vmem:[#allocation17 + $0x1c8] sm:$0xff] }
 0x9a7   :  { %13119 = vmatmul.mubr.bf16.vlgmr.msra.gmra.mxu1 %v19507_v2  ;;  %v7555_v29 = vld [vmem:[#allocation17 + $0x1ae0] sm:$0xff]  ;;  %v6756_v26 = vld [vmem:[#allocation17 + $0x1e8] sm:$0xff] }
 0x9a8   :  { %13144 = vmatpush2.bf16.msra.mxu0 %v16512_v7  ;;  %13169 = vmatpush1.bf16.msra.mxu1 %v16576_v28  ;;  %v7615_v44 = vld [vmem:[#allocation17 + $0x1cc0] sm:$0xff]  ;;  %v16481_v38 = vcombine.high %v7551_v56, %v7555_v29  ;;  %v16480_v58 = vcombine.low %v7551_v56, %v7555_v29  ;;  %v15683_v56 = vcombine.high %v6752_v22, %v6756_v26 }
 0x9a9   :  { %13200 = vmatprep.mubr.bf16.mxu1 %v19509_v50  ;;  %13145 = vmatprep.subr.bf16.mxu0 %v16505_v15  ;;  %v7619_v54 = vld [vmem:[#allocation17 + $0x1ce0] sm:$0xff] }
 0x9aa   :  { %13170 = vmatprep.subr.bf16.mxu1 %v16569_v8  ;;  %v16545_v0 = vcombine.high %v7615_v44, %v7619_v54  ;;  %v7543_v37 = vld [vmem:[#allocation17 + $0x1a80] sm:$0xff]  ;;  %v16544_v4 = vcombine.low %v7615_v44, %v7619_v54  ;;  %v6744_v54 = vld [vmem:[#allocation17 + $0x188] sm:$0xff] }
 0x9ab   :  { %v7547_v23 = vld [vmem:[#allocation17 + $0x1aa0] sm:$0xff] }
 0x9ac   :  { %13146 = vmatpush2.bf16.msra.mxu0 %v16504_v9  ;;  %13171 = vmatpush1.bf16.msra.mxu1 %v16568_v10  ;;  %v7607_v21 = vld [vmem:[#allocation17 + $0x1c80] sm:$0xff]  ;;  %v16473_v18 = vcombine.high %v7543_v37, %v7547_v23  ;;  %v16472_v7 = vcombine.low %v7543_v37, %v7547_v23 }
 0x9ad   :  { %13147 = vmatprep.subr.bf16.mxu0 %v16497_v12  ;;  %13172 = vmatprep.subr.bf16.mxu1 %v16561_v1  ;;  %v7611_v42 = vld [vmem:[#allocation17 + $0x1ca0] sm:$0xff] }
 0x9ae   :  { %v16537_v40 = vcombine.high %v7607_v21, %v7611_v42  ;;  %v7535_v30 = vld [vmem:[#allocation17 + $0x1a40] sm:$0xff]  ;;  %v16536_v28 = vcombine.low %v7607_v21, %v7611_v42  ;;  %v6736_v42 = vld [vmem:[#allocation17 + $0x148] sm:$0xff] }
 0x9af   :  { %v7539_v62 = vld [vmem:[#allocation17 + $0x1a60] sm:$0xff] }
 0x9b0   :  { %13148 = vmatpush2.bf16.msra.mxu0 %v16496_v36  ;;  %13173 = vmatpush1.bf16.msra.mxu1 %v16560_v59  ;;  %v7599_v39 = vld [vmem:[#allocation17 + $0x1c40] sm:$0xff]  ;;  %v16465_v15 = vcombine.high %v7535_v30, %v7539_v62  ;;  %v16464_v9 = vcombine.low %v7535_v30, %v7539_v62 }
 0x9b1   :  { %13149 = vmatprep.subr.bf16.mxu0 %v16489_v41  ;;  %13174 = vmatprep.subr.bf16.mxu1 %v16553_v24  ;;  %v7603_v52 = vld [vmem:[#allocation17 + $0x1c60] sm:$0xff]  ;;  %v6675_v41 = vmax.f32 %v19400_v60, 0.0 }
 0x9b2   :  { %v16529_v61 = vcombine.high %v7599_v39, %v7603_v52  ;;  %v7527_v8 = vld [vmem:[#allocation17 + $0x1a00] sm:$0xff]  ;;  %v16528_v10 = vcombine.low %v7599_v39, %v7603_v52 }
 0x9b3   :  { %v7531_v5 = vld [vmem:[#allocation17 + $0x1a20] sm:$0xff] }
 0x9b4   :  { %13150 = vmatpush2.bf16.msra.mxu0 %v16488_v35  ;;  %13175 = vmatpush1.bf16.msra.mxu1 %v16552_v43  ;;  %v7591_v45 = vld [vmem:[#allocation17 + $0x1c00] sm:$0xff]  ;;  %v16457_v12 = vcombine.high %v7527_v8, %v7531_v5  ;;  %v16456_v36 = vcombine.low %v7527_v8, %v7531_v5  ;;  %v6748_v35 = vld [vmem:[#allocation17 + $0x1a8] sm:$0xff] }
 0x9b5   :  { %13151 = vmatprep.subr.bf16.mxu0 %v16481_v38  ;;  %13176 = vmatprep.subr.bf16.mxu1 %v16545_v0  ;;  %v7595_v63 = vld [vmem:[#allocation17 + $0x1c20] sm:$0xff]  ;;  %v15682_v38 = vcombine.low %v6752_v22, %v6756_v26  ;;  %v19514_v0 = vpack.c.bf16 %v6675_v41, %v6675_v41  ;;  %v15675_v21 = vcombine.high %v6744_v54, %v6748_v35 }
 0x9b6   :  { %v16521_v1 = vcombine.high %v7591_v45, %v7595_v63  ;;  %v7711_v55 = vld [vmem:[#allocation17 + $0x1fc0] sm:$0xff]  ;;  %v16520_v59 = vcombine.low %v7591_v45, %v7595_v63 }
 0x9b7   :  { %v7715_v49 = vld [vmem:[#allocation17 + $0x1fe0] sm:$0xff] }
 0x9b8   :  { %13152 = vmatpush2.bf16.msra.mxu0 %v16480_v58  ;;  %13177 = vmatpush1.bf16.msra.mxu1 %v16544_v4  ;;  %v16641_v24 = vcombine.high %v7711_v55, %v7715_v49  ;;  %v7703_v29 = vld [vmem:[#allocation17 + $0x1f80] sm:$0xff]  ;;  %v16640_v43 = vcombine.low %v7711_v55, %v7715_v49  ;;  %v6740_v58 = vld [vmem:[#allocation17 + $0x168] sm:$0xff] }
 0x9b9   :  { %13153 = vmatprep.subr.bf16.mxu0 %v16473_v18  ;;  %13178 = vmatprep.subr.bf16.mxu1 %v16537_v40  ;;  %v7707_v44 = vld [vmem:[#allocation17 + $0x1fa0] sm:$0xff]  ;;  %v15674_v40 = vcombine.low %v6744_v54, %v6748_v35  ;;  %v15667_v39 = vcombine.high %v6736_v42, %v6740_v58  ;;  %v15666_v5 = vcombine.low %v6736_v42, %v6740_v58  ;;  %v6724_v55 = vld [vmem:[#allocation17 + $0xe8] sm:$0xff] }
 0x9ba   :  { %v16633_v37 = vcombine.high %v7703_v29, %v7707_v44  ;;  %v7695_v23 = vld [vmem:[#allocation17 + $0x1f40] sm:$0xff]  ;;  %v16632_v18 = vcombine.low %v7703_v29, %v7707_v44 }
 0x9bb   :  { %v7699_v60 = vld [vmem:[#allocation17 + $0x1f60] sm:$0xff] }
 0x9bc   :  { %13154 = vmatpush2.bf16.msra.mxu0 %v16472_v7  ;;  %13179 = vmatpush1.bf16.msra.mxu1 %v16536_v28  ;;  %v16625_v62 = vcombine.high %v7695_v23, %v7699_v60  ;;  %v7687_v52 = vld [vmem:[#allocation17 + $0x1f00] sm:$0xff]  ;;  %v6728_v28 = vld [vmem:[#allocation17 + $0x108] sm:$0xff]  ;;  %v16624_v8 = vcombine.low %v7695_v23, %v7699_v60 }
 0x9bd   :  { %13155 = vmatprep.subr.bf16.mxu0 %v16465_v15  ;;  %13180 = vmatprep.subr.bf16.mxu1 %v16529_v61  ;;  %v7691_v7 = vld [vmem:[#allocation17 + $0x1f20] sm:$0xff]  ;;  %v6732_v15 = vld [vmem:[#allocation17 + $0x128] sm:$0xff] }
 0x9be   :  { %v16617_v63 = vcombine.high %v7687_v52, %v7691_v7  ;;  %v16616_v49 = vcombine.low %v7687_v52, %v7691_v7  ;;  %v15658_v22 = vcombine.low %v6728_v28, %v6732_v15  ;;  %v7675_v41 = vld [vmem:[#allocation17 + $0x1ea0] sm:$0xff]  ;;  %v6708_v23 = vld [vmem:[#allocation17 + $0x68] sm:$0xff] }
 0x9c0   :  { %13156 = vmatpush2.bf16.msra.mxu0 %v16464_v9  ;;  %13181 = vmatpush1.bf16.msra.mxu1 %v16528_v10  ;;  %v15659_v9 = vcombine.high %v6728_v28, %v6732_v15  ;;  %v7679_v10 = vld [vmem:[#allocation17 + $0x1ec0] sm:$0xff] }
 0x9c1   :  { %13157 = vmatprep.subr.bf16.mxu0 %v16457_v12  ;;  %13182 = vmatprep.subr.bf16.mxu1 %v16521_v1  ;;  %v7683_v12 = vld [vmem:[#allocation17 + $0x1ee0] sm:$0xff]  ;;  %v6720_v1 = vld [vmem:[#allocation17 + $0xc8] sm:$0xff] }
 0x9c2   :  { %v16609_v26 = vcombine.high %v7679_v10, %v7683_v12  ;;  %v16608_v29 = vcombine.low %v7679_v10, %v7683_v12  ;;  %v15650_v44 = vcombine.low %v6720_v1, %v6724_v55  ;;  %v6677_v12 = vmax.f32 %v19475_v14, 0.0 }
 0x9c4   :  { %13158 = vmatpush2.bf16.msra.mxu0 %v16456_v36  ;;  %13183 = vmatpush1.bf16.msra.mxu1 %v16520_v59  ;;  %v15651_v36 = vcombine.high %v6720_v1, %v6724_v55  ;;  %v7671_v59 = vld [vmem:[#allocation17 + $0x1e80] sm:$0xff] }
 0x9c5   :  { %13184 = vmatprep.subr.bf16.mxu1 %v16641_v24  ;;  %13209 = vmatprep.subr.bf16.mxu0 %v15683_v56  ;;  %v6712_v24 = vld [vmem:[#allocation17 + $0x88] sm:$0xff]  ;;  %v16601_v54 = vcombine.high %v7671_v59, %v7675_v41 }
 0x9c6   :  { %v6716_v56 = vld [vmem:[#allocation17 + $0xa8] sm:$0xff] }
 0x9c7   :  { %13160 = vmatmul.mubr.bf16.vlgmr.msra.gmra.mxu0 %v19514_v0  ;;  %v19517_v4 = vpop.f32.mrf.mxu0  ;;  %v15643_v35 = vcombine.high %v6712_v24, %v6716_v56  ;;  %v15642_v60 = vcombine.low %v6712_v24, %v6716_v56 }
 0x9c8   :  { %13185 = vmatpush2.bf16.msra.mxu1 %v16640_v43  ;;  %13210 = vmatpush1.bf16.msra.mxu0 %v15682_v38  ;;  %v7663_v43 = vld [vmem:[#allocation17 + $0x1e40] sm:$0xff] }
 0x9c9   :  { %13241 = vmatprep.mubr.bf16.mxu0 %v19341_v6  ;;  %v19520_v30 = vpop.f32.mrf.mxu0  ;;  %13186 = vmatprep.subr.bf16.mxu1 %v16633_v37  ;;  %v7667_v38 = vld [vmem:[#allocation17 + $0x1e60] sm:$0xff]  ;;  %v6704_v37 = vld [vmem:[#allocation17 + $0x48] sm:$0xff] }
 0x9ca   :  { %13211 = vmatprep.subr.bf16.mxu0 %v15675_v21  ;;  %v16600_v21 = vcombine.low %v7671_v59, %v7675_v41  ;;  %v16593_v42 = vcombine.high %v7663_v43, %v7667_v38  ;;  %v15635_v58 = vcombine.high %v6704_v37, %v6708_v23  ;;  %v16592_v52 = vcombine.low %v7663_v43, %v7667_v38  ;;  %v6876_v59 = vld [vmem:[#allocation17 + $0x5a8] sm:$0xff] }
 0x9cb   :  { %v12919_v61 = vpop.f32.mrf.mxu0  ;;  %v15634_v7 = vcombine.low %v6704_v37, %v6708_v23  ;;  %v6804_v43 = vld [vmem:[#allocation17 + $0x368] sm:$0xff] }
 0x9cc   :  { %13187 = vmatpush2.bf16.msra.mxu1 %v16632_v18  ;;  %13212 = vmatpush1.bf16.msra.mxu0 %v15674_v40  ;;  %v7655_v18 = vld [vmem:[#allocation17 + $0x1e00] sm:$0xff]  ;;  %v6816_v61 = vld [vmem:[#allocation17 + $0x3c8] sm:$0xff] }
 0x9cd   :  { %v12920_v45 = vpop.f32.mrf.mxu0  ;;  %13188 = vmatprep.subr.bf16.mxu1 %v16625_v62  ;;  %13213 = vmatprep.subr.bf16.mxu0 %v15667_v39  ;;  %v7659_v40 = vld [vmem:[#allocation17 + $0x1e20] sm:$0xff]  ;;  %v6696_v62 = vld [vmem:[#allocation17 + $0x8] sm:$0xff] }
 0x9ce   :  { %v6700_v39 = vld [vmem:[#allocation17 + $0x28] sm:$0xff]  ;;  %v16585_v28 = vcombine.high %v7655_v18, %v7659_v40 }
 0x9cf   :  { %v15627_v15 = vcombine.high %v6696_v62, %v6700_v39  ;;  %v6884_v45 = vld [vmem:[#allocation17 + $0x5e8] sm:$0xff]  ;;  %v15626_v10 = vcombine.low %v6696_v62, %v6700_v39 }
 0x9d0   :  { %13189 = vmatpush2.bf16.msra.mxu1 %v16624_v8  ;;  %13214 = vmatpush1.bf16.msra.mxu0 %v15666_v5  ;;  %v6820_v8 = vld [vmem:[#allocation17 + $0x3e8] sm:$0xff] }
 0x9d1   :  { %13190 = vmatprep.subr.bf16.mxu1 %v16617_v63  ;;  %13215 = vmatprep.subr.bf16.mxu0 %v15659_v9  ;;  %v6880_v5 = vld [vmem:[#allocation17 + $0x5c8] sm:$0xff]  ;;  %v7719_v63 = vld [vmem:[#allocation19] sm:$0xff]  ;;  %v16584_v9 = vcombine.low %v7655_v18, %v7659_v40  ;;  %v15747_v1 = vcombine.high %v6816_v61, %v6820_v8  ;;  %v15746_v24 = vcombine.low %v6816_v61, %v6820_v8 }
 0x9d2   :  { %v15811_v55 = vcombine.high %v6880_v5, %v6884_v45  ;;  %v7728_v41 = vrot.slane %v7719_v63, %v17956_v31  ;;  %v15810_v56 = vcombine.low %v6880_v5, %v6884_v45  ;;  %v6864_v38 = vld [vmem:[#allocation17 + $0x548] sm:$0xff] }
 0x9d3   :  { %v6868_v37 = vld [vmem:[#allocation17 + $0x568] sm:$0xff] }
 0x9d4   :  { %13191 = vmatpush2.bf16.msra.mxu1 %v16616_v49  ;;  %13216 = vmatpush1.bf16.msra.mxu0 %v15658_v22  ;;  %v7724_v49 = vrot.slane %v7719_v63, %v17953_v27  ;;  %v6808_v22 = vld [vmem:[#allocation17 + $0x388] sm:$0xff]  ;;  %v15795_v40 = vcombine.high %v6864_v38, %v6868_v37  ;;  %v15794_v61 = vcombine.low %v6864_v38, %v6868_v37 }
 0x9d5   :  { %13192 = vmatprep.subr.bf16.mxu1 %v16609_v26  ;;  %13217 = vmatprep.subr.bf16.mxu0 %v15651_v36  ;;  %v6812_v26 = vld [vmem:[#allocation17 + $0x3a8] sm:$0xff] }
 0x9d6   :  { %v6872_v36 = vld [vmem:[#allocation17 + $0x588] sm:$0xff]  ;;  %v15739_v14 = vcombine.high %v6808_v22, %v6812_v26 }
 0x9d7   :  { %v6792_v62 = vld [vmem:[#allocation17 + $0x308] sm:$0xff] }
 0x9d8   :  { %13193 = vmatpush2.bf16.msra.mxu1 %v16608_v29  ;;  %13218 = vmatpush1.bf16.msra.mxu0 %v15650_v44  ;;  %v19525_v29 = vpack.c.bf16 %v6677_v12, %v6677_v12  ;;  %v6800_v44 = vld [vmem:[#allocation17 + $0x348] sm:$0xff] }
 0x9d9   :  { %13194 = vmatprep.subr.bf16.mxu1 %v16601_v54  ;;  %13219 = vmatprep.subr.bf16.mxu0 %v15643_v35  ;;  %v12916_v54 = vadd.f32 %v19517_v4, %v7724_v49  ;;  %v15803_v35 = vcombine.high %v6872_v36, %v6876_v59  ;;  %v15731_v4 = vcombine.high %v6800_v44, %v6804_v43  ;;  %v6784_v63 = vld [vmem:[#allocation17 + $0x2c8] sm:$0xff] }
 0x9da   :  { %v6852_v12 = vld [vmem:[#allocation17 + $0x4e8] sm:$0xff] }
 0x9db   :  { %v6836_v38 = vld [vmem:[#allocation17 + $0x468] sm:$0xff] }
 0x9dc   :  { %13195 = vmatpush2.bf16.msra.mxu1 %v16600_v21  ;;  %13220 = vmatpush1.bf16.msra.mxu0 %v15642_v60  ;;  %v15738_v21 = vcombine.low %v6808_v22, %v6812_v26  ;;  %v12918_v60 = vadd.f32 %v19520_v30, %v7728_v41  ;;  %v15730_v30 = vcombine.low %v6800_v44, %v6804_v43  ;;  %v6776_v26 = vld [vmem:[#allocation17 + $0x288] sm:$0xff] }
 0x9dd   :  { %13196 = vmatprep.subr.bf16.mxu1 %v16593_v42  ;;  %13221 = vmatprep.subr.bf16.mxu0 %v15635_v58  ;;  %v15802_v58 = vcombine.low %v6872_v36, %v6876_v59  ;;  %v6780_v36 = vld [vmem:[#allocation17 + $0x2a8] sm:$0xff] }
 0x9de   :  { %v6840_v59 = vld [vmem:[#allocation17 + $0x488] sm:$0xff]  ;;  %v15706_v37 = vcombine.low %v6776_v26, %v6780_v36 }
 0x9df   :  { %v6844_v41 = vld [vmem:[#allocation17 + $0x4a8] sm:$0xff] }
 0x9e0   :  { %13197 = vmatpush2.bf16.msra.mxu1 %v16592_v52  ;;  %13222 = vmatpush1.bf16.msra.mxu0 %v15634_v7  ;;  %v6796_v52 = vld [vmem:[#allocation17 + $0x328] sm:$0xff]  ;;  %v15771_v44 = vcombine.high %v6840_v59, %v6844_v41 }
 0x9e1   :  { %13198 = vmatprep.subr.bf16.mxu1 %v16585_v28  ;;  %13223 = vmatprep.subr.bf16.mxu0 %v15627_v15  ;;  %v6856_v7 = vld [vmem:[#allocation17 + $0x508] sm:$0xff]  ;;  %v15723_v5 = vcombine.high %v6792_v62, %v6796_v52 }
 0x9e2   :  { %v6860_v28 = vld [vmem:[#allocation17 + $0x528] sm:$0xff] }
 0x9e3   :  { %v15787_v45 = vcombine.high %v6856_v7, %v6860_v28  ;;  %v6832_v43 = vld [vmem:[#allocation17 + $0x448] sm:$0xff] }
 0x9e4   :  { %13199 = vmatpush2.bf16.msra.mxu1 %v16584_v9  ;;  %13224 = vmatpush1.bf16.msra.mxu0 %v15626_v10  ;;  %v6788_v9 = vld [vmem:[#allocation17 + $0x2e8] sm:$0xff] }
 0x9e5   :  { %13225 = vmatprep.subr.bf16.mxu0 %v15747_v1  ;;  %13250 = vmatprep.subr.bf16.mxu1 %v15811_v55  ;;  %v6848_v10 = vld [vmem:[#allocation17 + $0x4c8] sm:$0xff]  ;;  %v15722_v1 = vcombine.low %v6792_v62, %v6796_v52  ;;  %v15786_v55 = vcombine.low %v6856_v7, %v6860_v28  ;;  %v15715_v49 = vcombine.high %v6784_v63, %v6788_v9 }
 0x9e6   :  { %v15779_v22 = vcombine.high %v6848_v10, %v6852_v12  ;;  %v15762_v52 = vcombine.low %v6832_v43, %v6836_v38 }
 0x9e7   :  { %13201 = vmatmul.mubr.bf16.vlgmr.msra.gmra.mxu1 %v19525_v29  ;;  %v12956_v23 = vpop.f32.mrf.mxu1 }
 0x9e8   :  { %v19530_v42 = vadd.f32 %v12956_v23, %v12916_v54  ;;  %13226 = vmatpush2.bf16.msra.mxu0 %v15746_v24  ;;  %13251 = vmatpush1.bf16.msra.mxu1 %v15810_v56  ;;  %v15714_v24 = vcombine.low %v6784_v63, %v6788_v9  ;;  %v15778_v56 = vcombine.low %v6848_v10, %v6852_v12  ;;  %v6768_v54 = vld [vmem:[#allocation17 + $0x248] sm:$0xff] }
 0x9e9   :  { %13282 = vmatprep.mubr.bf16.mxu1 %v19437_v34  ;;  %v12958_v18 = vpop.f32.mrf.mxu1  ;;  %13227 = vmatprep.subr.bf16.mxu0 %v15739_v14  ;;  %v15707_v14 = vcombine.high %v6776_v26, %v6780_v36  ;;  %v15770_v23 = vcombine.low %v6840_v59, %v6844_v41  ;;  %v6936_v10 = vld [vmem:[#allocation17 + $0x788] sm:$0xff] }
 0x9ea   :  { %v19533_v39 = vadd.f32 %v12958_v18, %v12918_v60  ;;  %13252 = vmatprep.subr.bf16.mxu1 %v15803_v35  ;;  %v6772_v35 = vld [vmem:[#allocation17 + $0x268] sm:$0xff]  ;;  %v15763_v60 = vcombine.high %v6832_v43, %v6836_v38 }
 0x9eb   :  { %v12960_v15 = vpop.f32.mrf.mxu1  ;;  %v6764_v18 = vld [vmem:[#allocation17 + $0x228] sm:$0xff]  ;;  %v15698_v62 = vcombine.low %v6768_v54, %v6772_v35 }
 0x9ec   :  { %13228 = vmatpush2.bf16.msra.mxu0 %v15738_v21  ;;  %13253 = vmatpush1.bf16.msra.mxu1 %v15802_v58  ;;  %v15699_v21 = vcombine.high %v6768_v54, %v6772_v35  ;;  %v6760_v58 = vld [vmem:[#allocation17 + $0x208] sm:$0xff] }
 0x9ed   :  { %v12961_v8 = vpop.f32.mrf.mxu1  ;;  %13229 = vmatprep.subr.bf16.mxu0 %v15731_v4  ;;  %13254 = vmatprep.subr.bf16.mxu1 %v15795_v40  ;;  %v6824_v4 = vld [vmem:[#allocation17 + $0x408] sm:$0xff]  ;;  %v15691_v7 = vcombine.high %v6760_v58, %v6764_v18 }
 0x9ee   :  { %v6828_v40 = vld [vmem:[#allocation17 + $0x428] sm:$0xff] }
 0x9ef   :  { %v15755_v28 = vcombine.high %v6824_v4, %v6828_v40  ;;  %v6944_v15 = vld [vmem:[#allocation17 + $0x7c8] sm:$0xff] }
 0x9f0   :  { %13230 = vmatpush2.bf16.msra.mxu0 %v15730_v30  ;;  %13255 = vmatpush1.bf16.msra.mxu1 %v15794_v61  ;;  %v6948_v30 = vld [vmem:[#allocation17 + $0x7e8] sm:$0xff] }
 0x9f1   :  { %13231 = vmatprep.subr.bf16.mxu0 %v15723_v5  ;;  %13256 = vmatprep.subr.bf16.mxu1 %v15787_v45  ;;  %v7008_v61 = vld [vmem:[#allocation17 + $0x9c8] sm:$0xff]  ;;  %v15690_v5 = vcombine.low %v6760_v58, %v6764_v18  ;;  %v15754_v45 = vcombine.low %v6824_v4, %v6828_v40  ;;  %v15875_v63 = vcombine.high %v6944_v15, %v6948_v30 }
 0x9f2   :  { %v7012_v8 = vld [vmem:[#allocation17 + $0x9e8] sm:$0xff] }
 0x9f3   :  { %v15939_v9 = vcombine.high %v7008_v61, %v7012_v8  ;;  %v6940_v12 = vld [vmem:[#allocation17 + $0x7a8] sm:$0xff] }
 0x9f4   :  { %13232 = vmatpush2.bf16.msra.mxu0 %v15722_v1  ;;  %13257 = vmatpush1.bf16.msra.mxu1 %v15786_v55  ;;  %v7000_v1 = vld [vmem:[#allocation17 + $0x988] sm:$0xff]  ;;  %v15867_v26 = vcombine.high %v6936_v10, %v6940_v12  ;;  %v15866_v54 = vcombine.low %v6936_v10, %v6940_v12 }
 0x9f5   :  { %13233 = vmatprep.subr.bf16.mxu0 %v15715_v49  ;;  %13258 = vmatprep.subr.bf16.mxu1 %v15779_v22  ;;  %v7004_v55 = vld [vmem:[#allocation17 + $0x9a8] sm:$0xff]  ;;  %v15874_v49 = vcombine.low %v6944_v15, %v6948_v30  ;;  %v15938_v22 = vcombine.low %v7008_v61, %v7012_v8 }
 0x9f6   :  { %v6928_v36 = vld [vmem:[#allocation17 + $0x748] sm:$0xff]  ;;  %v15931_v59 = vcombine.high %v7000_v1, %v7004_v55  ;;  %v15930_v35 = vcombine.low %v7000_v1, %v7004_v55 }
 0x9f7   :  { %v6932_v41 = vld [vmem:[#allocation17 + $0x768] sm:$0xff] }
 0x9f8   :  { %13234 = vmatpush2.bf16.msra.mxu0 %v15714_v24  ;;  %13259 = vmatpush1.bf16.msra.mxu1 %v15778_v56  ;;  %v6992_v24 = vld [vmem:[#allocation17 + $0x948] sm:$0xff]  ;;  %v15859_v38 = vcombine.high %v6928_v36, %v6932_v41  ;;  %v15858_v4 = vcombine.low %v6928_v36, %v6932_v41 }
 0x9f9   :  { %13235 = vmatprep.subr.bf16.mxu0 %v15707_v14  ;;  %13260 = vmatprep.subr.bf16.mxu1 %v15771_v44  ;;  %v6996_v56 = vld [vmem:[#allocation17 + $0x968] sm:$0xff] }
 0x9fa   :  { %v6984_v58 = vld [vmem:[#allocation17 + $0x908] sm:$0xff]  ;;  %v15922_v40 = vcombine.low %v6992_v24, %v6996_v56 }
 0x9fb   :  { %v6988_v18 = vld [vmem:[#allocation17 + $0x928] sm:$0xff] }
 0x9fc   :  { %13236 = vmatpush2.bf16.msra.mxu0 %v15706_v37  ;;  %13261 = vmatpush1.bf16.msra.mxu1 %v15770_v23  ;;  %v15923_v37 = vcombine.high %v6992_v24, %v6996_v56  ;;  %v6920_v23 = vld [vmem:[#allocation17 + $0x708] sm:$0xff]  ;;  %v15914_v8 = vcombine.low %v6984_v58, %v6988_v18 }
 0x9fd   :  { %13237 = vmatprep.subr.bf16.mxu0 %v15699_v21  ;;  %13262 = vmatprep.subr.bf16.mxu1 %v15763_v60  ;;  %v6924_v60 = vld [vmem:[#allocation17 + $0x728] sm:$0xff] }
 0x9fe   :  { %v6916_v15 = vld [vmem:[#allocation17 + $0x6e8] sm:$0xff] }
 0x9ff   :  { %v6976_v30 = vld [vmem:[#allocation17 + $0x8c8] sm:$0xff] }
 0xa00   :  { %13238 = vmatpush2.bf16.msra.mxu0 %v15698_v62  ;;  %13263 = vmatpush1.bf16.msra.mxu1 %v15762_v52  ;;  %v15851_v52 = vcombine.high %v6920_v23, %v6924_v60  ;;  %v6980_v61 = vld [vmem:[#allocation17 + $0x8e8] sm:$0xff] }
 0xa01   :  { %13239 = vmatprep.subr.bf16.mxu0 %v15691_v7  ;;  %13264 = vmatprep.subr.bf16.mxu1 %v15755_v28  ;;  %v15915_v7 = vcombine.high %v6984_v58, %v6988_v18  ;;  %v6912_v28 = vld [vmem:[#allocation17 + $0x6c8] sm:$0xff]  ;;  %v15906_v55 = vcombine.low %v6976_v30, %v6980_v61 }
 0xa02   :  { %v6968_v10 = vld [vmem:[#allocation17 + $0x888] sm:$0xff]  ;;  %v15842_v1 = vcombine.low %v6912_v28, %v6916_v15 }
 0xa03   :  { %v6972_v12 = vld [vmem:[#allocation17 + $0x8a8] sm:$0xff] }
 0xa04   :  { %13240 = vmatpush2.bf16.msra.mxu0 %v15690_v5  ;;  %13265 = vmatpush1.bf16.msra.mxu1 %v15754_v45  ;;  %v15843_v5 = vcombine.high %v6912_v28, %v6916_v15  ;;  %v15907_v45 = vcombine.high %v6976_v30, %v6980_v61  ;;  %v6900_v36 = vld [vmem:[#allocation17 + $0x668] sm:$0xff]  ;;  %v15898_v56 = vcombine.low %v6968_v10, %v6972_v12 }
 0xa05   :  { %13266 = vmatprep.subr.bf16.mxu1 %v15875_v63  ;;  %13291 = vmatprep.subr.bf16.mxu0 %v15939_v9  ;;  %v6904_v63 = vld [vmem:[#allocation17 + $0x688] sm:$0xff] }
 0xa06   :  { %v6908_v9 = vld [vmem:[#allocation17 + $0x6a8] sm:$0xff] }
 0xa07   :  { %v12997_v14 = vpop.f32.mrf.mxu0  ;;  %13242 = vmatmul.mubr.bf16.vlgmr.msra.gmra.mxu0 %v19345_v25  ;;  %v6964_v41 = vld [vmem:[#allocation17 + $0x868] sm:$0xff]  ;;  %v15834_v24 = vcombine.low %v6904_v63, %v6908_v9 }
 0xa08   :  { %v19537_v44 = vadd.f32 %v12997_v14, %v19530_v42  ;;  %13267 = vmatpush2.bf16.msra.mxu1 %v15874_v49  ;;  %13292 = vmatpush1.bf16.msra.mxu0 %v15938_v22  ;;  %v15835_v49 = vcombine.high %v6904_v63, %v6908_v9  ;;  %v15899_v22 = vcombine.high %v6968_v10, %v6972_v12  ;;  %v7064_v30 = vld [vmem:[#allocation17 + $0xb88] sm:$0xff] }
 0xa09   :  { %13323 = vmatprep.mubr.bf16.mxu0 %v19371_v19  ;;  %v12999_v43 = vpop.f32.mrf.mxu0  ;;  %13268 = vmatprep.subr.bf16.mxu1 %v15867_v26  ;;  %v6896_v26 = vld [vmem:[#allocation17 + $0x648] sm:$0xff] }
 0xa0a   :  { %v19541_v21 = vadd.f32 %v12999_v43, %v19533_v39  ;;  %13293 = vmatprep.subr.bf16.mxu0 %v15931_v59  ;;  %v15850_v39 = vcombine.low %v6920_v23, %v6924_v60  ;;  %v6960_v59 = vld [vmem:[#allocation17 + $0x848] sm:$0xff]  ;;  %v15827_v14 = vcombine.high %v6896_v26, %v6900_v36  ;;  %v15826_v23 = vcombine.low %v6896_v26, %v6900_v36 }
 0xa0b   :  { %v13001_v42 = vpop.f32.mrf.mxu0  ;;  %v6892_v43 = vld [vmem:[#allocation17 + $0x628] sm:$0xff]  ;;  %v15890_v60 = vcombine.low %v6960_v59, %v6964_v41 }
 0xa0c   :  { %13269 = vmatpush2.bf16.msra.mxu1 %v15866_v54  ;;  %13294 = vmatpush1.bf16.msra.mxu0 %v15930_v35  ;;  %v15891_v54 = vcombine.high %v6960_v59, %v6964_v41  ;;  %v6888_v35 = vld [vmem:[#allocation17 + $0x608] sm:$0xff] }
 0xa0d   :  { %v13002_v62 = vpop.f32.mrf.mxu0  ;;  %13270 = vmatprep.subr.bf16.mxu1 %v15859_v38  ;;  %13295 = vmatprep.subr.bf16.mxu0 %v15923_v37  ;;  %v6952_v38 = vld [vmem:[#allocation17 + $0x808] sm:$0xff]  ;;  %v15819_v58 = vcombine.high %v6888_v35, %v6892_v43 }
 0xa0e   :  { %v6956_v37 = vld [vmem:[#allocation17 + $0x828] sm:$0xff] }
 0xa0f   :  { %v15883_v18 = vcombine.high %v6952_v38, %v6956_v37  ;;  %v7072_v42 = vld [vmem:[#allocation17 + $0xbc8] sm:$0xff] }
 0xa10   :  { %13271 = vmatpush2.bf16.msra.mxu1 %v15858_v4  ;;  %13296 = vmatpush1.bf16.msra.mxu0 %v15922_v40  ;;  %v7076_v4 = vld [vmem:[#allocation17 + $0xbe8] sm:$0xff] }
 0xa11   :  { %13272 = vmatprep.subr.bf16.mxu1 %v15851_v52  ;;  %13297 = vmatprep.subr.bf16.mxu0 %v15915_v7  ;;  %v7136_v40 = vld [vmem:[#allocation17 + $0xdc8] sm:$0xff]  ;;  %v15818_v52 = vcombine.low %v6888_v35, %v6892_v43  ;;  %v15882_v7 = vcombine.low %v6952_v38, %v6956_v37  ;;  %v16003_v28 = vcombine.high %v7072_v42, %v7076_v4 }
 0xa12   :  { %v7140_v62 = vld [vmem:[#allocation17 + $0xde8] sm:$0xff] }
 0xa13   :  { %v16067_v15 = vcombine.high %v7136_v40, %v7140_v62  ;;  %v7068_v61 = vld [vmem:[#allocation17 + $0xba8] sm:$0xff] }
 0xa14   :  { %13273 = vmatpush2.bf16.msra.mxu1 %v15850_v39  ;;  %13298 = vmatpush1.bf16.msra.mxu0 %v15914_v8  ;;  %v7128_v39 = vld [vmem:[#allocation17 + $0xd88] sm:$0xff]  ;;  %v15995_v63 = vcombine.high %v7064_v30, %v7068_v61  ;;  %v15994_v26 = vcombine.low %v7064_v30, %v7068_v61 }
 0xa15   :  { %13274 = vmatprep.subr.bf16.mxu1 %v15843_v5  ;;  %13299 = vmatprep.subr.bf16.mxu0 %v15907_v45  ;;  %v7132_v8 = vld [vmem:[#allocation17 + $0xda8] sm:$0xff]  ;;  %v16002_v5 = vcombine.low %v7072_v42, %v7076_v4  ;;  %v16066_v45 = vcombine.low %v7136_v40, %v7140_v62 }
 0xa16   :  { %v7056_v9 = vld [vmem:[#allocation17 + $0xb48] sm:$0xff]  ;;  %v16059_v10 = vcombine.high %v7128_v39, %v7132_v8  ;;  %v16058_v36 = vcombine.low %v7128_v39, %v7132_v8 }
 0xa17   :  { %v7060_v12 = vld [vmem:[#allocation17 + $0xb68] sm:$0xff] }
 0xa18   :  { %13275 = vmatpush2.bf16.msra.mxu1 %v15842_v1  ;;  %13300 = vmatpush1.bf16.msra.mxu0 %v15906_v55  ;;  %v7120_v1 = vld [vmem:[#allocation17 + $0xd48] sm:$0xff]  ;;  %v15987_v41 = vcombine.high %v7056_v9, %v7060_v12  ;;  %v15986_v38 = vcombine.low %v7056_v9, %v7060_v12 }
 0xa19   :  { %13276 = vmatprep.subr.bf16.mxu1 %v15835_v49  ;;  %13301 = vmatprep.subr.bf16.mxu0 %v15899_v22  ;;  %v7124_v55 = vld [vmem:[#allocation17 + $0xd68] sm:$0xff] }
 0xa1a   :  { %v7112_v35 = vld [vmem:[#allocation17 + $0xd08] sm:$0xff]  ;;  %v16050_v37 = vcombine.low %v7120_v1, %v7124_v55 }
 0xa1b   :  { %v7116_v43 = vld [vmem:[#allocation17 + $0xd28] sm:$0xff] }
 0xa1c   :  { %13277 = vmatpush2.bf16.msra.mxu1 %v15834_v24  ;;  %13302 = vmatpush1.bf16.msra.mxu0 %v15898_v56  ;;  %v16051_v24 = vcombine.high %v7120_v1, %v7124_v55  ;;  %v7048_v56 = vld [vmem:[#allocation17 + $0xb08] sm:$0xff]  ;;  %v16042_v62 = vcombine.low %v7112_v35, %v7116_v43 }
 0xa1d   :  { %13278 = vmatprep.subr.bf16.mxu1 %v15827_v14  ;;  %13303 = vmatprep.subr.bf16.mxu0 %v15891_v54  ;;  %v7052_v54 = vld [vmem:[#allocation17 + $0xb28] sm:$0xff] }
 0xa1e   :  { %v7044_v42 = vld [vmem:[#allocation17 + $0xae8] sm:$0xff] }
 0xa1f   :  { %v7104_v4 = vld [vmem:[#allocation17 + $0xcc8] sm:$0xff] }
 0xa20   :  { %13279 = vmatpush2.bf16.msra.mxu1 %v15826_v23  ;;  %13304 = vmatpush1.bf16.msra.mxu0 %v15890_v60  ;;  %v15979_v60 = vcombine.high %v7048_v56, %v7052_v54  ;;  %v7108_v40 = vld [vmem:[#allocation17 + $0xce8] sm:$0xff] }
 0xa21   :  { %13280 = vmatprep.subr.bf16.mxu1 %v15819_v58  ;;  %13305 = vmatprep.subr.bf16.mxu0 %v15883_v18  ;;  %v16043_v58 = vcombine.high %v7112_v35, %v7116_v43  ;;  %v7040_v18 = vld [vmem:[#allocation17 + $0xac8] sm:$0xff]  ;;  %v16034_v8 = vcombine.low %v7104_v4, %v7108_v40 }
 0xa22   :  { %v7096_v30 = vld [vmem:[#allocation17 + $0xc88] sm:$0xff]  ;;  %v15970_v39 = vcombine.low %v7040_v18, %v7044_v42 }
 0xa23   :  { %v7100_v61 = vld [vmem:[#allocation17 + $0xca8] sm:$0xff] }
 0xa24   :  { %13281 = vmatpush2.bf16.msra.mxu1 %v15818_v52  ;;  %13306 = vmatpush1.bf16.msra.mxu0 %v15882_v7  ;;  %v15971_v52 = vcombine.high %v7040_v18, %v7044_v42  ;;  %v16035_v7 = vcombine.high %v7104_v4, %v7108_v40  ;;  %v7028_v9 = vld [vmem:[#allocation17 + $0xa68] sm:$0xff]  ;;  %v16026_v55 = vcombine.low %v7096_v30, %v7100_v61 }
 0xa25   :  { %13307 = vmatprep.subr.bf16.mxu0 %v16003_v28  ;;  %13332 = vmatprep.subr.bf16.mxu1 %v16067_v15  ;;  %v7032_v28 = vld [vmem:[#allocation17 + $0xa88] sm:$0xff] }
 0xa26   :  { %v7036_v15 = vld [vmem:[#allocation17 + $0xaa8] sm:$0xff] }
 0xa27   :  { %v13038_v49 = vpop.f32.mrf.mxu1  ;;  %13283 = vmatmul.mubr.bf16.vlgmr.msra.gmra.mxu1 %v19439_v3  ;;  %v7092_v12 = vld [vmem:[#allocation17 + $0xc68] sm:$0xff]  ;;  %v15962_v1 = vcombine.low %v7032_v28, %v7036_v15 }
 0xa28   :  { %v19545_v22 = vadd.f32 %v13038_v49, %v19537_v44  ;;  %13308 = vmatpush2.bf16.msra.mxu0 %v16002_v5  ;;  %13333 = vmatpush1.bf16.msra.mxu1 %v16066_v45  ;;  %v15963_v5 = vcombine.high %v7032_v28, %v7036_v15  ;;  %v16027_v45 = vcombine.high %v7096_v30, %v7100_v61  ;;  %v7192_v4 = vld [vmem:[#allocation17 + $0xf88] sm:$0xff] }
 0xa29   :  { %13364 = vmatprep.mubr.bf16.mxu1 %v19457_v11  ;;  %v13040_v59 = vpop.f32.mrf.mxu1  ;;  %13309 = vmatprep.subr.bf16.mxu0 %v15995_v63  ;;  %v7024_v63 = vld [vmem:[#allocation17 + $0xa48] sm:$0xff] }
 0xa2a   :  { %v19549_v14 = vadd.f32 %v13040_v59, %v19541_v21  ;;  %13334 = vmatprep.subr.bf16.mxu1 %v16059_v10  ;;  %v15978_v21 = vcombine.low %v7048_v56, %v7052_v54  ;;  %v7088_v10 = vld [vmem:[#allocation17 + $0xc48] sm:$0xff]  ;;  %v15955_v49 = vcombine.high %v7024_v63, %v7028_v9  ;;  %v15954_v56 = vcombine.low %v7024_v63, %v7028_v9 }
 0xa2b   :  { %v13042_v44 = vpop.f32.mrf.mxu1  ;;  %v7020_v59 = vld [vmem:[#allocation17 + $0xa28] sm:$0xff]  ;;  %v16018_v54 = vcombine.low %v7088_v10, %v7092_v12 }
 0xa2c   :  { %13310 = vmatpush2.bf16.msra.mxu0 %v15994_v26  ;;  %13335 = vmatpush1.bf16.msra.mxu1 %v16058_v36  ;;  %v16019_v26 = vcombine.high %v7088_v10, %v7092_v12  ;;  %v7016_v36 = vld [vmem:[#allocation17 + $0xa08] sm:$0xff] }
 0xa2d   :  { %v13043_v23 = vpop.f32.mrf.mxu1  ;;  %13311 = vmatprep.subr.bf16.mxu0 %v15987_v41  ;;  %13336 = vmatprep.subr.bf16.mxu1 %v16051_v24  ;;  %v7080_v41 = vld [vmem:[#allocation17 + $0xc08] sm:$0xff]  ;;  %v15947_v35 = vcombine.high %v7016_v36, %v7020_v59 }
 0xa2e   :  { %v7084_v24 = vld [vmem:[#allocation17 + $0xc28] sm:$0xff] }
 0xa2f   :  { %v16011_v43 = vcombine.high %v7080_v41, %v7084_v24  ;;  %v7200_v44 = vld [vmem:[#allocation17 + $0xfc8] sm:$0xff] }
 0xa30   :  { %13312 = vmatpush2.bf16.msra.mxu0 %v15986_v38  ;;  %13337 = vmatpush1.bf16.msra.mxu1 %v16050_v37  ;;  %v7204_v38 = vld [vmem:[#allocation17 + $0xfe8] sm:$0xff] }
 0xa31   :  { %13313 = vmatprep.subr.bf16.mxu0 %v15979_v60  ;;  %13338 = vmatprep.subr.bf16.mxu1 %v16043_v58  ;;  %v7264_v37 = vld [vmem:[#allocation17 + $0x11c8] sm:$0xff]  ;;  %v15946_v60 = vcombine.low %v7016_v36, %v7020_v59  ;;  %v16010_v58 = vcombine.low %v7080_v41, %v7084_v24  ;;  %v16131_v18 = vcombine.high %v7200_v44, %v7204_v38 }
 0xa32   :  { %v7268_v23 = vld [vmem:[#allocation17 + $0x11e8] sm:$0xff] }
 0xa33   :  { %v16195_v42 = vcombine.high %v7264_v37, %v7268_v23  ;;  %v7196_v40 = vld [vmem:[#allocation17 + $0xfa8] sm:$0xff] }
 0xa34   :  { %13314 = vmatpush2.bf16.msra.mxu0 %v15978_v21  ;;  %13339 = vmatpush1.bf16.msra.mxu1 %v16042_v62  ;;  %v7256_v21 = vld [vmem:[#allocation17 + $0x1188] sm:$0xff]  ;;  %v16123_v28 = vcombine.high %v7192_v4, %v7196_v40  ;;  %v16122_v63 = vcombine.low %v7192_v4, %v7196_v40 }
 0xa35   :  { %13315 = vmatprep.subr.bf16.mxu0 %v15971_v52  ;;  %13340 = vmatprep.subr.bf16.mxu1 %v16035_v7  ;;  %v7260_v62 = vld [vmem:[#allocation17 + $0x11a8] sm:$0xff]  ;;  %v16130_v52 = vcombine.low %v7200_v44, %v7204_v38  ;;  %v16194_v7 = vcombine.low %v7264_v37, %v7268_v23 }
 0xa36   :  { %v7184_v15 = vld [vmem:[#allocation17 + $0xf48] sm:$0xff]  ;;  %v16187_v30 = vcombine.high %v7256_v21, %v7260_v62  ;;  %v16186_v9 = vcombine.low %v7256_v21, %v7260_v62 }
 0xa37   :  { %v7188_v61 = vld [vmem:[#allocation17 + $0xf68] sm:$0xff] }
 0xa38   :  { %13316 = vmatpush2.bf16.msra.mxu0 %v15970_v39  ;;  %13341 = vmatpush1.bf16.msra.mxu1 %v16034_v8  ;;  %v7248_v39 = vld [vmem:[#allocation17 + $0x1148] sm:$0xff]  ;;  %v16115_v12 = vcombine.high %v7184_v15, %v7188_v61  ;;  %v16114_v41 = vcombine.low %v7184_v15, %v7188_v61 }
 0xa39   :  { %13317 = vmatprep.subr.bf16.mxu0 %v15963_v5  ;;  %13342 = vmatprep.subr.bf16.mxu1 %v16027_v45  ;;  %v7252_v8 = vld [vmem:[#allocation17 + $0x1168] sm:$0xff] }
 0xa3a   :  { %v7240_v36 = vld [vmem:[#allocation17 + $0x1108] sm:$0xff]  ;;  %v16178_v24 = vcombine.low %v7248_v39, %v7252_v8 }
 0xa3b   :  { %v7244_v59 = vld [vmem:[#allocation17 + $0x1128] sm:$0xff] }
 0xa3c   :  { %13318 = vmatpush2.bf16.msra.mxu0 %v15962_v1  ;;  %13343 = vmatpush1.bf16.msra.mxu1 %v16026_v55  ;;  %v16179_v1 = vcombine.high %v7248_v39, %v7252_v8  ;;  %v7176_v55 = vld [vmem:[#allocation17 + $0xf08] sm:$0xff]  ;;  %v16170_v23 = vcombine.low %v7240_v36, %v7244_v59 }
 0xa3d   :  { %13319 = vmatprep.subr.bf16.mxu0 %v15955_v49  ;;  %13344 = vmatprep.subr.bf16.mxu1 %v16019_v26  ;;  %v7180_v26 = vld [vmem:[#allocation17 + $0xf28] sm:$0xff] }
 0xa3e   :  { %v7172_v44 = vld [vmem:[#allocation17 + $0xee8] sm:$0xff] }
 0xa3f   :  { %v7232_v38 = vld [vmem:[#allocation17 + $0x10c8] sm:$0xff] }
 0xa40   :  { %13320 = vmatpush2.bf16.msra.mxu0 %v15954_v56  ;;  %13345 = vmatpush1.bf16.msra.mxu1 %v16018_v54  ;;  %v16107_v54 = vcombine.high %v7176_v55, %v7180_v26  ;;  %v7236_v37 = vld [vmem:[#allocation17 + $0x10e8] sm:$0xff] }
 0xa41   :  { %13321 = vmatprep.subr.bf16.mxu0 %v15947_v35  ;;  %13346 = vmatprep.subr.bf16.mxu1 %v16011_v43  ;;  %v16171_v35 = vcombine.high %v7240_v36, %v7244_v59  ;;  %v7168_v43 = vld [vmem:[#allocation17 + $0xec8] sm:$0xff]  ;;  %v16162_v62 = vcombine.low %v7232_v38, %v7236_v37 }
 0xa42   :  { %v7224_v4 = vld [vmem:[#allocation17 + $0x1088] sm:$0xff]  ;;  %v16098_v21 = vcombine.low %v7168_v43, %v7172_v44 }
 0xa43   :  { %v7228_v40 = vld [vmem:[#allocation17 + $0x10a8] sm:$0xff] }
 0xa44   :  { %13322 = vmatpush2.bf16.msra.mxu0 %v15946_v60  ;;  %13347 = vmatpush1.bf16.msra.mxu1 %v16010_v58  ;;  %v16099_v60 = vcombine.high %v7168_v43, %v7172_v44  ;;  %v16163_v58 = vcombine.high %v7232_v38, %v7236_v37  ;;  %v7156_v15 = vld [vmem:[#allocation17 + $0xe68] sm:$0xff]  ;;  %v16154_v8 = vcombine.low %v7224_v4, %v7228_v40 }
 0xa45   :  { %13348 = vmatprep.subr.bf16.mxu1 %v16131_v18  ;;  %13373 = vmatprep.subr.bf16.mxu0 %v16195_v42  ;;  %v7160_v18 = vld [vmem:[#allocation17 + $0xe88] sm:$0xff] }
 0xa46   :  { %v7164_v42 = vld [vmem:[#allocation17 + $0xea8] sm:$0xff] }
 0xa47   :  { %v13079_v5 = vpop.f32.mrf.mxu0  ;;  %13324 = vmatmul.mubr.bf16.vlgmr.msra.gmra.mxu0 %v19483_v47  ;;  %v7220_v61 = vld [vmem:[#allocation17 + $0x1068] sm:$0xff]  ;;  %v16090_v39 = vcombine.low %v7160_v18, %v7164_v42 }
 0xa48   :  { %v19553_v45 = vadd.f32 %v13079_v5, %v19545_v22  ;;  %13349 = vmatpush2.bf16.msra.mxu1 %v16130_v52  ;;  %13374 = vmatpush1.bf16.msra.mxu0 %v16194_v7  ;;  %v16091_v52 = vcombine.high %v7160_v18, %v7164_v42  ;;  %v16155_v7 = vcombine.high %v7224_v4, %v7228_v40  ;;  %v7320_v38 = vld [vmem:[#allocation17 + $0x1388] sm:$0xff] }
 0xa49   :  { %13405 = vmatprep.mubr.bf16.mxu0 %v19485_v51  ;;  %v13081_v10 = vpop.f32.mrf.mxu0  ;;  %13350 = vmatprep.subr.bf16.mxu1 %v16123_v28  ;;  %v7152_v28 = vld [vmem:[#allocation17 + $0xe48] sm:$0xff] }
 0xa4a   :  { %v19557_v49 = vadd.f32 %v13081_v10, %v19549_v14  ;;  %13375 = vmatprep.subr.bf16.mxu0 %v16187_v30  ;;  %v16106_v14 = vcombine.low %v7176_v55, %v7180_v26  ;;  %v7216_v30 = vld [vmem:[#allocation17 + $0x1048] sm:$0xff]  ;;  %v16083_v5 = vcombine.high %v7152_v28, %v7156_v15  ;;  %v16082_v55 = vcombine.low %v7152_v28, %v7156_v15 }
 0xa4b   :  { %v13083_v22 = vpop.f32.mrf.mxu0  ;;  %v7148_v10 = vld [vmem:[#allocation17 + $0xe28] sm:$0xff]  ;;  %v16146_v26 = vcombine.low %v7216_v30, %v7220_v61 }
 0xa4c   :  { %13351 = vmatpush2.bf16.msra.mxu1 %v16122_v63  ;;  %13376 = vmatpush1.bf16.msra.mxu0 %v16186_v9  ;;  %v16147_v63 = vcombine.high %v7216_v30, %v7220_v61  ;;  %v7144_v9 = vld [vmem:[#allocation17 + $0xe08] sm:$0xff] }
 0xa4d   :  { %v13084_v56 = vpop.f32.mrf.mxu0  ;;  %13352 = vmatprep.subr.bf16.mxu1 %v16115_v12  ;;  %13377 = vmatprep.subr.bf16.mxu0 %v16179_v1  ;;  %v7208_v12 = vld [vmem:[#allocation17 + $0x1008] sm:$0xff]  ;;  %v16075_v36 = vcombine.high %v7144_v9, %v7148_v10 }
 0xa4e   :  { %v7212_v1 = vld [vmem:[#allocation17 + $0x1028] sm:$0xff] }
 0xa4f   :  { %v16139_v59 = vcombine.high %v7208_v12, %v7212_v1  ;;  %v7328_v22 = vld [vmem:[#allocation17 + $0x13c8] sm:$0xff] }
 0xa50   :  { %13353 = vmatpush2.bf16.msra.mxu1 %v16114_v41  ;;  %13378 = vmatpush1.bf16.msra.mxu0 %v16178_v24  ;;  %v7332_v41 = vld [vmem:[#allocation17 + $0x13e8] sm:$0xff] }
 0xa51   :  { %13354 = vmatprep.subr.bf16.mxu1 %v16107_v54  ;;  %13379 = vmatprep.subr.bf16.mxu0 %v16171_v35  ;;  %v7392_v24 = vld [vmem:[#allocation17 + $0x15c8] sm:$0xff]  ;;  %v16074_v54 = vcombine.low %v7144_v9, %v7148_v10  ;;  %v16138_v35 = vcombine.low %v7208_v12, %v7212_v1  ;;  %v16259_v43 = vcombine.high %v7328_v22, %v7332_v41 }
 0xa52   :  { %v7396_v56 = vld [vmem:[#allocation17 + $0x15e8] sm:$0xff] }
 0xa53   :  { %v16323_v44 = vcombine.high %v7392_v24, %v7396_v56  ;;  %v7324_v37 = vld [vmem:[#allocation17 + $0x13a8] sm:$0xff] }
 0xa54   :  { %13355 = vmatpush2.bf16.msra.mxu1 %v16106_v14  ;;  %13380 = vmatpush1.bf16.msra.mxu0 %v16170_v23  ;;  %v7384_v14 = vld [vmem:[#allocation17 + $0x1588] sm:$0xff]  ;;  %v16251_v18 = vcombine.high %v7320_v38, %v7324_v37  ;;  %v16250_v28 = vcombine.low %v7320_v38, %v7324_v37 }
 0xa55   :  { %13356 = vmatprep.subr.bf16.mxu1 %v16099_v60  ;;  %13381 = vmatprep.subr.bf16.mxu0 %v16163_v58  ;;  %v7388_v23 = vld [vmem:[#allocation17 + $0x15a8] sm:$0xff]  ;;  %v16258_v60 = vcombine.low %v7328_v22, %v7332_v41  ;;  %v16322_v58 = vcombine.low %v7392_v24, %v7396_v56 }
 0xa56   :  { %v7312_v42 = vld [vmem:[#allocation17 + $0x1348] sm:$0xff]  ;;  %v16315_v4 = vcombine.high %v7384_v14, %v7388_v23  ;;  %v16314_v15 = vcombine.low %v7384_v14, %v7388_v23 }
 0xa57   :  { %v7316_v40 = vld [vmem:[#allocation17 + $0x1368] sm:$0xff] }
 0xa58   :  { %13357 = vmatpush2.bf16.msra.mxu1 %v16098_v21  ;;  %13382 = vmatpush1.bf16.msra.mxu0 %v16162_v62  ;;  %v7376_v21 = vld [vmem:[#allocation17 + $0x1548] sm:$0xff]  ;;  %v16243_v61 = vcombine.high %v7312_v42, %v7316_v40  ;;  %v16242_v12 = vcombine.low %v7312_v42, %v7316_v40 }
 0xa59   :  { %13358 = vmatprep.subr.bf16.mxu1 %v16091_v52  ;;  %13383 = vmatprep.subr.bf16.mxu0 %v16155_v7  ;;  %v7380_v62 = vld [vmem:[#allocation17 + $0x1568] sm:$0xff] }
 0xa5a   :  { %v7368_v9 = vld [vmem:[#allocation17 + $0x1508] sm:$0xff]  ;;  %v16306_v1 = vcombine.low %v7376_v21, %v7380_v62 }
 0xa5b   :  { %v7372_v10 = vld [vmem:[#allocation17 + $0x1528] sm:$0xff] }
 0xa5c   :  { %13359 = vmatpush2.bf16.msra.mxu1 %v16090_v39  ;;  %13384 = vmatpush1.bf16.msra.mxu0 %v16154_v8  ;;  %v16307_v39 = vcombine.high %v7376_v21, %v7380_v62  ;;  %v7304_v8 = vld [vmem:[#allocation17 + $0x1308] sm:$0xff]  ;;  %v16298_v56 = vcombine.low %v7368_v9, %v7372_v10 }
 0xa5d   :  { %13360 = vmatprep.subr.bf16.mxu1 %v16083_v5  ;;  %13385 = vmatprep.subr.bf16.mxu0 %v16147_v63  ;;  %v7308_v63 = vld [vmem:[#allocation17 + $0x1328] sm:$0xff] }
 0xa5e   :  { %v7300_v22 = vld [vmem:[#allocation17 + $0x12e8] sm:$0xff] }
 0xa5f   :  { %v7360_v41 = vld [vmem:[#allocation17 + $0x14c8] sm:$0xff] }
 0xa60   :  { %13361 = vmatpush2.bf16.msra.mxu1 %v16082_v55  ;;  %13386 = vmatpush1.bf16.msra.mxu0 %v16146_v26  ;;  %v16235_v26 = vcombine.high %v7304_v8, %v7308_v63  ;;  %v7364_v24 = vld [vmem:[#allocation17 + $0x14e8] sm:$0xff] }
 0xa61   :  { %13362 = vmatprep.subr.bf16.mxu1 %v16075_v36  ;;  %13387 = vmatprep.subr.bf16.mxu0 %v16139_v59  ;;  %v16299_v36 = vcombine.high %v7368_v9, %v7372_v10  ;;  %v7296_v59 = vld [vmem:[#allocation17 + $0x12c8] sm:$0xff]  ;;  %v16290_v23 = vcombine.low %v7360_v41, %v7364_v24 }
 0xa62   :  { %v7352_v38 = vld [vmem:[#allocation17 + $0x1488] sm:$0xff]  ;;  %v16226_v14 = vcombine.low %v7296_v59, %v7300_v22 }
 0xa63   :  { %v7356_v37 = vld [vmem:[#allocation17 + $0x14a8] sm:$0xff] }
 0xa64   :  { %13363 = vmatpush2.bf16.msra.mxu1 %v16074_v54  ;;  %13388 = vmatpush1.bf16.msra.mxu0 %v16138_v35  ;;  %v16227_v54 = vcombine.high %v7296_v59, %v7300_v22  ;;  %v16291_v35 = vcombine.high %v7360_v41, %v7364_v24  ;;  %v7284_v42 = vld [vmem:[#allocation17 + $0x1268] sm:$0xff]  ;;  %v16282_v62 = vcombine.low %v7352_v38, %v7356_v37 }
 0xa65   :  { %13389 = vmatprep.subr.bf16.mxu0 %v16259_v43  ;;  %13414 = vmatprep.subr.bf16.mxu1 %v16323_v44  ;;  %v7288_v43 = vld [vmem:[#allocation17 + $0x1288] sm:$0xff] }
 0xa66   :  { %v7292_v44 = vld [vmem:[#allocation17 + $0x12a8] sm:$0xff] }
 0xa67   :  { %v13120_v52 = vpop.f32.mrf.mxu1  ;;  %13365 = vmatmul.mubr.bf16.vlgmr.msra.gmra.mxu1 %v19491_v13  ;;  %v7348_v40 = vld [vmem:[#allocation17 + $0x1468] sm:$0xff]  ;;  %v16218_v21 = vcombine.low %v7288_v43, %v7292_v44 }
 0xa68   :  { %v19561_v7 = vadd.f32 %v13120_v52, %v19553_v45  ;;  %13390 = vmatpush2.bf16.msra.mxu0 %v16258_v60  ;;  %13415 = vmatpush1.bf16.msra.mxu1 %v16322_v58  ;;  %v16219_v60 = vcombine.high %v7288_v43, %v7292_v44  ;;  %v16283_v58 = vcombine.high %v7352_v38, %v7356_v37  ;;  %v7448_v41 = vld [vmem:[#allocation17 + $0x1788] sm:$0xff] }
 0xa69   :  { %13446 = vmatprep.mubr.bf16.mxu1 %v19493_v20  ;;  %v13122_v30 = vpop.f32.mrf.mxu1  ;;  %13391 = vmatprep.subr.bf16.mxu0 %v16251_v18  ;;  %v7280_v18 = vld [vmem:[#allocation17 + $0x1248] sm:$0xff] }
 0xa6a   :  { %v19565_v5 = vadd.f32 %v13122_v30, %v19557_v49  ;;  %13416 = vmatprep.subr.bf16.mxu1 %v16315_v4  ;;  %v16234_v49 = vcombine.low %v7304_v8, %v7308_v63  ;;  %v7344_v4 = vld [vmem:[#allocation17 + $0x1448] sm:$0xff]  ;;  %v16211_v52 = vcombine.high %v7280_v18, %v7284_v42  ;;  %v16210_v8 = vcombine.low %v7280_v18, %v7284_v42 }
 0xa6b   :  { %v13124_v45 = vpop.f32.mrf.mxu1  ;;  %v7276_v30 = vld [vmem:[#allocation17 + $0x1228] sm:$0xff]  ;;  %v16274_v63 = vcombine.low %v7344_v4, %v7348_v40 }
 0xa6c   :  { %13392 = vmatpush2.bf16.msra.mxu0 %v16250_v28  ;;  %13417 = vmatpush1.bf16.msra.mxu1 %v16314_v15  ;;  %v16275_v28 = vcombine.high %v7344_v4, %v7348_v40  ;;  %v7272_v15 = vld [vmem:[#allocation17 + $0x1208] sm:$0xff] }
 0xa6d   :  { %v13125_v55 = vpop.f32.mrf.mxu1  ;;  %13393 = vmatprep.subr.bf16.mxu0 %v16243_v61  ;;  %13418 = vmatprep.subr.bf16.mxu1 %v16307_v39  ;;  %v7336_v61 = vld [vmem:[#allocation17 + $0x1408] sm:$0xff]  ;;  %v16203_v9 = vcombine.high %v7272_v15, %v7276_v30 }
 0xa6e   :  { %v7340_v39 = vld [vmem:[#allocation17 + $0x1428] sm:$0xff] }
 0xa6f   :  { %v16267_v10 = vcombine.high %v7336_v61, %v7340_v39  ;;  %v7456_v45 = vld [vmem:[#allocation17 + $0x17c8] sm:$0xff] }
 0xa70   :  { %13394 = vmatpush2.bf16.msra.mxu0 %v16242_v12  ;;  %13419 = vmatpush1.bf16.msra.mxu1 %v16306_v1  ;;  %v7460_v12 = vld [vmem:[#allocation17 + $0x17e8] sm:$0xff] }
 0xa71   :  { %13395 = vmatprep.subr.bf16.mxu0 %v16235_v26  ;;  %13420 = vmatprep.subr.bf16.mxu1 %v16299_v36  ;;  %v7520_v1 = vld [vmem:[#allocation17 + $0x19c8] sm:$0xff]  ;;  %v16202_v26 = vcombine.low %v7272_v15, %v7276_v30  ;;  %v16266_v36 = vcombine.low %v7336_v61, %v7340_v39  ;;  %v16387_v59 = vcombine.high %v7456_v45, %v7460_v12 }
 0xa72   :  { %v7524_v55 = vld [vmem:[#allocation17 + $0x19e8] sm:$0xff] }
 0xa73   :  { %v16451_v22 = vcombine.high %v7520_v1, %v7524_v55  ;;  %v7452_v24 = vld [vmem:[#allocation17 + $0x17a8] sm:$0xff] }
 0xa74   :  { %13396 = vmatpush2.bf16.msra.mxu0 %v16234_v49  ;;  %13421 = vmatpush1.bf16.msra.mxu1 %v16298_v56  ;;  %v7512_v49 = vld [vmem:[#allocation17 + $0x1988] sm:$0xff]  ;;  %v16379_v43 = vcombine.high %v7448_v41, %v7452_v24  ;;  %v16378_v18 = vcombine.low %v7448_v41, %v7452_v24 }
 0xa75   :  { %13397 = vmatprep.subr.bf16.mxu0 %v16227_v54  ;;  %13422 = vmatprep.subr.bf16.mxu1 %v16291_v35  ;;  %v7516_v56 = vld [vmem:[#allocation17 + $0x19a8] sm:$0xff]  ;;  %v16386_v54 = vcombine.low %v7456_v45, %v7460_v12  ;;  %v16450_v35 = vcombine.low %v7520_v1, %v7524_v55 }
 0xa76   :  { %v7440_v44 = vld [vmem:[#allocation17 + $0x1748] sm:$0xff]  ;;  %v16443_v38 = vcombine.high %v7512_v49, %v7516_v56  ;;  %v16442_v42 = vcombine.low %v7512_v49, %v7516_v56 }
 0xa77   :  { %v7444_v37 = vld [vmem:[#allocation17 + $0x1768] sm:$0xff] }
 0xa78   :  { %13398 = vmatpush2.bf16.msra.mxu0 %v16226_v14  ;;  %13423 = vmatpush1.bf16.msra.mxu1 %v16290_v23  ;;  %v7504_v14 = vld [vmem:[#allocation17 + $0x1948] sm:$0xff]  ;;  %v16371_v40 = vcombine.high %v7440_v44, %v7444_v37  ;;  %v16370_v61 = vcombine.low %v7440_v44, %v7444_v37 }
 0xa79   :  { %13399 = vmatprep.subr.bf16.mxu0 %v16219_v60  ;;  %13424 = vmatprep.subr.bf16.mxu1 %v16283_v58  ;;  %v7508_v23 = vld [vmem:[#allocation17 + $0x1968] sm:$0xff] }
 0xa7a   :  { %v7496_v15 = vld [vmem:[#allocation17 + $0x1908] sm:$0xff]  ;;  %v16434_v39 = vcombine.low %v7504_v14, %v7508_v23 }
 0xa7b   :  { %v7500_v30 = vld [vmem:[#allocation17 + $0x1928] sm:$0xff] }
 0xa7c   :  { %13400 = vmatpush2.bf16.msra.mxu0 %v16218_v21  ;;  %13425 = vmatpush1.bf16.msra.mxu1 %v16282_v62  ;;  %v16435_v21 = vcombine.high %v7504_v14, %v7508_v23  ;;  %v7432_v62 = vld [vmem:[#allocation17 + $0x1708] sm:$0xff]  ;;  %v16426_v55 = vcombine.low %v7496_v15, %v7500_v30 }
 0xa7d   :  { %13401 = vmatprep.subr.bf16.mxu0 %v16211_v52  ;;  %13426 = vmatprep.subr.bf16.mxu1 %v16275_v28  ;;  %v7436_v28 = vld [vmem:[#allocation17 + $0x1728] sm:$0xff] }
 0xa7e   :  { %v7428_v45 = vld [vmem:[#allocation17 + $0x16e8] sm:$0xff] }
 0xa7f   :  { %v7488_v12 = vld [vmem:[#allocation17 + $0x18c8] sm:$0xff] }
 0xa80   :  { %13402 = vmatpush2.bf16.msra.mxu0 %v16210_v8  ;;  %13427 = vmatpush1.bf16.msra.mxu1 %v16274_v63  ;;  %v16363_v63 = vcombine.high %v7432_v62, %v7436_v28  ;;  %v7492_v1 = vld [vmem:[#allocation17 + $0x18e8] sm:$0xff] }
 0xa81   :  { %13403 = vmatprep.subr.bf16.mxu0 %v16203_v9  ;;  %13428 = vmatprep.subr.bf16.mxu1 %v16267_v10  ;;  %v16427_v9 = vcombine.high %v7496_v15, %v7500_v30  ;;  %v7424_v10 = vld [vmem:[#allocation17 + $0x16c8] sm:$0xff]  ;;  %v16418_v56 = vcombine.low %v7488_v12, %v7492_v1 }
 0xa82   :  { %v7480_v41 = vld [vmem:[#allocation17 + $0x1888] sm:$0xff]  ;;  %v16354_v49 = vcombine.low %v7424_v10, %v7428_v45 }
 0xa83   :  { %v7484_v24 = vld [vmem:[#allocation17 + $0x18a8] sm:$0xff] }
 0xa84   :  { %13404 = vmatpush2.bf16.msra.mxu0 %v16202_v26  ;;  %13429 = vmatpush1.bf16.msra.mxu1 %v16266_v36  ;;  %v16355_v26 = vcombine.high %v7424_v10, %v7428_v45  ;;  %v16419_v36 = vcombine.high %v7488_v12, %v7492_v1  ;;  %v7412_v44 = vld [vmem:[#allocation17 + $0x1668] sm:$0xff]  ;;  %v16410_v23 = vcombine.low %v7480_v41, %v7484_v24 }
 0xa85   :  { %13430 = vmatprep.subr.bf16.mxu1 %v16387_v59  ;;  %13455 = vmatprep.subr.bf16.mxu0 %v16451_v22  ;;  %v7416_v59 = vld [vmem:[#allocation17 + $0x1688] sm:$0xff] }
 0xa86   :  { %v7420_v22 = vld [vmem:[#allocation17 + $0x16a8] sm:$0xff] }
 0xa87   :  { %v13161_v60 = vpop.f32.mrf.mxu0  ;;  %13406 = vmatmul.mubr.bf16.vlgmr.msra.gmra.mxu0 %v19499_v57  ;;  %v7476_v37 = vld [vmem:[#allocation17 + $0x1868] sm:$0xff]  ;;  %v16346_v14 = vcombine.low %v7416_v59, %v7420_v22 }
 0xa88   :  { %v19569_v58 = vadd.f32 %v13161_v60, %v19561_v7  ;;  %13431 = vmatpush2.bf16.msra.mxu1 %v16386_v54  ;;  %13456 = vmatpush1.bf16.msra.mxu0 %v16450_v35  ;;  %v16347_v54 = vcombine.high %v7416_v59, %v7420_v22  ;;  %v16411_v35 = vcombine.high %v7480_v41, %v7484_v24  ;;  %v7576_v12 = vld [vmem:[#allocation17 + $0x1b88] sm:$0xff] }
 0xa89   :  { %13487 = vmatprep.mubr.bf16.mxu0 %v19501_v17  ;;  %v13163_v4 = vpop.f32.mrf.mxu0  ;;  %13432 = vmatprep.subr.bf16.mxu1 %v16379_v43  ;;  %v7408_v43 = vld [vmem:[#allocation17 + $0x1648] sm:$0xff] }
 0xa8a   :  { %v19573_v52 = vadd.f32 %v13163_v4, %v19565_v5  ;;  %13457 = vmatprep.subr.bf16.mxu0 %v16443_v38  ;;  %v16362_v5 = vcombine.low %v7432_v62, %v7436_v28  ;;  %v7472_v38 = vld [vmem:[#allocation17 + $0x1848] sm:$0xff]  ;;  %v16339_v60 = vcombine.high %v7408_v43, %v7412_v44  ;;  %v16338_v62 = vcombine.low %v7408_v43, %v7412_v44 }
 0xa8b   :  { %v13165_v7 = vpop.f32.mrf.mxu0  ;;  %v7404_v4 = vld [vmem:[#allocation17 + $0x1628] sm:$0xff]  ;;  %v16402_v28 = vcombine.low %v7472_v38, %v7476_v37 }
 0xa8c   :  { %13433 = vmatpush2.bf16.msra.mxu1 %v16378_v18  ;;  %13458 = vmatpush1.bf16.msra.mxu0 %v16442_v42  ;;  %v16403_v18 = vcombine.high %v7472_v38, %v7476_v37  ;;  %v7400_v42 = vld [vmem:[#allocation17 + $0x1608] sm:$0xff] }
 0xa8d   :  { %v13166_v8 = vpop.f32.mrf.mxu0  ;;  %13434 = vmatprep.subr.bf16.mxu1 %v16371_v40  ;;  %13459 = vmatprep.subr.bf16.mxu0 %v16435_v21  ;;  %v7464_v40 = vld [vmem:[#allocation17 + $0x1808] sm:$0xff]  ;;  %v16331_v15 = vcombine.high %v7400_v42, %v7404_v4 }
 0xa8e   :  { %v7468_v21 = vld [vmem:[#allocation17 + $0x1828] sm:$0xff] }
 0xa8f   :  { %v16395_v30 = vcombine.high %v7464_v40, %v7468_v21  ;;  %v7584_v7 = vld [vmem:[#allocation17 + $0x1bc8] sm:$0xff] }
 0xa90   :  { %13435 = vmatpush2.bf16.msra.mxu1 %v16370_v61  ;;  %13460 = vmatpush1.bf16.msra.mxu0 %v16434_v39  ;;  %v7588_v61 = vld [vmem:[#allocation17 + $0x1be8] sm:$0xff] }
 0xa91   :  { %13436 = vmatprep.subr.bf16.mxu1 %v16363_v63  ;;  %13461 = vmatprep.subr.bf16.mxu0 %v16427_v9  ;;  %v7648_v39 = vld [vmem:[#allocation17 + $0x1dc8] sm:$0xff]  ;;  %v16330_v63 = vcombine.low %v7400_v42, %v7404_v4  ;;  %v16394_v9 = vcombine.low %v7464_v40, %v7468_v21  ;;  %v16515_v10 = vcombine.high %v7584_v7, %v7588_v61 }
 0xa92   :  { %v7652_v8 = vld [vmem:[#allocation17 + $0x1de8] sm:$0xff] }
 0xa93   :  { %v16579_v45 = vcombine.high %v7648_v39, %v7652_v8  ;;  %v7580_v1 = vld [vmem:[#allocation17 + $0x1ba8] sm:$0xff] }
 0xa94   :  { %13437 = vmatpush2.bf16.msra.mxu1 %v16362_v5  ;;  %13462 = vmatpush1.bf16.msra.mxu0 %v16426_v55  ;;  %v7640_v5 = vld [vmem:[#allocation17 + $0x1d88] sm:$0xff]  ;;  %v16507_v59 = vcombine.high %v7576_v12, %v7580_v1  ;;  %v16506_v43 = vcombine.low %v7576_v12, %v7580_v1 }
 0xa95   :  { %13438 = vmatprep.subr.bf16.mxu1 %v16355_v26  ;;  %13463 = vmatprep.subr.bf16.mxu0 %v16419_v36  ;;  %v7644_v55 = vld [vmem:[#allocation17 + $0x1da8] sm:$0xff]  ;;  %v16514_v26 = vcombine.low %v7584_v7, %v7588_v61  ;;  %v16578_v36 = vcombine.low %v7648_v39, %v7652_v8 }
 0xa96   :  { %v7568_v22 = vld [vmem:[#allocation17 + $0x1b48] sm:$0xff]  ;;  %v16571_v41 = vcombine.high %v7640_v5, %v7644_v55  ;;  %v16570_v44 = vcombine.low %v7640_v5, %v7644_v55 }
 0xa97   :  { %v7572_v24 = vld [vmem:[#allocation17 + $0x1b68] sm:$0xff] }
 0xa98   :  { %13439 = vmatpush2.bf16.msra.mxu1 %v16354_v49  ;;  %13464 = vmatpush1.bf16.msra.mxu0 %v16418_v56  ;;  %v7632_v49 = vld [vmem:[#allocation17 + $0x1d48] sm:$0xff]  ;;  %v16499_v37 = vcombine.high %v7568_v22, %v7572_v24  ;;  %v16498_v40 = vcombine.low %v7568_v22, %v7572_v24 }
 0xa99   :  { %13440 = vmatprep.subr.bf16.mxu1 %v16347_v54  ;;  %13465 = vmatprep.subr.bf16.mxu0 %v16411_v35  ;;  %v7636_v56 = vld [vmem:[#allocation17 + $0x1d68] sm:$0xff] }
 0xa9a   :  { %v7624_v42 = vld [vmem:[#allocation17 + $0x1d08] sm:$0xff]  ;;  %v16562_v21 = vcombine.low %v7632_v49, %v7636_v56 }
 0xa9b   :  { %v7628_v4 = vld [vmem:[#allocation17 + $0x1d28] sm:$0xff] }
 0xa9c   :  { %13441 = vmatpush2.bf16.msra.mxu1 %v16346_v14  ;;  %13466 = vmatpush1.bf16.msra.mxu0 %v16410_v23  ;;  %v16563_v14 = vcombine.high %v7632_v49, %v7636_v56  ;;  %v7560_v23 = vld [vmem:[#allocation17 + $0x1b08] sm:$0xff]  ;;  %v16554_v8 = vcombine.low %v7624_v42, %v7628_v4 }
 0xa9d   :  { %13442 = vmatprep.subr.bf16.mxu1 %v16339_v60  ;;  %13467 = vmatprep.subr.bf16.mxu0 %v16403_v18  ;;  %v7564_v18 = vld [vmem:[#allocation17 + $0x1b28] sm:$0xff] }
 0xa9e   :  { %v7556_v7 = vld [vmem:[#allocation17 + $0x1ae8] sm:$0xff] }
 0xa9f   :  { %v7616_v61 = vld [vmem:[#allocation17 + $0x1cc8] sm:$0xff] }
 0xaa0   :  { %13443 = vmatpush2.bf16.msra.mxu1 %v16338_v62  ;;  %13468 = vmatpush1.bf16.msra.mxu0 %v16402_v28  ;;  %v16491_v28 = vcombine.high %v7560_v23, %v7564_v18  ;;  %v7620_v39 = vld [vmem:[#allocation17 + $0x1ce8] sm:$0xff] }
 0xaa1   :  { %13444 = vmatprep.subr.bf16.mxu1 %v16331_v15  ;;  %13469 = vmatprep.subr.bf16.mxu0 %v16395_v30  ;;  %v16555_v15 = vcombine.high %v7624_v42, %v7628_v4  ;;  %v7552_v30 = vld [vmem:[#allocation17 + $0x1ac8] sm:$0xff]  ;;  %v16546_v55 = vcombine.low %v7616_v61, %v7620_v39 }
 0xaa2   :  { %v7608_v12 = vld [vmem:[#allocation17 + $0x1c88] sm:$0xff]  ;;  %v16482_v5 = vcombine.low %v7552_v30, %v7556_v7 }
 0xaa3   :  { %v7612_v1 = vld [vmem:[#allocation17 + $0x1ca8] sm:$0xff] }
 0xaa4   :  { %13445 = vmatpush2.bf16.msra.mxu1 %v16330_v63  ;;  %13470 = vmatpush1.bf16.msra.mxu0 %v16394_v9  ;;  %v16483_v63 = vcombine.high %v7552_v30, %v7556_v7  ;;  %v16547_v9 = vcombine.high %v7616_v61, %v7620_v39  ;;  %v7540_v22 = vld [vmem:[#allocation17 + $0x1a68] sm:$0xff]  ;;  %v16538_v56 = vcombine.low %v7608_v12, %v7612_v1 }
 0xaa5   :  { %13471 = vmatprep.subr.bf16.mxu0 %v16515_v10  ;;  %13496 = vmatprep.subr.bf16.mxu1 %v16579_v45  ;;  %v7544_v10 = vld [vmem:[#allocation17 + $0x1a88] sm:$0xff] }
 0xaa6   :  { %v7548_v45 = vld [vmem:[#allocation17 + $0x1aa8] sm:$0xff] }
 0xaa7   :  { %v13202_v54 = vpop.f32.mrf.mxu1  ;;  %13447 = vmatmul.mubr.bf16.vlgmr.msra.gmra.mxu1 %v19507_v2  ;;  %v7604_v24 = vld [vmem:[#allocation17 + $0x1c68] sm:$0xff]  ;;  %v16474_v49 = vcombine.low %v7544_v10, %v7548_v45 }
 0xaa8   :  { %v19577_v35 = vadd.f32 %v13202_v54, %v19569_v58  ;;  %13472 = vmatpush2.bf16.msra.mxu0 %v16514_v26  ;;  %13497 = vmatpush1.bf16.msra.mxu1 %v16578_v36  ;;  %v16475_v26 = vcombine.high %v7544_v10, %v7548_v45  ;;  %v16539_v36 = vcombine.high %v7608_v12, %v7612_v1  ;;  %v7704_v61 = vld [vmem:[#allocation17 + $0x1f88] sm:$0xff] }
 0xaa9   :  { %13528 = vmatprep.mubr.bf16.mxu1 %v19509_v50  ;;  %v13204_v38 = vpop.f32.mrf.mxu1  ;;  %13473 = vmatprep.subr.bf16.mxu0 %v16507_v59  ;;  %v7536_v59 = vld [vmem:[#allocation17 + $0x1a48] sm:$0xff] }
 0xaaa   :  { %v19581_v60 = vadd.f32 %v13204_v38, %v19573_v52  ;;  %13498 = vmatprep.subr.bf16.mxu1 %v16571_v41  ;;  %v16490_v52 = vcombine.low %v7560_v23, %v7564_v18  ;;  %v7600_v41 = vld [vmem:[#allocation17 + $0x1c48] sm:$0xff]  ;;  %v16467_v54 = vcombine.high %v7536_v59, %v7540_v22  ;;  %v16466_v23 = vcombine.low %v7536_v59, %v7540_v22 }
 0xaab   :  { %v13206_v58 = vpop.f32.mrf.mxu1  ;;  %v7532_v38 = vld [vmem:[#allocation17 + $0x1a28] sm:$0xff]  ;;  %v16530_v18 = vcombine.low %v7600_v41, %v7604_v24 }
 0xaac   :  { %13474 = vmatpush2.bf16.msra.mxu0 %v16506_v43  ;;  %13499 = vmatpush1.bf16.msra.mxu1 %v16570_v44  ;;  %v16531_v43 = vcombine.high %v7600_v41, %v7604_v24  ;;  %v7528_v44 = vld [vmem:[#allocation17 + $0x1a08] sm:$0xff] }
 0xaad   :  { %v13207_v62 = vpop.f32.mrf.mxu1  ;;  %13475 = vmatprep.subr.bf16.mxu0 %v16499_v37  ;;  %13500 = vmatprep.subr.bf16.mxu1 %v16563_v14  ;;  %v7592_v37 = vld [vmem:[#allocation17 + $0x1c08] sm:$0xff]  ;;  %v16459_v42 = vcombine.high %v7528_v44, %v7532_v38 }
 0xaae   :  { %v7596_v14 = vld [vmem:[#allocation17 + $0x1c28] sm:$0xff]  ;;  %v6757_v62 = vld [vmem:[#allocation17 + $0x1f0] sm:$0xff] }
 0xaaf   :  { %v16523_v4 = vcombine.high %v7592_v37, %v7596_v14  ;;  %v7712_v58 = vld [vmem:[#allocation17 + $0x1fc8] sm:$0xff] }
 0xab0   :  { %13476 = vmatpush2.bf16.msra.mxu0 %v16498_v40  ;;  %13501 = vmatpush1.bf16.msra.mxu1 %v16562_v21  ;;  %v7716_v40 = vld [vmem:[#allocation17 + $0x1fe8] sm:$0xff]  ;;  %v6753_v21 = vld [vmem:[#allocation17 + $0x1d0] sm:$0xff] }
 0xab1   :  { %13477 = vmatprep.subr.bf16.mxu0 %v16491_v28  ;;  %13502 = vmatprep.subr.bf16.mxu1 %v16555_v15  ;;  %v16458_v28 = vcombine.low %v7528_v44, %v7532_v38  ;;  %v16522_v15 = vcombine.low %v7592_v37, %v7596_v14  ;;  %v16643_v30 = vcombine.high %v7712_v58, %v7716_v40  ;;  %v7708_v39 = vld [vmem:[#allocation17 + $0x1fa8] sm:$0xff] }
 0xab2   :  { %v15685_v7 = vcombine.high %v6753_v21, %v6757_v62  ;;  %v16635_v10 = vcombine.high %v7704_v61, %v7708_v39  ;;  %v7696_v45 = vld [vmem:[#allocation17 + $0x1f48] sm:$0xff] }
 0xab3   :  { %v7700_v1 = vld [vmem:[#allocation17 + $0x1f68] sm:$0xff] }
 0xab4   :  { %13478 = vmatpush2.bf16.msra.mxu0 %v16490_v52  ;;  %13503 = vmatpush1.bf16.msra.mxu1 %v16554_v8  ;;  %v6745_v52 = vld [vmem:[#allocation17 + $0x190] sm:$0xff]  ;;  %v16627_v41 = vcombine.high %v7696_v45, %v7700_v1  ;;  %v16626_v38 = vcombine.low %v7696_v45, %v7700_v1  ;;  %v7668_v45 = vld [vmem:[#allocation17 + $0x1e68] sm:$0xff] }
 0xab5   :  { %13479 = vmatprep.subr.bf16.mxu0 %v16483_v63  ;;  %13504 = vmatprep.subr.bf16.mxu1 %v16547_v9  ;;  %v6749_v8 = vld [vmem:[#allocation17 + $0x1b0] sm:$0xff]  ;;  %v16642_v63 = vcombine.low %v7712_v58, %v7716_v40  ;;  %v15684_v9 = vcombine.low %v6753_v21, %v6757_v62 }
 0xab6   :  { %v15677_v12 = vcombine.high %v6745_v52, %v6749_v8  ;;  %v15676_v59 = vcombine.low %v6745_v52, %v6749_v8  ;;  %v6721_v58 = vld [vmem:[#allocation17 + $0xd0] sm:$0xff] }
 0xab7   :  { %v6725_v40 = vld [vmem:[#allocation17 + $0xf0] sm:$0xff] }
 0xab8   :  { %13480 = vmatpush2.bf16.msra.mxu0 %v16482_v5  ;;  %13505 = vmatpush1.bf16.msra.mxu1 %v16546_v55  ;;  %v6737_v5 = vld [vmem:[#allocation17 + $0x150] sm:$0xff]  ;;  %v15652_v8 = vcombine.low %v6721_v58, %v6725_v40 }
 0xab9   :  { %13481 = vmatprep.subr.bf16.mxu0 %v16475_v26  ;;  %13506 = vmatprep.subr.bf16.mxu1 %v16539_v36  ;;  %v6741_v55 = vld [vmem:[#allocation17 + $0x170] sm:$0xff]  ;;  %v16634_v36 = vcombine.low %v7704_v61, %v7708_v39 }
 0xaba   :  { %v15669_v24 = vcombine.high %v6737_v5, %v6741_v55  ;;  %v15668_v37 = vcombine.low %v6737_v5, %v6741_v55  ;;  %v6713_v61 = vld [vmem:[#allocation17 + $0x90] sm:$0xff] }
 0xabb   :  { %v6717_v39 = vld [vmem:[#allocation17 + $0xb0] sm:$0xff] }
 0xabc   :  { %13482 = vmatpush2.bf16.msra.mxu0 %v16474_v49  ;;  %13507 = vmatpush1.bf16.msra.mxu1 %v16538_v56  ;;  %v7688_v49 = vld [vmem:[#allocation17 + $0x1f08] sm:$0xff]  ;;  %v6709_v1 = vld [vmem:[#allocation17 + $0x70] sm:$0xff]  ;;  %v15644_v55 = vcombine.low %v6713_v61, %v6717_v39 }
 0xabd   :  { %13483 = vmatprep.subr.bf16.mxu0 %v16467_v54  ;;  %13508 = vmatprep.subr.bf16.mxu1 %v16531_v43  ;;  %v7692_v56 = vld [vmem:[#allocation17 + $0x1f28] sm:$0xff]  ;;  %v6729_v54 = vld [vmem:[#allocation17 + $0x110] sm:$0xff] }
 0xabe   :  { %v6733_v43 = vld [vmem:[#allocation17 + $0x130] sm:$0xff]  ;;  %v16618_v21 = vcombine.low %v7688_v49, %v7692_v56 }
 0xabf   :  { %v15660_v62 = vcombine.low %v6729_v54, %v6733_v43 }
 0xac0   :  { %13484 = vmatpush2.bf16.msra.mxu0 %v16466_v23  ;;  %13509 = vmatpush1.bf16.msra.mxu1 %v16530_v18  ;;  %v16619_v23 = vcombine.high %v7688_v49, %v7692_v56  ;;  %v15661_v18 = vcombine.high %v6729_v54, %v6733_v43  ;;  %v6697_v49 = vld [vmem:[#allocation17 + $0x10] sm:$0xff] }
 0xac1   :  { %13485 = vmatprep.subr.bf16.mxu0 %v16459_v42  ;;  %13510 = vmatprep.subr.bf16.mxu1 %v16523_v4  ;;  %v7680_v42 = vld [vmem:[#allocation17 + $0x1ec8] sm:$0xff]  ;;  %v6701_v56 = vld [vmem:[#allocation17 + $0x30] sm:$0xff] }
 0xac2   :  { %v7684_v4 = vld [vmem:[#allocation17 + $0x1ee8] sm:$0xff] }
 0xac3   :  { %v16610_v52 = vcombine.low %v7680_v42, %v7684_v4 }
 0xac4   :  { %13486 = vmatpush2.bf16.msra.mxu0 %v16458_v28  ;;  %13511 = vmatpush1.bf16.msra.mxu1 %v16522_v15  ;;  %v16611_v28 = vcombine.high %v7680_v42, %v7684_v4  ;;  %v15653_v15 = vcombine.high %v6721_v58, %v6725_v40  ;;  %v15628_v4 = vcombine.low %v6697_v49, %v6701_v56 }
 0xac5   :  { %13512 = vmatprep.subr.bf16.mxu1 %v16643_v30  ;;  %13537 = vmatprep.subr.bf16.mxu0 %v15685_v7  ;;  %v7672_v30 = vld [vmem:[#allocation17 + $0x1e88] sm:$0xff] }
 0xac6   :  { %v7676_v7 = vld [vmem:[#allocation17 + $0x1ea8] sm:$0xff] }
 0xac7   :  { %v19583_v26 = vpop.f32.mrf.mxu0  ;;  %13488 = vmatmul.mubr.bf16.vlgmr.msra.gmra.mxu0 %v19514_v0  ;;  %v16602_v5 = vcombine.low %v7672_v30, %v7676_v7 }
 0xac8   :  { %13513 = vmatpush2.bf16.msra.mxu1 %v16642_v63  ;;  %13538 = vmatpush1.bf16.msra.mxu0 %v15684_v9  ;;  %v16603_v63 = vcombine.high %v7672_v30, %v7676_v7  ;;  %v15645_v9 = vcombine.high %v6713_v61, %v6717_v39  ;;  %v6873_v30 = vld [vmem:[#allocation17 + $0x590] sm:$0xff] }
 0xac9   :  { %13569 = vmatprep.mubr.bf16.mxu0 %v19341_v6  ;;  %v19587_v22 = vpop.f32.mrf.mxu0  ;;  %13514 = vmatprep.subr.bf16.mxu1 %v16635_v10  ;;  %v7664_v10 = vld [vmem:[#allocation17 + $0x1e48] sm:$0xff]  ;;  %v6877_v7 = vld [vmem:[#allocation17 + $0x5b0] sm:$0xff] }
 0xaca   :  { %13539 = vmatprep.subr.bf16.mxu0 %v15677_v12  ;;  %v6705_v12 = vld [vmem:[#allocation17 + $0x50] sm:$0xff]  ;;  %v16594_v54 = vcombine.low %v7664_v10, %v7668_v45 }
 0xacb   :  { %v13247_v44 = vpop.f32.mrf.mxu0  ;;  %v15636_v43 = vcombine.low %v6705_v12, %v6709_v1 }
 0xacc   :  { %13515 = vmatpush2.bf16.msra.mxu1 %v16634_v36  ;;  %13540 = vmatpush1.bf16.msra.mxu0 %v15676_v59  ;;  %v16595_v36 = vcombine.high %v7664_v10, %v7668_v45  ;;  %v15637_v59 = vcombine.high %v6705_v12, %v6709_v1  ;;  %v15805_v10 = vcombine.high %v6873_v30, %v6877_v7  ;;  %v6805_v45 = vld [vmem:[#allocation17 + $0x370] sm:$0xff] }
 0xacd   :  { %v13248_v14 = vpop.f32.mrf.mxu0  ;;  %13516 = vmatprep.subr.bf16.mxu1 %v16627_v41  ;;  %13541 = vmatprep.subr.bf16.mxu0 %v15669_v24  ;;  %v7656_v41 = vld [vmem:[#allocation17 + $0x1e08] sm:$0xff]  ;;  %v6865_v12 = vld [vmem:[#allocation17 + $0x550] sm:$0xff] }
 0xace   :  { %v7660_v24 = vld [vmem:[#allocation17 + $0x1e28] sm:$0xff]  ;;  %v6821_v14 = vld [vmem:[#allocation17 + $0x3f0] sm:$0xff] }
 0xacf   :  { %v16587_v44 = vcombine.high %v7656_v41, %v7660_v24  ;;  %v16586_v42 = vcombine.low %v7656_v41, %v7660_v24  ;;  %v6793_v24 = vld [vmem:[#allocation17 + $0x310] sm:$0xff] }
 0xad0   :  { %13517 = vmatpush2.bf16.msra.mxu1 %v16626_v38  ;;  %13542 = vmatpush1.bf16.msra.mxu0 %v15668_v37  ;;  %v15629_v38 = vcombine.high %v6697_v49, %v6701_v56  ;;  %v6817_v37 = vld [vmem:[#allocation17 + $0x3d0] sm:$0xff] }
 0xad1   :  { %13518 = vmatprep.subr.bf16.mxu1 %v16619_v23  ;;  %13543 = vmatprep.subr.bf16.mxu0 %v15661_v18  ;;  %v6881_v23 = vld [vmem:[#allocation17 + $0x5d0] sm:$0xff]  ;;  %v15749_v58 = vcombine.high %v6817_v37, %v6821_v14  ;;  %v15748_v39 = vcombine.low %v6817_v37, %v6821_v14 }
 0xad2   :  { %v6885_v18 = vld [vmem:[#allocation17 + $0x5f0] sm:$0xff] }
 0xad3   :  { %v15813_v40 = vcombine.high %v6881_v23, %v6885_v18  ;;  %v6797_v56 = vld [vmem:[#allocation17 + $0x330] sm:$0xff] }
 0xad4   :  { %13519 = vmatpush2.bf16.msra.mxu1 %v16618_v21  ;;  %13544 = vmatpush1.bf16.msra.mxu0 %v15660_v62  ;;  %v17335_v21 = vld [vmem:[#allocation19] sm:$0xff]  ;;  %v15725_v14 = vcombine.high %v6793_v24, %v6797_v56 }
 0xad5   :  { %13520 = vmatprep.subr.bf16.mxu1 %v16611_v28  ;;  %13545 = vmatprep.subr.bf16.mxu0 %v15653_v15  ;;  %v7732_v62 = vrot.slane %v17335_v21, %v17963_v33  ;;  %v6809_v28 = vld [vmem:[#allocation17 + $0x390] sm:$0xff]  ;;  %v7736_v61 = vrot.slane %v17335_v21, %v19405_v16 }
 0xad6   :  { %v6813_v15 = vld [vmem:[#allocation17 + $0x3b0] sm:$0xff] }
 0xad7   :  { %v6869_v33 = vld [vmem:[#allocation17 + $0x570] sm:$0xff]  ;;  %v13246_v16 = vadd.f32 %v19587_v22, %v7736_v61 }
 0xad8   :  { %13521 = vmatpush2.bf16.msra.mxu1 %v16610_v52  ;;  %13546 = vmatpush1.bf16.msra.mxu0 %v15652_v8  ;;  %v15812_v52 = vcombine.low %v6881_v23, %v6885_v18  ;;  %v15741_v8 = vcombine.high %v6809_v28, %v6813_v15  ;;  %v15797_v41 = vcombine.high %v6865_v12, %v6869_v33  ;;  %v6785_v18 = vld [vmem:[#allocation17 + $0x2d0] sm:$0xff] }
 0xad9   :  { %13522 = vmatprep.subr.bf16.mxu1 %v16603_v63  ;;  %13547 = vmatprep.subr.bf16.mxu0 %v15645_v9  ;;  %v6801_v63 = vld [vmem:[#allocation17 + $0x350] sm:$0xff]  ;;  %v13244_v9 = vadd.f32 %v19583_v26, %v7732_v62 }
 0xada   :  { %v15733_v26 = vcombine.high %v6801_v63, %v6805_v45  ;;  %v15732_v22 = vcombine.low %v6801_v63, %v6805_v45  ;;  %v6845_v61 = vld [vmem:[#allocation17 + $0x4b0] sm:$0xff] }
 0xadb   :  { %v6833_v45 = vld [vmem:[#allocation17 + $0x450] sm:$0xff] }
 0xadc   :  { %13523 = vmatpush2.bf16.msra.mxu1 %v16602_v5  ;;  %13548 = vmatpush1.bf16.msra.mxu0 %v15644_v55  ;;  %v15740_v5 = vcombine.low %v6809_v28, %v6813_v15  ;;  %v6777_v15 = vld [vmem:[#allocation17 + $0x290] sm:$0xff] }
 0xadd   :  { %13524 = vmatprep.subr.bf16.mxu1 %v16595_v36  ;;  %13549 = vmatprep.subr.bf16.mxu0 %v15637_v59  ;;  %v15804_v36 = vcombine.low %v6873_v30, %v6877_v7  ;;  %v6781_v30 = vld [vmem:[#allocation17 + $0x2b0] sm:$0xff] }
 0xade   :  { %v6841_v7 = vld [vmem:[#allocation17 + $0x490] sm:$0xff] }
 0xadf   :  { %v15773_v63 = vcombine.high %v6841_v7, %v6845_v61 }
 0xae0   :  { %13525 = vmatpush2.bf16.msra.mxu1 %v16594_v54  ;;  %13550 = vmatpush1.bf16.msra.mxu0 %v15636_v43  ;;  %v6857_v54 = vld [vmem:[#allocation17 + $0x510] sm:$0xff] }
 0xae1   :  { %13526 = vmatprep.subr.bf16.mxu1 %v16587_v44  ;;  %13551 = vmatprep.subr.bf16.mxu0 %v15629_v38  ;;  %v6861_v43 = vld [vmem:[#allocation17 + $0x530] sm:$0xff]  ;;  %v15796_v38 = vcombine.low %v6865_v12, %v6869_v33  ;;  %v15708_v33 = vcombine.low %v6777_v15, %v6781_v30 }
 0xae2   :  { %v15789_v23 = vcombine.high %v6857_v54, %v6861_v43  ;;  %v15788_v21 = vcombine.low %v6857_v54, %v6861_v43  ;;  %v6837_v12 = vld [vmem:[#allocation17 + $0x470] sm:$0xff] }
 0xae4   :  { %13527 = vmatpush2.bf16.msra.mxu1 %v16586_v42  ;;  %13552 = vmatpush1.bf16.msra.mxu0 %v15628_v4  ;;  %v6789_v42 = vld [vmem:[#allocation17 + $0x2f0] sm:$0xff] }
 0xae5   :  { %13553 = vmatprep.subr.bf16.mxu0 %v15749_v58  ;;  %13578 = vmatprep.subr.bf16.mxu1 %v15813_v40  ;;  %v6849_v4 = vld [vmem:[#allocation17 + $0x4d0] sm:$0xff]  ;;  %v15724_v40 = vcombine.low %v6793_v24, %v6797_v56  ;;  %v15717_v62 = vcombine.high %v6785_v18, %v6789_v42  ;;  %v15764_v56 = vcombine.low %v6833_v45, %v6837_v12 }
 0xae6   :  { %v6853_v58 = vld [vmem:[#allocation17 + $0x4f0] sm:$0xff] }
 0xae7   :  { %v13284_v1 = vpop.f32.mrf.mxu1  ;;  %13529 = vmatmul.mubr.bf16.vlgmr.msra.gmra.mxu1 %v19525_v29  ;;  %v15781_v28 = vcombine.high %v6849_v4, %v6853_v58 }
 0xae8   :  { %v19594_v55 = vadd.f32 %v13284_v1, %v13244_v9  ;;  %13554 = vmatpush2.bf16.msra.mxu0 %v15748_v39  ;;  %13579 = vmatpush1.bf16.msra.mxu1 %v15812_v52  ;;  %v15716_v39 = vcombine.low %v6785_v18, %v6789_v42  ;;  %v15780_v52 = vcombine.low %v6849_v4, %v6853_v58  ;;  %v6769_v9 = vld [vmem:[#allocation17 + $0x250] sm:$0xff] }
 0xae9   :  { %13610 = vmatprep.mubr.bf16.mxu1 %v19437_v34  ;;  %v13286_v59 = vpop.f32.mrf.mxu1  ;;  %13555 = vmatprep.subr.bf16.mxu0 %v15741_v8  ;;  %v15709_v8 = vcombine.high %v6777_v15, %v6781_v30  ;;  %v15772_v1 = vcombine.low %v6841_v7, %v6845_v61  ;;  %v6937_v4 = vld [vmem:[#allocation17 + $0x790] sm:$0xff] }
 0xaea   :  { %v19597_v49 = vadd.f32 %v13286_v59, %v13246_v16  ;;  %13580 = vmatprep.subr.bf16.mxu1 %v15805_v10  ;;  %v6773_v10 = vld [vmem:[#allocation17 + $0x270] sm:$0xff]  ;;  %v15765_v16 = vcombine.high %v6833_v45, %v6837_v12 }
 0xaeb   :  { %v13288_v44 = vpop.f32.mrf.mxu1  ;;  %v6765_v59 = vld [vmem:[#allocation17 + $0x230] sm:$0xff]  ;;  %v15700_v24 = vcombine.low %v6769_v9, %v6773_v10 }
 0xaec   :  { %13556 = vmatpush2.bf16.msra.mxu0 %v15740_v5  ;;  %13581 = vmatpush1.bf16.msra.mxu1 %v15804_v36  ;;  %v15701_v5 = vcombine.high %v6769_v9, %v6773_v10  ;;  %v6761_v36 = vld [vmem:[#allocation17 + $0x210] sm:$0xff] }
 0xaed   :  { %v13289_v37 = vpop.f32.mrf.mxu1  ;;  %13557 = vmatprep.subr.bf16.mxu0 %v15733_v26  ;;  %13582 = vmatprep.subr.bf16.mxu1 %v15797_v41  ;;  %v6825_v26 = vld [vmem:[#allocation17 + $0x410] sm:$0xff]  ;;  %v15693_v54 = vcombine.high %v6761_v36, %v6765_v59 }
 0xaee   :  { %v6829_v41 = vld [vmem:[#allocation17 + $0x430] sm:$0xff] }
 0xaef   :  { %v15757_v43 = vcombine.high %v6825_v26, %v6829_v41  ;;  %v6945_v44 = vld [vmem:[#allocation17 + $0x7d0] sm:$0xff] }
 0xaf0   :  { %13558 = vmatpush2.bf16.msra.mxu0 %v15732_v22  ;;  %13583 = vmatpush1.bf16.msra.mxu1 %v15796_v38  ;;  %v6949_v22 = vld [vmem:[#allocation17 + $0x7f0] sm:$0xff] }
 0xaf1   :  { %13559 = vmatprep.subr.bf16.mxu0 %v15725_v14  ;;  %13584 = vmatprep.subr.bf16.mxu1 %v15789_v23  ;;  %v7009_v38 = vld [vmem:[#allocation17 + $0x9d0] sm:$0xff]  ;;  %v15692_v14 = vcombine.low %v6761_v36, %v6765_v59  ;;  %v15756_v23 = vcombine.low %v6825_v26, %v6829_v41  ;;  %v15877_v18 = vcombine.high %v6945_v44, %v6949_v22 }
 0xaf2   :  { %v7013_v37 = vld [vmem:[#allocation17 + $0x9f0] sm:$0xff] }
 0xaf3   :  { %v15941_v42 = vcombine.high %v7009_v38, %v7013_v37  ;;  %v6941_v58 = vld [vmem:[#allocation17 + $0x7b0] sm:$0xff] }
 0xaf4   :  { %13560 = vmatpush2.bf16.msra.mxu0 %v15724_v40  ;;  %13585 = vmatpush1.bf16.msra.mxu1 %v15788_v21  ;;  %v7001_v40 = vld [vmem:[#allocation17 + $0x990] sm:$0xff]  ;;  %v15869_v15 = vcombine.high %v6937_v4, %v6941_v58  ;;  %v15868_v9 = vcombine.low %v6937_v4, %v6941_v58 }
 0xaf5   :  { %13561 = vmatprep.subr.bf16.mxu0 %v15717_v62  ;;  %13586 = vmatprep.subr.bf16.mxu1 %v15781_v28  ;;  %v7005_v21 = vld [vmem:[#allocation17 + $0x9b0] sm:$0xff]  ;;  %v15876_v62 = vcombine.low %v6945_v44, %v6949_v22  ;;  %v15940_v28 = vcombine.low %v7009_v38, %v7013_v37 }
 0xaf6   :  { %v6929_v30 = vld [vmem:[#allocation17 + $0x750] sm:$0xff]  ;;  %v15933_v7 = vcombine.high %v7001_v40, %v7005_v21  ;;  %v15932_v10 = vcombine.low %v7001_v40, %v7005_v21 }
 0xaf7   :  { %v6933_v61 = vld [vmem:[#allocation17 + $0x770] sm:$0xff] }
 0xaf8   :  { %13562 = vmatpush2.bf16.msra.mxu0 %v15716_v39  ;;  %13587 = vmatpush1.bf16.msra.mxu1 %v15780_v52  ;;  %v6993_v39 = vld [vmem:[#allocation17 + $0x950] sm:$0xff]  ;;  %v15861_v12 = vcombine.high %v6929_v30, %v6933_v61  ;;  %v15860_v26 = vcombine.low %v6929_v30, %v6933_v61 }
 0xaf9   :  { %13563 = vmatprep.subr.bf16.mxu0 %v15709_v8  ;;  %13588 = vmatprep.subr.bf16.mxu1 %v15773_v63  ;;  %v6997_v52 = vld [vmem:[#allocation17 + $0x970] sm:$0xff] }
 0xafa   :  { %v6985_v36 = vld [vmem:[#allocation17 + $0x910] sm:$0xff]  ;;  %v15924_v41 = vcombine.low %v6993_v39, %v6997_v52 }
 0xafb   :  { %v6989_v59 = vld [vmem:[#allocation17 + $0x930] sm:$0xff] }
 0xafc   :  { %13564 = vmatpush2.bf16.msra.mxu0 %v15708_v33  ;;  %13589 = vmatpush1.bf16.msra.mxu1 %v15772_v1  ;;  %v15925_v33 = vcombine.high %v6993_v39, %v6997_v52  ;;  %v6921_v1 = vld [vmem:[#allocation17 + $0x710] sm:$0xff]  ;;  %v15916_v37 = vcombine.low %v6985_v36, %v6989_v59 }
 0xafd   :  { %13565 = vmatprep.subr.bf16.mxu0 %v15701_v5  ;;  %13590 = vmatprep.subr.bf16.mxu1 %v15765_v16  ;;  %v6925_v16 = vld [vmem:[#allocation17 + $0x730] sm:$0xff] }
 0xafe   :  { %v6917_v44 = vld [vmem:[#allocation17 + $0x6f0] sm:$0xff] }
 0xaff   :  { %v6977_v22 = vld [vmem:[#allocation17 + $0x8d0] sm:$0xff] }
 0xb00   :  { %13566 = vmatpush2.bf16.msra.mxu0 %v15700_v24  ;;  %13591 = vmatpush1.bf16.msra.mxu1 %v15764_v56  ;;  %v15853_v56 = vcombine.high %v6921_v1, %v6925_v16  ;;  %v6981_v38 = vld [vmem:[#allocation17 + $0x8f0] sm:$0xff] }
 0xb01   :  { %13567 = vmatprep.subr.bf16.mxu0 %v15693_v54  ;;  %13592 = vmatprep.subr.bf16.mxu1 %v15757_v43  ;;  %v15917_v54 = vcombine.high %v6985_v36, %v6989_v59  ;;  %v6913_v43 = vld [vmem:[#allocation17 + $0x6d0] sm:$0xff]  ;;  %v15908_v21 = vcombine.low %v6977_v22, %v6981_v38 }
 0xb02   :  { %v6969_v4 = vld [vmem:[#allocation17 + $0x890] sm:$0xff]  ;;  %v15844_v40 = vcombine.low %v6913_v43, %v6917_v44 }
 0xb03   :  { %v6973_v58 = vld [vmem:[#allocation17 + $0x8b0] sm:$0xff] }
 0xb04   :  { %13568 = vmatpush2.bf16.msra.mxu0 %v15692_v14  ;;  %13593 = vmatpush1.bf16.msra.mxu1 %v15756_v23  ;;  %v15845_v14 = vcombine.high %v6913_v43, %v6917_v44  ;;  %v15909_v23 = vcombine.high %v6977_v22, %v6981_v38  ;;  %v6901_v30 = vld [vmem:[#allocation17 + $0x670] sm:$0xff]  ;;  %v15900_v52 = vcombine.low %v6969_v4, %v6973_v58 }
 0xb05   :  { %13594 = vmatprep.subr.bf16.mxu1 %v15877_v18  ;;  %13619 = vmatprep.subr.bf16.mxu0 %v15941_v42  ;;  %v6905_v18 = vld [vmem:[#allocation17 + $0x690] sm:$0xff] }
 0xb06   :  { %v6909_v42 = vld [vmem:[#allocation17 + $0x6b0] sm:$0xff] }
 0xb07   :  { %v13325_v8 = vpop.f32.mrf.mxu0  ;;  %13570 = vmatmul.mubr.bf16.vlgmr.msra.gmra.mxu0 %v19345_v25  ;;  %v6965_v61 = vld [vmem:[#allocation17 + $0x870] sm:$0xff]  ;;  %v15836_v39 = vcombine.low %v6905_v18, %v6909_v42 }
 0xb08   :  { %v19601_v63 = vadd.f32 %v13325_v8, %v19594_v55  ;;  %13595 = vmatpush2.bf16.msra.mxu1 %v15876_v62  ;;  %13620 = vmatpush1.bf16.msra.mxu0 %v15940_v28  ;;  %v15837_v62 = vcombine.high %v6905_v18, %v6909_v42  ;;  %v15901_v28 = vcombine.high %v6969_v4, %v6973_v58  ;;  %v7065_v22 = vld [vmem:[#allocation17 + $0xb90] sm:$0xff] }
 0xb09   :  { %13651 = vmatprep.mubr.bf16.mxu0 %v19371_v19  ;;  %v13327_v45 = vpop.f32.mrf.mxu0  ;;  %13596 = vmatprep.subr.bf16.mxu1 %v15869_v15  ;;  %v6897_v15 = vld [vmem:[#allocation17 + $0x650] sm:$0xff] }
 0xb0a   :  { %v19605_v5 = vadd.f32 %v13327_v45, %v19597_v49  ;;  %13621 = vmatprep.subr.bf16.mxu0 %v15933_v7  ;;  %v15852_v49 = vcombine.low %v6921_v1, %v6925_v16  ;;  %v6961_v7 = vld [vmem:[#allocation17 + $0x850] sm:$0xff]  ;;  %v15829_v8 = vcombine.high %v6897_v15, %v6901_v30  ;;  %v15828_v1 = vcombine.low %v6897_v15, %v6901_v30 }
 0xb0b   :  { %v13329_v55 = vpop.f32.mrf.mxu0  ;;  %v6893_v45 = vld [vmem:[#allocation17 + $0x630] sm:$0xff]  ;;  %v15892_v16 = vcombine.low %v6961_v7, %v6965_v61 }
 0xb0c   :  { %13597 = vmatpush2.bf16.msra.mxu1 %v15868_v9  ;;  %13622 = vmatpush1.bf16.msra.mxu0 %v15932_v10  ;;  %v15893_v9 = vcombine.high %v6961_v7, %v6965_v61  ;;  %v6889_v10 = vld [vmem:[#allocation17 + $0x610] sm:$0xff] }
 0xb0d   :  { %v13330_v24 = vpop.f32.mrf.mxu0  ;;  %13598 = vmatprep.subr.bf16.mxu1 %v15861_v12  ;;  %13623 = vmatprep.subr.bf16.mxu0 %v15925_v33  ;;  %v6953_v12 = vld [vmem:[#allocation17 + $0x810] sm:$0xff]  ;;  %v15821_v36 = vcombine.high %v6889_v10, %v6893_v45 }
 0xb0e   :  { %v6957_v33 = vld [vmem:[#allocation17 + $0x830] sm:$0xff] }
 0xb0f   :  { %v15885_v59 = vcombine.high %v6953_v12, %v6957_v33  ;;  %v7073_v55 = vld [vmem:[#allocation17 + $0xbd0] sm:$0xff] }
 0xb10   :  { %13599 = vmatpush2.bf16.msra.mxu1 %v15860_v26  ;;  %13624 = vmatpush1.bf16.msra.mxu0 %v15924_v41  ;;  %v7077_v26 = vld [vmem:[#allocation17 + $0xbf0] sm:$0xff] }
 0xb11   :  { %13600 = vmatprep.subr.bf16.mxu1 %v15853_v56  ;;  %13625 = vmatprep.subr.bf16.mxu0 %v15917_v54  ;;  %v7137_v41 = vld [vmem:[#allocation17 + $0xdd0] sm:$0xff]  ;;  %v15820_v56 = vcombine.low %v6889_v10, %v6893_v45  ;;  %v15884_v54 = vcombine.low %v6953_v12, %v6957_v33  ;;  %v16005_v43 = vcombine.high %v7073_v55, %v7077_v26 }
 0xb12   :  { %v7141_v24 = vld [vmem:[#allocation17 + $0xdf0] sm:$0xff] }
 0xb13   :  { %v16069_v44 = vcombine.high %v7137_v41, %v7141_v24  ;;  %v7069_v38 = vld [vmem:[#allocation17 + $0xbb0] sm:$0xff] }
 0xb14   :  { %13601 = vmatpush2.bf16.msra.mxu1 %v15852_v49  ;;  %13626 = vmatpush1.bf16.msra.mxu0 %v15916_v37  ;;  %v7129_v49 = vld [vmem:[#allocation17 + $0xd90] sm:$0xff]  ;;  %v15997_v18 = vcombine.high %v7065_v22, %v7069_v38  ;;  %v15996_v15 = vcombine.low %v7065_v22, %v7069_v38 }
 0xb15   :  { %13602 = vmatprep.subr.bf16.mxu1 %v15845_v14  ;;  %13627 = vmatprep.subr.bf16.mxu0 %v15909_v23  ;;  %v7133_v37 = vld [vmem:[#allocation17 + $0xdb0] sm:$0xff]  ;;  %v16004_v14 = vcombine.low %v7073_v55, %v7077_v26  ;;  %v16068_v23 = vcombine.low %v7137_v41, %v7141_v24 }
 0xb16   :  { %v7057_v42 = vld [vmem:[#allocation17 + $0xb50] sm:$0xff]  ;;  %v16061_v4 = vcombine.high %v7129_v49, %v7133_v37  ;;  %v16060_v30 = vcombine.low %v7129_v49, %v7133_v37 }
 0xb17   :  { %v7061_v58 = vld [vmem:[#allocation17 + $0xb70] sm:$0xff] }
 0xb18   :  { %13603 = vmatpush2.bf16.msra.mxu1 %v15844_v40  ;;  %13628 = vmatpush1.bf16.msra.mxu0 %v15908_v21  ;;  %v7121_v40 = vld [vmem:[#allocation17 + $0xd50] sm:$0xff]  ;;  %v15989_v61 = vcombine.high %v7057_v42, %v7061_v58  ;;  %v15988_v12 = vcombine.low %v7057_v42, %v7061_v58 }
 0xb19   :  { %13604 = vmatprep.subr.bf16.mxu1 %v15837_v62  ;;  %13629 = vmatprep.subr.bf16.mxu0 %v15901_v28  ;;  %v7125_v21 = vld [vmem:[#allocation17 + $0xd70] sm:$0xff] }
 0xb1a   :  { %v7113_v10 = vld [vmem:[#allocation17 + $0xd10] sm:$0xff]  ;;  %v16052_v33 = vcombine.low %v7121_v40, %v7125_v21 }
 0xb1b   :  { %v7117_v45 = vld [vmem:[#allocation17 + $0xd30] sm:$0xff] }
 0xb1c   :  { %13605 = vmatpush2.bf16.msra.mxu1 %v15836_v39  ;;  %13630 = vmatpush1.bf16.msra.mxu0 %v15900_v52  ;;  %v16053_v39 = vcombine.high %v7121_v40, %v7125_v21  ;;  %v7049_v52 = vld [vmem:[#allocation17 + $0xb10] sm:$0xff]  ;;  %v16044_v24 = vcombine.low %v7113_v10, %v7117_v45 }
 0xb1d   :  { %13606 = vmatprep.subr.bf16.mxu1 %v15829_v8  ;;  %13631 = vmatprep.subr.bf16.mxu0 %v15893_v9  ;;  %v7053_v9 = vld [vmem:[#allocation17 + $0xb30] sm:$0xff] }
 0xb1e   :  { %v7045_v55 = vld [vmem:[#allocation17 + $0xaf0] sm:$0xff] }
 0xb1f   :  { %v7105_v26 = vld [vmem:[#allocation17 + $0xcd0] sm:$0xff] }
 0xb20   :  { %13607 = vmatpush2.bf16.msra.mxu1 %v15828_v1  ;;  %13632 = vmatpush1.bf16.msra.mxu0 %v15892_v16  ;;  %v15981_v16 = vcombine.high %v7049_v52, %v7053_v9  ;;  %v7109_v41 = vld [vmem:[#allocation17 + $0xcf0] sm:$0xff] }
 0xb21   :  { %13608 = vmatprep.subr.bf16.mxu1 %v15821_v36  ;;  %13633 = vmatprep.subr.bf16.mxu0 %v15885_v59  ;;  %v16045_v36 = vcombine.high %v7113_v10, %v7117_v45  ;;  %v7041_v59 = vld [vmem:[#allocation17 + $0xad0] sm:$0xff]  ;;  %v16036_v37 = vcombine.low %v7105_v26, %v7109_v41 }
 0xb22   :  { %v7097_v22 = vld [vmem:[#allocation17 + $0xc90] sm:$0xff]  ;;  %v15972_v49 = vcombine.low %v7041_v59, %v7045_v55 }
 0xb23   :  { %v7101_v38 = vld [vmem:[#allocation17 + $0xcb0] sm:$0xff] }
 0xb24   :  { %13609 = vmatpush2.bf16.msra.mxu1 %v15820_v56  ;;  %13634 = vmatpush1.bf16.msra.mxu0 %v15884_v54  ;;  %v15973_v56 = vcombine.high %v7041_v59, %v7045_v55  ;;  %v16037_v54 = vcombine.high %v7105_v26, %v7109_v41  ;;  %v7029_v42 = vld [vmem:[#allocation17 + $0xa70] sm:$0xff]  ;;  %v16028_v21 = vcombine.low %v7097_v22, %v7101_v38 }
 0xb25   :  { %13635 = vmatprep.subr.bf16.mxu0 %v16005_v43  ;;  %13660 = vmatprep.subr.bf16.mxu1 %v16069_v44  ;;  %v7033_v43 = vld [vmem:[#allocation17 + $0xa90] sm:$0xff] }
 0xb26   :  { %v7037_v44 = vld [vmem:[#allocation17 + $0xab0] sm:$0xff] }
 0xb27   :  { %v13366_v62 = vpop.f32.mrf.mxu1  ;;  %13611 = vmatmul.mubr.bf16.vlgmr.msra.gmra.mxu1 %v19439_v3  ;;  %v7093_v58 = vld [vmem:[#allocation17 + $0xc70] sm:$0xff]  ;;  %v15964_v40 = vcombine.low %v7033_v43, %v7037_v44 }
 0xb28   :  { %v19609_v28 = vadd.f32 %v13366_v62, %v19601_v63  ;;  %13636 = vmatpush2.bf16.msra.mxu0 %v16004_v14  ;;  %13661 = vmatpush1.bf16.msra.mxu1 %v16068_v23  ;;  %v15965_v14 = vcombine.high %v7033_v43, %v7037_v44  ;;  %v16029_v23 = vcombine.high %v7097_v22, %v7101_v38  ;;  %v7193_v26 = vld [vmem:[#allocation17 + $0xf90] sm:$0xff] }
 0xb29   :  { %13692 = vmatprep.mubr.bf16.mxu1 %v19457_v11  ;;  %v13368_v7 = vpop.f32.mrf.mxu1  ;;  %13637 = vmatprep.subr.bf16.mxu0 %v15997_v18  ;;  %v7025_v18 = vld [vmem:[#allocation17 + $0xa50] sm:$0xff] }
 0xb2a   :  { %v19613_v8 = vadd.f32 %v13368_v7, %v19605_v5  ;;  %13662 = vmatprep.subr.bf16.mxu1 %v16061_v4  ;;  %v15980_v5 = vcombine.low %v7049_v52, %v7053_v9  ;;  %v7089_v4 = vld [vmem:[#allocation17 + $0xc50] sm:$0xff]  ;;  %v15957_v62 = vcombine.high %v7025_v18, %v7029_v42  ;;  %v15956_v52 = vcombine.low %v7025_v18, %v7029_v42 }
 0xb2b   :  { %v13370_v63 = vpop.f32.mrf.mxu1  ;;  %v7021_v7 = vld [vmem:[#allocation17 + $0xa30] sm:$0xff]  ;;  %v16020_v9 = vcombine.low %v7089_v4, %v7093_v58 }
 0xb2c   :  { %13638 = vmatpush2.bf16.msra.mxu0 %v15996_v15  ;;  %13663 = vmatpush1.bf16.msra.mxu1 %v16060_v30  ;;  %v16021_v15 = vcombine.high %v7089_v4, %v7093_v58  ;;  %v7017_v30 = vld [vmem:[#allocation17 + $0xa10] sm:$0xff] }
 0xb2d   :  { %v13371_v1 = vpop.f32.mrf.mxu1  ;;  %13639 = vmatprep.subr.bf16.mxu0 %v15989_v61  ;;  %13664 = vmatprep.subr.bf16.mxu1 %v16053_v39  ;;  %v7081_v61 = vld [vmem:[#allocation17 + $0xc10] sm:$0xff]  ;;  %v15949_v10 = vcombine.high %v7017_v30, %v7021_v7 }
 0xb2e   :  { %v7085_v39 = vld [vmem:[#allocation17 + $0xc30] sm:$0xff] }
 0xb2f   :  { %v16013_v45 = vcombine.high %v7081_v61, %v7085_v39  ;;  %v7201_v63 = vld [vmem:[#allocation17 + $0xfd0] sm:$0xff] }
 0xb30   :  { %13640 = vmatpush2.bf16.msra.mxu0 %v15988_v12  ;;  %13665 = vmatpush1.bf16.msra.mxu1 %v16052_v33  ;;  %v7205_v12 = vld [vmem:[#allocation17 + $0xff0] sm:$0xff] }
 0xb31   :  { %13641 = vmatprep.subr.bf16.mxu0 %v15981_v16  ;;  %13666 = vmatprep.subr.bf16.mxu1 %v16045_v36  ;;  %v7265_v33 = vld [vmem:[#allocation17 + $0x11d0] sm:$0xff]  ;;  %v15948_v16 = vcombine.low %v7017_v30, %v7021_v7  ;;  %v16012_v36 = vcombine.low %v7081_v61, %v7085_v39  ;;  %v16133_v59 = vcombine.high %v7201_v63, %v7205_v12 }
 0xb32   :  { %v7269_v1 = vld [vmem:[#allocation17 + $0x11f0] sm:$0xff] }
 0xb33   :  { %v16197_v55 = vcombine.high %v7265_v33, %v7269_v1  ;;  %v7197_v41 = vld [vmem:[#allocation17 + $0xfb0] sm:$0xff] }
 0xb34   :  { %13642 = vmatpush2.bf16.msra.mxu0 %v15980_v5  ;;  %13667 = vmatpush1.bf16.msra.mxu1 %v16044_v24  ;;  %v7257_v5 = vld [vmem:[#allocation17 + $0x1190] sm:$0xff]  ;;  %v16125_v43 = vcombine.high %v7193_v26, %v7197_v41  ;;  %v16124_v18 = vcombine.low %v7193_v26, %v7197_v41 }
 0xb35   :  { %13643 = vmatprep.subr.bf16.mxu0 %v15973_v56  ;;  %13668 = vmatprep.subr.bf16.mxu1 %v16037_v54  ;;  %v7261_v24 = vld [vmem:[#allocation17 + $0x11b0] sm:$0xff]  ;;  %v16132_v56 = vcombine.low %v7201_v63, %v7205_v12  ;;  %v16196_v54 = vcombine.low %v7265_v33, %v7269_v1 }
 0xb36   :  { %v7185_v44 = vld [vmem:[#allocation17 + $0xf50] sm:$0xff]  ;;  %v16189_v22 = vcombine.high %v7257_v5, %v7261_v24  ;;  %v16188_v42 = vcombine.low %v7257_v5, %v7261_v24 }
 0xb37   :  { %v7189_v38 = vld [vmem:[#allocation17 + $0xf70] sm:$0xff] }
 0xb38   :  { %13644 = vmatpush2.bf16.msra.mxu0 %v15972_v49  ;;  %13669 = vmatpush1.bf16.msra.mxu1 %v16036_v37  ;;  %v7249_v49 = vld [vmem:[#allocation17 + $0x1150] sm:$0xff]  ;;  %v16117_v58 = vcombine.high %v7185_v44, %v7189_v38  ;;  %v16116_v61 = vcombine.low %v7185_v44, %v7189_v38 }
 0xb39   :  { %13645 = vmatprep.subr.bf16.mxu0 %v15965_v14  ;;  %13670 = vmatprep.subr.bf16.mxu1 %v16029_v23  ;;  %v7253_v37 = vld [vmem:[#allocation17 + $0x1170] sm:$0xff] }
 0xb3a   :  { %v7241_v30 = vld [vmem:[#allocation17 + $0x1110] sm:$0xff]  ;;  %v16180_v39 = vcombine.low %v7249_v49, %v7253_v37 }
 0xb3b   :  { %v7245_v7 = vld [vmem:[#allocation17 + $0x1130] sm:$0xff] }
 0xb3c   :  { %13646 = vmatpush2.bf16.msra.mxu0 %v15964_v40  ;;  %13671 = vmatpush1.bf16.msra.mxu1 %v16028_v21  ;;  %v16181_v40 = vcombine.high %v7249_v49, %v7253_v37  ;;  %v7177_v21 = vld [vmem:[#allocation17 + $0xf10] sm:$0xff]  ;;  %v16172_v1 = vcombine.low %v7241_v30, %v7245_v7 }
 0xb3d   :  { %13647 = vmatprep.subr.bf16.mxu0 %v15957_v62  ;;  %13672 = vmatprep.subr.bf16.mxu1 %v16021_v15  ;;  %v7181_v15 = vld [vmem:[#allocation17 + $0xf30] sm:$0xff] }
 0xb3e   :  { %v7173_v63 = vld [vmem:[#allocation17 + $0xef0] sm:$0xff] }
 0xb3f   :  { %v7233_v12 = vld [vmem:[#allocation17 + $0x10d0] sm:$0xff] }
 0xb40   :  { %13648 = vmatpush2.bf16.msra.mxu0 %v15956_v52  ;;  %13673 = vmatpush1.bf16.msra.mxu1 %v16020_v9  ;;  %v16109_v9 = vcombine.high %v7177_v21, %v7181_v15  ;;  %v7237_v33 = vld [vmem:[#allocation17 + $0x10f0] sm:$0xff] }
 0xb41   :  { %13649 = vmatprep.subr.bf16.mxu0 %v15949_v10  ;;  %13674 = vmatprep.subr.bf16.mxu1 %v16013_v45  ;;  %v16173_v10 = vcombine.high %v7241_v30, %v7245_v7  ;;  %v7169_v45 = vld [vmem:[#allocation17 + $0xed0] sm:$0xff]  ;;  %v16164_v24 = vcombine.low %v7233_v12, %v7237_v33 }
 0xb42   :  { %v7225_v26 = vld [vmem:[#allocation17 + $0x1090] sm:$0xff]  ;;  %v16100_v5 = vcombine.low %v7169_v45, %v7173_v63 }
 0xb43   :  { %v7229_v41 = vld [vmem:[#allocation17 + $0x10b0] sm:$0xff] }
 0xb44   :  { %13650 = vmatpush2.bf16.msra.mxu0 %v15948_v16  ;;  %13675 = vmatpush1.bf16.msra.mxu1 %v16012_v36  ;;  %v16101_v16 = vcombine.high %v7169_v45, %v7173_v63  ;;  %v16165_v36 = vcombine.high %v7233_v12, %v7237_v33  ;;  %v7157_v44 = vld [vmem:[#allocation17 + $0xe70] sm:$0xff]  ;;  %v16156_v37 = vcombine.low %v7225_v26, %v7229_v41 }
 0xb45   :  { %13676 = vmatprep.subr.bf16.mxu1 %v16133_v59  ;;  %13701 = vmatprep.subr.bf16.mxu0 %v16197_v55  ;;  %v7161_v59 = vld [vmem:[#allocation17 + $0xe90] sm:$0xff] }
 0xb46   :  { %v7165_v55 = vld [vmem:[#allocation17 + $0xeb0] sm:$0xff] }
 0xb47   :  { %v13407_v14 = vpop.f32.mrf.mxu0  ;;  %13652 = vmatmul.mubr.bf16.vlgmr.msra.gmra.mxu0 %v19483_v47  ;;  %v7221_v38 = vld [vmem:[#allocation17 + $0x1070] sm:$0xff]  ;;  %v16092_v49 = vcombine.low %v7161_v59, %v7165_v55 }
 0xb48   :  { %v19617_v23 = vadd.f32 %v13407_v14, %v19609_v28  ;;  %13677 = vmatpush2.bf16.msra.mxu1 %v16132_v56  ;;  %13702 = vmatpush1.bf16.msra.mxu0 %v16196_v54  ;;  %v16093_v56 = vcombine.high %v7161_v59, %v7165_v55  ;;  %v16157_v54 = vcombine.high %v7225_v26, %v7229_v41  ;;  %v7321_v12 = vld [vmem:[#allocation17 + $0x1390] sm:$0xff] }
 0xb49   :  { %13733 = vmatprep.mubr.bf16.mxu0 %v19485_v51  ;;  %v13409_v4 = vpop.f32.mrf.mxu0  ;;  %13678 = vmatprep.subr.bf16.mxu1 %v16125_v43  ;;  %v7153_v43 = vld [vmem:[#allocation17 + $0xe50] sm:$0xff] }
 0xb4a   :  { %v19621_v62 = vadd.f32 %v13409_v4, %v19613_v8  ;;  %13703 = vmatprep.subr.bf16.mxu0 %v16189_v22  ;;  %v16108_v8 = vcombine.low %v7177_v21, %v7181_v15  ;;  %v7217_v22 = vld [vmem:[#allocation17 + $0x1050] sm:$0xff]  ;;  %v16085_v14 = vcombine.high %v7153_v43, %v7157_v44  ;;  %v16084_v21 = vcombine.low %v7153_v43, %v7157_v44 }
 0xb4b   :  { %v13411_v28 = vpop.f32.mrf.mxu0  ;;  %v7149_v4 = vld [vmem:[#allocation17 + $0xe30] sm:$0xff]  ;;  %v16148_v15 = vcombine.low %v7217_v22, %v7221_v38 }
 0xb4c   :  { %13679 = vmatpush2.bf16.msra.mxu1 %v16124_v18  ;;  %13704 = vmatpush1.bf16.msra.mxu0 %v16188_v42  ;;  %v16149_v18 = vcombine.high %v7217_v22, %v7221_v38  ;;  %v7145_v42 = vld [vmem:[#allocation17 + $0xe10] sm:$0xff] }
 0xb4d   :  { %v13412_v52 = vpop.f32.mrf.mxu0  ;;  %13680 = vmatprep.subr.bf16.mxu1 %v16117_v58  ;;  %13705 = vmatprep.subr.bf16.mxu0 %v16181_v40  ;;  %v7209_v58 = vld [vmem:[#allocation17 + $0x1010] sm:$0xff]  ;;  %v16077_v30 = vcombine.high %v7145_v42, %v7149_v4 }
 0xb4e   :  { %v7213_v40 = vld [vmem:[#allocation17 + $0x1030] sm:$0xff] }
 0xb4f   :  { %v16141_v7 = vcombine.high %v7209_v58, %v7213_v40  ;;  %v7329_v28 = vld [vmem:[#allocation17 + $0x13d0] sm:$0xff] }
 0xb50   :  { %13681 = vmatpush2.bf16.msra.mxu1 %v16116_v61  ;;  %13706 = vmatpush1.bf16.msra.mxu0 %v16180_v39  ;;  %v7333_v61 = vld [vmem:[#allocation17 + $0x13f0] sm:$0xff] }
 0xb51   :  { %13682 = vmatprep.subr.bf16.mxu1 %v16109_v9  ;;  %13707 = vmatprep.subr.bf16.mxu0 %v16173_v10  ;;  %v7393_v39 = vld [vmem:[#allocation17 + $0x15d0] sm:$0xff]  ;;  %v16076_v9 = vcombine.low %v7145_v42, %v7149_v4  ;;  %v16140_v10 = vcombine.low %v7209_v58, %v7213_v40  ;;  %v16261_v45 = vcombine.high %v7329_v28, %v7333_v61 }
 0xb52   :  { %v7397_v52 = vld [vmem:[#allocation17 + $0x15f0] sm:$0xff] }
 0xb53   :  { %v16325_v63 = vcombine.high %v7393_v39, %v7397_v52  ;;  %v7325_v33 = vld [vmem:[#allocation17 + $0x13b0] sm:$0xff] }
 0xb54   :  { %13683 = vmatpush2.bf16.msra.mxu1 %v16108_v8  ;;  %13708 = vmatpush1.bf16.msra.mxu0 %v16172_v1  ;;  %v7385_v8 = vld [vmem:[#allocation17 + $0x1590] sm:$0xff]  ;;  %v16253_v59 = vcombine.high %v7321_v12, %v7325_v33  ;;  %v16252_v43 = vcombine.low %v7321_v12, %v7325_v33 }
 0xb55   :  { %13684 = vmatprep.subr.bf16.mxu1 %v16101_v16  ;;  %13709 = vmatprep.subr.bf16.mxu0 %v16165_v36  ;;  %v7389_v1 = vld [vmem:[#allocation17 + $0x15b0] sm:$0xff]  ;;  %v16260_v16 = vcombine.low %v7329_v28, %v7333_v61  ;;  %v16324_v36 = vcombine.low %v7393_v39, %v7397_v52 }
 0xb56   :  { %v7313_v55 = vld [vmem:[#allocation17 + $0x1350] sm:$0xff]  ;;  %v16317_v26 = vcombine.high %v7385_v8, %v7389_v1  ;;  %v16316_v44 = vcombine.low %v7385_v8, %v7389_v1 }
 0xb57   :  { %v7317_v41 = vld [vmem:[#allocation17 + $0x1370] sm:$0xff] }
 0xb58   :  { %13685 = vmatpush2.bf16.msra.mxu1 %v16100_v5  ;;  %13710 = vmatpush1.bf16.msra.mxu0 %v16164_v24  ;;  %v7377_v5 = vld [vmem:[#allocation17 + $0x1550] sm:$0xff]  ;;  %v16245_v38 = vcombine.high %v7313_v55, %v7317_v41  ;;  %v16244_v58 = vcombine.low %v7313_v55, %v7317_v41 }
 0xb59   :  { %13686 = vmatprep.subr.bf16.mxu1 %v16093_v56  ;;  %13711 = vmatprep.subr.bf16.mxu0 %v16157_v54  ;;  %v7381_v24 = vld [vmem:[#allocation17 + $0x1570] sm:$0xff] }
 0xb5a   :  { %v7369_v42 = vld [vmem:[#allocation17 + $0x1510] sm:$0xff]  ;;  %v16308_v40 = vcombine.low %v7377_v5, %v7381_v24 }
 0xb5b   :  { %v7373_v4 = vld [vmem:[#allocation17 + $0x1530] sm:$0xff] }
 0xb5c   :  { %13687 = vmatpush2.bf16.msra.mxu1 %v16092_v49  ;;  %13712 = vmatpush1.bf16.msra.mxu0 %v16156_v37  ;;  %v16309_v49 = vcombine.high %v7377_v5, %v7381_v24  ;;  %v7305_v37 = vld [vmem:[#allocation17 + $0x1310] sm:$0xff]  ;;  %v16300_v52 = vcombine.low %v7369_v42, %v7373_v4 }
 0xb5d   :  { %13688 = vmatprep.subr.bf16.mxu1 %v16085_v14  ;;  %13713 = vmatprep.subr.bf16.mxu0 %v16149_v18  ;;  %v7309_v18 = vld [vmem:[#allocation17 + $0x1330] sm:$0xff] }
 0xb5e   :  { %v7301_v28 = vld [vmem:[#allocation17 + $0x12f0] sm:$0xff] }
 0xb5f   :  { %v7361_v61 = vld [vmem:[#allocation17 + $0x14d0] sm:$0xff] }
 0xb60   :  { %13689 = vmatpush2.bf16.msra.mxu1 %v16084_v21  ;;  %13714 = vmatpush1.bf16.msra.mxu0 %v16148_v15  ;;  %v16237_v15 = vcombine.high %v7305_v37, %v7309_v18  ;;  %v7365_v39 = vld [vmem:[#allocation17 + $0x14f0] sm:$0xff] }
 0xb61   :  { %13690 = vmatprep.subr.bf16.mxu1 %v16077_v30  ;;  %13715 = vmatprep.subr.bf16.mxu0 %v16141_v7  ;;  %v16301_v30 = vcombine.high %v7369_v42, %v7373_v4  ;;  %v7297_v7 = vld [vmem:[#allocation17 + $0x12d0] sm:$0xff]  ;;  %v16292_v1 = vcombine.low %v7361_v61, %v7365_v39 }
 0xb62   :  { %v7353_v12 = vld [vmem:[#allocation17 + $0x1490] sm:$0xff]  ;;  %v16228_v8 = vcombine.low %v7297_v7, %v7301_v28 }
 0xb63   :  { %v7357_v33 = vld [vmem:[#allocation17 + $0x14b0] sm:$0xff] }
 0xb64   :  { %13691 = vmatpush2.bf16.msra.mxu1 %v16076_v9  ;;  %13716 = vmatpush1.bf16.msra.mxu0 %v16140_v10  ;;  %v16229_v9 = vcombine.high %v7297_v7, %v7301_v28  ;;  %v16293_v10 = vcombine.high %v7361_v61, %v7365_v39  ;;  %v7285_v55 = vld [vmem:[#allocation17 + $0x1270] sm:$0xff]  ;;  %v16284_v24 = vcombine.low %v7353_v12, %v7357_v33 }
 0xb65   :  { %13717 = vmatprep.subr.bf16.mxu0 %v16261_v45  ;;  %13742 = vmatprep.subr.bf16.mxu1 %v16325_v63  ;;  %v7289_v45 = vld [vmem:[#allocation17 + $0x1290] sm:$0xff] }
 0xb66   :  { %v7293_v63 = vld [vmem:[#allocation17 + $0x12b0] sm:$0xff] }
 0xb67   :  { %v13448_v56 = vpop.f32.mrf.mxu1  ;;  %13693 = vmatmul.mubr.bf16.vlgmr.msra.gmra.mxu1 %v19491_v13  ;;  %v7349_v41 = vld [vmem:[#allocation17 + $0x1470] sm:$0xff]  ;;  %v16220_v5 = vcombine.low %v7289_v45, %v7293_v63 }
 0xb68   :  { %v19625_v54 = vadd.f32 %v13448_v56, %v19617_v23  ;;  %13718 = vmatpush2.bf16.msra.mxu0 %v16260_v16  ;;  %13743 = vmatpush1.bf16.msra.mxu1 %v16324_v36  ;;  %v16221_v16 = vcombine.high %v7289_v45, %v7293_v63  ;;  %v16285_v36 = vcombine.high %v7353_v12, %v7357_v33  ;;  %v7449_v61 = vld [vmem:[#allocation17 + $0x1790] sm:$0xff] }
 0xb69   :  { %13774 = vmatprep.mubr.bf16.mxu1 %v19493_v20  ;;  %v13450_v22 = vpop.f32.mrf.mxu1  ;;  %13719 = vmatprep.subr.bf16.mxu0 %v16253_v59  ;;  %v7281_v59 = vld [vmem:[#allocation17 + $0x1250] sm:$0xff] }
 0xb6a   :  { %v19629_v14 = vadd.f32 %v13450_v22, %v19621_v62  ;;  %13744 = vmatprep.subr.bf16.mxu1 %v16317_v26  ;;  %v16236_v62 = vcombine.low %v7305_v37, %v7309_v18  ;;  %v7345_v26 = vld [vmem:[#allocation17 + $0x1450] sm:$0xff]  ;;  %v16213_v56 = vcombine.high %v7281_v59, %v7285_v55  ;;  %v16212_v37 = vcombine.low %v7281_v59, %v7285_v55 }
 0xb6b   :  { %v13452_v23 = vpop.f32.mrf.mxu1  ;;  %v7277_v22 = vld [vmem:[#allocation17 + $0x1230] sm:$0xff]  ;;  %v16276_v18 = vcombine.low %v7345_v26, %v7349_v41 }
 0xb6c   :  { %13720 = vmatpush2.bf16.msra.mxu0 %v16252_v43  ;;  %13745 = vmatpush1.bf16.msra.mxu1 %v16316_v44  ;;  %v16277_v43 = vcombine.high %v7345_v26, %v7349_v41  ;;  %v7273_v44 = vld [vmem:[#allocation17 + $0x1210] sm:$0xff] }
 0xb6d   :  { %v13453_v21 = vpop.f32.mrf.mxu1  ;;  %13721 = vmatprep.subr.bf16.mxu0 %v16245_v38  ;;  %13746 = vmatprep.subr.bf16.mxu1 %v16309_v49  ;;  %v7337_v38 = vld [vmem:[#allocation17 + $0x1410] sm:$0xff]  ;;  %v16205_v42 = vcombine.high %v7273_v44, %v7277_v22 }
 0xb6e   :  { %v7341_v49 = vld [vmem:[#allocation17 + $0x1430] sm:$0xff] }
 0xb6f   :  { %v16269_v4 = vcombine.high %v7337_v38, %v7341_v49  ;;  %v7457_v23 = vld [vmem:[#allocation17 + $0x17d0] sm:$0xff] }
 0xb70   :  { %13722 = vmatpush2.bf16.msra.mxu0 %v16244_v58  ;;  %13747 = vmatpush1.bf16.msra.mxu1 %v16308_v40  ;;  %v7461_v58 = vld [vmem:[#allocation17 + $0x17f0] sm:$0xff] }
 0xb71   :  { %13723 = vmatprep.subr.bf16.mxu0 %v16237_v15  ;;  %13748 = vmatprep.subr.bf16.mxu1 %v16301_v30  ;;  %v7521_v40 = vld [vmem:[#allocation17 + $0x19d0] sm:$0xff]  ;;  %v16204_v15 = vcombine.low %v7273_v44, %v7277_v22  ;;  %v16268_v30 = vcombine.low %v7337_v38, %v7341_v49  ;;  %v16389_v7 = vcombine.high %v7457_v23, %v7461_v58 }
 0xb72   :  { %v7525_v21 = vld [vmem:[#allocation17 + $0x19f0] sm:$0xff] }
 0xb73   :  { %v16453_v28 = vcombine.high %v7521_v40, %v7525_v21  ;;  %v7453_v39 = vld [vmem:[#allocation17 + $0x17b0] sm:$0xff] }
 0xb74   :  { %13724 = vmatpush2.bf16.msra.mxu0 %v16236_v62  ;;  %13749 = vmatpush1.bf16.msra.mxu1 %v16300_v52  ;;  %v7513_v62 = vld [vmem:[#allocation17 + $0x1990] sm:$0xff]  ;;  %v16381_v45 = vcombine.high %v7449_v61, %v7453_v39  ;;  %v16380_v59 = vcombine.low %v7449_v61, %v7453_v39 }
 0xb75   :  { %13725 = vmatprep.subr.bf16.mxu0 %v16229_v9  ;;  %13750 = vmatprep.subr.bf16.mxu1 %v16293_v10  ;;  %v7517_v52 = vld [vmem:[#allocation17 + $0x19b0] sm:$0xff]  ;;  %v16388_v9 = vcombine.low %v7457_v23, %v7461_v58  ;;  %v16452_v10 = vcombine.low %v7521_v40, %v7525_v21 }
 0xb76   :  { %v7441_v63 = vld [vmem:[#allocation17 + $0x1750] sm:$0xff]  ;;  %v16445_v12 = vcombine.high %v7513_v62, %v7517_v52  ;;  %v16444_v55 = vcombine.low %v7513_v62, %v7517_v52 }
 0xb77   :  { %v7445_v33 = vld [vmem:[#allocation17 + $0x1770] sm:$0xff] }
 0xb78   :  { %13726 = vmatpush2.bf16.msra.mxu0 %v16228_v8  ;;  %13751 = vmatpush1.bf16.msra.mxu1 %v16292_v1  ;;  %v7505_v8 = vld [vmem:[#allocation17 + $0x1950] sm:$0xff]  ;;  %v16373_v41 = vcombine.high %v7441_v63, %v7445_v33  ;;  %v16372_v38 = vcombine.low %v7441_v63, %v7445_v33 }
 0xb79   :  { %13727 = vmatprep.subr.bf16.mxu0 %v16221_v16  ;;  %13752 = vmatprep.subr.bf16.mxu1 %v16285_v36  ;;  %v7509_v1 = vld [vmem:[#allocation17 + $0x1970] sm:$0xff] }
 0xb7a   :  { %v7497_v44 = vld [vmem:[#allocation17 + $0x1910] sm:$0xff]  ;;  %v16436_v49 = vcombine.low %v7505_v8, %v7509_v1 }
 0xb7b   :  { %v7501_v22 = vld [vmem:[#allocation17 + $0x1930] sm:$0xff] }
 0xb7c   :  { %13728 = vmatpush2.bf16.msra.mxu0 %v16220_v5  ;;  %13753 = vmatpush1.bf16.msra.mxu1 %v16284_v24  ;;  %v16437_v5 = vcombine.high %v7505_v8, %v7509_v1  ;;  %v7433_v24 = vld [vmem:[#allocation17 + $0x1710] sm:$0xff]  ;;  %v16428_v21 = vcombine.low %v7497_v44, %v7501_v22 }
 0xb7d   :  { %13729 = vmatprep.subr.bf16.mxu0 %v16213_v56  ;;  %13754 = vmatprep.subr.bf16.mxu1 %v16277_v43  ;;  %v7437_v43 = vld [vmem:[#allocation17 + $0x1730] sm:$0xff] }
 0xb7e   :  { %v7429_v23 = vld [vmem:[#allocation17 + $0x16f0] sm:$0xff] }
 0xb7f   :  { %v7489_v58 = vld [vmem:[#allocation17 + $0x18d0] sm:$0xff] }
 0xb80   :  { %13730 = vmatpush2.bf16.msra.mxu0 %v16212_v37  ;;  %13755 = vmatpush1.bf16.msra.mxu1 %v16276_v18  ;;  %v16365_v18 = vcombine.high %v7433_v24, %v7437_v43  ;;  %v7493_v40 = vld [vmem:[#allocation17 + $0x18f0] sm:$0xff] }
 0xb81   :  { %13731 = vmatprep.subr.bf16.mxu0 %v16205_v42  ;;  %13756 = vmatprep.subr.bf16.mxu1 %v16269_v4  ;;  %v16429_v42 = vcombine.high %v7497_v44, %v7501_v22  ;;  %v7425_v4 = vld [vmem:[#allocation17 + $0x16d0] sm:$0xff]  ;;  %v16420_v52 = vcombine.low %v7489_v58, %v7493_v40 }
 0xb82   :  { %v7481_v61 = vld [vmem:[#allocation17 + $0x1890] sm:$0xff]  ;;  %v16356_v62 = vcombine.low %v7425_v4, %v7429_v23 }
 0xb83   :  { %v7485_v39 = vld [vmem:[#allocation17 + $0x18b0] sm:$0xff] }
 0xb84   :  { %13732 = vmatpush2.bf16.msra.mxu0 %v16204_v15  ;;  %13757 = vmatpush1.bf16.msra.mxu1 %v16268_v30  ;;  %v16357_v15 = vcombine.high %v7425_v4, %v7429_v23  ;;  %v16421_v30 = vcombine.high %v7489_v58, %v7493_v40  ;;  %v7413_v63 = vld [vmem:[#allocation17 + $0x1670] sm:$0xff]  ;;  %v16412_v1 = vcombine.low %v7481_v61, %v7485_v39 }
 0xb85   :  { %13758 = vmatprep.subr.bf16.mxu1 %v16389_v7  ;;  %13783 = vmatprep.subr.bf16.mxu0 %v16453_v28  ;;  %v7417_v7 = vld [vmem:[#allocation17 + $0x1690] sm:$0xff] }
 0xb86   :  { %v7421_v28 = vld [vmem:[#allocation17 + $0x16b0] sm:$0xff] }
 0xb87   :  { %v13489_v16 = vpop.f32.mrf.mxu0  ;;  %13734 = vmatmul.mubr.bf16.vlgmr.msra.gmra.mxu0 %v19499_v57  ;;  %v7477_v33 = vld [vmem:[#allocation17 + $0x1870] sm:$0xff]  ;;  %v16348_v8 = vcombine.low %v7417_v7, %v7421_v28 }
 0xb88   :  { %v19633_v36 = vadd.f32 %v13489_v16, %v19625_v54  ;;  %13759 = vmatpush2.bf16.msra.mxu1 %v16388_v9  ;;  %13784 = vmatpush1.bf16.msra.mxu0 %v16452_v10  ;;  %v16349_v9 = vcombine.high %v7417_v7, %v7421_v28  ;;  %v16413_v10 = vcombine.high %v7481_v61, %v7485_v39  ;;  %v7577_v58 = vld [vmem:[#allocation17 + $0x1b90] sm:$0xff] }
 0xb89   :  { %13815 = vmatprep.mubr.bf16.mxu0 %v19501_v17  ;;  %v13491_v26 = vpop.f32.mrf.mxu0  ;;  %13760 = vmatprep.subr.bf16.mxu1 %v16381_v45  ;;  %v7409_v45 = vld [vmem:[#allocation17 + $0x1650] sm:$0xff] }
 0xb8a   :  { %v19637_v56 = vadd.f32 %v13491_v26, %v19629_v14  ;;  %13785 = vmatprep.subr.bf16.mxu0 %v16445_v12  ;;  %v16364_v14 = vcombine.low %v7433_v24, %v7437_v43  ;;  %v7473_v12 = vld [vmem:[#allocation17 + $0x1850] sm:$0xff]  ;;  %v16341_v16 = vcombine.high %v7409_v45, %v7413_v63  ;;  %v16340_v24 = vcombine.low %v7409_v45, %v7413_v63 }
 0xb8b   :  { %v13493_v54 = vpop.f32.mrf.mxu0  ;;  %v7405_v26 = vld [vmem:[#allocation17 + $0x1630] sm:$0xff]  ;;  %v16404_v43 = vcombine.low %v7473_v12, %v7477_v33 }
 0xb8c   :  { %13761 = vmatpush2.bf16.msra.mxu1 %v16380_v59  ;;  %13786 = vmatpush1.bf16.msra.mxu0 %v16444_v55  ;;  %v16405_v59 = vcombine.high %v7473_v12, %v7477_v33  ;;  %v7401_v55 = vld [vmem:[#allocation17 + $0x1610] sm:$0xff] }
 0xb8d   :  { %v13494_v37 = vpop.f32.mrf.mxu0  ;;  %13762 = vmatprep.subr.bf16.mxu1 %v16373_v41  ;;  %13787 = vmatprep.subr.bf16.mxu0 %v16437_v5  ;;  %v7465_v41 = vld [vmem:[#allocation17 + $0x1810] sm:$0xff]  ;;  %v16333_v44 = vcombine.high %v7401_v55, %v7405_v26 }
 0xb8e   :  { %v7469_v5 = vld [vmem:[#allocation17 + $0x1830] sm:$0xff] }
 0xb8f   :  { %v16397_v22 = vcombine.high %v7465_v41, %v7469_v5  ;;  %v7585_v54 = vld [vmem:[#allocation17 + $0x1bd0] sm:$0xff] }
 0xb90   :  { %13763 = vmatpush2.bf16.msra.mxu1 %v16372_v38  ;;  %13788 = vmatpush1.bf16.msra.mxu0 %v16436_v49  ;;  %v7589_v38 = vld [vmem:[#allocation17 + $0x1bf0] sm:$0xff] }
 0xb91   :  { %13764 = vmatprep.subr.bf16.mxu1 %v16365_v18  ;;  %13789 = vmatprep.subr.bf16.mxu0 %v16429_v42  ;;  %v7649_v49 = vld [vmem:[#allocation17 + $0x1dd0] sm:$0xff]  ;;  %v16332_v18 = vcombine.low %v7401_v55, %v7405_v26  ;;  %v16396_v42 = vcombine.low %v7465_v41, %v7469_v5  ;;  %v16517_v4 = vcombine.high %v7585_v54, %v7589_v38 }
 0xb92   :  { %v7653_v37 = vld [vmem:[#allocation17 + $0x1df0] sm:$0xff] }
 0xb93   :  { %v16581_v23 = vcombine.high %v7649_v49, %v7653_v37  ;;  %v7581_v40 = vld [vmem:[#allocation17 + $0x1bb0] sm:$0xff] }
 0xb94   :  { %13765 = vmatpush2.bf16.msra.mxu1 %v16364_v14  ;;  %13790 = vmatpush1.bf16.msra.mxu0 %v16428_v21  ;;  %v7641_v14 = vld [vmem:[#allocation17 + $0x1d90] sm:$0xff]  ;;  %v16509_v7 = vcombine.high %v7577_v58, %v7581_v40  ;;  %v16508_v45 = vcombine.low %v7577_v58, %v7581_v40 }
 0xb95   :  { %13766 = vmatprep.subr.bf16.mxu1 %v16357_v15  ;;  %13791 = vmatprep.subr.bf16.mxu0 %v16421_v30  ;;  %v7645_v21 = vld [vmem:[#allocation17 + $0x1db0] sm:$0xff]  ;;  %v16516_v15 = vcombine.low %v7585_v54, %v7589_v38  ;;  %v16580_v30 = vcombine.low %v7649_v49, %v7653_v37 }
 0xb96   :  { %v7569_v28 = vld [vmem:[#allocation17 + $0x1b50] sm:$0xff]  ;;  %v16573_v61 = vcombine.high %v7641_v14, %v7645_v21  ;;  %v16572_v63 = vcombine.low %v7641_v14, %v7645_v21 }
 0xb97   :  { %v7573_v39 = vld [vmem:[#allocation17 + $0x1b70] sm:$0xff] }
 0xb98   :  { %13767 = vmatpush2.bf16.msra.mxu1 %v16356_v62  ;;  %13792 = vmatpush1.bf16.msra.mxu0 %v16420_v52  ;;  %v7633_v62 = vld [vmem:[#allocation17 + $0x1d50] sm:$0xff]  ;;  %v16501_v33 = vcombine.high %v7569_v28, %v7573_v39  ;;  %v16500_v41 = vcombine.low %v7569_v28, %v7573_v39 }
 0xb99   :  { %13768 = vmatprep.subr.bf16.mxu1 %v16349_v9  ;;  %13793 = vmatprep.subr.bf16.mxu0 %v16413_v10  ;;  %v7637_v52 = vld [vmem:[#allocation17 + $0x1d70] sm:$0xff] }
 0xb9a   :  { %v7625_v55 = vld [vmem:[#allocation17 + $0x1d10] sm:$0xff]  ;;  %v16564_v5 = vcombine.low %v7633_v62, %v7637_v52 }
 0xb9b   :  { %v7629_v26 = vld [vmem:[#allocation17 + $0x1d30] sm:$0xff] }
 0xb9c   :  { %13769 = vmatpush2.bf16.msra.mxu1 %v16348_v8  ;;  %13794 = vmatpush1.bf16.msra.mxu0 %v16412_v1  ;;  %v16565_v8 = vcombine.high %v7633_v62, %v7637_v52  ;;  %v7561_v1 = vld [vmem:[#allocation17 + $0x1b10] sm:$0xff]  ;;  %v16556_v37 = vcombine.low %v7625_v55, %v7629_v26 }
 0xb9d   :  { %13770 = vmatprep.subr.bf16.mxu1 %v16341_v16  ;;  %13795 = vmatprep.subr.bf16.mxu0 %v16405_v59  ;;  %v7565_v59 = vld [vmem:[#allocation17 + $0x1b30] sm:$0xff] }
 0xb9e   :  { %v7557_v54 = vld [vmem:[#allocation17 + $0x1af0] sm:$0xff] }
 0xb9f   :  { %v7617_v38 = vld [vmem:[#allocation17 + $0x1cd0] sm:$0xff] }
 0xba0   :  { %13771 = vmatpush2.bf16.msra.mxu1 %v16340_v24  ;;  %13796 = vmatpush1.bf16.msra.mxu0 %v16404_v43  ;;  %v16493_v43 = vcombine.high %v7561_v1, %v7565_v59  ;;  %v7621_v49 = vld [vmem:[#allocation17 + $0x1cf0] sm:$0xff] }
 0xba1   :  { %13772 = vmatprep.subr.bf16.mxu1 %v16333_v44  ;;  %13797 = vmatprep.subr.bf16.mxu0 %v16397_v22  ;;  %v16557_v44 = vcombine.high %v7625_v55, %v7629_v26  ;;  %v7553_v22 = vld [vmem:[#allocation17 + $0x1ad0] sm:$0xff]  ;;  %v16548_v21 = vcombine.low %v7617_v38, %v7621_v49 }
 0xba2   :  { %v7609_v58 = vld [vmem:[#allocation17 + $0x1c90] sm:$0xff]  ;;  %v16484_v14 = vcombine.low %v7553_v22, %v7557_v54 }
 0xba3   :  { %v7613_v40 = vld [vmem:[#allocation17 + $0x1cb0] sm:$0xff] }
 0xba4   :  { %13773 = vmatpush2.bf16.msra.mxu1 %v16332_v18  ;;  %13798 = vmatpush1.bf16.msra.mxu0 %v16396_v42  ;;  %v16485_v18 = vcombine.high %v7553_v22, %v7557_v54  ;;  %v16549_v42 = vcombine.high %v7617_v38, %v7621_v49  ;;  %v7541_v28 = vld [vmem:[#allocation17 + $0x1a70] sm:$0xff]  ;;  %v16540_v52 = vcombine.low %v7609_v58, %v7613_v40 }
 0xba5   :  { %13799 = vmatprep.subr.bf16.mxu0 %v16517_v4  ;;  %13824 = vmatprep.subr.bf16.mxu1 %v16581_v23  ;;  %v7545_v4 = vld [vmem:[#allocation17 + $0x1a90] sm:$0xff] }
 0xba6   :  { %v7549_v23 = vld [vmem:[#allocation17 + $0x1ab0] sm:$0xff] }
 0xba7   :  { %v13530_v9 = vpop.f32.mrf.mxu1  ;;  %13775 = vmatmul.mubr.bf16.vlgmr.msra.gmra.mxu1 %v19507_v2  ;;  %v7605_v39 = vld [vmem:[#allocation17 + $0x1c70] sm:$0xff]  ;;  %v16476_v62 = vcombine.low %v7545_v4, %v7549_v23 }
 0xba8   :  { %v19641_v10 = vadd.f32 %v13530_v9, %v19633_v36  ;;  %13800 = vmatpush2.bf16.msra.mxu0 %v16516_v15  ;;  %13825 = vmatpush1.bf16.msra.mxu1 %v16580_v30  ;;  %v16477_v15 = vcombine.high %v7545_v4, %v7549_v23  ;;  %v16541_v30 = vcombine.high %v7609_v58, %v7613_v40  ;;  %v7705_v38 = vld [vmem:[#allocation17 + $0x1f90] sm:$0xff] }
 0xba9   :  { %13856 = vmatprep.mubr.bf16.mxu1 %v19509_v50  ;;  %v13532_v12 = vpop.f32.mrf.mxu1  ;;  %13801 = vmatprep.subr.bf16.mxu0 %v16509_v7  ;;  %v7537_v7 = vld [vmem:[#allocation17 + $0x1a50] sm:$0xff] }
 0xbaa   :  { %v19645_v16 = vadd.f32 %v13532_v12, %v19637_v56  ;;  %13826 = vmatprep.subr.bf16.mxu1 %v16573_v61  ;;  %v16492_v56 = vcombine.low %v7561_v1, %v7565_v59  ;;  %v7601_v61 = vld [vmem:[#allocation17 + $0x1c50] sm:$0xff]  ;;  %v16469_v9 = vcombine.high %v7537_v7, %v7541_v28  ;;  %v16468_v1 = vcombine.low %v7537_v7, %v7541_v28 }
 0xbab   :  { %v13534_v36 = vpop.f32.mrf.mxu1  ;;  %v7533_v12 = vld [vmem:[#allocation17 + $0x1a30] sm:$0xff]  ;;  %v16532_v59 = vcombine.low %v7601_v61, %v7605_v39 }
 0xbac   :  { %13802 = vmatpush2.bf16.msra.mxu0 %v16508_v45  ;;  %13827 = vmatpush1.bf16.msra.mxu1 %v16572_v63  ;;  %v16533_v45 = vcombine.high %v7601_v61, %v7605_v39  ;;  %v7529_v63 = vld [vmem:[#allocation17 + $0x1a10] sm:$0xff] }
 0xbad   :  { %v13535_v24 = vpop.f32.mrf.mxu1  ;;  %13803 = vmatprep.subr.bf16.mxu0 %v16501_v33  ;;  %13828 = vmatprep.subr.bf16.mxu1 %v16565_v8  ;;  %v7593_v33 = vld [vmem:[#allocation17 + $0x1c10] sm:$0xff]  ;;  %v16461_v55 = vcombine.high %v7529_v63, %v7533_v12 }
 0xbae   :  { %v7597_v8 = vld [vmem:[#allocation17 + $0x1c30] sm:$0xff]  ;;  %v6758_v24 = vld [vmem:[#allocation17 + $0x1f8] sm:$0xff] }
 0xbaf   :  { %v16525_v26 = vcombine.high %v7593_v33, %v7597_v8  ;;  %v7713_v36 = vld [vmem:[#allocation17 + $0x1fd0] sm:$0xff] }
 0xbb0   :  { %13804 = vmatpush2.bf16.msra.mxu0 %v16500_v41  ;;  %13829 = vmatpush1.bf16.msra.mxu1 %v16564_v5  ;;  %v7717_v41 = vld [vmem:[#allocation17 + $0x1ff0] sm:$0xff]  ;;  %v6754_v5 = vld [vmem:[#allocation17 + $0x1d8] sm:$0xff] }
 0xbb1   :  { %13805 = vmatprep.subr.bf16.mxu0 %v16493_v43  ;;  %13830 = vmatprep.subr.bf16.mxu1 %v16557_v44  ;;  %v16460_v43 = vcombine.low %v7529_v63, %v7533_v12  ;;  %v16524_v44 = vcombine.low %v7593_v33, %v7597_v8  ;;  %v16645_v22 = vcombine.high %v7713_v36, %v7717_v41  ;;  %v7709_v49 = vld [vmem:[#allocation17 + $0x1fb0] sm:$0xff] }
 0xbb2   :  { %v15687_v54 = vcombine.high %v6754_v5, %v6758_v24  ;;  %v16637_v4 = vcombine.high %v7705_v38, %v7709_v49  ;;  %v7697_v23 = vld [vmem:[#allocation17 + $0x1f50] sm:$0xff] }
 0xbb3   :  { %v7701_v40 = vld [vmem:[#allocation17 + $0x1f70] sm:$0xff] }
 0xbb4   :  { %13806 = vmatpush2.bf16.msra.mxu0 %v16492_v56  ;;  %13831 = vmatpush1.bf16.msra.mxu1 %v16556_v37  ;;  %v6746_v56 = vld [vmem:[#allocation17 + $0x198] sm:$0xff]  ;;  %v16629_v61 = vcombine.high %v7697_v23, %v7701_v40  ;;  %v16628_v12 = vcombine.low %v7697_v23, %v7701_v40 }
 0xbb5   :  { %13807 = vmatprep.subr.bf16.mxu0 %v16485_v18  ;;  %13832 = vmatprep.subr.bf16.mxu1 %v16549_v42  ;;  %v6750_v37 = vld [vmem:[#allocation17 + $0x1b8] sm:$0xff]  ;;  %v16644_v18 = vcombine.low %v7713_v36, %v7717_v41  ;;  %v15686_v42 = vcombine.low %v6754_v5, %v6758_v24 }
 0xbb6   :  { %v15679_v58 = vcombine.high %v6746_v56, %v6750_v37  ;;  %v15678_v7 = vcombine.low %v6746_v56, %v6750_v37  ;;  %v6726_v36 = vld [vmem:[#allocation17 + $0xf8] sm:$0xff] }
 0xbb7   :  { %v6706_v23 = vld [vmem:[#allocation17 + $0x58] sm:$0xff] }
 0xbb8   :  { %13808 = vmatpush2.bf16.msra.mxu0 %v16484_v14  ;;  %13833 = vmatpush1.bf16.msra.mxu1 %v16548_v21  ;;  %v6738_v14 = vld [vmem:[#allocation17 + $0x158] sm:$0xff] }
 0xbb9   :  { %13809 = vmatprep.subr.bf16.mxu0 %v16477_v15  ;;  %13834 = vmatprep.subr.bf16.mxu1 %v16541_v30  ;;  %v6742_v21 = vld [vmem:[#allocation17 + $0x178] sm:$0xff]  ;;  %v16636_v30 = vcombine.low %v7705_v38, %v7709_v49 }
 0xbba   :  { %v15671_v39 = vcombine.high %v6738_v14, %v6742_v21  ;;  %v15670_v33 = vcombine.low %v6738_v14, %v6742_v21  ;;  %v6718_v38 = vld [vmem:[#allocation17 + $0xb8] sm:$0xff] }
 0xbbc   :  { %13810 = vmatpush2.bf16.msra.mxu0 %v16476_v62  ;;  %13835 = vmatpush1.bf16.msra.mxu1 %v16540_v52  ;;  %v7689_v62 = vld [vmem:[#allocation17 + $0x1f10] sm:$0xff] }
 0xbbd   :  { %13811 = vmatprep.subr.bf16.mxu0 %v16469_v9  ;;  %13836 = vmatprep.subr.bf16.mxu1 %v16533_v45  ;;  %v7693_v52 = vld [vmem:[#allocation17 + $0x1f30] sm:$0xff]  ;;  %v6730_v9 = vld [vmem:[#allocation17 + $0x118] sm:$0xff] }
 0xbbe   :  { %v6734_v45 = vld [vmem:[#allocation17 + $0x138] sm:$0xff]  ;;  %v16620_v41 = vcombine.low %v7689_v62, %v7693_v52 }
 0xbbf   :  { %v15662_v5 = vcombine.low %v6730_v9, %v6734_v45 }
 0xbc0   :  { %13812 = vmatpush2.bf16.msra.mxu0 %v16468_v1  ;;  %13837 = vmatpush1.bf16.msra.mxu1 %v16532_v59  ;;  %v16621_v1 = vcombine.high %v7689_v62, %v7693_v52  ;;  %v7681_v59 = vld [vmem:[#allocation17 + $0x1ed0] sm:$0xff]  ;;  %v6702_v62 = vld [vmem:[#allocation17 + $0x38] sm:$0xff] }
 0xbc1   :  { %13813 = vmatprep.subr.bf16.mxu0 %v16461_v55  ;;  %13838 = vmatprep.subr.bf16.mxu1 %v16525_v26  ;;  %v7685_v55 = vld [vmem:[#allocation17 + $0x1ef0] sm:$0xff]  ;;  %v6722_v26 = vld [vmem:[#allocation17 + $0xd8] sm:$0xff] }
 0xbc2   :  { %v16613_v24 = vcombine.high %v7681_v59, %v7685_v55  ;;  %v16612_v49 = vcombine.low %v7681_v59, %v7685_v55  ;;  %v15654_v56 = vcombine.low %v6722_v26, %v6726_v36 }
 0xbc4   :  { %13814 = vmatpush2.bf16.msra.mxu0 %v16460_v43  ;;  %13839 = vmatpush1.bf16.msra.mxu1 %v16524_v44  ;;  %v15655_v43 = vcombine.high %v6722_v26, %v6726_v36  ;;  %v7673_v44 = vld [vmem:[#allocation17 + $0x1e90] sm:$0xff]  ;;  %v17336_v36 = vld [vmem:[#allocation19] sm:$0xff] }
 0xbc5   :  { %13840 = vmatprep.subr.bf16.mxu1 %v16645_v22  ;;  %13865 = vmatprep.subr.bf16.mxu0 %v15687_v54  ;;  %v7677_v22 = vld [vmem:[#allocation17 + $0x1eb0] sm:$0xff]  ;;  %v6714_v54 = vld [vmem:[#allocation17 + $0x98] sm:$0xff] }
 0xbc6   :  { %v16605_v37 = vcombine.high %v7673_v44, %v7677_v22  ;;  %v16604_v40 = vcombine.low %v7673_v44, %v7677_v22  ;;  %v15646_v14 = vcombine.low %v6714_v54, %v6718_v38  ;;  %v6878_v44 = vld [vmem:[#allocation17 + $0x5b8] sm:$0xff]  ;;  %v7744_v22 = vrot.slane %v17336_v36, %v19326_v53 }
 0xbc7   :  { %v19647_v15 = vpop.f32.mrf.mxu0  ;;  %13816 = vmatmul.mubr.bf16.vlgmr.msra.gmra.mxu0 %v19514_v0 }
 0xbc8   :  { %13841 = vmatpush2.bf16.msra.mxu1 %v16644_v18  ;;  %13866 = vmatpush1.bf16.msra.mxu0 %v15686_v42  ;;  %v15647_v18 = vcombine.high %v6714_v54, %v6718_v38  ;;  %v7665_v42 = vld [vmem:[#allocation17 + $0x1e50] sm:$0xff] }
 0xbc9   :  { %13897 = vmatprep.mubr.bf16.mxu0 %v19341_v6  ;;  %v19651_v28 = vpop.f32.mrf.mxu0  ;;  %13842 = vmatprep.subr.bf16.mxu1 %v16637_v4  ;;  %v15663_v6 = vcombine.high %v6730_v9, %v6734_v45  ;;  %v7669_v4 = vld [vmem:[#allocation17 + $0x1e70] sm:$0xff] }
 0xbca   :  { %13867 = vmatprep.subr.bf16.mxu0 %v15679_v58  ;;  %v6710_v58 = vld [vmem:[#allocation17 + $0x78] sm:$0xff]  ;;  %v16597_v21 = vcombine.high %v7665_v42, %v7669_v4  ;;  %v16596_v52 = vcombine.low %v7665_v42, %v7669_v4  ;;  %v13574_v53 = vadd.f32 %v19651_v28, %v7744_v22 }
 0xbcb   :  { %v13575_v63 = vpop.f32.mrf.mxu0  ;;  %v15638_v9 = vcombine.low %v6706_v23, %v6710_v58  ;;  %v6806_v42 = vld [vmem:[#allocation17 + $0x378] sm:$0xff] }
 0xbcc   :  { %13843 = vmatpush2.bf16.msra.mxu1 %v16636_v30  ;;  %13868 = vmatpush1.bf16.msra.mxu0 %v15678_v7  ;;  %v15639_v30 = vcombine.high %v6706_v23, %v6710_v58  ;;  %v7657_v7 = vld [vmem:[#allocation17 + $0x1e10] sm:$0xff]  ;;  %v6866_v4 = vld [vmem:[#allocation17 + $0x558] sm:$0xff] }
 0xbcd   :  { %v13576_v8 = vpop.f32.mrf.mxu0  ;;  %13844 = vmatprep.subr.bf16.mxu1 %v16629_v61  ;;  %13869 = vmatprep.subr.bf16.mxu0 %v15671_v39  ;;  %v7661_v61 = vld [vmem:[#allocation17 + $0x1e30] sm:$0xff]  ;;  %v6698_v39 = vld [vmem:[#allocation17 + $0x18] sm:$0xff] }
 0xbce   :  { %v16589_v45 = vcombine.high %v7657_v7, %v7661_v61  ;;  %v15631_v63 = vcombine.high %v6698_v39, %v6702_v62  ;;  %v6882_v8 = vld [vmem:[#allocation17 + $0x5d8] sm:$0xff]  ;;  %v15630_v59 = vcombine.low %v6698_v39, %v6702_v62 }
 0xbcf   :  { %v6798_v39 = vld [vmem:[#allocation17 + $0x338] sm:$0xff] }
 0xbd0   :  { %13845 = vmatpush2.bf16.msra.mxu1 %v16628_v12  ;;  %13870 = vmatpush1.bf16.msra.mxu0 %v15670_v33  ;;  %v6818_v12 = vld [vmem:[#allocation17 + $0x3d8] sm:$0xff] }
 0xbd1   :  { %13846 = vmatprep.subr.bf16.mxu1 %v16621_v1  ;;  %13871 = vmatprep.subr.bf16.mxu0 %v15663_v6  ;;  %v6822_v33 = vld [vmem:[#allocation17 + $0x3f8] sm:$0xff]  ;;  %v16588_v6 = vcombine.low %v7657_v7, %v7661_v61 }
 0xbd2   :  { %v6886_v1 = vld [vmem:[#allocation17 + $0x5f8] sm:$0xff]  ;;  %v15751_v55 = vcombine.high %v6818_v12, %v6822_v33  ;;  %v15750_v54 = vcombine.low %v6818_v12, %v6822_v33 }
 0xbd3   :  { %v15815_v26 = vcombine.high %v6882_v8, %v6886_v1  ;;  %v15814_v38 = vcombine.low %v6882_v8, %v6886_v1  ;;  %v6794_v7 = vld [vmem:[#allocation17 + $0x318] sm:$0xff] }
 0xbd4   :  { %13847 = vmatpush2.bf16.msra.mxu1 %v16620_v41  ;;  %13872 = vmatpush1.bf16.msra.mxu0 %v15662_v5  ;;  %v7740_v41 = vrot.slane %v17336_v36, %v19323_v46  ;;  %v6810_v5 = vld [vmem:[#allocation17 + $0x398] sm:$0xff] }
 0xbd5   :  { %13848 = vmatprep.subr.bf16.mxu1 %v16613_v24  ;;  %13873 = vmatprep.subr.bf16.mxu0 %v15655_v43  ;;  %v6814_v24 = vld [vmem:[#allocation17 + $0x3b8] sm:$0xff] }
 0xbd6   :  { %v6874_v43 = vld [vmem:[#allocation17 + $0x598] sm:$0xff]  ;;  %v15742_v58 = vcombine.low %v6810_v5, %v6814_v24 }
 0xbd7   :  { %v6870_v46 = vld [vmem:[#allocation17 + $0x578] sm:$0xff] }
 0xbd8   :  { %13849 = vmatpush2.bf16.msra.mxu1 %v16612_v49  ;;  %13874 = vmatpush1.bf16.msra.mxu0 %v15654_v56  ;;  %v15743_v49 = vcombine.high %v6810_v5, %v6814_v24  ;;  %v6802_v56 = vld [vmem:[#allocation17 + $0x358] sm:$0xff] }
 0xbd9   :  { %13850 = vmatprep.subr.bf16.mxu1 %v16605_v37  ;;  %13875 = vmatprep.subr.bf16.mxu0 %v15647_v18  ;;  %v13572_v37 = vadd.f32 %v19647_v15, %v7740_v41  ;;  %v15807_v18 = vcombine.high %v6874_v43, %v6878_v44  ;;  %v15735_v15 = vcombine.high %v6802_v56, %v6806_v42  ;;  %v6858_v62 = vld [vmem:[#allocation17 + $0x518] sm:$0xff] }
 0xbda   :  { %v15734_v28 = vcombine.low %v6802_v56, %v6806_v42  ;;  %v6786_v33 = vld [vmem:[#allocation17 + $0x2d8] sm:$0xff] }
 0xbdb   :  { %v6790_v8 = vld [vmem:[#allocation17 + $0x2f8] sm:$0xff] }
 0xbdc   :  { %13851 = vmatpush2.bf16.msra.mxu1 %v16604_v40  ;;  %13876 = vmatpush1.bf16.msra.mxu0 %v15646_v14  ;;  %v15806_v14 = vcombine.low %v6874_v43, %v6878_v44  ;;  %v6850_v1 = vld [vmem:[#allocation17 + $0x4d8] sm:$0xff]  ;;  %v15718_v44 = vcombine.low %v6786_v33, %v6790_v8 }
 0xbdd   :  { %13852 = vmatprep.subr.bf16.mxu1 %v16597_v21  ;;  %13877 = vmatprep.subr.bf16.mxu0 %v15639_v30  ;;  %v15799_v30 = vcombine.high %v6866_v4, %v6870_v46  ;;  %v6778_v41 = vld [vmem:[#allocation17 + $0x298] sm:$0xff] }
 0xbde   :  { %v6782_v5 = vld [vmem:[#allocation17 + $0x2b8] sm:$0xff] }
 0xbdf   :  { %v6842_v24 = vld [vmem:[#allocation17 + $0x498] sm:$0xff]  ;;  %v15710_v42 = vcombine.low %v6778_v41, %v6782_v5 }
 0xbe0   :  { %13853 = vmatpush2.bf16.msra.mxu1 %v16596_v52  ;;  %13878 = vmatpush1.bf16.msra.mxu0 %v15638_v9  ;;  %v6862_v52 = vld [vmem:[#allocation17 + $0x538] sm:$0xff] }
 0xbe1   :  { %13854 = vmatprep.subr.bf16.mxu1 %v16589_v45  ;;  %13879 = vmatprep.subr.bf16.mxu0 %v15631_v63  ;;  %v15798_v45 = vcombine.low %v6866_v4, %v6870_v46  ;;  %v15791_v12 = vcombine.high %v6858_v62, %v6862_v52  ;;  %v6846_v43 = vld [vmem:[#allocation17 + $0x4b8] sm:$0xff] }
 0xbe2   :  { %v6774_v56 = vld [vmem:[#allocation17 + $0x278] sm:$0xff]  ;;  %v15774_v4 = vcombine.low %v6842_v24, %v6846_v43 }
 0xbe4   :  { %13855 = vmatpush2.bf16.msra.mxu1 %v16588_v6  ;;  %13880 = vmatpush1.bf16.msra.mxu0 %v15630_v59  ;;  %v6854_v6 = vld [vmem:[#allocation17 + $0x4f8] sm:$0xff]  ;;  %v15726_v59 = vcombine.low %v6794_v7, %v6798_v39 }
 0xbe5   :  { %13881 = vmatprep.subr.bf16.mxu0 %v15751_v55  ;;  %13906 = vmatprep.subr.bf16.mxu1 %v15815_v26  ;;  %v15790_v55 = vcombine.low %v6858_v62, %v6862_v52  ;;  %v15719_v26 = vcombine.high %v6786_v33, %v6790_v8  ;;  %v15783_v36 = vcombine.high %v6850_v1, %v6854_v6  ;;  %v6946_v62 = vld [vmem:[#allocation17 + $0x7d8] sm:$0xff] }
 0xbe6   :  { %v15782_v22 = vcombine.low %v6850_v1, %v6854_v6  ;;  %v6950_v52 = vld [vmem:[#allocation17 + $0x7f8] sm:$0xff] }
 0xbe7   :  { %v13612_v23 = vpop.f32.mrf.mxu1  ;;  %13857 = vmatmul.mubr.bf16.vlgmr.msra.gmra.mxu1 %v19525_v29  ;;  %v6938_v33 = vld [vmem:[#allocation17 + $0x798] sm:$0xff] }
 0xbe8   :  { %v19658_v40 = vadd.f32 %v13612_v23, %v13572_v37  ;;  %13882 = vmatpush2.bf16.msra.mxu0 %v15750_v54  ;;  %13907 = vmatpush1.bf16.msra.mxu1 %v15814_v38  ;;  %v15711_v54 = vcombine.high %v6778_v41, %v6782_v5  ;;  %v15775_v38 = vcombine.high %v6842_v24, %v6846_v43  ;;  %v6834_v37 = vld [vmem:[#allocation17 + $0x458] sm:$0xff] }
 0xbe9   :  { %13938 = vmatprep.mubr.bf16.mxu1 %v19437_v34  ;;  %v13614_v21 = vpop.f32.mrf.mxu1  ;;  %13883 = vmatprep.subr.bf16.mxu0 %v15743_v49  ;;  %v15727_v34 = vcombine.high %v6794_v7, %v6798_v39  ;;  %v6770_v49 = vld [vmem:[#allocation17 + $0x258] sm:$0xff] }
 0xbea   :  { %v19661_v61 = vadd.f32 %v13614_v21, %v13574_v53  ;;  %13908 = vmatprep.subr.bf16.mxu1 %v15807_v18  ;;  %v6838_v18 = vld [vmem:[#allocation17 + $0x478] sm:$0xff]  ;;  %v15703_v46 = vcombine.high %v6770_v49, %v6774_v56 }
 0xbeb   :  { %v13616_v9 = vpop.f32.mrf.mxu1  ;;  %v15767_v23 = vcombine.high %v6834_v37, %v6838_v18  ;;  %v6766_v53 = vld [vmem:[#allocation17 + $0x238] sm:$0xff] }
 0xbec   :  { %13884 = vmatpush2.bf16.msra.mxu0 %v15742_v58  ;;  %13909 = vmatpush1.bf16.msra.mxu1 %v15806_v14  ;;  %v6762_v58 = vld [vmem:[#allocation17 + $0x218] sm:$0xff] }
 0xbed   :  { %v13617_v63 = vpop.f32.mrf.mxu1  ;;  %13885 = vmatprep.subr.bf16.mxu0 %v15735_v15  ;;  %13910 = vmatprep.subr.bf16.mxu1 %v15799_v30  ;;  %v6826_v14 = vld [vmem:[#allocation17 + $0x418] sm:$0xff]  ;;  %v15702_v15 = vcombine.low %v6770_v49, %v6774_v56  ;;  %v15766_v30 = vcombine.low %v6834_v37, %v6838_v18  ;;  %v15695_v7 = vcombine.high %v6762_v58, %v6766_v53 }
 0xbee   :  { %v6830_v21 = vld [vmem:[#allocation17 + $0x438] sm:$0xff] }
 0xbef   :  { %v15759_v39 = vcombine.high %v6826_v14, %v6830_v21  ;;  %v7010_v9 = vld [vmem:[#allocation17 + $0x9d8] sm:$0xff]  ;;  %v15758_v63 = vcombine.low %v6826_v14, %v6830_v21 }
 0xbf0   :  { %13886 = vmatpush2.bf16.msra.mxu0 %v15734_v28  ;;  %13911 = vmatpush1.bf16.msra.mxu1 %v15798_v45  ;;  %v7014_v28 = vld [vmem:[#allocation17 + $0x9f8] sm:$0xff]  ;;  %v15694_v45 = vcombine.low %v6762_v58, %v6766_v53 }
 0xbf1   :  { %13887 = vmatprep.subr.bf16.mxu0 %v15727_v34  ;;  %13912 = vmatprep.subr.bf16.mxu1 %v15791_v12  ;;  %v15879_v34 = vcombine.high %v6946_v62, %v6950_v52  ;;  %v15943_v12 = vcombine.high %v7010_v9, %v7014_v28  ;;  %v6942_v8 = vld [vmem:[#allocation17 + $0x7b8] sm:$0xff] }
 0xbf2   :  { %v7002_v1 = vld [vmem:[#allocation17 + $0x998] sm:$0xff] }
 0xbf3   :  { %v7006_v6 = vld [vmem:[#allocation17 + $0x9b8] sm:$0xff] }
 0xbf4   :  { %13888 = vmatpush2.bf16.msra.mxu0 %v15726_v59  ;;  %13913 = vmatpush1.bf16.msra.mxu1 %v15790_v55  ;;  %v15878_v59 = vcombine.low %v6946_v62, %v6950_v52  ;;  %v15942_v55 = vcombine.low %v7010_v9, %v7014_v28  ;;  %v15935_v41 = vcombine.high %v7002_v1, %v7006_v6  ;;  %v6934_v5 = vld [vmem:[#allocation17 + $0x778] sm:$0xff] }
 0xbf5   :  { %13889 = vmatprep.subr.bf16.mxu0 %v15719_v26  ;;  %13914 = vmatprep.subr.bf16.mxu1 %v15783_v36  ;;  %v15871_v26 = vcombine.high %v6938_v33, %v6942_v8  ;;  %v6930_v36 = vld [vmem:[#allocation17 + $0x758] sm:$0xff] }
 0xbf6   :  { %v6994_v24 = vld [vmem:[#allocation17 + $0x958] sm:$0xff]  ;;  %v15863_v56 = vcombine.high %v6930_v36, %v6934_v5 }
 0xbf7   :  { %v6998_v43 = vld [vmem:[#allocation17 + $0x978] sm:$0xff] }
 0xbf8   :  { %13890 = vmatpush2.bf16.msra.mxu0 %v15718_v44  ;;  %13915 = vmatpush1.bf16.msra.mxu1 %v15782_v22  ;;  %v15927_v37 = vcombine.high %v6994_v24, %v6998_v43  ;;  %v6922_v18 = vld [vmem:[#allocation17 + $0x718] sm:$0xff]  ;;  %v15926_v58 = vcombine.low %v6994_v24, %v6998_v43 }
 0xbf9   :  { %13891 = vmatprep.subr.bf16.mxu0 %v15711_v54  ;;  %13916 = vmatprep.subr.bf16.mxu1 %v15775_v38  ;;  %v15870_v54 = vcombine.low %v6938_v33, %v6942_v8  ;;  %v15934_v38 = vcombine.low %v7002_v1, %v7006_v6  ;;  %v6914_v21 = vld [vmem:[#allocation17 + $0x6d8] sm:$0xff] }
 0xbfa   :  { %v6906_v9 = vld [vmem:[#allocation17 + $0x698] sm:$0xff] }
 0xbfb   :  { %v6910_v28 = vld [vmem:[#allocation17 + $0x6b8] sm:$0xff] }
 0xbfc   :  { %13892 = vmatpush2.bf16.msra.mxu0 %v15710_v42  ;;  %13917 = vmatpush1.bf16.msra.mxu1 %v15774_v4  ;;  %v6926_v4 = vld [vmem:[#allocation17 + $0x738] sm:$0xff]  ;;  %v15839_v33 = vcombine.high %v6906_v9, %v6910_v28 }
 0xbfd   :  { %13893 = vmatprep.subr.bf16.mxu0 %v15703_v46  ;;  %13918 = vmatprep.subr.bf16.mxu1 %v15767_v23  ;;  %v6990_v46 = vld [vmem:[#allocation17 + $0x938] sm:$0xff]  ;;  %v15862_v23 = vcombine.low %v6930_v36, %v6934_v5 }
 0xbfe   :  { %v6898_v1 = vld [vmem:[#allocation17 + $0x658] sm:$0xff] }
 0xbff   :  { %v6902_v6 = vld [vmem:[#allocation17 + $0x678] sm:$0xff] }
 0xc00   :  { %13894 = vmatpush2.bf16.msra.mxu0 %v15702_v15  ;;  %13919 = vmatpush1.bf16.msra.mxu1 %v15766_v30  ;;  %v6918_v15 = vld [vmem:[#allocation17 + $0x6f8] sm:$0xff] }
 0xc01   :  { %13895 = vmatprep.subr.bf16.mxu0 %v15695_v7  ;;  %13920 = vmatprep.subr.bf16.mxu1 %v15759_v39  ;;  %v6978_v30 = vld [vmem:[#allocation17 + $0x8d8] sm:$0xff]  ;;  %v15847_v62 = vcombine.high %v6914_v21, %v6918_v15 }
 0xc02   :  { %v6982_v7 = vld [vmem:[#allocation17 + $0x8f8] sm:$0xff] }
 0xc03   :  { %v15911_v52 = vcombine.high %v6978_v30, %v6982_v7  ;;  %v6890_v24 = vld [vmem:[#allocation17 + $0x618] sm:$0xff] }
 0xc04   :  { %13896 = vmatpush2.bf16.msra.mxu0 %v15694_v45  ;;  %13921 = vmatpush1.bf16.msra.mxu1 %v15758_v63  ;;  %v6970_v45 = vld [vmem:[#allocation17 + $0x898] sm:$0xff] }
 0xc05   :  { %13922 = vmatprep.subr.bf16.mxu1 %v15879_v34  ;;  %13947 = vmatprep.subr.bf16.mxu0 %v15943_v12  ;;  %v6974_v63 = vld [vmem:[#allocation17 + $0x8b8] sm:$0xff]  ;;  %v15846_v34 = vcombine.low %v6914_v21, %v6918_v15  ;;  %v15910_v12 = vcombine.low %v6978_v30, %v6982_v7 }
 0xc06   :  { %v15903_v8 = vcombine.high %v6970_v45, %v6974_v63  ;;  %v15902_v36 = vcombine.low %v6970_v45, %v6974_v63  ;;  %v6894_v43 = vld [vmem:[#allocation17 + $0x638] sm:$0xff] }
 0xc07   :  { %v13653_v44 = vpop.f32.mrf.mxu0  ;;  %13898 = vmatmul.mubr.bf16.vlgmr.msra.gmra.mxu0 %v19345_v25  ;;  %v6986_v25 = vld [vmem:[#allocation17 + $0x918] sm:$0xff] }
 0xc08   :  { %v19665_v22 = vadd.f32 %v13653_v44, %v19658_v40  ;;  %13923 = vmatpush2.bf16.msra.mxu1 %v15878_v59  ;;  %13948 = vmatpush1.bf16.msra.mxu0 %v15942_v55  ;;  %v15919_v14 = vcombine.high %v6986_v25, %v6990_v46  ;;  %v15918_v39 = vcombine.low %v6986_v25, %v6990_v46  ;;  %v6962_v59 = vld [vmem:[#allocation17 + $0x858] sm:$0xff] }
 0xc09   :  { %13979 = vmatprep.mubr.bf16.mxu0 %v19371_v19  ;;  %v13655_v49 = vpop.f32.mrf.mxu0  ;;  %13924 = vmatprep.subr.bf16.mxu1 %v15871_v26  ;;  %v15855_v19 = vcombine.high %v6922_v18, %v6926_v4  ;;  %v6966_v55 = vld [vmem:[#allocation17 + $0x878] sm:$0xff]  ;;  %v15838_v26 = vcombine.low %v6906_v9, %v6910_v28 }
 0xc0a   :  { %v19669_v42 = vadd.f32 %v13655_v49, %v19661_v61  ;;  %13949 = vmatprep.subr.bf16.mxu0 %v15935_v41  ;;  %v15854_v61 = vcombine.low %v6922_v18, %v6926_v4  ;;  %v15831_v41 = vcombine.high %v6898_v1, %v6902_v6  ;;  %v15895_v5 = vcombine.high %v6962_v59, %v6966_v55  ;;  %v6954_v44 = vld [vmem:[#allocation17 + $0x818] sm:$0xff] }
 0xc0b   :  { %v13657_v40 = vpop.f32.mrf.mxu0  ;;  %v15894_v49 = vcombine.low %v6962_v59, %v6966_v55  ;;  %v7074_v18 = vld [vmem:[#allocation17 + $0xbd8] sm:$0xff] }
 0xc0c   :  { %13925 = vmatpush2.bf16.msra.mxu1 %v15870_v54  ;;  %13950 = vmatpush1.bf16.msra.mxu0 %v15934_v38  ;;  %v6958_v54 = vld [vmem:[#allocation17 + $0x838] sm:$0xff]  ;;  %v15830_v38 = vcombine.low %v6898_v1, %v6902_v6  ;;  %v15822_v40 = vcombine.low %v6890_v24, %v6894_v43 }
 0xc0d   :  { %v13658_v53 = vpop.f32.mrf.mxu0  ;;  %13926 = vmatprep.subr.bf16.mxu1 %v15863_v56  ;;  %13951 = vmatprep.subr.bf16.mxu0 %v15927_v37  ;;  %v15823_v56 = vcombine.high %v6890_v24, %v6894_v43  ;;  %v15887_v37 = vcombine.high %v6954_v44, %v6958_v54  ;;  %v7078_v4 = vld [vmem:[#allocation17 + $0xbf8] sm:$0xff] }
 0xc0e   :  { %v7138_v25 = vld [vmem:[#allocation17 + $0xdd8] sm:$0xff]  ;;  %v16006_v30 = vcombine.low %v7074_v18, %v7078_v4 }
 0xc0f   :  { %v7142_v46 = vld [vmem:[#allocation17 + $0xdf8] sm:$0xff] }
 0xc10   :  { %13927 = vmatpush2.bf16.msra.mxu1 %v15862_v23  ;;  %13952 = vmatpush1.bf16.msra.mxu0 %v15926_v58  ;;  %v15886_v23 = vcombine.low %v6954_v44, %v6958_v54  ;;  %v16007_v58 = vcombine.high %v7074_v18, %v7078_v4  ;;  %v16071_v53 = vcombine.high %v7138_v25, %v7142_v46  ;;  %v7130_v21 = vld [vmem:[#allocation17 + $0xd98] sm:$0xff] }
 0xc11   :  { %13928 = vmatprep.subr.bf16.mxu1 %v15855_v19  ;;  %13953 = vmatprep.subr.bf16.mxu0 %v15919_v14  ;;  %v7066_v19 = vld [vmem:[#allocation17 + $0xb98] sm:$0xff]  ;;  %v16070_v7 = vcombine.low %v7138_v25, %v7142_v46 }
 0xc12   :  { %v7070_v14 = vld [vmem:[#allocation17 + $0xbb8] sm:$0xff] }
 0xc13   :  { %v7134_v15 = vld [vmem:[#allocation17 + $0xdb8] sm:$0xff] }
 0xc14   :  { %13929 = vmatpush2.bf16.msra.mxu1 %v15854_v61  ;;  %13954 = vmatpush1.bf16.msra.mxu0 %v15918_v39  ;;  %v15999_v61 = vcombine.high %v7066_v19, %v7070_v14  ;;  %v7058_v39 = vld [vmem:[#allocation17 + $0xb58] sm:$0xff] }
 0xc15   :  { %13930 = vmatprep.subr.bf16.mxu1 %v15847_v62  ;;  %13955 = vmatprep.subr.bf16.mxu0 %v15911_v52  ;;  %v16063_v62 = vcombine.high %v7130_v21, %v7134_v15  ;;  %v7062_v52 = vld [vmem:[#allocation17 + $0xb78] sm:$0xff] }
 0xc16   :  { %v7122_v9 = vld [vmem:[#allocation17 + $0xd58] sm:$0xff] }
 0xc17   :  { %v7126_v28 = vld [vmem:[#allocation17 + $0xd78] sm:$0xff] }
 0xc18   :  { %13931 = vmatpush2.bf16.msra.mxu1 %v15846_v34  ;;  %13956 = vmatpush1.bf16.msra.mxu0 %v15910_v12  ;;  %v15998_v34 = vcombine.low %v7066_v19, %v7070_v14  ;;  %v16062_v12 = vcombine.low %v7130_v21, %v7134_v15  ;;  %v16055_v1 = vcombine.high %v7122_v9, %v7126_v28  ;;  %v7050_v6 = vld [vmem:[#allocation17 + $0xb18] sm:$0xff] }
 0xc19   :  { %13932 = vmatprep.subr.bf16.mxu1 %v15839_v33  ;;  %13957 = vmatprep.subr.bf16.mxu0 %v15903_v8  ;;  %v15991_v8 = vcombine.high %v7058_v39, %v7062_v52  ;;  %v7054_v55 = vld [vmem:[#allocation17 + $0xb38] sm:$0xff] }
 0xc1a   :  { %v7042_v43 = vld [vmem:[#allocation17 + $0xad8] sm:$0xff] }
 0xc1b   :  { %v7046_v44 = vld [vmem:[#allocation17 + $0xaf8] sm:$0xff] }
 0xc1c   :  { %13933 = vmatpush2.bf16.msra.mxu1 %v15838_v26  ;;  %13958 = vmatpush1.bf16.msra.mxu0 %v15902_v36  ;;  %v7118_v26 = vld [vmem:[#allocation17 + $0xd38] sm:$0xff]  ;;  %v15990_v36 = vcombine.low %v7058_v39, %v7062_v52 }
 0xc1d   :  { %13934 = vmatprep.subr.bf16.mxu1 %v15831_v41  ;;  %13959 = vmatprep.subr.bf16.mxu0 %v15895_v5  ;;  %v16054_v41 = vcombine.low %v7122_v9, %v7126_v28  ;;  %v7106_v54 = vld [vmem:[#allocation17 + $0xcd8] sm:$0xff] }
 0xc1e   :  { %v7034_v18 = vld [vmem:[#allocation17 + $0xa98] sm:$0xff] }
 0xc1f   :  { %v7038_v4 = vld [vmem:[#allocation17 + $0xab8] sm:$0xff] }
 0xc20   :  { %13935 = vmatpush2.bf16.msra.mxu1 %v15830_v38  ;;  %13960 = vmatpush1.bf16.msra.mxu0 %v15894_v49  ;;  %v7110_v38 = vld [vmem:[#allocation17 + $0xcf8] sm:$0xff] }
 0xc21   :  { %13936 = vmatprep.subr.bf16.mxu1 %v15823_v56  ;;  %13961 = vmatprep.subr.bf16.mxu0 %v15887_v37  ;;  %v15975_v56 = vcombine.high %v7042_v43, %v7046_v44  ;;  %v16039_v37 = vcombine.high %v7106_v54, %v7110_v38  ;;  %v7098_v25 = vld [vmem:[#allocation17 + $0xc98] sm:$0xff] }
 0xc22   :  { %v7102_v46 = vld [vmem:[#allocation17 + $0xcb8] sm:$0xff] }
 0xc23   :  { %v7026_v19 = vld [vmem:[#allocation17 + $0xa58] sm:$0xff] }
 0xc24   :  { %13937 = vmatpush2.bf16.msra.mxu1 %v15822_v40  ;;  %13962 = vmatpush1.bf16.msra.mxu0 %v15886_v23  ;;  %v15974_v40 = vcombine.low %v7042_v43, %v7046_v44  ;;  %v16038_v23 = vcombine.low %v7106_v54, %v7110_v38  ;;  %v7030_v14 = vld [vmem:[#allocation17 + $0xa78] sm:$0xff] }
 0xc25   :  { %13963 = vmatprep.subr.bf16.mxu0 %v16007_v58  ;;  %13988 = vmatprep.subr.bf16.mxu1 %v16071_v53  ;;  %v15967_v58 = vcombine.high %v7034_v18, %v7038_v4  ;;  %v16031_v53 = vcombine.high %v7098_v25, %v7102_v46  ;;  %v7090_v21 = vld [vmem:[#allocation17 + $0xc58] sm:$0xff] }
 0xc26   :  { %v7094_v15 = vld [vmem:[#allocation17 + $0xc78] sm:$0xff] }
 0xc27   :  { %v13694_v45 = vpop.f32.mrf.mxu1  ;;  %13939 = vmatmul.mubr.bf16.vlgmr.msra.gmra.mxu1 %v19439_v3  ;;  %v7114_v3 = vld [vmem:[#allocation17 + $0xd18] sm:$0xff]  ;;  %v16023_v39 = vcombine.high %v7090_v21, %v7094_v15 }
 0xc28   :  { %v19673_v63 = vadd.f32 %v13694_v45, %v19665_v22  ;;  %13964 = vmatpush2.bf16.msra.mxu0 %v16006_v30  ;;  %13989 = vmatpush1.bf16.msra.mxu1 %v16070_v7  ;;  %v16047_v24 = vcombine.high %v7114_v3, %v7118_v26  ;;  %v16046_v49 = vcombine.low %v7114_v3, %v7118_v26  ;;  %v7022_v52 = vld [vmem:[#allocation17 + $0xa38] sm:$0xff] }
 0xc29   :  { %14020 = vmatprep.mubr.bf16.mxu1 %v19457_v11  ;;  %v13696_v33 = vpop.f32.mrf.mxu1  ;;  %13965 = vmatprep.subr.bf16.mxu0 %v15999_v61  ;;  %v15983_v11 = vcombine.high %v7050_v6, %v7054_v55  ;;  %v15966_v30 = vcombine.low %v7034_v18, %v7038_v4  ;;  %v16030_v7 = vcombine.low %v7098_v25, %v7102_v46  ;;  %v7082_v9 = vld [vmem:[#allocation17 + $0xc18] sm:$0xff] }
 0xc2a   :  { %v19677_v59 = vadd.f32 %v13696_v33, %v19669_v42  ;;  %13990 = vmatprep.subr.bf16.mxu1 %v16063_v62  ;;  %v15982_v42 = vcombine.low %v7050_v6, %v7054_v55  ;;  %v15959_v61 = vcombine.high %v7026_v19, %v7030_v14  ;;  %v7018_v62 = vld [vmem:[#allocation17 + $0xa18] sm:$0xff]  ;;  %v15958_v45 = vcombine.low %v7026_v19, %v7030_v14 }
 0xc2b   :  { %v13698_v22 = vpop.f32.mrf.mxu1  ;;  %v7086_v28 = vld [vmem:[#allocation17 + $0xc38] sm:$0xff]  ;;  %v15950_v3 = vcombine.low %v7018_v62, %v7022_v52 }
 0xc2c   :  { %13966 = vmatpush2.bf16.msra.mxu0 %v15998_v34  ;;  %13991 = vmatpush1.bf16.msra.mxu1 %v16062_v12  ;;  %v16022_v34 = vcombine.low %v7090_v21, %v7094_v15  ;;  %v15951_v12 = vcombine.high %v7018_v62, %v7022_v52  ;;  %v16015_v33 = vcombine.high %v7082_v9, %v7086_v28  ;;  %v7266_v6 = vld [vmem:[#allocation17 + $0x11d8] sm:$0xff] }
 0xc2d   :  { %v13699_v5 = vpop.f32.mrf.mxu1  ;;  %13967 = vmatprep.subr.bf16.mxu0 %v15991_v8  ;;  %13992 = vmatprep.subr.bf16.mxu1 %v16055_v1  ;;  %v7202_v8 = vld [vmem:[#allocation17 + $0xfd8] sm:$0xff]  ;;  %v16014_v26 = vcombine.low %v7082_v9, %v7086_v28 }
 0xc2e   :  { %v7206_v1 = vld [vmem:[#allocation17 + $0xff8] sm:$0xff] }
 0xc2f   :  { %v7270_v55 = vld [vmem:[#allocation17 + $0x11f8] sm:$0xff]  ;;  %v16135_v22 = vcombine.high %v7202_v8, %v7206_v1  ;;  %v16134_v43 = vcombine.low %v7202_v8, %v7206_v1 }
 0xc30   :  { %13968 = vmatpush2.bf16.msra.mxu0 %v15990_v36  ;;  %13993 = vmatpush1.bf16.msra.mxu1 %v16054_v41  ;;  %v16199_v36 = vcombine.high %v7266_v6, %v7270_v55  ;;  %v7194_v41 = vld [vmem:[#allocation17 + $0xf98] sm:$0xff]  ;;  %v16198_v44 = vcombine.low %v7266_v6, %v7270_v55 }
 0xc31   :  { %13969 = vmatprep.subr.bf16.mxu0 %v15983_v11  ;;  %13994 = vmatprep.subr.bf16.mxu1 %v16047_v24  ;;  %v7198_v5 = vld [vmem:[#allocation17 + $0xfb8] sm:$0xff] }
 0xc32   :  { %v7258_v11 = vld [vmem:[#allocation17 + $0x1198] sm:$0xff]  ;;  %v16127_v54 = vcombine.high %v7194_v41, %v7198_v5  ;;  %v16126_v25 = vcombine.low %v7194_v41, %v7198_v5 }
 0xc33   :  { %v7262_v24 = vld [vmem:[#allocation17 + $0x11b8] sm:$0xff] }
 0xc34   :  { %13970 = vmatpush2.bf16.msra.mxu0 %v15982_v42  ;;  %13995 = vmatpush1.bf16.msra.mxu1 %v16046_v49  ;;  %v7186_v38 = vld [vmem:[#allocation17 + $0xf58] sm:$0xff]  ;;  %v16191_v42 = vcombine.high %v7258_v11, %v7262_v24  ;;  %v16190_v46 = vcombine.low %v7258_v11, %v7262_v24 }
 0xc35   :  { %13971 = vmatprep.subr.bf16.mxu0 %v15975_v56  ;;  %13996 = vmatprep.subr.bf16.mxu1 %v16039_v37  ;;  %v7190_v49 = vld [vmem:[#allocation17 + $0xf78] sm:$0xff] }
 0xc36   :  { %v7250_v56 = vld [vmem:[#allocation17 + $0x1158] sm:$0xff]  ;;  %v16118_v15 = vcombine.low %v7186_v38, %v7190_v49 }
 0xc37   :  { %v7254_v37 = vld [vmem:[#allocation17 + $0x1178] sm:$0xff] }
 0xc38   :  { %13972 = vmatpush2.bf16.msra.mxu0 %v15974_v40  ;;  %13997 = vmatpush1.bf16.msra.mxu1 %v16038_v23  ;;  %v16119_v23 = vcombine.high %v7186_v38, %v7190_v49  ;;  %v7182_v14 = vld [vmem:[#allocation17 + $0xf38] sm:$0xff] }
 0xc39   :  { %13973 = vmatprep.subr.bf16.mxu0 %v15967_v58  ;;  %13998 = vmatprep.subr.bf16.mxu1 %v16031_v53  ;;  %v16183_v58 = vcombine.high %v7250_v56, %v7254_v37  ;;  %v7178_v53 = vld [vmem:[#allocation17 + $0xf18] sm:$0xff] }
 0xc3a   :  { %v7246_v21 = vld [vmem:[#allocation17 + $0x1138] sm:$0xff] }
 0xc3b   :  { %v7174_v62 = vld [vmem:[#allocation17 + $0xef8] sm:$0xff] }
 0xc3c   :  { %13974 = vmatpush2.bf16.msra.mxu0 %v15966_v30  ;;  %13999 = vmatpush1.bf16.msra.mxu1 %v16030_v7  ;;  %v16182_v30 = vcombine.low %v7250_v56, %v7254_v37  ;;  %v7234_v52 = vld [vmem:[#allocation17 + $0x10d8] sm:$0xff] }
 0xc3d   :  { %13975 = vmatprep.subr.bf16.mxu0 %v15959_v61  ;;  %14000 = vmatprep.subr.bf16.mxu1 %v16023_v39  ;;  %v7170_v39 = vld [vmem:[#allocation17 + $0xed8] sm:$0xff] }
 0xc3e   :  { %v7238_v9 = vld [vmem:[#allocation17 + $0x10f8] sm:$0xff]  ;;  %v16102_v6 = vcombine.low %v7170_v39, %v7174_v62 }
 0xc3f   :  { %v7226_v8 = vld [vmem:[#allocation17 + $0x1098] sm:$0xff]  ;;  %v16166_v55 = vcombine.low %v7234_v52, %v7238_v9 }
 0xc40   :  { %13976 = vmatpush2.bf16.msra.mxu0 %v15958_v45  ;;  %14001 = vmatpush1.bf16.msra.mxu1 %v16022_v34  ;;  %v16103_v45 = vcombine.high %v7170_v39, %v7174_v62  ;;  %v16167_v34 = vcombine.high %v7234_v52, %v7238_v9  ;;  %v7230_v1 = vld [vmem:[#allocation17 + $0x10b8] sm:$0xff] }
 0xc41   :  { %13977 = vmatprep.subr.bf16.mxu0 %v15951_v12  ;;  %14002 = vmatprep.subr.bf16.mxu1 %v16015_v33  ;;  %v7162_v12 = vld [vmem:[#allocation17 + $0xe98] sm:$0xff]  ;;  %v16158_v24 = vcombine.low %v7226_v8, %v7230_v1 }
 0xc42   :  { %v7166_v33 = vld [vmem:[#allocation17 + $0xeb8] sm:$0xff] }
 0xc43   :  { %v7218_v41 = vld [vmem:[#allocation17 + $0x1058] sm:$0xff]  ;;  %v16094_v11 = vcombine.low %v7162_v12, %v7166_v33 }
 0xc44   :  { %13978 = vmatpush2.bf16.msra.mxu0 %v15950_v3  ;;  %14003 = vmatpush1.bf16.msra.mxu1 %v16014_v26  ;;  %v16095_v3 = vcombine.high %v7162_v12, %v7166_v33  ;;  %v16159_v26 = vcombine.high %v7226_v8, %v7230_v1  ;;  %v7222_v5 = vld [vmem:[#allocation17 + $0x1078] sm:$0xff] }
 0xc45   :  { %14004 = vmatprep.subr.bf16.mxu1 %v16135_v22  ;;  %14029 = vmatprep.subr.bf16.mxu0 %v16199_v36  ;;  %v7154_v22 = vld [vmem:[#allocation17 + $0xe58] sm:$0xff]  ;;  %v16150_v37 = vcombine.low %v7218_v41, %v7222_v5 }
 0xc46   :  { %v7158_v36 = vld [vmem:[#allocation17 + $0xe78] sm:$0xff] }
 0xc47   :  { %v13735_v18 = vpop.f32.mrf.mxu0  ;;  %13980 = vmatmul.mubr.bf16.vlgmr.msra.gmra.mxu0 %v19483_v47  ;;  %v7242_v47 = vld [vmem:[#allocation17 + $0x1118] sm:$0xff]  ;;  %v16086_v56 = vcombine.low %v7154_v22, %v7158_v36 }
 0xc48   :  { %v19681_v4 = vadd.f32 %v13735_v18, %v19673_v63  ;;  %14005 = vmatpush2.bf16.msra.mxu1 %v16134_v43  ;;  %14030 = vmatpush1.bf16.msra.mxu0 %v16198_v44  ;;  %v16175_v61 = vcombine.high %v7242_v47, %v7246_v21  ;;  %v16174_v28 = vcombine.low %v7242_v47, %v7246_v21  ;;  %v7150_v38 = vld [vmem:[#allocation17 + $0xe38] sm:$0xff] }
 0xc49   :  { %14061 = vmatprep.mubr.bf16.mxu0 %v19485_v51  ;;  %v13737_v40 = vpop.f32.mrf.mxu0  ;;  %14006 = vmatprep.subr.bf16.mxu1 %v16127_v54  ;;  %v16111_v51 = vcombine.high %v7178_v53, %v7182_v14  ;;  %v16087_v43 = vcombine.high %v7154_v22, %v7158_v36  ;;  %v16151_v44 = vcombine.high %v7218_v41, %v7222_v5  ;;  %v7146_v54 = vld [vmem:[#allocation17 + $0xe18] sm:$0xff] }
 0xc4a   :  { %v19685_v19 = vadd.f32 %v13737_v40, %v19677_v59  ;;  %14031 = vmatprep.subr.bf16.mxu0 %v16191_v42  ;;  %v16110_v59 = vcombine.low %v7178_v53, %v7182_v14  ;;  %v7210_v42 = vld [vmem:[#allocation17 + $0x1018] sm:$0xff]  ;;  %v16079_v18 = vcombine.high %v7146_v54, %v7150_v38  ;;  %v16078_v53 = vcombine.low %v7146_v54, %v7150_v38 }
 0xc4b   :  { %v13739_v63 = vpop.f32.mrf.mxu0  ;;  %v7214_v49 = vld [vmem:[#allocation17 + $0x1038] sm:$0xff] }
 0xc4c   :  { %14007 = vmatpush2.bf16.msra.mxu1 %v16126_v25  ;;  %14032 = vmatpush1.bf16.msra.mxu0 %v16190_v46  ;;  %v16143_v25 = vcombine.high %v7210_v42, %v7214_v49  ;;  %v7330_v46 = vld [vmem:[#allocation17 + $0x13d8] sm:$0xff]  ;;  %v16142_v14 = vcombine.low %v7210_v42, %v7214_v49 }
 0xc4d   :  { %v13740_v7 = vpop.f32.mrf.mxu0  ;;  %14008 = vmatprep.subr.bf16.mxu1 %v16119_v23  ;;  %14033 = vmatprep.subr.bf16.mxu0 %v16183_v58  ;;  %v7334_v40 = vld [vmem:[#allocation17 + $0x13f8] sm:$0xff] }
 0xc4e   :  { %v7394_v23 = vld [vmem:[#allocation17 + $0x15d8] sm:$0xff]  ;;  %v16263_v47 = vcombine.high %v7330_v46, %v7334_v40 }
 0xc4f   :  { %v7398_v58 = vld [vmem:[#allocation17 + $0x15f8] sm:$0xff] }
 0xc50   :  { %14009 = vmatpush2.bf16.msra.mxu1 %v16118_v15  ;;  %14034 = vmatpush1.bf16.msra.mxu0 %v16182_v30  ;;  %v16327_v21 = vcombine.high %v7394_v23, %v7398_v58  ;;  %v7322_v63 = vld [vmem:[#allocation17 + $0x1398] sm:$0xff] }
 0xc51   :  { %14010 = vmatprep.subr.bf16.mxu1 %v16111_v51  ;;  %14035 = vmatprep.subr.bf16.mxu0 %v16175_v61  ;;  %v7326_v15 = vld [vmem:[#allocation17 + $0x13b8] sm:$0xff]  ;;  %v16262_v51 = vcombine.low %v7330_v46, %v7334_v40  ;;  %v16326_v61 = vcombine.low %v7394_v23, %v7398_v58 }
 0xc52   :  { %v7386_v30 = vld [vmem:[#allocation17 + $0x1598] sm:$0xff]  ;;  %v16255_v39 = vcombine.high %v7322_v63, %v7326_v15  ;;  %v16254_v12 = vcombine.low %v7322_v63, %v7326_v15 }
 0xc53   :  { %v7390_v7 = vld [vmem:[#allocation17 + $0x15b8] sm:$0xff] }
 0xc54   :  { %14011 = vmatpush2.bf16.msra.mxu1 %v16110_v59  ;;  %14036 = vmatpush1.bf16.msra.mxu0 %v16174_v28  ;;  %v7314_v62 = vld [vmem:[#allocation17 + $0x1358] sm:$0xff]  ;;  %v16319_v52 = vcombine.high %v7386_v30, %v7390_v7  ;;  %v16318_v33 = vcombine.low %v7386_v30, %v7390_v7 }
 0xc55   :  { %14012 = vmatprep.subr.bf16.mxu1 %v16103_v45  ;;  %14037 = vmatprep.subr.bf16.mxu0 %v16167_v34  ;;  %v7318_v9 = vld [vmem:[#allocation17 + $0x1378] sm:$0xff] }
 0xc56   :  { %v7378_v59 = vld [vmem:[#allocation17 + $0x1558] sm:$0xff]  ;;  %v16247_v1 = vcombine.high %v7314_v62, %v7318_v9  ;;  %v16246_v36 = vcombine.low %v7314_v62, %v7318_v9 }
 0xc57   :  { %v7382_v28 = vld [vmem:[#allocation17 + $0x1578] sm:$0xff] }
 0xc58   :  { %14013 = vmatpush2.bf16.msra.mxu1 %v16102_v6  ;;  %14038 = vmatpush1.bf16.msra.mxu0 %v16166_v55  ;;  %v16311_v6 = vcombine.high %v7378_v59, %v7382_v28  ;;  %v7306_v55 = vld [vmem:[#allocation17 + $0x1318] sm:$0xff]  ;;  %v16310_v41 = vcombine.low %v7378_v59, %v7382_v28 }
 0xc59   :  { %14014 = vmatprep.subr.bf16.mxu1 %v16095_v3  ;;  %14039 = vmatprep.subr.bf16.mxu0 %v16159_v26  ;;  %v7310_v26 = vld [vmem:[#allocation17 + $0x1338] sm:$0xff] }
 0xc5a   :  { %v7374_v22 = vld [vmem:[#allocation17 + $0x1538] sm:$0xff] }
 0xc5b   :  { %v7366_v54 = vld [vmem:[#allocation17 + $0x14f8] sm:$0xff] }
 0xc5c   :  { %14015 = vmatpush2.bf16.msra.mxu1 %v16094_v11  ;;  %14040 = vmatpush1.bf16.msra.mxu0 %v16158_v24  ;;  %v7298_v24 = vld [vmem:[#allocation17 + $0x12d8] sm:$0xff] }
 0xc5d   :  { %14016 = vmatprep.subr.bf16.mxu1 %v16087_v43  ;;  %14041 = vmatprep.subr.bf16.mxu0 %v16151_v44  ;;  %v7302_v43 = vld [vmem:[#allocation17 + $0x12f8] sm:$0xff] }
 0xc5e   :  { %v7362_v44 = vld [vmem:[#allocation17 + $0x14d8] sm:$0xff]  ;;  %v16231_v42 = vcombine.high %v7298_v24, %v7302_v43  ;;  %v16230_v46 = vcombine.low %v7298_v24, %v7302_v43 }
 0xc5f   :  { %v16295_v49 = vcombine.high %v7362_v44, %v7366_v54  ;;  %v16294_v40 = vcombine.low %v7362_v44, %v7366_v54  ;;  %v7342_v62 = vld [vmem:[#allocation17 + $0x1438] sm:$0xff] }
 0xc60   :  { %14017 = vmatpush2.bf16.msra.mxu1 %v16086_v56  ;;  %14042 = vmatpush1.bf16.msra.mxu0 %v16150_v37  ;;  %v7290_v56 = vld [vmem:[#allocation17 + $0x1298] sm:$0xff] }
 0xc61   :  { %14018 = vmatprep.subr.bf16.mxu1 %v16079_v18  ;;  %14043 = vmatprep.subr.bf16.mxu0 %v16143_v25  ;;  %v7294_v37 = vld [vmem:[#allocation17 + $0x12b8] sm:$0xff] }
 0xc62   :  { %v7354_v18 = vld [vmem:[#allocation17 + $0x1498] sm:$0xff]  ;;  %v16223_v23 = vcombine.high %v7290_v56, %v7294_v37  ;;  %v16222_v63 = vcombine.low %v7290_v56, %v7294_v37 }
 0xc63   :  { %v7358_v25 = vld [vmem:[#allocation17 + $0x14b8] sm:$0xff] }
 0xc64   :  { %14019 = vmatpush2.bf16.msra.mxu1 %v16078_v53  ;;  %14044 = vmatpush1.bf16.msra.mxu0 %v16142_v14  ;;  %v16287_v58 = vcombine.high %v7354_v18, %v7358_v25  ;;  %v7282_v53 = vld [vmem:[#allocation17 + $0x1258] sm:$0xff]  ;;  %v16286_v15 = vcombine.low %v7354_v18, %v7358_v25 }
 0xc65   :  { %14045 = vmatprep.subr.bf16.mxu0 %v16263_v47  ;;  %14070 = vmatprep.subr.bf16.mxu1 %v16327_v21  ;;  %v7286_v14 = vld [vmem:[#allocation17 + $0x1278] sm:$0xff] }
 0xc66   :  { %v7346_v47 = vld [vmem:[#allocation17 + $0x1458] sm:$0xff]  ;;  %v16215_v30 = vcombine.high %v7282_v53, %v7286_v14 }
 0xc67   :  { %v13776_v45 = vpop.f32.mrf.mxu1  ;;  %14021 = vmatmul.mubr.bf16.vlgmr.msra.gmra.mxu1 %v19491_v13  ;;  %v7370_v13 = vld [vmem:[#allocation17 + $0x1518] sm:$0xff] }
 0xc68   :  { %v19689_v34 = vadd.f32 %v13776_v45, %v19681_v4  ;;  %14046 = vmatpush2.bf16.msra.mxu0 %v16262_v51  ;;  %14071 = vmatpush1.bf16.msra.mxu1 %v16326_v61  ;;  %v16303_v11 = vcombine.high %v7370_v13, %v7374_v22  ;;  %v16302_v38 = vcombine.low %v7370_v13, %v7374_v22  ;;  %v7350_v21 = vld [vmem:[#allocation17 + $0x1478] sm:$0xff] }
 0xc69   :  { %14102 = vmatprep.mubr.bf16.mxu1 %v19493_v20  ;;  %v13778_v8 = vpop.f32.mrf.mxu1  ;;  %14047 = vmatprep.subr.bf16.mxu0 %v16255_v39  ;;  %v16239_v20 = vcombine.high %v7306_v55, %v7310_v26  ;;  %v16279_v7 = vcombine.high %v7346_v47, %v7350_v21  ;;  %v7274_v51 = vld [vmem:[#allocation17 + $0x1218] sm:$0xff]  ;;  %v16278_v9 = vcombine.low %v7346_v47, %v7350_v21 }
 0xc6a   :  { %v19693_v3 = vadd.f32 %v13778_v8, %v19685_v19  ;;  %14072 = vmatprep.subr.bf16.mxu1 %v16319_v52  ;;  %v16238_v19 = vcombine.low %v7306_v55, %v7310_v26  ;;  %v7278_v61 = vld [vmem:[#allocation17 + $0x1238] sm:$0xff]  ;;  %v16214_v52 = vcombine.low %v7282_v53, %v7286_v14 }
 0xc6b   :  { %v13780_v4 = vpop.f32.mrf.mxu1  ;;  %v7338_v39 = vld [vmem:[#allocation17 + $0x1418] sm:$0xff]  ;;  %v16207_v59 = vcombine.high %v7274_v51, %v7278_v61 }
 0xc6c   :  { %14048 = vmatpush2.bf16.msra.mxu0 %v16254_v12  ;;  %14073 = vmatpush1.bf16.msra.mxu1 %v16318_v33  ;;  %v16271_v28 = vcombine.high %v7338_v39, %v7342_v62  ;;  %v7458_v45 = vld [vmem:[#allocation17 + $0x17d8] sm:$0xff] }
 0xc6d   :  { %v13781_v5 = vpop.f32.mrf.mxu1  ;;  %14049 = vmatprep.subr.bf16.mxu0 %v16247_v1  ;;  %14074 = vmatprep.subr.bf16.mxu1 %v16311_v6  ;;  %v7462_v12 = vld [vmem:[#allocation17 + $0x17f8] sm:$0xff]  ;;  %v16206_v1 = vcombine.low %v7274_v51, %v7278_v61  ;;  %v16270_v6 = vcombine.low %v7338_v39, %v7342_v62 }
 0xc6e   :  { %v7522_v33 = vld [vmem:[#allocation17 + $0x19d8] sm:$0xff]  ;;  %v16391_v55 = vcombine.high %v7458_v45, %v7462_v12 }
 0xc6f   :  { %v7526_v8 = vld [vmem:[#allocation17 + $0x19f8] sm:$0xff] }
 0xc70   :  { %14050 = vmatpush2.bf16.msra.mxu0 %v16246_v36  ;;  %14075 = vmatpush1.bf16.msra.mxu1 %v16310_v41  ;;  %v16455_v26 = vcombine.high %v7522_v33, %v7526_v8  ;;  %v7450_v13 = vld [vmem:[#allocation17 + $0x1798] sm:$0xff]  ;;  %v16390_v41 = vcombine.low %v7458_v45, %v7462_v12  ;;  %v16454_v5 = vcombine.low %v7522_v33, %v7526_v8 }
 0xc71   :  { %14051 = vmatprep.subr.bf16.mxu0 %v16239_v20  ;;  %14076 = vmatprep.subr.bf16.mxu1 %v16303_v11  ;;  %v7454_v22 = vld [vmem:[#allocation17 + $0x17b8] sm:$0xff] }
 0xc72   :  { %v7514_v4 = vld [vmem:[#allocation17 + $0x1998] sm:$0xff]  ;;  %v16383_v20 = vcombine.high %v7450_v13, %v7454_v22 }
 0xc73   :  { %v7518_v36 = vld [vmem:[#allocation17 + $0x19b8] sm:$0xff] }
 0xc74   :  { %14052 = vmatpush2.bf16.msra.mxu0 %v16238_v19  ;;  %14077 = vmatpush1.bf16.msra.mxu1 %v16302_v38  ;;  %v7442_v11 = vld [vmem:[#allocation17 + $0x1758] sm:$0xff]  ;;  %v16447_v24 = vcombine.high %v7514_v4, %v7518_v36 }
 0xc75   :  { %14053 = vmatprep.subr.bf16.mxu0 %v16231_v42  ;;  %14078 = vmatprep.subr.bf16.mxu1 %v16295_v49  ;;  %v7446_v43 = vld [vmem:[#allocation17 + $0x1778] sm:$0xff]  ;;  %v16382_v42 = vcombine.low %v7450_v13, %v7454_v22  ;;  %v16446_v49 = vcombine.low %v7514_v4, %v7518_v36 }
 0xc76   :  { %v7506_v44 = vld [vmem:[#allocation17 + $0x1958] sm:$0xff]  ;;  %v16375_v37 = vcombine.high %v7442_v11, %v7446_v43 }
 0xc77   :  { %v7510_v54 = vld [vmem:[#allocation17 + $0x1978] sm:$0xff] }
 0xc78   :  { %14054 = vmatpush2.bf16.msra.mxu0 %v16230_v46  ;;  %14079 = vmatpush1.bf16.msra.mxu1 %v16294_v40  ;;  %v16439_v18 = vcombine.high %v7506_v44, %v7510_v54  ;;  %v7434_v25 = vld [vmem:[#allocation17 + $0x1718] sm:$0xff]  ;;  %v16438_v53 = vcombine.low %v7506_v44, %v7510_v54 }
 0xc79   :  { %14055 = vmatprep.subr.bf16.mxu0 %v16223_v23  ;;  %14080 = vmatprep.subr.bf16.mxu1 %v16287_v58  ;;  %v7438_v40 = vld [vmem:[#allocation17 + $0x1738] sm:$0xff]  ;;  %v16374_v58 = vcombine.low %v7442_v11, %v7446_v43 }
 0xc7a   :  { %v7502_v23 = vld [vmem:[#allocation17 + $0x1938] sm:$0xff] }
 0xc7b   :  { %v7426_v21 = vld [vmem:[#allocation17 + $0x16d8] sm:$0xff] }
 0xc7c   :  { %14056 = vmatpush2.bf16.msra.mxu0 %v16222_v63  ;;  %14081 = vmatpush1.bf16.msra.mxu1 %v16286_v15  ;;  %v7430_v63 = vld [vmem:[#allocation17 + $0x16f8] sm:$0xff] }
 0xc7d   :  { %14057 = vmatprep.subr.bf16.mxu0 %v16215_v30  ;;  %14082 = vmatprep.subr.bf16.mxu1 %v16279_v7  ;;  %v7490_v15 = vld [vmem:[#allocation17 + $0x18d8] sm:$0xff]  ;;  %v16359_v51 = vcombine.high %v7426_v21, %v7430_v63 }
 0xc7e   :  { %v7494_v30 = vld [vmem:[#allocation17 + $0x18f8] sm:$0xff] }
 0xc7f   :  { %v16423_v61 = vcombine.high %v7490_v15, %v7494_v30  ;;  %v7418_v39 = vld [vmem:[#allocation17 + $0x1698] sm:$0xff] }
 0xc80   :  { %14058 = vmatpush2.bf16.msra.mxu0 %v16214_v52  ;;  %14083 = vmatpush1.bf16.msra.mxu1 %v16278_v9  ;;  %v7422_v62 = vld [vmem:[#allocation17 + $0x16b8] sm:$0xff] }
 0xc81   :  { %14059 = vmatprep.subr.bf16.mxu0 %v16207_v59  ;;  %14084 = vmatprep.subr.bf16.mxu1 %v16271_v28  ;;  %v7482_v52 = vld [vmem:[#allocation17 + $0x1898] sm:$0xff]  ;;  %v16358_v59 = vcombine.low %v7426_v21, %v7430_v63  ;;  %v16422_v28 = vcombine.low %v7490_v15, %v7494_v30  ;;  %v16351_v45 = vcombine.high %v7418_v39, %v7422_v62 }
 0xc82   :  { %v7486_v9 = vld [vmem:[#allocation17 + $0x18b8] sm:$0xff] }
 0xc83   :  { %v16415_v12 = vcombine.high %v7482_v52, %v7486_v9  ;;  %v7410_v33 = vld [vmem:[#allocation17 + $0x1658] sm:$0xff] }
 0xc84   :  { %14060 = vmatpush2.bf16.msra.mxu0 %v16206_v1  ;;  %14085 = vmatpush1.bf16.msra.mxu1 %v16270_v6  ;;  %v7414_v8 = vld [vmem:[#allocation17 + $0x1678] sm:$0xff] }
 0xc85   :  { %14086 = vmatprep.subr.bf16.mxu1 %v16391_v55  ;;  %14111 = vmatprep.subr.bf16.mxu0 %v16455_v26  ;;  %v7474_v1 = vld [vmem:[#allocation17 + $0x1858] sm:$0xff]  ;;  %v16350_v55 = vcombine.low %v7418_v39, %v7422_v62  ;;  %v16414_v26 = vcombine.low %v7482_v52, %v7486_v9  ;;  %v16343_v13 = vcombine.high %v7410_v33, %v7414_v8 }
 0xc86   :  { %v7478_v6 = vld [vmem:[#allocation17 + $0x1878] sm:$0xff] }
 0xc87   :  { %v13817_v19 = vpop.f32.mrf.mxu0  ;;  %14062 = vmatmul.mubr.bf16.vlgmr.msra.gmra.mxu0 %v19499_v57  ;;  %v7498_v57 = vld [vmem:[#allocation17 + $0x1918] sm:$0xff]  ;;  %v16407_v22 = vcombine.high %v7474_v1, %v7478_v6  ;;  %v16406_v11 = vcombine.low %v7474_v1, %v7478_v6 }
 0xc88   :  { %v19697_v38 = vadd.f32 %v13817_v19, %v19689_v34  ;;  %14087 = vmatpush2.bf16.msra.mxu1 %v16390_v41  ;;  %14112 = vmatpush1.bf16.msra.mxu0 %v16454_v5  ;;  %v16431_v47 = vcombine.high %v7498_v57, %v7502_v23  ;;  %v16430_v7 = vcombine.low %v7498_v57, %v7502_v23  ;;  %v7402_v4 = vld [vmem:[#allocation17 + $0x1618] sm:$0xff] }
 0xc89   :  { %14143 = vmatprep.mubr.bf16.mxu0 %v19501_v17  ;;  %v13819_v56 = vpop.f32.mrf.mxu0  ;;  %14088 = vmatprep.subr.bf16.mxu1 %v16383_v20  ;;  %v16367_v17 = vcombine.high %v7434_v25, %v7438_v40  ;;  %v7406_v36 = vld [vmem:[#allocation17 + $0x1638] sm:$0xff]  ;;  %v16342_v20 = vcombine.low %v7410_v33, %v7414_v8 }
 0xc8a   :  { %v19701_v46 = vadd.f32 %v13819_v56, %v19693_v3  ;;  %14113 = vmatprep.subr.bf16.mxu0 %v16447_v24  ;;  %v16366_v3 = vcombine.low %v7434_v25, %v7438_v40  ;;  %v7466_v41 = vld [vmem:[#allocation17 + $0x1818] sm:$0xff]  ;;  %v16335_v24 = vcombine.high %v7402_v4, %v7406_v36 }
 0xc8b   :  { %v13821_v34 = vpop.f32.mrf.mxu0  ;;  %v7470_v5 = vld [vmem:[#allocation17 + $0x1838] sm:$0xff] }
 0xc8c   :  { %14089 = vmatpush2.bf16.msra.mxu1 %v16382_v42  ;;  %14114 = vmatpush1.bf16.msra.mxu0 %v16446_v49  ;;  %v16399_v43 = vcombine.high %v7466_v41, %v7470_v5  ;;  %v7586_v44 = vld [vmem:[#allocation17 + $0x1bd8] sm:$0xff]  ;;  %v16334_v49 = vcombine.low %v7402_v4, %v7406_v36  ;;  %v16398_v56 = vcombine.low %v7466_v41, %v7470_v5 }
 0xc8d   :  { %v13822_v14 = vpop.f32.mrf.mxu0  ;;  %14090 = vmatprep.subr.bf16.mxu1 %v16375_v37  ;;  %14115 = vmatprep.subr.bf16.mxu0 %v16439_v18  ;;  %v7590_v54 = vld [vmem:[#allocation17 + $0x1bf8] sm:$0xff] }
 0xc8e   :  { %v7650_v19 = vld [vmem:[#allocation17 + $0x1dd8] sm:$0xff]  ;;  %v16519_v37 = vcombine.high %v7586_v44, %v7590_v54  ;;  %v16518_v34 = vcombine.low %v7586_v44, %v7590_v54 }
 0xc8f   :  { %v7654_v42 = vld [vmem:[#allocation17 + $0x1df8] sm:$0xff] }
 0xc90   :  { %14091 = vmatpush2.bf16.msra.mxu1 %v16374_v58  ;;  %14116 = vmatpush1.bf16.msra.mxu0 %v16438_v53  ;;  %v16583_v18 = vcombine.high %v7650_v19, %v7654_v42  ;;  %v7578_v25 = vld [vmem:[#allocation17 + $0x1b98] sm:$0xff]  ;;  %v16582_v58 = vcombine.low %v7650_v19, %v7654_v42 }
 0xc91   :  { %14092 = vmatprep.subr.bf16.mxu1 %v16367_v17  ;;  %14117 = vmatprep.subr.bf16.mxu0 %v16431_v47  ;;  %v7582_v40 = vld [vmem:[#allocation17 + $0x1bb8] sm:$0xff] }
 0xc92   :  { %v7642_v57 = vld [vmem:[#allocation17 + $0x1d98] sm:$0xff]  ;;  %v16511_v53 = vcombine.high %v7578_v25, %v7582_v40 }
 0xc93   :  { %v7646_v23 = vld [vmem:[#allocation17 + $0x1db8] sm:$0xff] }
 0xc94   :  { %14093 = vmatpush2.bf16.msra.mxu1 %v16366_v3  ;;  %14118 = vmatpush1.bf16.msra.mxu0 %v16430_v7  ;;  %v7570_v14 = vld [vmem:[#allocation17 + $0x1b58] sm:$0xff]  ;;  %v16575_v17 = vcombine.high %v7642_v57, %v7646_v23  ;;  %v16510_v3 = vcombine.low %v7578_v25, %v7582_v40  ;;  %v16574_v7 = vcombine.low %v7642_v57, %v7646_v23 }
 0xc95   :  { %14094 = vmatprep.subr.bf16.mxu1 %v16359_v51  ;;  %14119 = vmatprep.subr.bf16.mxu0 %v16423_v61  ;;  %v7574_v47 = vld [vmem:[#allocation17 + $0x1b78] sm:$0xff] }
 0xc96   :  { %v7634_v21 = vld [vmem:[#allocation17 + $0x1d58] sm:$0xff]  ;;  %v16503_v61 = vcombine.high %v7570_v14, %v7574_v47 }
 0xc97   :  { %v7638_v63 = vld [vmem:[#allocation17 + $0x1d78] sm:$0xff] }
 0xc98   :  { %14095 = vmatpush2.bf16.msra.mxu1 %v16358_v59  ;;  %14120 = vmatpush1.bf16.msra.mxu0 %v16422_v28  ;;  %v16567_v39 = vcombine.high %v7634_v21, %v7638_v63  ;;  %v7562_v62 = vld [vmem:[#allocation17 + $0x1b18] sm:$0xff]  ;;  %v16502_v28 = vcombine.low %v7570_v14, %v7574_v47 }
 0xc99   :  { %14096 = vmatprep.subr.bf16.mxu1 %v16351_v45  ;;  %14121 = vmatprep.subr.bf16.mxu0 %v16415_v12  ;;  %v7566_v9 = vld [vmem:[#allocation17 + $0x1b38] sm:$0xff]  ;;  %v16566_v45 = vcombine.low %v7634_v21, %v7638_v63 }
 0xc9a   :  { %v7630_v59 = vld [vmem:[#allocation17 + $0x1d38] sm:$0xff] }
 0xc9b   :  { %v7554_v8 = vld [vmem:[#allocation17 + $0x1ad8] sm:$0xff] }
 0xc9c   :  { %14097 = vmatpush2.bf16.msra.mxu1 %v16350_v55  ;;  %14122 = vmatpush1.bf16.msra.mxu0 %v16414_v26  ;;  %v7558_v1 = vld [vmem:[#allocation17 + $0x1af8] sm:$0xff] }
 0xc9d   :  { %14098 = vmatprep.subr.bf16.mxu1 %v16343_v13  ;;  %14123 = vmatprep.subr.bf16.mxu0 %v16407_v22  ;;  %v7618_v6 = vld [vmem:[#allocation17 + $0x1cd8] sm:$0xff]  ;;  %v16487_v13 = vcombine.high %v7554_v8, %v7558_v1 }
 0xc9e   :  { %v7622_v55 = vld [vmem:[#allocation17 + $0x1cf8] sm:$0xff] }
 0xc9f   :  { %v16551_v22 = vcombine.high %v7618_v6, %v7622_v55  ;;  %v7546_v4 = vld [vmem:[#allocation17 + $0x1a98] sm:$0xff] }
 0xca0   :  { %14099 = vmatpush2.bf16.msra.mxu1 %v16342_v20  ;;  %14124 = vmatpush1.bf16.msra.mxu0 %v16406_v11  ;;  %v7550_v36 = vld [vmem:[#allocation17 + $0x1ab8] sm:$0xff]  ;;  %v16486_v20 = vcombine.low %v7554_v8, %v7558_v1  ;;  %v16550_v11 = vcombine.low %v7618_v6, %v7622_v55 }
 0xca1   :  { %14100 = vmatprep.subr.bf16.mxu1 %v16335_v24  ;;  %14125 = vmatprep.subr.bf16.mxu0 %v16399_v43  ;;  %v7610_v41 = vld [vmem:[#allocation17 + $0x1c98] sm:$0xff]  ;;  %v16479_v24 = vcombine.high %v7546_v4, %v7550_v36 }
 0xca2   :  { %v7614_v5 = vld [vmem:[#allocation17 + $0x1cb8] sm:$0xff] }
 0xca3   :  { %v16543_v43 = vcombine.high %v7610_v41, %v7614_v5  ;;  %v7538_v44 = vld [vmem:[#allocation17 + $0x1a58] sm:$0xff] }
 0xca4   :  { %14101 = vmatpush2.bf16.msra.mxu1 %v16334_v49  ;;  %14126 = vmatpush1.bf16.msra.mxu0 %v16398_v56  ;;  %v7542_v54 = vld [vmem:[#allocation17 + $0x1a78] sm:$0xff]  ;;  %v16478_v49 = vcombine.low %v7546_v4, %v7550_v36  ;;  %v16542_v56 = vcombine.low %v7610_v41, %v7614_v5  ;;  %v17146_v5 = vld [vmem:[#allocation20 + $0x40] ss:$8 sps:$4 sm:$0xff]  }
 0xca5   :  { %14127 = vmatprep.subr.bf16.mxu0 %v16519_v37  ;;  %14152 = vmatprep.subr.bf16.mxu1 %v16583_v18  ;;  %v7602_v19 = vld [vmem:[#allocation17 + $0x1c58] sm:$0xff]  ;;  %v16471_v37 = vcombine.high %v7538_v44, %v7542_v54 }
 0xca6   :  { %v7606_v42 = vld [vmem:[#allocation17 + $0x1c78] sm:$0xff] }
 0xca7   :  { %v13858_v15 = vpop.f32.mrf.mxu1  ;;  %14103 = vmatmul.mubr.bf16.vlgmr.msra.gmra.mxu1 %v19507_v2  ;;  %v7626_v2 = vld [vmem:[#allocation17 + $0x1d18] sm:$0xff]  ;;  %v16535_v18 = vcombine.high %v7602_v19, %v7606_v42 }
 0xca8   :  { %v19705_v30 = vadd.f32 %v13858_v15, %v19697_v38  ;;  %14128 = vmatpush2.bf16.msra.mxu0 %v16518_v34  ;;  %14153 = vmatpush1.bf16.msra.mxu1 %v16582_v58  ;;  %v16559_v33 = vcombine.high %v7626_v2, %v7630_v59  ;;  %v16558_v26 = vcombine.low %v7626_v2, %v7630_v59  ;;  %v7530_v25 = vld [vmem:[#allocation17 + $0x1a18] sm:$0xff]  ;;  %v17142_v2 = vld [vmem:[#allocation20 + $0x64] ss:$8 sps:$4 sm:$0xff]  }
 0xca9   :  { %14184 = vmatprep.mubr.bf16.mxu1 %v19509_v50  ;;  %v13860_v51 = vpop.f32.mrf.mxu1  ;;  %14129 = vmatprep.subr.bf16.mxu0 %v16511_v53  ;;  %v16495_v50 = vcombine.high %v7562_v62, %v7566_v9  ;;  %v7534_v40 = vld [vmem:[#allocation17 + $0x1a38] sm:$0xff]  ;;  %v16470_v34 = vcombine.low %v7538_v44, %v7542_v54  ;;  %v16534_v58 = vcombine.low %v7602_v19, %v7606_v42  ;;  %v17154_v42 = vld [vmem:[#allocation20 + $0x24] ss:$8 sps:$4 sm:$0xff]  }
 0xcaa   :  { %v19709_v52 = vadd.f32 %v13860_v51, %v19701_v46  ;;  %14154 = vmatprep.subr.bf16.mxu1 %v16575_v17  ;;  %v16494_v46 = vcombine.low %v7562_v62, %v7566_v9  ;;  %v7594_v57 = vld [vmem:[#allocation17 + $0x1c18] sm:$0xff]  ;;  %v16463_v53 = vcombine.high %v7530_v25, %v7534_v40  ;;  %v16462_v21 = vcombine.low %v7530_v25, %v7534_v40 }
 0xcab   :  { %v13862_v38 = vpop.f32.mrf.mxu1  ;;  %v7598_v23 = vld [vmem:[#allocation17 + $0x1c38] sm:$0xff] }
 0xcac   :  { %14130 = vmatpush2.bf16.msra.mxu0 %v16510_v3  ;;  %14155 = vmatpush1.bf16.msra.mxu1 %v16574_v7  ;;  %v16527_v14 = vcombine.high %v7594_v57, %v7598_v23  ;;  %v7714_v17 = vld [vmem:[#allocation17 + $0x1fd8] sm:$0xff]  ;;  %v16526_v63 = vcombine.low %v7594_v57, %v7598_v23 }
 0xcad   :  { %v13863_v12 = vpop.f32.mrf.mxu1  ;;  %14131 = vmatprep.subr.bf16.mxu0 %v16503_v61  ;;  %14156 = vmatprep.subr.bf16.mxu1 %v16567_v39  ;;  %v7718_v47 = vld [vmem:[#allocation17 + $0x1ff8] sm:$0xff]  ;;  %v14194_v61 = vmax.f32 %v19581_v60, 0.0 }
 0xcae   :  { %v16647_v15 = vcombine.high %v7714_v17, %v7718_v47  ;;  %v17139_v3 = vld [vmem:[#allocation20 + $0x74] ss:$8 sps:$4 sm:$0xff]   ;;  %v16646_v39 = vcombine.low %v7714_v17, %v7718_v47  ;;  %v17137_v62 = vld [vmem:[#allocation20 + $0x70] ss:$8 sps:$4 sm:$0xff]   ;;  %v17158_v47 = vld [vmem:[#allocation20] ss:$8 sps:$4 sm:$0xff]  }
 0xcaf   :  { %v7706_v7 = vld [vmem:[#allocation17 + $0x1f98] sm:$0xff] }
 0xcb0   :  { %14132 = vmatpush2.bf16.msra.mxu0 %v16502_v28  ;;  %14157 = vmatpush1.bf16.msra.mxu1 %v16566_v45  ;;  %v7710_v51 = vld [vmem:[#allocation17 + $0x1fb8] sm:$0xff]  ;;  %v14202_v28 = vpack.c.bf16 %v14194_v61, %v14194_v61 }
 0xcb1   :  { %14133 = vmatprep.subr.bf16.mxu0 %v16495_v50  ;;  %14158 = vmatprep.subr.bf16.mxu1 %v16559_v33  ;;  %v16639_v9 = vcombine.high %v7706_v7, %v7710_v51  ;;  %v7698_v59 = vld [vmem:[#allocation17 + $0x1f58] sm:$0xff]  ;;  %v16638_v12 = vcombine.low %v7706_v7, %v7710_v51  ;;  %v17140_v50 = vld [vmem:[#allocation20 + $0x60] ss:$8 sps:$4 sm:$0xff]   ;;  %v14196_v7 = vmax.f32 %v19645_v16, 0.0 }
 0xcb2   :  { %v7702_v38 = vld [vmem:[#allocation17 + $0x1f78] sm:$0xff]  ;;  %v17170_v16 = vld [vmem:[#allocation20 + $0x160] ss:$8 sps:$4 sm:$0xff]  }
 0xcb3   :  { %v16631_v33 = vcombine.high %v7698_v59, %v7702_v38  ;;  %v17145_v8 = vld [vmem:[#allocation20 + $0x54] ss:$8 sps:$4 sm:$0xff]   ;;  %v17149_v54 = vld [vmem:[#allocation20 + $0x30] ss:$8 sps:$4 sm:$0xff]  }
 0xcb4   :  { %14134 = vmatpush2.bf16.msra.mxu0 %v16494_v46  ;;  %14159 = vmatpush1.bf16.msra.mxu1 %v16558_v26  ;;  %v7690_v1 = vld [vmem:[#allocation17 + $0x1f18] sm:$0xff]  ;;  %v16630_v46 = vcombine.low %v7698_v59, %v7702_v38  ;;  %v14204_v59 = vpack.c.bf16 %v14196_v7, %v14196_v7 }
 0xcb5   :  { %14135 = vmatprep.subr.bf16.mxu0 %v16487_v13  ;;  %14160 = vmatprep.subr.bf16.mxu1 %v16551_v22  ;;  %v7694_v6 = vld [vmem:[#allocation17 + $0x1f38] sm:$0xff]  ;;  %v17148_v22 = vld [vmem:[#allocation20 + $0x44] ss:$8 sps:$4 sm:$0xff]  }
 0xcb6   :  { %v17143_v26 = vld [vmem:[#allocation20 + $0x50] ss:$8 sps:$4 sm:$0xff]   ;;  %v16622_v41 = vcombine.low %v7690_v1, %v7694_v6  ;;  %v17157_v40 = vld [vmem:[#allocation20 + $0x14] ss:$8 sps:$4 sm:$0xff]  }
 0xcb7   :  { %v7682_v4 = vld [vmem:[#allocation17 + $0x1ed8] sm:$0xff] }
 0xcb8   :  { %14136 = vmatpush2.bf16.msra.mxu0 %v16486_v20  ;;  %14161 = vmatpush1.bf16.msra.mxu1 %v16550_v11  ;;  %v7686_v36 = vld [vmem:[#allocation17 + $0x1ef8] sm:$0xff] }
 0xcb9   :  { %14137 = vmatprep.subr.bf16.mxu0 %v16479_v24  ;;  %14162 = vmatprep.subr.bf16.mxu1 %v16543_v43  ;;  %v16615_v20 = vcombine.high %v7682_v4, %v7686_v36  ;;  %v17151_v11 = vld [vmem:[#allocation20 + $0x34] ss:$8 sps:$4 sm:$0xff]   ;;  %v16614_v44 = vcombine.low %v7682_v4, %v7686_v36  ;;  %v17161_v61 = vld [vmem:[#allocation20 + $0xf0] ss:$8 sps:$4 sm:$0xff]   ;;  %v17193_v36 = vld [vmem:[#allocation20 + $0xa4] ss:$8 sps:$4 sm:$0xff]  }
 0xcba   :  { %v7674_v24 = vld [vmem:[#allocation17 + $0x1e98] sm:$0xff] }
 0xcbb   :  { %v7678_v43 = vld [vmem:[#allocation17 + $0x1eb8] sm:$0xff] }
 0xcbc   :  { %14138 = vmatpush2.bf16.msra.mxu0 %v16478_v49  ;;  %14163 = vmatpush1.bf16.msra.mxu1 %v16542_v56  ;;  %v16607_v19 = vcombine.high %v7674_v24, %v7678_v43  ;;  %v7666_v49 = vld [vmem:[#allocation17 + $0x1e58] sm:$0xff] }
 0xcbd   :  { %14139 = vmatprep.subr.bf16.mxu0 %v16471_v37  ;;  %14164 = vmatprep.subr.bf16.mxu1 %v16535_v18  ;;  %v7670_v56 = vld [vmem:[#allocation17 + $0x1e78] sm:$0xff]  ;;  %v16606_v37 = vcombine.low %v7674_v24, %v7678_v43  ;;  %v17152_v18 = vld [vmem:[#allocation20 + $0x20] ss:$8 sps:$4 sm:$0xff]  }
 0xcbe   :  { %v16599_v25 = vcombine.high %v7666_v49, %v7670_v56  ;;  %v7658_v57 = vld [vmem:[#allocation17 + $0x1e18] sm:$0xff] }
 0xcbf   :  { %v7662_v23 = vld [vmem:[#allocation17 + $0x1e38] sm:$0xff] }
 0xcc0   :  { %14140 = vmatpush2.bf16.msra.mxu0 %v16470_v34  ;;  %14165 = vmatpush1.bf16.msra.mxu1 %v16534_v58  ;;  %v16598_v34 = vcombine.low %v7666_v49, %v7670_v56  ;;  %v17155_v58 = vld [vmem:[#allocation20 + $0x10] ss:$8 sps:$4 sm:$0xff]   ;;  %v16590_v17 = vcombine.low %v7658_v57, %v7662_v23  ;;  %v17202_v24 = vld [vmem:[#allocation20 + $0x114] ss:$8 sps:$4 sm:$0xff]   ;;  %v17206_v49 = vld [vmem:[#allocation20 + $0x100] ss:$8 sps:$4 sm:$0xff]  }
 0xcc1   :  { %14141 = vmatprep.subr.bf16.mxu0 %v16463_v53  ;;  %14166 = vmatprep.subr.bf16.mxu1 %v16527_v14  ;;  %v16591_v53 = vcombine.high %v7658_v57, %v7662_v23  ;;  %v17160_v14 = vld [vmem:[#allocation20 + $0x4] ss:$8 sps:$4 sm:$0xff]   ;;  %v17188_v4 = vld [vmem:[#allocation20 + $0x130] ss:$8 sps:$4 sm:$0xff]   ;;  %v14193_v56 = vmax.f32 %v19577_v35, 0.0 }
 0xcc2   :  { %v17197_v43 = vld [vmem:[#allocation20 + $0x90] ss:$8 sps:$4 sm:$0xff]  }
 0xcc3   :  { %v17212_v57 = vld [vmem:[#allocation20 + $0x270] ss:$8 sps:$4 sm:$0xff]   ;;  %v14201_v23 = vpack.c.bf16 %v14193_v56, %v14193_v56 }
 0xcc4   :  { %14142 = vmatpush2.bf16.msra.mxu0 %v16462_v21  ;;  %14167 = vmatpush1.bf16.msra.mxu1 %v16526_v63  ;;  %v17163_v21 = vld [vmem:[#allocation20 + $0xf4] ss:$8 sps:$4 sm:$0xff]   ;;  %v17221_v7 = vld [vmem:[#allocation20 + $0x1d0] ss:$8 sps:$4 sm:$0xff]  }
 0xcc5   :  { %14168 = vmatprep.subr.bf16.mxu1 %v16647_v15  ;;  %14989 = vmatprep.subr.bf16.mxu0 %v17139_v3  ;;  %v17166_v63 = vld [vmem:[#allocation20 + $0x174] ss:$8 sps:$4 sm:$0xff]  }
 0xcc6   :  { %v17337_v15 = vld [vmem:[#allocation19] sm:$0xff] }
 0xcc7   :  { %v19712_v45 = vpop.f32.mrf.mxu0  ;;  %14144 = vmatmul.mubr.bf16.vlgmr.msra.gmra.mxu0 %v19514_v0  ;;  %v16623_v0 = vcombine.high %v7690_v1, %v7694_v6  ;;  %v7748_v3 = vrot.slane %v17337_v15, %v19422_v32  ;;  %v7752_v51 = vrot.slane %v17337_v15, %v19425_v48  ;;  %v17167_v48 = vld [vmem:[#allocation20 + $0xe0] ss:$8 sps:$4 sm:$0xff]   ;;  %v17176_v1 = vld [vmem:[#allocation20 + $0x150] ss:$8 sps:$4 sm:$0xff]   ;;  %v17181_v6 = vld [vmem:[#allocation20 + $0xc4] ss:$8 sps:$4 sm:$0xff]  }
 0xcc8   :  { %14169 = vmatpush2.bf16.msra.mxu1 %v16646_v39  ;;  %14990 = vmatpush1.bf16.msra.mxu0 %v17137_v62  ;;  %v17164_v39 = vld [vmem:[#allocation20 + $0x170] ss:$8 sps:$4 sm:$0xff]   ;;  %v17169_v62 = vld [vmem:[#allocation20 + $0xe4] ss:$8 sps:$4 sm:$0xff]  }
 0xcc9   :  { %15021 = vmatprep.mubr.bf16.mxu0 %v14202_v28  ;;  %v19715_v60 = vpop.f32.mrf.mxu0  ;;  %14170 = vmatprep.subr.bf16.mxu1 %v16639_v9  ;;  %v13900_v9 = vadd.f32 %v19712_v45, %v7748_v3 }
 0xcca   :  { %14991 = vmatprep.subr.bf16.mxu0 %v17142_v2  ;;  %v17172_v2 = vld [vmem:[#allocation20 + $0x164] ss:$8 sps:$4 sm:$0xff]   ;;  %v13902_v32 = vadd.f32 %v19715_v60, %v7752_v51  ;;  %v17224_v51 = vld [vmem:[#allocation20 + $0x250] ss:$8 sps:$4 sm:$0xff]  }
 0xccb   :  { %v13903_v55 = vpop.f32.mrf.mxu0 }
 0xccc   :  { %14171 = vmatpush2.bf16.msra.mxu1 %v16638_v12  ;;  %14992 = vmatpush1.bf16.msra.mxu0 %v17140_v50  ;;  %v17175_v50 = vld [vmem:[#allocation20 + $0xd4] ss:$8 sps:$4 sm:$0xff]   ;;  %v17184_v55 = vld [vmem:[#allocation20 + $0x144] ss:$8 sps:$4 sm:$0xff]  }
 0xccd   :  { %v13904_v13 = vpop.f32.mrf.mxu0  ;;  %14172 = vmatprep.subr.bf16.mxu1 %v16631_v33  ;;  %14993 = vmatprep.subr.bf16.mxu0 %v17145_v8  ;;  %v17178_v33 = vld [vmem:[#allocation20 + $0x154] ss:$8 sps:$4 sm:$0xff]  }
 0xcce   :  { %v17187_v13 = vld [vmem:[#allocation20 + $0xb4] ss:$8 sps:$4 sm:$0xff]  }
 0xcd0   :  { %14173 = vmatpush2.bf16.msra.mxu1 %v16630_v46  ;;  %14994 = vmatpush1.bf16.msra.mxu0 %v17143_v26  ;;  %v17179_v46 = vld [vmem:[#allocation20 + $0xc0] ss:$8 sps:$4 sm:$0xff]  }
 0xcd1   :  { %14174 = vmatprep.subr.bf16.mxu1 %v16623_v0  ;;  %14995 = vmatprep.subr.bf16.mxu0 %v17148_v22  ;;  %v17182_v26 = vld [vmem:[#allocation20 + $0x140] ss:$8 sps:$4 sm:$0xff]   ;;  %v17190_v0 = vld [vmem:[#allocation20 + $0x134] ss:$8 sps:$4 sm:$0xff]   ;;  %v17185_v22 = vld [vmem:[#allocation20 + $0xb0] ss:$8 sps:$4 sm:$0xff]  }
 0xcd4   :  { %14175 = vmatpush2.bf16.msra.mxu1 %v16622_v41  ;;  %14996 = vmatpush1.bf16.msra.mxu0 %v17146_v5  ;;  %v17196_v41 = vld [vmem:[#allocation20 + $0x124] ss:$8 sps:$4 sm:$0xff]   ;;  %v17191_v5 = vld [vmem:[#allocation20 + $0xa0] ss:$8 sps:$4 sm:$0xff]  }
 0xcd5   :  { %14176 = vmatprep.subr.bf16.mxu1 %v16615_v20  ;;  %14997 = vmatprep.subr.bf16.mxu0 %v17151_v11  ;;  %v17194_v20 = vld [vmem:[#allocation20 + $0x120] ss:$8 sps:$4 sm:$0xff]   ;;  %v17199_v11 = vld [vmem:[#allocation20 + $0x94] ss:$8 sps:$4 sm:$0xff]  }
 0xcd8   :  { %14177 = vmatpush2.bf16.msra.mxu1 %v16614_v44  ;;  %14998 = vmatpush1.bf16.msra.mxu0 %v17149_v54  ;;  %v17200_v44 = vld [vmem:[#allocation20 + $0x110] ss:$8 sps:$4 sm:$0xff]   ;;  %v17205_v54 = vld [vmem:[#allocation20 + $0x84] ss:$8 sps:$4 sm:$0xff]  }
 0xcd9   :  { %14178 = vmatprep.subr.bf16.mxu1 %v16607_v19  ;;  %14999 = vmatprep.subr.bf16.mxu0 %v17154_v42  ;;  %v17208_v19 = vld [vmem:[#allocation20 + $0x104] ss:$8 sps:$4 sm:$0xff]   ;;  %v17203_v42 = vld [vmem:[#allocation20 + $0x80] ss:$8 sps:$4 sm:$0xff]  }
 0xcdc   :  { %14179 = vmatpush2.bf16.msra.mxu1 %v16606_v37  ;;  %15000 = vmatpush1.bf16.msra.mxu0 %v17152_v18  ;;  %v17211_v37 = vld [vmem:[#allocation20 + $0x1f4] ss:$8 sps:$4 sm:$0xff]  }
 0xcdd   :  { %14180 = vmatprep.subr.bf16.mxu1 %v16599_v25  ;;  %15001 = vmatprep.subr.bf16.mxu0 %v17157_v40  ;;  %v17214_v18 = vld [vmem:[#allocation20 + $0x274] ss:$8 sps:$4 sm:$0xff]   ;;  %v14198_v25 = vmax.f32 %v19709_v52, 0.0  ;;  %v17209_v40 = vld [vmem:[#allocation20 + $0x1f0] ss:$8 sps:$4 sm:$0xff]  }
 0xce0   :  { %14181 = vmatpush2.bf16.msra.mxu1 %v16598_v34  ;;  %15002 = vmatpush1.bf16.msra.mxu0 %v17155_v58  ;;  %v17217_v34 = vld [vmem:[#allocation20 + $0x1e4] ss:$8 sps:$4 sm:$0xff]  }
 0xce1   :  { %14182 = vmatprep.subr.bf16.mxu1 %v16591_v53  ;;  %15003 = vmatprep.subr.bf16.mxu0 %v17160_v14  ;;  %v17220_v58 = vld [vmem:[#allocation20 + $0x264] ss:$8 sps:$4 sm:$0xff]   ;;  %v14206_v53 = vpack.c.bf16 %v14198_v25, %v14198_v25  ;;  %v17266_v25 = vld [vmem:[#allocation20 + $0x2c0] ss:$8 sps:$4 sm:$0xff]  }
 0xce4   :  { %14183 = vmatpush2.bf16.msra.mxu1 %v16590_v17  ;;  %15004 = vmatpush1.bf16.msra.mxu0 %v17158_v47  ;;  %v17215_v17 = vld [vmem:[#allocation20 + $0x1e0] ss:$8 sps:$4 sm:$0xff]  }
 0xce5   :  { %15005 = vmatprep.subr.bf16.mxu0 %v17163_v21  ;;  %15030 = vmatprep.subr.bf16.mxu1 %v17166_v63  ;;  %v17218_v47 = vld [vmem:[#allocation20 + $0x260] ss:$8 sps:$4 sm:$0xff]   ;;  %v17223_v21 = vld [vmem:[#allocation20 + $0x1d4] ss:$8 sps:$4 sm:$0xff]  }
 0xce6   :  { %v17226_v63 = vld [vmem:[#allocation20 + $0x254] ss:$8 sps:$4 sm:$0xff]  }
 0xce7   :  { %v13940_v38 = vpop.f32.mrf.mxu1  ;;  %14185 = vmatmul.mubr.bf16.vlgmr.msra.gmra.mxu1 %v19525_v29  ;;  %v17173_v29 = vld [vmem:[#allocation20 + $0xd0] ss:$8 sps:$4 sm:$0xff]  }
 0xce8   :  { %v19723_v28 = vadd.f32 %v13940_v38, %v13900_v9  ;;  %15006 = vmatpush2.bf16.msra.mxu0 %v17161_v61  ;;  %15031 = vmatpush1.bf16.msra.mxu1 %v17164_v39  ;;  %v17229_v39 = vld [vmem:[#allocation20 + $0x1c4] ss:$8 sps:$4 sm:$0xff]   ;;  %v17227_v9 = vld [vmem:[#allocation20 + $0x1c0] ss:$8 sps:$4 sm:$0xff]   ;;  %v17238_v38 = vld [vmem:[#allocation20 + $0x234] ss:$8 sps:$4 sm:$0xff]  }
 0xce9   :  { %15062 = vmatprep.mubr.bf16.mxu1 %v14204_v59  ;;  %v13942_v12 = vpop.f32.mrf.mxu1  ;;  %15007 = vmatprep.subr.bf16.mxu0 %v17169_v62  ;;  %v17232_v62 = vld [vmem:[#allocation20 + $0x244] ss:$8 sps:$4 sm:$0xff]   ;;  %v17235_v59 = vld [vmem:[#allocation20 + $0x1b4] ss:$8 sps:$4 sm:$0xff]  }
 0xcea   :  { %v19725_v8 = vadd.f32 %v13942_v12, %v13902_v32  ;;  %15032 = vmatprep.subr.bf16.mxu1 %v17172_v2  ;;  %v17230_v2 = vld [vmem:[#allocation20 + $0x240] ss:$8 sps:$4 sm:$0xff]   ;;  %v17233_v32 = vld [vmem:[#allocation20 + $0x1b0] ss:$8 sps:$4 sm:$0xff]  }
 0xceb   :  { %v13944_v45 = vpop.f32.mrf.mxu1  ;;  %v17239_v12 = vld [vmem:[#allocation20 + $0x1a0] ss:$8 sps:$4 sm:$0xff]  }
 0xcec   :  { %15008 = vmatpush2.bf16.msra.mxu0 %v17167_v48  ;;  %15033 = vmatpush1.bf16.msra.mxu1 %v17170_v16  ;;  %v17241_v48 = vld [vmem:[#allocation20 + $0x1a4] ss:$8 sps:$4 sm:$0xff]   ;;  %v17245_v45 = vld [vmem:[#allocation20 + $0x190] ss:$8 sps:$4 sm:$0xff]  }
 0xced   :  { %v13945_v60 = vpop.f32.mrf.mxu1  ;;  %15009 = vmatprep.subr.bf16.mxu0 %v17175_v50  ;;  %15034 = vmatprep.subr.bf16.mxu1 %v17178_v33  ;;  %v17244_v16 = vld [vmem:[#allocation20 + $0x224] ss:$8 sps:$4 sm:$0xff]   ;;  %v17242_v50 = vld [vmem:[#allocation20 + $0x220] ss:$8 sps:$4 sm:$0xff]   ;;  %v17247_v33 = vld [vmem:[#allocation20 + $0x194] ss:$8 sps:$4 sm:$0xff]  }
 0xcee   :  { %v17256_v60 = vld [vmem:[#allocation20 + $0x204] ss:$8 sps:$4 sm:$0xff]  }
 0xcf0   :  { %15010 = vmatpush2.bf16.msra.mxu0 %v17173_v29  ;;  %15035 = vmatpush1.bf16.msra.mxu1 %v17176_v1  ;;  %v17248_v29 = vld [vmem:[#allocation20 + $0x210] ss:$8 sps:$4 sm:$0xff]   ;;  %v17253_v1 = vld [vmem:[#allocation20 + $0x184] ss:$8 sps:$4 sm:$0xff]  }
 0xcf1   :  { %15011 = vmatprep.subr.bf16.mxu0 %v17181_v6  ;;  %15036 = vmatprep.subr.bf16.mxu1 %v17184_v55  ;;  %v17251_v6 = vld [vmem:[#allocation20 + $0x180] ss:$8 sps:$4 sm:$0xff]  }
 0xcf2   :  { %v17254_v55 = vld [vmem:[#allocation20 + $0x200] ss:$8 sps:$4 sm:$0xff]  }
 0xcf4   :  { %15012 = vmatpush2.bf16.msra.mxu0 %v17179_v46  ;;  %15037 = vmatpush1.bf16.msra.mxu1 %v17182_v26  ;;  %v14195_v46 = vmax.f32 %v19641_v10, 0.0  ;;  %v17259_v26 = vld [vmem:[#allocation20 + $0x2f4] ss:$8 sps:$4 sm:$0xff]   ;;  %v17260_v10 = vld [vmem:[#allocation20 + $0x2e0] ss:$8 sps:$4 sm:$0xff]  }
 0xcf5   :  { %15013 = vmatprep.subr.bf16.mxu0 %v17187_v13  ;;  %15038 = vmatprep.subr.bf16.mxu1 %v17190_v0  ;;  %v17283_v13 = vld [vmem:[#allocation20 + $0x374] ss:$8 sps:$4 sm:$0xff]   ;;  %v17257_v0 = vld [vmem:[#allocation20 + $0x2f0] ss:$8 sps:$4 sm:$0xff]  }
 0xcf8   :  { %15014 = vmatpush2.bf16.msra.mxu0 %v17185_v22  ;;  %15039 = vmatpush1.bf16.msra.mxu1 %v17188_v4  ;;  %v17281_v22 = vld [vmem:[#allocation20 + $0x370] ss:$8 sps:$4 sm:$0xff]   ;;  %v14203_v4 = vpack.c.bf16 %v14195_v46, %v14195_v46  ;;  %v17328_v46 = vld [vmem:[#allocation20 + $0x384] ss:$8 sps:$4 sm:$0xff]  }
 0xcf9   :  { %15015 = vmatprep.subr.bf16.mxu0 %v17193_v36  ;;  %15040 = vmatprep.subr.bf16.mxu1 %v17196_v41  ;;  %v17262_v36 = vld [vmem:[#allocation20 + $0x2e4] ss:$8 sps:$4 sm:$0xff]  }
 0xcfa   :  { %v17286_v41 = vld [vmem:[#allocation20 + $0x364] ss:$8 sps:$4 sm:$0xff]  }
 0xcfc   :  { %15016 = vmatpush2.bf16.msra.mxu0 %v17191_v5  ;;  %15041 = vmatpush1.bf16.msra.mxu1 %v17194_v20 }
 0xcfd   :  { %15017 = vmatprep.subr.bf16.mxu0 %v17199_v11  ;;  %15042 = vmatprep.subr.bf16.mxu1 %v17202_v24  ;;  %v17284_v11 = vld [vmem:[#allocation20 + $0x360] ss:$8 sps:$4 sm:$0xff]  }
 0xd00   :  { %15018 = vmatpush2.bf16.msra.mxu0 %v17197_v43  ;;  %15043 = vmatpush1.bf16.msra.mxu1 %v17200_v44  ;;  %v17265_v43 = vld [vmem:[#allocation20 + $0x2d4] ss:$8 sps:$4 sm:$0xff]  }
 0xd01   :  { %15019 = vmatprep.subr.bf16.mxu0 %v17205_v54  ;;  %15044 = vmatprep.subr.bf16.mxu1 %v17208_v19  ;;  %v17289_v44 = vld [vmem:[#allocation20 + $0x354] ss:$8 sps:$4 sm:$0xff]  }
 0xd04   :  { %15020 = vmatpush2.bf16.msra.mxu0 %v17203_v42  ;;  %15045 = vmatpush1.bf16.msra.mxu1 %v17206_v49  ;;  %v17263_v42 = vld [vmem:[#allocation20 + $0x2d0] ss:$8 sps:$4 sm:$0xff]  }
 0xd05   :  { %15046 = vmatprep.subr.bf16.mxu1 %v17211_v37  ;;  %15071 = vmatprep.subr.bf16.mxu0 %v17214_v18  ;;  %v17287_v49 = vld [vmem:[#allocation20 + $0x350] ss:$8 sps:$4 sm:$0xff]   ;;  %v17268_v37 = vld [vmem:[#allocation20 + $0x2c4] ss:$8 sps:$4 sm:$0xff]  }
 0xd06   :  { %v17292_v18 = vld [vmem:[#allocation20 + $0x344] ss:$8 sps:$4 sm:$0xff]  }
 0xd07   :  { %v13981_v14 = vpop.f32.mrf.mxu0  ;;  %15022 = vmatmul.mubr.bf16.vlgmr.msra.gmra.mxu0 %v14201_v23  ;;  %v17295_v23 = vld [vmem:[#allocation20 + $0x334] ss:$8 sps:$4 sm:$0xff]  }
 0xd08   :  { %v19730_v35 = vadd.f32 %v13981_v14, %v19723_v28  ;;  %15047 = vmatpush2.bf16.msra.mxu1 %v17209_v40  ;;  %15072 = vmatpush1.bf16.msra.mxu0 %v17212_v57  ;;  %v17236_v28 = vld [vmem:[#allocation20 + $0x230] ss:$8 sps:$4 sm:$0xff]   ;;  %v17290_v40 = vld [vmem:[#allocation20 + $0x340] ss:$8 sps:$4 sm:$0xff]   ;;  %v17271_v57 = vld [vmem:[#allocation20 + $0x2b4] ss:$8 sps:$4 sm:$0xff]  }
 0xd09   :  { %15103 = vmatprep.mubr.bf16.mxu0 %v14206_v53  ;;  %v13983_v52 = vpop.f32.mrf.mxu0  ;;  %15048 = vmatprep.subr.bf16.mxu1 %v17217_v34  ;;  %v17269_v34 = vld [vmem:[#allocation20 + $0x2b0] ss:$8 sps:$4 sm:$0xff]   ;;  %v17274_v53 = vld [vmem:[#allocation20 + $0x2a4] ss:$8 sps:$4 sm:$0xff]  }
 0xd0a   :  { %v19733_v15 = vadd.f32 %v13983_v52, %v19725_v8  ;;  %15073 = vmatprep.subr.bf16.mxu0 %v17220_v58  ;;  %v17250_v8 = vld [vmem:[#allocation20 + $0x214] ss:$8 sps:$4 sm:$0xff]   ;;  %v17293_v58 = vld [vmem:[#allocation20 + $0x330] ss:$8 sps:$4 sm:$0xff]   ;;  %v17298_v14 = vld [vmem:[#allocation20 + $0x324] ss:$8 sps:$4 sm:$0xff]  }
 0xd0b   :  { %v13985_v3 = vpop.f32.mrf.mxu0  ;;  %v17301_v52 = vld [vmem:[#allocation20 + $0x314] ss:$8 sps:$4 sm:$0xff]  }
 0xd0c   :  { %15049 = vmatpush2.bf16.msra.mxu1 %v17215_v17  ;;  %15074 = vmatpush1.bf16.msra.mxu0 %v17218_v47  ;;  %v17296_v17 = vld [vmem:[#allocation20 + $0x320] ss:$8 sps:$4 sm:$0xff]   ;;  %v17277_v47 = vld [vmem:[#allocation20 + $0x294] ss:$8 sps:$4 sm:$0xff]   ;;  %v17304_v3 = vld [vmem:[#allocation20 + $0x304] ss:$8 sps:$4 sm:$0xff]  }
 0xd0d   :  { %v13986_v61 = vpop.f32.mrf.mxu0  ;;  %15050 = vmatprep.subr.bf16.mxu1 %v17223_v21  ;;  %15075 = vmatprep.subr.bf16.mxu0 %v17226_v63  ;;  %v17275_v21 = vld [vmem:[#allocation20 + $0x290] ss:$8 sps:$4 sm:$0xff]  }
 0xd0e   :  { %v17299_v63 = vld [vmem:[#allocation20 + $0x310] ss:$8 sps:$4 sm:$0xff]   ;;  %v14197_v61 = vmax.f32 %v19705_v30, 0.0 }
 0xd10   :  { %15051 = vmatpush2.bf16.msra.mxu1 %v17221_v7  ;;  %15076 = vmatpush1.bf16.msra.mxu0 %v17224_v51  ;;  %v17278_v7 = vld [vmem:[#allocation20 + $0x280] ss:$8 sps:$4 sm:$0xff]  }
 0xd11   :  { %15052 = vmatprep.subr.bf16.mxu1 %v17229_v39  ;;  %15077 = vmatprep.subr.bf16.mxu0 %v17232_v62  ;;  %v17302_v51 = vld [vmem:[#allocation20 + $0x300] ss:$8 sps:$4 sm:$0xff]   ;;  %v17307_v39 = vld [vmem:[#allocation20 + $0x3f4] ss:$8 sps:$4 sm:$0xff]   ;;  %v17305_v62 = vld [vmem:[#allocation20 + $0x3f0] ss:$8 sps:$4 sm:$0xff]  }
 0xd14   :  { %15053 = vmatpush2.bf16.msra.mxu1 %v17227_v9  ;;  %15078 = vmatpush1.bf16.msra.mxu0 %v17230_v2  ;;  %v14205_v9 = vpack.c.bf16 %v14197_v61, %v14197_v61  ;;  %v17310_v2 = vld [vmem:[#allocation20 + $0x3e4] ss:$8 sps:$4 sm:$0xff]  }
 0xd15   :  { %15054 = vmatprep.subr.bf16.mxu1 %v17235_v59  ;;  %15079 = vmatprep.subr.bf16.mxu0 %v17238_v38 }
 0xd18   :  { %15055 = vmatpush2.bf16.msra.mxu1 %v17233_v32  ;;  %15080 = vmatpush1.bf16.msra.mxu0 %v17236_v28  ;;  %v17308_v32 = vld [vmem:[#allocation20 + $0x3e0] ss:$8 sps:$4 sm:$0xff]  }
 0xd19   :  { %15056 = vmatprep.subr.bf16.mxu1 %v17241_v48  ;;  %15081 = vmatprep.subr.bf16.mxu0 %v17244_v16  ;;  %v17313_v48 = vld [vmem:[#allocation20 + $0x3d4] ss:$8 sps:$4 sm:$0xff]  }
 0xd1c   :  { %15057 = vmatpush2.bf16.msra.mxu1 %v17239_v12  ;;  %15082 = vmatpush1.bf16.msra.mxu0 %v17242_v50  ;;  %v17311_v12 = vld [vmem:[#allocation20 + $0x3d0] ss:$8 sps:$4 sm:$0xff]  }
 0xd1d   :  { %15058 = vmatprep.subr.bf16.mxu1 %v17247_v33  ;;  %15083 = vmatprep.subr.bf16.mxu0 %v17250_v8  ;;  %v17316_v33 = vld [vmem:[#allocation20 + $0x3c4] ss:$8 sps:$4 sm:$0xff]   ;;  %v17314_v8 = vld [vmem:[#allocation20 + $0x3c0] ss:$8 sps:$4 sm:$0xff]  }
 0xd20   :  { %15059 = vmatpush2.bf16.msra.mxu1 %v17245_v45  ;;  %15084 = vmatpush1.bf16.msra.mxu0 %v17248_v29  ;;  %v17319_v45 = vld [vmem:[#allocation20 + $0x3b4] ss:$8 sps:$4 sm:$0xff]   ;;  %v17317_v29 = vld [vmem:[#allocation20 + $0x3b0] ss:$8 sps:$4 sm:$0xff]  }
 0xd21   :  { %15060 = vmatprep.subr.bf16.mxu1 %v17253_v1  ;;  %15085 = vmatprep.subr.bf16.mxu0 %v17256_v60  ;;  %v17322_v1 = vld [vmem:[#allocation20 + $0x3a4] ss:$8 sps:$4 sm:$0xff]   ;;  %v17320_v60 = vld [vmem:[#allocation20 + $0x3a0] ss:$8 sps:$4 sm:$0xff]  }
 0xd24   :  { %15061 = vmatpush2.bf16.msra.mxu1 %v17251_v6  ;;  %15086 = vmatpush1.bf16.msra.mxu0 %v17254_v55  ;;  %v17325_v6 = vld [vmem:[#allocation20 + $0x394] ss:$8 sps:$4 sm:$0xff]   ;;  %v17323_v55 = vld [vmem:[#allocation20 + $0x390] ss:$8 sps:$4 sm:$0xff]  }
 0xd25   :  { %15087 = vmatprep.subr.bf16.mxu0 %v17259_v26  ;;  %15112 = vmatprep.subr.bf16.mxu1 %v17283_v13  ;;  %v17326_v26 = vld [vmem:[#allocation20 + $0x380] ss:$8 sps:$4 sm:$0xff]  }
 0xd27   :  { %v14022_v5 = vpop.f32.mrf.mxu1  ;;  %15063 = vmatmul.mubr.bf16.vlgmr.msra.gmra.mxu1 %v14203_v4 }
 0xd28   :  { %v19737_v20 = vadd.f32 %v14022_v5, %v19730_v35  ;;  %15088 = vmatpush2.bf16.msra.mxu0 %v17257_v0  ;;  %15113 = vmatpush1.bf16.msra.mxu1 %v17281_v22  ;;  %v17272_v35 = vld [vmem:[#allocation20 + $0x2a0] ss:$8 sps:$4 sm:$0xff]  }
 0xd29   :  { %v14024_v24 = vpop.f32.mrf.mxu1  ;;  %15089 = vmatprep.subr.bf16.mxu0 %v17262_v36  ;;  %15114 = vmatprep.subr.bf16.mxu1 %v17286_v41 }
 0xd2a   :  { %v19740_v54 = vadd.f32 %v14024_v24, %v19733_v15  ;;  %v17280_v15 = vld [vmem:[#allocation20 + $0x284] ss:$8 sps:$4 sm:$0xff]   ;;  %v15185_v24 = vld [vmem:[%s19867_s15 + $0xf0] sm:$0xff] }
 0xd2b   :  { %v14026_v19 = vpop.f32.mrf.mxu1 }
 0xd2c   :  { %15090 = vmatpush2.bf16.msra.mxu0 %v17260_v10  ;;  %15115 = vmatpush1.bf16.msra.mxu1 %v17284_v11  ;;  %v15186_v10 = vld [vmem:[%s19867_s15 + $0xf8] sm:$0xff]  ;;  %v15183_v19 = vld [vmem:[%s19867_s15 + $0xe0] sm:$0xff] }
 0xd2d   :  { %v14027_v56 = vpop.f32.mrf.mxu1  ;;  %15091 = vmatprep.subr.bf16.mxu0 %v17265_v43  ;;  %15116 = vmatprep.subr.bf16.mxu1 %v17289_v44  ;;  %v15170_v11 = vld [vmem:[%s19867_s15 + $0x78] sm:$0xff]  ;;  %v15169_v43 = vld [vmem:[%s19867_s15 + $0x70] sm:$0xff]  ;;  %v15184_v44 = vld [vmem:[%s19867_s15 + $0xe8] sm:$0xff] }
 0xd2e   :  { %v15166_v56 = vld [vmem:[%s19867_s15 + $0x58] sm:$0xff] }
 0xd30   :  { %15092 = vmatpush2.bf16.msra.mxu0 %v17263_v42  ;;  %15117 = vmatpush1.bf16.msra.mxu1 %v17287_v49  ;;  %v15167_v42 = vld [vmem:[%s19867_s15 + $0x60] sm:$0xff]  ;;  %v15182_v49 = vld [vmem:[%s19867_s15 + $0xd8] sm:$0xff] }
 0xd31   :  { %15093 = vmatprep.subr.bf16.mxu0 %v17268_v37  ;;  %15118 = vmatprep.subr.bf16.mxu1 %v17292_v18  ;;  %v15181_v37 = vld [vmem:[%s19867_s15 + $0xd0] sm:$0xff] }
 0xd32   :  { %v15165_v18 = vld [vmem:[%s19867_s15 + $0x50] sm:$0xff] }
 0xd34   :  { %15094 = vmatpush2.bf16.msra.mxu0 %v17266_v25  ;;  %15119 = vmatpush1.bf16.msra.mxu1 %v17290_v40  ;;  %v15180_v25 = vld [vmem:[%s19867_s15 + $0xc8] sm:$0xff] }
 0xd35   :  { %15095 = vmatprep.subr.bf16.mxu0 %v17271_v57  ;;  %15120 = vmatprep.subr.bf16.mxu1 %v17295_v23  ;;  %v15164_v40 = vld [vmem:[%s19867_s15 + $0x48] sm:$0xff]  ;;  %v15179_v57 = vld [vmem:[%s19867_s15 + $0xc0] sm:$0xff] }
 0xd36   :  { %v15163_v23 = vld [vmem:[%s19867_s15 + $0x40] sm:$0xff] }
 0xd38   :  { %15096 = vmatpush2.bf16.msra.mxu0 %v17269_v34  ;;  %15121 = vmatpush1.bf16.msra.mxu1 %v17293_v58  ;;  %v15178_v34 = vld [vmem:[%s19867_s15 + $0xb8] sm:$0xff] }
 0xd39   :  { %15097 = vmatprep.subr.bf16.mxu0 %v17274_v53  ;;  %15122 = vmatprep.subr.bf16.mxu1 %v17298_v14  ;;  %v15162_v58 = vld [vmem:[%s19867_s15 + $0x38] sm:$0xff]  ;;  %v15177_v53 = vld [vmem:[%s19867_s15 + $0xb0] sm:$0xff] }
 0xd3a   :  { %v15161_v14 = vld [vmem:[%s19867_s15 + $0x30] sm:$0xff] }
 0xd3c   :  { %15098 = vmatpush2.bf16.msra.mxu0 %v17272_v35  ;;  %15123 = vmatpush1.bf16.msra.mxu1 %v17296_v17  ;;  %v15176_v35 = vld [vmem:[%s19867_s15 + $0xa8] sm:$0xff] }
 0xd3d   :  { %15099 = vmatprep.subr.bf16.mxu0 %v17277_v47  ;;  %15124 = vmatprep.subr.bf16.mxu1 %v17301_v52  ;;  %v15160_v17 = vld [vmem:[%s19867_s15 + $0x28] sm:$0xff]  ;;  %v15175_v47 = vld [vmem:[%s19867_s15 + $0xa0] sm:$0xff] }
 0xd3e   :  { %v15159_v52 = vld [vmem:[%s19867_s15 + $0x20] sm:$0xff] }
 0xd40   :  { %15100 = vmatpush2.bf16.msra.mxu0 %v17275_v21  ;;  %15125 = vmatpush1.bf16.msra.mxu1 %v17299_v63 }
 0xd41   :  { %15101 = vmatprep.subr.bf16.mxu0 %v17280_v15  ;;  %15126 = vmatprep.subr.bf16.mxu1 %v17304_v3 }
 0xd44   :  { %15102 = vmatpush2.bf16.msra.mxu0 %v17278_v7  ;;  %15127 = vmatpush1.bf16.msra.mxu1 %v17302_v51 }
 0xd45   :  { %15128 = vmatprep.subr.bf16.mxu1 %v17307_v39  ;;  %16850 = vmatprep.subr.mxu0 %v15186_v10 }
 0xd47   :  { %v14063_v59 = vpop.f32.mrf.mxu0  ;;  %15104 = vmatmul.mubr.bf16.vlgmr.msra.gmra.mxu0 %v14205_v9 }
 0xd48   :  { %v19744_v38 = vadd.f32 %v14063_v59, %v19737_v20  ;;  %15129 = vmatpush2.bf16.msra.mxu1 %v17305_v62  ;;  %16851 = vmatpush3.msra.mxu0 %v15170_v11 }
 0xd49   :  { %v14065_v28 = vpop.f32.mrf.mxu0  ;;  %15130 = vmatprep.subr.bf16.mxu1 %v17310_v2  ;;  %16852 = vmatprep.subr.mxu0 %v15185_v24 }
 0xd4a   :  { %v19747_v30 = vadd.f32 %v14065_v28, %v19740_v54  ;;  %v15168_v54 = vld [vmem:[%s19867_s15 + $0x68] sm:$0xff]  ;;  %16853 = vmatpush3.msra.mxu0 %v15169_v43 }
 0xd4b   :  { %v14067_v16 = vpop.f32.mrf.mxu0  ;;  %16854 = vmatprep.subr.mxu0 %v15184_v44 }
 0xd4c   :  { %15131 = vmatpush2.bf16.msra.mxu1 %v17308_v32  ;;  %16855 = vmatpush3.msra.mxu0 %v15168_v54 }
 0xd4d   :  { %v14068_v50 = vpop.f32.mrf.mxu0  ;;  %15132 = vmatprep.subr.bf16.mxu1 %v17313_v48  ;;  %16856 = vmatprep.subr.mxu0 %v15183_v19 }
 0xd4e   :  { %16857 = vmatpush3.msra.mxu0 %v15167_v42  ;;  %v14337_v50 = vld [vmem:[#allocation22] sm:$0x3] }
 0xd4f   :  { %16858 = vmatprep.subr.mxu0 %v15182_v49 }
 0xd50   :  { %15133 = vmatpush2.bf16.msra.mxu1 %v17311_v12  ;;  %16859 = vmatpush3.msra.mxu0 %v15166_v56 }
 0xd51   :  { %15134 = vmatprep.subr.bf16.mxu1 %v17316_v33  ;;  %16860 = vmatprep.subr.mxu0 %v15181_v37  ;;  %v14346_v33 = vrot.slane %v14337_v50, %v17956_v31  ;;  %v15157_v31 = vld [vmem:[%s19867_s15 + $0x10] sm:$0xff] }
 0xd52   :  { %16861 = vmatpush3.msra.mxu0 %v15165_v18 }
 0xd53   :  { %16862 = vmatprep.subr.mxu0 %v15180_v25  ;;  %v16776_v25 = vld [vmem:[#allocation23] ss:$0 sm:$0xff] }
 0xd54   :  { %15135 = vmatpush2.bf16.msra.mxu1 %v17314_v8  ;;  %16863 = vmatpush3.msra.mxu0 %v15164_v40 }
 0xd55   :  { %15136 = vmatprep.subr.bf16.mxu1 %v17319_v45  ;;  %16864 = vmatprep.subr.mxu0 %v15179_v57 }
 0xd56   :  { %16865 = vmatpush3.msra.mxu0 %v15163_v23 }
 0xd57   :  { %16866 = vmatprep.subr.mxu0 %v15178_v34 }
 0xd58   :  { %15137 = vmatpush2.bf16.msra.mxu1 %v17317_v29  ;;  %16867 = vmatpush3.msra.mxu0 %v15162_v58 }
 0xd59   :  { %15138 = vmatprep.subr.bf16.mxu1 %v17322_v1  ;;  %16868 = vmatprep.subr.mxu0 %v15177_v53 }
 0xd5a   :  { %16869 = vmatpush3.msra.mxu0 %v15161_v14 }
 0xd5b   :  { %16870 = vmatprep.subr.mxu0 %v15176_v35 }
 0xd5c   :  { %15139 = vmatpush2.bf16.msra.mxu1 %v17320_v60  ;;  %16871 = vmatpush3.msra.mxu0 %v15160_v17 }
 0xd5d   :  { %15140 = vmatprep.subr.bf16.mxu1 %v17325_v6  ;;  %16872 = vmatprep.subr.mxu0 %v15175_v47 }
 0xd5e   :  { %16873 = vmatpush3.msra.mxu0 %v15159_v52 }
 0xd60   :  { %15141 = vmatpush2.bf16.msra.mxu1 %v17323_v55 }
 0xd61   :  { %15142 = vmatprep.subr.bf16.mxu1 %v17328_v46 }
 0xd64   :  { %15143 = vmatpush2.bf16.msra.mxu1 %v17326_v26  ;;  %v15174_v26 = vld [vmem:[%s19867_s15 + $0x98] sm:$0xff] }
 0xd65   :  { %16874 = vmatprep.subr.mxu0 %v15174_v26 }
 0xd67   :  { %v14104_v13 = vpop.f32.mrf.mxu1 }
 0xd68   :  { %v14105_v21 = vadd.f32 %v14104_v13, %v19744_v38  ;;  %v15158_v13 = vld [vmem:[%s19867_s15 + $0x18] sm:$0xff] }
 0xd69   :  { %v14106_v0 = vpop.f32.mrf.mxu1  ;;  %16875 = vmatpush3.msra.mxu0 %v15158_v13 }
 0xd6a   :  { %v14107_v63 = vadd.f32 %v14106_v0, %v19747_v30  ;;  %v14342_v30 = vrot.slane %v14337_v50, %v17953_v27  ;;  %v15173_v27 = vld [vmem:[%s19867_s15 + $0x90] sm:$0xff]  ;;  %v15172_v0 = vld [vmem:[%s19867_s15 + $0x88] sm:$0xff] }
 0xd6b   :  { %v14108_v22 = vpop.f32.mrf.mxu1  ;;  %16876 = vmatprep.subr.mxu0 %v15173_v27 }
 0xd6c   :  { %16877 = vmatpush3.msra.mxu0 %v15157_v31  ;;  %v15156_v22 = vld [vmem:[%s19867_s15 + $0x8] sm:$0xff] }
 0xd6d   :  { %v14109_v4 = vpop.f32.mrf.mxu1  ;;  %16878 = vmatprep.subr.mxu0 %v15172_v0 }
 0xd6e   :  { %16879 = vmatpush3.msra.mxu0 %v15156_v22  ;;  %v15171_v4 = vld [vmem:[%s19867_s15 + $0x80] sm:$0xff] }
 0xd6f   :  { %16880 = vmatprep.subr.mxu0 %v15171_v4 }
 0xd87   :  { %v14145_v36 = vpop.f32.mrf.mxu0 }
 0xd88   :  { %v14146_v15 = vadd.f32 %v14145_v36, %v14105_v21  ;;  %v15155_v36 = vld [vmem:[%s19867_s15] sm:$0xff]  ;;  %s17684_s15 = smov [#allocation25]  }
 0xd89   :  { %v14147_v41 = vpop.f32.mrf.mxu0  ;;  %16881 = vmatpush3.msra.mxu0 %v15155_v36  ;;  %s15281_s20 = sshll.u32 %s17684_s15, 4  ;;  %s15282_s20 = int_to_ptr.vmem [resolvable:$true] %s15281_s20 }
 0xd8a   :  { %v14148_v7 = vadd.f32 %v14147_v41, %v14107_v63  ;;  %s17618_s21 = scalar_lea.vmem %s15282_s20, 32  ;;  %p17623_p1 = scmp.lt.s32.totalorder %s15282_s20, %s15282_s20 }
 0xd8b   :  { %v14149_v5 = vpop.f32.mrf.mxu0  ;;  %p17619_p0 = scmp.ne.s32.totalorder %s15282_s20, %s17618_s21  ;;  %p17624_p2 = scmp.lt.s32.totalorder %s17618_s21, %s17618_s21 }
 0xd8d   :  { %v14150_v20 = vpop.f32.mrf.mxu0  ;;  %p17625_p3 = por %p17624_p2, %p17623_p1 }
 0xd8f   :  { %p17626_p4 = pnand %p17625_p3, %p17619_p0 }
 0xda7   :  { %v14186_v3 = vpop.f32.mrf.mxu1 }
 0xda8   :  { %v14187_v51 = vadd.f32 %v14186_v3, %v14146_v15 }
 0xda9   :  { %v14188_v61 = vpop.f32.mrf.mxu1 }
 0xdaa   :  { %v14189_v39 = vadd.f32 %v14188_v61, %v14148_v7  ;;  %v14199_v62 = vmax.f32 %v14187_v51, 0.0 }
 0xdab   :  { %v14190_v9 = vpop.f32.mrf.mxu1 }
 0xdac   :  { %v14200_v2 = vmax.f32 %v14189_v39, 0.0  ;;  %v14207_v28 = vpack.c.bf16 %v14199_v62, %v14199_v62 }
 0xdad   :  { %v14191_v59 = vpop.f32.mrf.mxu1 }
 0xdae   :  { %v14208_v32 = vpack.c.bf16 %v14200_v2, %v14200_v2 }
 0xdb0   :  { %15144 = vmatprep.mubr.bf16.mxu1 %v14208_v32 }
 0xdb1   :  { %15145 = vmatmul.mubr.bf16.vlgmr.msra.gmra.mxu1 %v14207_v28 }
 0xdc7   :  { %v15023_v48 = vpop.f32.mrf.mxu0 }
 0xdc8   :  { %v15024_v8 = vadd.f32 %v15023_v48, %v14342_v30 }
 0xdc9   :  { %v15025_v38 = vpop.f32.mrf.mxu0 }
 0xdca   :  { %v15026_v29 = vadd.f32 %v15025_v38, %v14346_v33 }
 0xdcb   :  { %v15027_v16 = vpop.f32.mrf.mxu0 }
 0xdcd   :  { %v15028_v12 = vpop.f32.mrf.mxu0 }
 0xde7   :  { %v15064_v45 = vpop.f32.mrf.mxu1 }
 0xde8   :  { %v15065_v1 = vadd.f32 %v15064_v45, %v15024_v8 }
 0xde9   :  { %v15066_v60 = vpop.f32.mrf.mxu1 }
 0xdea   :  { %v15067_v6 = vadd.f32 %v15066_v60, %v15026_v29 }
 0xdeb   :  { %v15068_v55 = vpop.f32.mrf.mxu1 }
 0xded   :  { %v15069_v46 = vpop.f32.mrf.mxu1 }
 0xe07   :  { %v15105_v41 = vpop.f32.mrf.mxu0 }
 0xe08   :  { %v15106_v5 = vadd.f32 %v15105_v41, %v15065_v1 }
 0xe09   :  { %v15107_v20 = vpop.f32.mrf.mxu0 }
 0xe0a   :  { %v15108_v10 = vadd.f32 %v15107_v20, %v15067_v6 }
 0xe0b   :  { %v15109_v11 = vpop.f32.mrf.mxu0 }
 0xe0d   :  { %v15110_v24 = vpop.f32.mrf.mxu0 }
 0xe71   :  { %v15146_v43 = vpop.f32.mrf.mxu1 }
 0xe72   :  { %v15147_v44 = vadd.f32 %v15146_v43, %v15106_v5 }
 0xe73   :  { %v15148_v54 = vpop.f32.mrf.mxu1 }
 0xe74   :  { %v15149_v19 = vadd.f32 %v15148_v54, %v15108_v10  ;;  %v15153_v56 = vmax.f32 %v15147_v44, 0.0 }
 0xe75   :  { %v15150_v42 = vpop.f32.mrf.mxu1 }
 0xe76   :  { %v15154_v49 = vmax.f32 %v15149_v19, 0.0 }
 0xe77   :  { %v15151_v37 = vpop.f32.mrf.mxu1 }
 0xe78   :  { %15258 = vmatprep.mubr.f32.mxu0 %v15154_v49 }
 0xe79   :  { %15259 = vmatmul.mubr.f32.vlgmr.msra.gmra.mxu0 %v15153_v56 }
 0xf39   :  { %v16882_v18 = vpop.f32.mrf.mxu0 }
 0xf3b   :  { %v16883_v40 = vpop.f32.mrf.mxu0 }
 0xf3c   :  { %v16884_v57 = vadd.f32 %v16883_v40, %v16882_v18 }
 0xf3e   :  { %v15261_v23 = vadd.f32 %v16884_v57, %v16776_v25 }
 0xf40   :  { %v15265_v34 = vand.u32 2147483647, %v15261_v23  ;;  %v15264_v47 = vmax.f32 %v15261_v23, 0.0 }
 0xf42   :  { %v15266_v58 = vsub.f32 0.0, %v15265_v34 }
 0xf44   :  { %v15267_v53 = vmul.f32 1.442695, %v15266_v58 }
 0xf46   :  { %17331 = vpow2.f32 %v15267_v53 }
 0xf53   :  { %v17332_v14 = vpop.eup %17331 }
 0xf54   :  { %v15269_v35 = vadd.f32 1.0, %v17332_v14 }
 0xf56   :  { %17333 = vlog2.f32 %v15269_v35 }
 0xf63   :  { %v17334_v17 = vpop.eup %17333 }
 0xf64   :  { %v15271_v52 = vmul.f32 0.6931472, %v17334_v17 }
 0xf66   :  { %v15272_v21 = vadd.f32 %v15271_v52, %v15264_v47 }
 0xf68   :  { %15274 = vst.msk [vmem:[#allocation25] sm:$0x3] %vm15273_vm8, %v15272_v21 }
 0xf69   :  { %17629 = shalt.err (!%p17626_p4)
}
 0xf6a   :  { %15284 = dma.vmem_to_hbm [thread:$0]  %s15282_s20, 32, %s19869_s17, [#allocation4]  }
 0xf6b   :  { %17654 = dma.done.wait [#allocation4], 32  }
 0xf6c   :  { %17655 = vsyncadd [#allocation4], 4294967264 }
 0xf6d   :  { %15288 = vsyncpa [#allocation3], 1 }
 0xf6e   :  { %15289 = vsyncpa [#allocation6], 1 }
 0xf6f   :  { %15290 = vsyncpa [#allocation9], 1 }
 0xf70   :  { %15291 = vsyncpa [#allocation12], 1 }
 0xf71   :  { %15292 = vsyncpa [#allocation15], 1 }
 0xf72   :  { %15293 = vsyncpa [#allocation18], 1 }
 0xf73   :  { %15294 = vsyncpa [#allocation21], 1 }
 0xf74   :  { %15295 = vsyncpa [#allocation24], 1 }
 0xf75   :  { %15296 = vsyncpa [#allocation4], 1 }

</bundles_post_ra>
